<compile_context>
chip_gen: v7x
topology: tpu7x:2x2x1
jax: 0.10.0
libtpu: 0.0.40
codegen_flags: <defaults>
</compile_context>

<pallas_src>
import functools

import jax
import jax.numpy as jnp
from jax.experimental import pallas as pl
from jax.experimental.pallas import tpu as pltpu


# Zero-halo convention for padded activations: 2 rows/cols on top/left
# (so the interior store offset is even / bf16-packing aligned), 1 on
# bottom/right (all a 3x3 pad=1 conv ever reads).
_PAD_LO, _PAD_HI = 2, 1
_PAD = _PAD_LO + _PAD_HI


@functools.lru_cache(maxsize=None)
def _vmem_limit_bytes():
    """~75% of physical VMEM, capped at 96 MiB (safe on v5e/v6e/v7x)."""
    try:
        cap = int(pltpu.get_tpu_info().vmem_capacity_bytes)
    except Exception:
        cap = 64 * 1024 * 1024
    return max(32 * 1024 * 1024, min(cap * 3 // 4, 96 * 1024 * 1024))


def _pick_tile_k(K, N, F):
    """Whole-K FC when the (double-buffered) operands fit; else a big divisor."""
    budget = _vmem_limit_bytes() // 2

    def fits(tk):
        return 2 * (N + F) * tk * 2 <= budget          # bf16, double-buffered

    if fits(K):
        return K
    for tk in (262144, 131072, 65536, 32768, 16384, 8192,
               4096, 2048, 1024, 512, 256, 128):
        if K % tk == 0 and fits(tk):
            return tk
    return K


# ----------------------------------------------------------------------------
# Pallas kernels
# ----------------------------------------------------------------------------
def _conv_bn_relu_kernel(x_ref, w_ref, s_ref, b_ref, o_ref, *,
                         H, W, Cin, Cout, pool, pad_out):
    """3x3 conv (pad=1, stride=1) + folded BN + ReLU (+ fused 2x2 maxpool).

    One full image per grid step.
    x_ref: (1, H+3, W+3, Cin) bf16 with the (_PAD_LO, _PAD_HI) zero halo.
    w_ref: (3, 3*Cin, Cout) bf16 (dw taps stacked along the contraction dim).
    s_ref/b_ref: (1, Cout) f32.
    o_ref: (1, OH+3, OW+3, Cout) bf16 (halo written in-kernel) if pad_out,
           else (1, OH, OW, Cout).
    """
    x = x_ref[0]                                    # (H+3, W+3, Cin) bf16
    acc = jnp.zeros((H * W, Cout), jnp.float32)

    if Cin % 128 == 0:
        # dw taps folded into the contraction (lane-aligned concat): 3 MXU
        # matmuls with K = 3*Cin, acc touched 3x instead of 9x.
        for dh in range(3):
            xr = x[dh + 1: dh + 1 + H]              # (H, W+3, Cin)
            patch = jnp.concatenate(
                [xr[:, 1:1 + W], xr[:, 2:2 + W], xr[:, 3:3 + W]], axis=-1)
            acc = acc + jnp.dot(patch.reshape(H * W, 3 * Cin), w_ref[dh],
                                preferred_element_type=jnp.float32)
    else:
        # Cin = 8 / 64: folding would need an unaligned lane concat, keep the
        # 9 accumulating MXU matmuls (these layers are bandwidth-bound anyway).
        for dh in range(3):
            for dw in range(3):
                patch = x[dh + 1: dh + 1 + H, dw + 1: dw + 1 + W, :]
                acc = acc + jnp.dot(patch.reshape(H * W, Cin),
                                    w_ref[dh, dw * Cin:(dw + 1) * Cin, :],
                                    preferred_element_type=jnp.float32)

    y = jnp.maximum(acc * s_ref[...] + b_ref[...], 0.0)   # folded BN + ReLU (f32)

    if pool:                                        # fused 2x2 maxpool, stride 2
        OH, OW = H // 2, W // 2
        y = y.reshape(OH, 2, OW, 2, Cout)
        y = jnp.max(y, axis=3)
        y = jnp.max(y, axis=1)
    else:
        OH, OW = H, W
        y = y.reshape(OH, OW, Cout)
    y = y.astype(o_ref.dtype)

    if pad_out:
        # Emit the next layer's zero halo here so no XLA-level pad pass (and
        # no extra HBM round trip of the activation) is needed between layers.
        o_ref[0] = jnp.zeros((OH + _PAD, OW + _PAD, Cout), o_ref.dtype)
        o_ref[0, _PAD_LO:OH + _PAD_LO, _PAD_LO:OW + _PAD_LO, :] = y
    else:
        o_ref[0] = y


def _linear_kernel(x_ref, w_ref, b_ref, o_ref, acc_ref):
    """(Possibly K-tiled) GEMV: x (N, TK) bf16 vs lane-dense w (F, TK) bf16."""
    @pl.when(pl.program_id(0) == 0)
    def _init():
        acc_ref[...] = jnp.zeros_like(acc_ref)

    acc_ref[...] += jax.lax.dot_general(
        x_ref[...], w_ref[...],
        dimension_numbers=(((1,), (1,)), ((), ())),
        preferred_element_type=jnp.float32)

    @pl.when(pl.program_id(0) == pl.num_programs(0) - 1)
    def _fin():
        o_ref[...] = acc_ref[...] + b_ref[...]


# ----------------------------------------------------------------------------
# Wrappers (pallas_call plumbing)
# ----------------------------------------------------------------------------
def conv_bn_relu(x, w3, scale, bias, *, pool=False, pad_out=True):
    """x: (N, H+3, W+3, Cin) bf16 haloed NHWC -> haloed (or plain) output."""
    N, Hb, Wb, Cin = x.shape
    H, W = Hb - _PAD, Wb - _PAD
    Cout = w3.shape[-1]
    if pool:
        assert H % 2 == 0 and W % 2 == 0, "pooled conv needs even spatial dims"
    OH, OW = (H // 2, W // 2) if pool else (H, W)
    OHb, OWb = (OH + _PAD, OW + _PAD) if pad_out else (OH, OW)

    kernel = functools.partial(_conv_bn_relu_kernel, H=H, W=W, Cin=Cin,
                               Cout=Cout, pool=pool, pad_out=pad_out)
    return pl.pallas_call(
        kernel,
        out_shape=jax.ShapeDtypeStruct((N, OHb, OWb, Cout), jnp.bfloat16),
        grid=(N,),
        in_specs=[
            pl.BlockSpec((1, Hb, Wb, Cin), lambda n: (n, 0, 0, 0)),
            pl.BlockSpec(w3.shape, lambda n: (0, 0, 0)),
            pl.BlockSpec((1, Cout), lambda n: (0, 0)),
            pl.BlockSpec((1, Cout), lambda n: (0, 0)),
        ],
        out_specs=pl.BlockSpec((1, OHb, OWb, Cout), lambda n: (n, 0, 0, 0)),
        compiler_params=pltpu.CompilerParams(
            dimension_semantics=("parallel",),      # megacore shards batch on v7x
            vmem_limit_bytes=_vmem_limit_bytes()),
    )(x, w3, scale.reshape(1, Cout), bias.reshape(1, Cout))


def linear(x, w_fk, b):
    """x: (N, K) bf16, w_fk: (F, K) bf16 lane-dense, b: (F,) f32 -> (N, F) f32."""
    N, K = x.shape
    F = w_fk.shape[0]
    TK = _pick_tile_k(K, N, F)                      # usually TK == K: 1 grid step
    nK = K // TK
    return pl.pallas_call(
        _linear_kernel,
        out_shape=jax.ShapeDtypeStruct((N, F), jnp.float32),
        grid=(nK,),
        in_specs=[
            pl.BlockSpec((N, TK), lambda k: (0, k)),
            pl.BlockSpec((F, TK), lambda k: (0, k)),
            pl.BlockSpec((1, F), lambda k: (0, 0)),
        ],
        out_specs=pl.BlockSpec((N, F), lambda k: (0, 0)),
        scratch_shapes=[pltpu.VMEM((N, F), jnp.float32)],
        compiler_params=pltpu.CompilerParams(
            dimension_semantics=("arbitrary",),
            vmem_limit_bytes=_vmem_limit_bytes()),
    )(x, w_fk, b.reshape(1, F))


# ----------------------------------------------------------------------------
# Parameter construction (deterministic, synthetic — mirrors vgg16_bn[:17]).
# TODO(synk): pretrained VGG weights are not loadable in-script; synthetic
# parameters with identical shapes/semantics are used instead.
# ----------------------------------------------------------------------------
_CONV_CHANNELS = [(3, 64), (64, 64), (64, 128), (128, 128), (128, 256)]


def make_params(key, h_in, w_in):
    convs = []
    for i, (cin, cout) in enumerate(_CONV_CHANNELS):
        ks = jax.random.split(jax.random.fold_in(key, i), 6)
        w = 0.05 * jax.random.normal(ks[0], (3, 3, cin, cout), jnp.float32)
        cb = 0.10 * jax.random.normal(ks[1], (cout,), jnp.float32)
        gamma = 1.0 + 0.10 * jax.random.normal(ks[2], (cout,), jnp.float32)
        beta = 0.10 * jax.random.normal(ks[3], (cout,), jnp.float32)
        mean = 0.10 * jax.random.normal(ks[4], (cout,), jnp.float32)
        var = jax.random.uniform(ks[5], (cout,), jnp.float32, 0.5, 1.5)
        # Fold conv bias + eval-mode BN into a single per-channel scale/bias.
        scale = gamma / jnp.sqrt(var + 1e-5)
        bias = beta + scale * (cb - mean)
        cin_eff = cin
        if cin == 3:
            # Lane-align the first layer: zero-pad Cin 3 -> 8 (result unchanged).
            w = jnp.pad(w, ((0, 0), (0, 0), (0, 8 - cin), (0, 0)))
            cin_eff = 8
        # Stack the dw taps along the contraction dim: (3, 3*Cin, Cout).
        w3 = w.reshape(3, 3 * cin_eff, cout).astype(jnp.bfloat16)
        convs.append((w3, scale, bias))

    hf, wf = h_in // 4, w_in // 4                   # two 2x2 maxpools -> /4
    feat = 256 * hf * wf
    kf = jax.random.fold_in(key, 100)
    # PyTorch layout: (out_features, in_features) with K in NCHW-flatten order.
    fc_w = 0.01 * jax.random.normal(kf, (2, feat), jnp.float32)
    # Fold the Flatten(NCHW) permutation into the weight ONCE: K -> NHWC order,
    # stored lane-dense as (F, K).
    fc_w_nhwc = fc_w.reshape(2, 256, hf, wf).transpose(0, 2, 3, 1).reshape(2, feat)
    fc_b = 0.01 * jax.random.normal(jax.random.fold_in(key, 101), (2,), jnp.float32)
    return {"convs": convs,
            "fc_w": fc_w_nhwc.astype(jnp.bfloat16),
            "fc_b": fc_b}


# ----------------------------------------------------------------------------
# Forward pass:
#   conv-bn-relu, conv-bn-relu(+pool), conv-bn-relu, conv-bn-relu(+pool),
#   conv-bn-relu, flatten (permutation folded into fc weight), linear -> (N, 2)
# ----------------------------------------------------------------------------
def szcvi_forward(x_nchw, params):
    x = jnp.transpose(x_nchw, (0, 2, 3, 1))         # NCHW -> NHWC
    c_in = x.shape[-1]
    # One pad of the raw input only: zero halo + channels 3 -> 8, cast to bf16.
    x = jnp.pad(x, ((0, 0), (_PAD_LO, _PAD_HI), (_PAD_LO, _PAD_HI),
                    (0, 8 - c_in)))
    x = x.astype(jnp.bfloat16)
    c = params["convs"]
    x = conv_bn_relu(x, *c[0])                       # haloed output
    x = conv_bn_relu(x, *c[1], pool=True)            # fused maxpool, haloed
    x = conv_bn_relu(x, *c[2])
    x = conv_bn_relu(x, *c[3], pool=True)            # fused maxpool, haloed
    x = conv_bn_relu(x, *c[4], pad_out=False)        # last conv: plain NHWC
    x = x.reshape(x.shape[0], -1)                    # NHWC flatten (weight pre-permuted)
    return linear(x, params["fc_w"], params["fc_b"])


if __name__ == "__main__":
    key = jax.random.PRNGKey(0)
    # Small shapes consistent with the module: N=2, 3-channel RGB frames, 16x16
    # spatial (the real model uses 224x224; the FC input dim scales with it).
    N, C, H, W = 2, 3, 16, 16
    x = jax.random.normal(jax.random.fold_in(key, 999), (N, C, H, W), jnp.float32)
    params = make_params(key, H, W)

    fwd = jax.jit(szcvi_forward)
    out = jax.block_until_ready(fwd(x, params))
    assert out.shape == (N, 2) and out.dtype == jnp.float32
    assert bool(jnp.all(jnp.isfinite(out)))
    print("KERNEL_OK")
</pallas_src>

<mosaic_0001>
module attributes {stable_mosaic.version = 11 : i64} {
  func.func @_conv_bn_relu_kernel(%arg0: i32, %arg1: memref<1x19x19x8xbf16, #tpu.memory_space<vmem>>, %arg2: memref<3x24x64xbf16, #tpu.memory_space<vmem>>, %arg3: memref<1x64xf32, #tpu.memory_space<vmem>>, %arg4: memref<1x64xf32, #tpu.memory_space<vmem>>, %arg5: memref<1x19x19x64xbf16, #tpu.memory_space<vmem>>) attributes {dimension_semantics = [#tpu.dimension_semantics<parallel>], iteration_bounds = array<i64: 2>, scalar_prefetch = 0 : i64, scratch_operands = 0 : i64, tpu.core_type = #tpu.core_type<tc>, window_params = [{transform_indices = @transform_0, window_bounds = array<i64: 1, 19, 19, 8>}, {pipeline_mode = #tpu.pipeline_mode<synchronous>, transform_indices = @transform_1, window_bounds = array<i64: 3, 24, 64>}, {pipeline_mode = #tpu.pipeline_mode<synchronous>, transform_indices = @transform_2, window_bounds = array<i64: 1, 64>}, {pipeline_mode = #tpu.pipeline_mode<synchronous>, transform_indices = @transform_3, window_bounds = array<i64: 1, 64>}, {transform_indices = @transform_4, window_bounds = array<i64: 1, 19, 19, 64>}]} {
    %c0 = arith.constant 0 : index
    %c0_0 = arith.constant 0 : index
    %c0_1 = arith.constant 0 : index
    %c0_2 = arith.constant 0 : index
    %0 = vector.load %arg1[%c0, %c0_0, %c0_1, %c0_2] : memref<1x19x19x8xbf16, #tpu.memory_space<vmem>>, vector<1x19x19x8xbf16>
    %1 = vector.shape_cast %0 : vector<1x19x19x8xbf16> to vector<19x19x8xbf16>
    %cst = arith.constant 0.000000e+00 : f32
    %2 = vector.broadcast %cst : f32 to vector<256x64xf32>
    %3 = vector.extract_strided_slice %1 {offsets = [1, 1, 0], sizes = [16, 16, 8], strides = [1, 1, 1]} : vector<19x19x8xbf16> to vector<16x16x8xbf16>
    %4 = vector.shape_cast %3 : vector<16x16x8xbf16> to vector<256x8xbf16>
    %c0_3 = arith.constant 0 : index
    %c0_4 = arith.constant 0 : index
    %c0_5 = arith.constant 0 : index
    %5 = vector.load %arg2[%c0_3, %c0_4, %c0_5] : memref<3x24x64xbf16, #tpu.memory_space<vmem>>, vector<1x8x64xbf16>
    %6 = vector.shape_cast %5 : vector<1x8x64xbf16> to vector<8x64xbf16>
    %cst_6 = arith.constant dense<0.000000e+00> : vector<256x64xf32>
    %7 = tpu.matmul %4, %6, %cst_6 {dimension_numbers = #tpu.dot_dimension_numbers<[1], [0], [0], [1], [0, 0, 1, 1], [], []>} : vector<256x8xbf16>, vector<8x64xbf16>, vector<256x64xf32> -> vector<256x64xf32>
    %8 = arith.addf %2, %7 : vector<256x64xf32>
    %9 = vector.extract_strided_slice %1 {offsets = [1, 2, 0], sizes = [16, 16, 8], strides = [1, 1, 1]} : vector<19x19x8xbf16> to vector<16x16x8xbf16>
    %10 = vector.shape_cast %9 : vector<16x16x8xbf16> to vector<256x8xbf16>
    %c0_7 = arith.constant 0 : index
    %c8 = arith.constant 8 : index
    %c0_8 = arith.constant 0 : index
    %11 = vector.load %arg2[%c0_7, %c8, %c0_8] : memref<3x24x64xbf16, #tpu.memory_space<vmem>>, vector<1x8x64xbf16>
    %12 = vector.shape_cast %11 : vector<1x8x64xbf16> to vector<8x64xbf16>
    %cst_9 = arith.constant dense<0.000000e+00> : vector<256x64xf32>
    %13 = tpu.matmul %10, %12, %cst_9 {dimension_numbers = #tpu.dot_dimension_numbers<[1], [0], [0], [1], [0, 0, 1, 1], [], []>} : vector<256x8xbf16>, vector<8x64xbf16>, vector<256x64xf32> -> vector<256x64xf32>
    %14 = arith.addf %8, %13 : vector<256x64xf32>
    %15 = vector.extract_strided_slice %1 {offsets = [1, 3, 0], sizes = [16, 16, 8], strides = [1, 1, 1]} : vector<19x19x8xbf16> to vector<16x16x8xbf16>
    %16 = vector.shape_cast %15 : vector<16x16x8xbf16> to vector<256x8xbf16>
    %c0_10 = arith.constant 0 : index
    %c16 = arith.constant 16 : index
    %c0_11 = arith.constant 0 : index
    %17 = vector.load %arg2[%c0_10, %c16, %c0_11] : memref<3x24x64xbf16, #tpu.memory_space<vmem>>, vector<1x8x64xbf16>
    %18 = vector.shape_cast %17 : vector<1x8x64xbf16> to vector<8x64xbf16>
    %cst_12 = arith.constant dense<0.000000e+00> : vector<256x64xf32>
    %19 = tpu.matmul %16, %18, %cst_12 {dimension_numbers = #tpu.dot_dimension_numbers<[1], [0], [0], [1], [0, 0, 1, 1], [], []>} : vector<256x8xbf16>, vector<8x64xbf16>, vector<256x64xf32> -> vector<256x64xf32>
    %20 = arith.addf %14, %19 : vector<256x64xf32>
    %21 = vector.extract_strided_slice %1 {offsets = [2, 1, 0], sizes = [16, 16, 8], strides = [1, 1, 1]} : vector<19x19x8xbf16> to vector<16x16x8xbf16>
    %22 = vector.shape_cast %21 : vector<16x16x8xbf16> to vector<256x8xbf16>
    %c1 = arith.constant 1 : index
    %c0_13 = arith.constant 0 : index
    %c0_14 = arith.constant 0 : index
    %23 = vector.load %arg2[%c1, %c0_13, %c0_14] : memref<3x24x64xbf16, #tpu.memory_space<vmem>>, vector<1x8x64xbf16>
    %24 = vector.shape_cast %23 : vector<1x8x64xbf16> to vector<8x64xbf16>
    %cst_15 = arith.constant dense<0.000000e+00> : vector<256x64xf32>
    %25 = tpu.matmul %22, %24, %cst_15 {dimension_numbers = #tpu.dot_dimension_numbers<[1], [0], [0], [1], [0, 0, 1, 1], [], []>} : vector<256x8xbf16>, vector<8x64xbf16>, vector<256x64xf32> -> vector<256x64xf32>
    %26 = arith.addf %20, %25 : vector<256x64xf32>
    %27 = vector.extract_strided_slice %1 {offsets = [2, 2, 0], sizes = [16, 16, 8], strides = [1, 1, 1]} : vector<19x19x8xbf16> to vector<16x16x8xbf16>
    %28 = vector.shape_cast %27 : vector<16x16x8xbf16> to vector<256x8xbf16>
    %c1_16 = arith.constant 1 : index
    %c8_17 = arith.constant 8 : index
    %c0_18 = arith.constant 0 : index
    %29 = vector.load %arg2[%c1_16, %c8_17, %c0_18] : memref<3x24x64xbf16, #tpu.memory_space<vmem>>, vector<1x8x64xbf16>
    %30 = vector.shape_cast %29 : vector<1x8x64xbf16> to vector<8x64xbf16>
    %cst_19 = arith.constant dense<0.000000e+00> : vector<256x64xf32>
    %31 = tpu.matmul %28, %30, %cst_19 {dimension_numbers = #tpu.dot_dimension_numbers<[1], [0], [0], [1], [0, 0, 1, 1], [], []>} : vector<256x8xbf16>, vector<8x64xbf16>, vector<256x64xf32> -> vector<256x64xf32>
    %32 = arith.addf %26, %31 : vector<256x64xf32>
    %33 = vector.extract_strided_slice %1 {offsets = [2, 3, 0], sizes = [16, 16, 8], strides = [1, 1, 1]} : vector<19x19x8xbf16> to vector<16x16x8xbf16>
    %34 = vector.shape_cast %33 : vector<16x16x8xbf16> to vector<256x8xbf16>
    %c1_20 = arith.constant 1 : index
    %c16_21 = arith.constant 16 : index
    %c0_22 = arith.constant 0 : index
    %35 = vector.load %arg2[%c1_20, %c16_21, %c0_22] : memref<3x24x64xbf16, #tpu.memory_space<vmem>>, vector<1x8x64xbf16>
    %36 = vector.shape_cast %35 : vector<1x8x64xbf16> to vector<8x64xbf16>
    %cst_23 = arith.constant dense<0.000000e+00> : vector<256x64xf32>
    %37 = tpu.matmul %34, %36, %cst_23 {dimension_numbers = #tpu.dot_dimension_numbers<[1], [0], [0], [1], [0, 0, 1, 1], [], []>} : vector<256x8xbf16>, vector<8x64xbf16>, vector<256x64xf32> -> vector<256x64xf32>
    %38 = arith.addf %32, %37 : vector<256x64xf32>
    %39 = vector.extract_strided_slice %1 {offsets = [3, 1, 0], sizes = [16, 16, 8], strides = [1, 1, 1]} : vector<19x19x8xbf16> to vector<16x16x8xbf16>
    %40 = vector.shape_cast %39 : vector<16x16x8xbf16> to vector<256x8xbf16>
    %c2 = arith.constant 2 : index
    %c0_24 = arith.constant 0 : index
    %c0_25 = arith.constant 0 : index
    %41 = vector.load %arg2[%c2, %c0_24, %c0_25] : memref<3x24x64xbf16, #tpu.memory_space<vmem>>, vector<1x8x64xbf16>
    %42 = vector.shape_cast %41 : vector<1x8x64xbf16> to vector<8x64xbf16>
    %cst_26 = arith.constant dense<0.000000e+00> : vector<256x64xf32>
    %43 = tpu.matmul %40, %42, %cst_26 {dimension_numbers = #tpu.dot_dimension_numbers<[1], [0], [0], [1], [0, 0, 1, 1], [], []>} : vector<256x8xbf16>, vector<8x64xbf16>, vector<256x64xf32> -> vector<256x64xf32>
    %44 = arith.addf %38, %43 : vector<256x64xf32>
    %45 = vector.extract_strided_slice %1 {offsets = [3, 2, 0], sizes = [16, 16, 8], strides = [1, 1, 1]} : vector<19x19x8xbf16> to vector<16x16x8xbf16>
    %46 = vector.shape_cast %45 : vector<16x16x8xbf16> to vector<256x8xbf16>
    %c2_27 = arith.constant 2 : index
    %c8_28 = arith.constant 8 : index
    %c0_29 = arith.constant 0 : index
    %47 = vector.load %arg2[%c2_27, %c8_28, %c0_29] : memref<3x24x64xbf16, #tpu.memory_space<vmem>>, vector<1x8x64xbf16>
    %48 = vector.shape_cast %47 : vector<1x8x64xbf16> to vector<8x64xbf16>
    %cst_30 = arith.constant dense<0.000000e+00> : vector<256x64xf32>
    %49 = tpu.matmul %46, %48, %cst_30 {dimension_numbers = #tpu.dot_dimension_numbers<[1], [0], [0], [1], [0, 0, 1, 1], [], []>} : vector<256x8xbf16>, vector<8x64xbf16>, vector<256x64xf32> -> vector<256x64xf32>
    %50 = arith.addf %44, %49 : vector<256x64xf32>
    %51 = vector.extract_strided_slice %1 {offsets = [3, 3, 0], sizes = [16, 16, 8], strides = [1, 1, 1]} : vector<19x19x8xbf16> to vector<16x16x8xbf16>
    %52 = vector.shape_cast %51 : vector<16x16x8xbf16> to vector<256x8xbf16>
    %c2_31 = arith.constant 2 : index
    %c16_32 = arith.constant 16 : index
    %c0_33 = arith.constant 0 : index
    %53 = vector.load %arg2[%c2_31, %c16_32, %c0_33] : memref<3x24x64xbf16, #tpu.memory_space<vmem>>, vector<1x8x64xbf16>
    %54 = vector.shape_cast %53 : vector<1x8x64xbf16> to vector<8x64xbf16>
    %cst_34 = arith.constant dense<0.000000e+00> : vector<256x64xf32>
    %55 = tpu.matmul %52, %54, %cst_34 {dimension_numbers = #tpu.dot_dimension_numbers<[1], [0], [0], [1], [0, 0, 1, 1], [], []>} : vector<256x8xbf16>, vector<8x64xbf16>, vector<256x64xf32> -> vector<256x64xf32>
    %56 = arith.addf %50, %55 : vector<256x64xf32>
    %c0_35 = arith.constant 0 : index
    %c0_36 = arith.constant 0 : index
    %57 = vector.load %arg3[%c0_35, %c0_36] : memref<1x64xf32, #tpu.memory_space<vmem>>, vector<1x64xf32>
    %58 = vector.broadcast %57 : vector<1x64xf32> to vector<256x64xf32>
    %59 = arith.mulf %56, %58 : vector<256x64xf32>
    %c0_37 = arith.constant 0 : index
    %c0_38 = arith.constant 0 : index
    %60 = vector.load %arg4[%c0_37, %c0_38] : memref<1x64xf32, #tpu.memory_space<vmem>>, vector<1x64xf32>
    %61 = vector.broadcast %60 : vector<1x64xf32> to vector<256x64xf32>
    %62 = arith.addf %59, %61 : vector<256x64xf32>
    %cst_39 = arith.constant 0.000000e+00 : f32
    %63 = vector.broadcast %cst_39 : f32 to vector<256x64xf32>
    %64 = arith.maximumf %62, %63 : vector<256x64xf32>
    %65 = vector.shape_cast %64 : vector<256x64xf32> to vector<16x16x64xf32>
    %66 = arith.truncf %65 : vector<16x16x64xf32> to vector<16x16x64xbf16>
    %cst_40 = arith.constant 0.000000e+00 : bf16
    %67 = vector.broadcast %cst_40 : bf16 to vector<19x19x64xbf16>
    %c0_41 = arith.constant 0 : index
    %c0_42 = arith.constant 0 : index
    %c0_43 = arith.constant 0 : index
    %c0_44 = arith.constant 0 : index
    %68 = vector.load %arg5[%c0_41, %c0_42, %c0_43, %c0_44] : memref<1x19x19x64xbf16, #tpu.memory_space<vmem>>, vector<1x19x19x64xbf16>
    %69 = vector.shape_cast %68 : vector<1x19x19x64xbf16> to vector<19x19x64xbf16>
    %70 = vector.shape_cast %67 : vector<19x19x64xbf16> to vector<1x19x19x64xbf16>
    tpu.vector_store %arg5[%c0_41, %c0_42, %c0_43, %c0_44], %70 {strides = array<i32>} : memref<1x19x19x64xbf16, #tpu.memory_space<vmem>>, vector<1x19x19x64xbf16>,
    %c0_45 = arith.constant 0 : index
    %c2_46 = arith.constant 2 : index
    %c2_47 = arith.constant 2 : index
    %c0_48 = arith.constant 0 : index
    %71 = vector.load %arg5[%c0_45, %c2_46, %c2_47, %c0_48] : memref<1x19x19x64xbf16, #tpu.memory_space<vmem>>, vector<1x16x16x64xbf16>
    %72 = vector.shape_cast %71 : vector<1x16x16x64xbf16> to vector<16x16x64xbf16>
    %73 = vector.shape_cast %66 : vector<16x16x64xbf16> to vector<1x16x16x64xbf16>
    tpu.vector_store %arg5[%c0_45, %c2_46, %c2_47, %c0_48], %73 {strides = array<i32>} : memref<1x19x19x64xbf16, #tpu.memory_space<vmem>>, vector<1x16x16x64xbf16>,
    return
  }
  func.func @transform_0(%arg0: i32) -> (i32, i32, i32, i32) {
    %c0_i32 = arith.constant 0 : i32
    %c0_i32_0 = arith.constant 0 : i32
    %c0_i32_1 = arith.constant 0 : i32
    %c0_i32_2 = arith.constant 0 : i32
    return %arg0, %c0_i32, %c0_i32_0, %c0_i32_1 : i32, i32, i32, i32
  }
  func.func @transform_1(%arg0: i32) -> (i32, i32, i32) {
    %c0_i32 = arith.constant 0 : i32
    %c0_i32_0 = arith.constant 0 : i32
    %c0_i32_1 = arith.constant 0 : i32
    %c0_i32_2 = arith.constant 0 : i32
    return %c0_i32, %c0_i32_0, %c0_i32_1 : i32, i32, i32
  }
  func.func @transform_2(%arg0: i32) -> (i32, i32) {
    %c0_i32 = arith.constant 0 : i32
    %c0_i32_0 = arith.constant 0 : i32
    %c0_i32_1 = arith.constant 0 : i32
    return %c0_i32, %c0_i32_0 : i32, i32
  }
  func.func @transform_3(%arg0: i32) -> (i32, i32) {
    %c0_i32 = arith.constant 0 : i32
    %c0_i32_0 = arith.constant 0 : i32
    %c0_i32_1 = arith.constant 0 : i32
    return %c0_i32, %c0_i32_0 : i32, i32
  }
  func.func @transform_4(%arg0: i32) -> (i32, i32, i32, i32) {
    %c0_i32 = arith.constant 0 : i32
    %c0_i32_0 = arith.constant 0 : i32
    %c0_i32_1 = arith.constant 0 : i32
    %c0_i32_2 = arith.constant 0 : i32
    return %arg0, %c0_i32, %c0_i32_0, %c0_i32_1 : i32, i32, i32, i32
  }
}

module attributes {stable_mosaic.version = 11 : i64} {
  func.func @_conv_bn_relu_kernel(%arg0: i32, %arg1: memref<1x19x19x64xbf16, #tpu.memory_space<vmem>>, %arg2: memref<3x192x64xbf16, #tpu.memory_space<vmem>>, %arg3: memref<1x64xf32, #tpu.memory_space<vmem>>, %arg4: memref<1x64xf32, #tpu.memory_space<vmem>>, %arg5: memref<1x11x11x64xbf16, #tpu.memory_space<vmem>>) attributes {dimension_semantics = [#tpu.dimension_semantics<parallel>], iteration_bounds = array<i64: 2>, scalar_prefetch = 0 : i64, scratch_operands = 0 : i64, tpu.core_type = #tpu.core_type<tc>, window_params = [{transform_indices = @transform_0, window_bounds = array<i64: 1, 19, 19, 64>}, {pipeline_mode = #tpu.pipeline_mode<synchronous>, transform_indices = @transform_1, window_bounds = array<i64: 3, 192, 64>}, {pipeline_mode = #tpu.pipeline_mode<synchronous>, transform_indices = @transform_2, window_bounds = array<i64: 1, 64>}, {pipeline_mode = #tpu.pipeline_mode<synchronous>, transform_indices = @transform_3, window_bounds = array<i64: 1, 64>}, {transform_indices = @transform_4, window_bounds = array<i64: 1, 11, 11, 64>}]} {
    %c0 = arith.constant 0 : index
    %c0_0 = arith.constant 0 : index
    %c0_1 = arith.constant 0 : index
    %c0_2 = arith.constant 0 : index
    %0 = vector.load %arg1[%c0, %c0_0, %c0_1, %c0_2] : memref<1x19x19x64xbf16, #tpu.memory_space<vmem>>, vector<1x19x19x64xbf16>
    %1 = vector.shape_cast %0 : vector<1x19x19x64xbf16> to vector<19x19x64xbf16>
    %cst = arith.constant 0.000000e+00 : f32
    %2 = vector.broadcast %cst : f32 to vector<256x64xf32>
    %3 = vector.extract_strided_slice %1 {offsets = [1, 1, 0], sizes = [16, 16, 64], strides = [1, 1, 1]} : vector<19x19x64xbf16> to vector<16x16x64xbf16>
    %4 = vector.shape_cast %3 : vector<16x16x64xbf16> to vector<256x64xbf16>
    %c0_3 = arith.constant 0 : index
    %c0_4 = arith.constant 0 : index
    %c0_5 = arith.constant 0 : index
    %5 = vector.load %arg2[%c0_3, %c0_4, %c0_5] : memref<3x192x64xbf16, #tpu.memory_space<vmem>>, vector<1x64x64xbf16>
    %6 = vector.shape_cast %5 : vector<1x64x64xbf16> to vector<64x64xbf16>
    %cst_6 = arith.constant dense<0.000000e+00> : vector<256x64xf32>
    %7 = tpu.matmul %4, %6, %cst_6 {dimension_numbers = #tpu.dot_dimension_numbers<[1], [0], [0], [1], [0, 0, 1, 1], [], []>} : vector<256x64xbf16>, vector<64x64xbf16>, vector<256x64xf32> -> vector<256x64xf32>
    %8 = arith.addf %2, %7 : vector<256x64xf32>
    %9 = vector.extract_strided_slice %1 {offsets = [1, 2, 0], sizes = [16, 16, 64], strides = [1, 1, 1]} : vector<19x19x64xbf16> to vector<16x16x64xbf16>
    %10 = vector.shape_cast %9 : vector<16x16x64xbf16> to vector<256x64xbf16>
    %c0_7 = arith.constant 0 : index
    %c64 = arith.constant 64 : index
    %c0_8 = arith.constant 0 : index
    %11 = vector.load %arg2[%c0_7, %c64, %c0_8] : memref<3x192x64xbf16, #tpu.memory_space<vmem>>, vector<1x64x64xbf16>
    %12 = vector.shape_cast %11 : vector<1x64x64xbf16> to vector<64x64xbf16>
    %cst_9 = arith.constant dense<0.000000e+00> : vector<256x64xf32>
    %13 = tpu.matmul %10, %12, %cst_9 {dimension_numbers = #tpu.dot_dimension_numbers<[1], [0], [0], [1], [0, 0, 1, 1], [], []>} : vector<256x64xbf16>, vector<64x64xbf16>, vector<256x64xf32> -> vector<256x64xf32>
    %14 = arith.addf %8, %13 : vector<256x64xf32>
    %15 = vector.extract_strided_slice %1 {offsets = [1, 3, 0], sizes = [16, 16, 64], strides = [1, 1, 1]} : vector<19x19x64xbf16> to vector<16x16x64xbf16>
    %16 = vector.shape_cast %15 : vector<16x16x64xbf16> to vector<256x64xbf16>
    %c0_10 = arith.constant 0 : index
    %c128 = arith.constant 128 : index
    %c0_11 = arith.constant 0 : index
    %17 = vector.load %arg2[%c0_10, %c128, %c0_11] : memref<3x192x64xbf16, #tpu.memory_space<vmem>>, vector<1x64x64xbf16>
    %18 = vector.shape_cast %17 : vector<1x64x64xbf16> to vector<64x64xbf16>
    %cst_12 = arith.constant dense<0.000000e+00> : vector<256x64xf32>
    %19 = tpu.matmul %16, %18, %cst_12 {dimension_numbers = #tpu.dot_dimension_numbers<[1], [0], [0], [1], [0, 0, 1, 1], [], []>} : vector<256x64xbf16>, vector<64x64xbf16>, vector<256x64xf32> -> vector<256x64xf32>
    %20 = arith.addf %14, %19 : vector<256x64xf32>
    %21 = vector.extract_strided_slice %1 {offsets = [2, 1, 0], sizes = [16, 16, 64], strides = [1, 1, 1]} : vector<19x19x64xbf16> to vector<16x16x64xbf16>
    %22 = vector.shape_cast %21 : vector<16x16x64xbf16> to vector<256x64xbf16>
    %c1 = arith.constant 1 : index
    %c0_13 = arith.constant 0 : index
    %c0_14 = arith.constant 0 : index
    %23 = vector.load %arg2[%c1, %c0_13, %c0_14] : memref<3x192x64xbf16, #tpu.memory_space<vmem>>, vector<1x64x64xbf16>
    %24 = vector.shape_cast %23 : vector<1x64x64xbf16> to vector<64x64xbf16>
    %cst_15 = arith.constant dense<0.000000e+00> : vector<256x64xf32>
    %25 = tpu.matmul %22, %24, %cst_15 {dimension_numbers = #tpu.dot_dimension_numbers<[1], [0], [0], [1], [0, 0, 1, 1], [], []>} : vector<256x64xbf16>, vector<64x64xbf16>, vector<256x64xf32> -> vector<256x64xf32>
    %26 = arith.addf %20, %25 : vector<256x64xf32>
    %27 = vector.extract_strided_slice %1 {offsets = [2, 2, 0], sizes = [16, 16, 64], strides = [1, 1, 1]} : vector<19x19x64xbf16> to vector<16x16x64xbf16>
    %28 = vector.shape_cast %27 : vector<16x16x64xbf16> to vector<256x64xbf16>
    %c1_16 = arith.constant 1 : index
    %c64_17 = arith.constant 64 : index
    %c0_18 = arith.constant 0 : index
    %29 = vector.load %arg2[%c1_16, %c64_17, %c0_18] : memref<3x192x64xbf16, #tpu.memory_space<vmem>>, vector<1x64x64xbf16>
    %30 = vector.shape_cast %29 : vector<1x64x64xbf16> to vector<64x64xbf16>
    %cst_19 = arith.constant dense<0.000000e+00> : vector<256x64xf32>
    %31 = tpu.matmul %28, %30, %cst_19 {dimension_numbers = #tpu.dot_dimension_numbers<[1], [0], [0], [1], [0, 0, 1, 1], [], []>} : vector<256x64xbf16>, vector<64x64xbf16>, vector<256x64xf32> -> vector<256x64xf32>
    %32 = arith.addf %26, %31 : vector<256x64xf32>
    %33 = vector.extract_strided_slice %1 {offsets = [2, 3, 0], sizes = [16, 16, 64], strides = [1, 1, 1]} : vector<19x19x64xbf16> to vector<16x16x64xbf16>
    %34 = vector.shape_cast %33 : vector<16x16x64xbf16> to vector<256x64xbf16>
    %c1_20 = arith.constant 1 : index
    %c128_21 = arith.constant 128 : index
    %c0_22 = arith.constant 0 : index
    %35 = vector.load %arg2[%c1_20, %c128_21, %c0_22] : memref<3x192x64xbf16, #tpu.memory_space<vmem>>, vector<1x64x64xbf16>
    %36 = vector.shape_cast %35 : vector<1x64x64xbf16> to vector<64x64xbf16>
    %cst_23 = arith.constant dense<0.000000e+00> : vector<256x64xf32>
    %37 = tpu.matmul %34, %36, %cst_23 {dimension_numbers = #tpu.dot_dimension_numbers<[1], [0], [0], [1], [0, 0, 1, 1], [], []>} : vector<256x64xbf16>, vector<64x64xbf16>, vector<256x64xf32> -> vector<256x64xf32>
    %38 = arith.addf %32, %37 : vector<256x64xf32>
    %39 = vector.extract_strided_slice %1 {offsets = [3, 1, 0], sizes = [16, 16, 64], strides = [1, 1, 1]} : vector<19x19x64xbf16> to vector<16x16x64xbf16>
    %40 = vector.shape_cast %39 : vector<16x16x64xbf16> to vector<256x64xbf16>
    %c2 = arith.constant 2 : index
    %c0_24 = arith.constant 0 : index
    %c0_25 = arith.constant 0 : index
    %41 = vector.load %arg2[%c2, %c0_24, %c0_25] : memref<3x192x64xbf16, #tpu.memory_space<vmem>>, vector<1x64x64xbf16>
    %42 = vector.shape_cast %41 : vector<1x64x64xbf16> to vector<64x64xbf16>
    %cst_26 = arith.constant dense<0.000000e+00> : vector<256x64xf32>
    %43 = tpu.matmul %40, %42, %cst_26 {dimension_numbers = #tpu.dot_dimension_numbers<[1], [0], [0], [1], [0, 0, 1, 1], [], []>} : vector<256x64xbf16>, vector<64x64xbf16>, vector<256x64xf32> -> vector<256x64xf32>
    %44 = arith.addf %38, %43 : vector<256x64xf32>
    %45 = vector.extract_strided_slice %1 {offsets = [3, 2, 0], sizes = [16, 16, 64], strides = [1, 1, 1]} : vector<19x19x64xbf16> to vector<16x16x64xbf16>
    %46 = vector.shape_cast %45 : vector<16x16x64xbf16> to vector<256x64xbf16>
    %c2_27 = arith.constant 2 : index
    %c64_28 = arith.constant 64 : index
    %c0_29 = arith.constant 0 : index
    %47 = vector.load %arg2[%c2_27, %c64_28, %c0_29] : memref<3x192x64xbf16, #tpu.memory_space<vmem>>, vector<1x64x64xbf16>
    %48 = vector.shape_cast %47 : vector<1x64x64xbf16> to vector<64x64xbf16>
    %cst_30 = arith.constant dense<0.000000e+00> : vector<256x64xf32>
    %49 = tpu.matmul %46, %48, %cst_30 {dimension_numbers = #tpu.dot_dimension_numbers<[1], [0], [0], [1], [0, 0, 1, 1], [], []>} : vector<256x64xbf16>, vector<64x64xbf16>, vector<256x64xf32> -> vector<256x64xf32>
    %50 = arith.addf %44, %49 : vector<256x64xf32>
    %51 = vector.extract_strided_slice %1 {offsets = [3, 3, 0], sizes = [16, 16, 64], strides = [1, 1, 1]} : vector<19x19x64xbf16> to vector<16x16x64xbf16>
    %52 = vector.shape_cast %51 : vector<16x16x64xbf16> to vector<256x64xbf16>
    %c2_31 = arith.constant 2 : index
    %c128_32 = arith.constant 128 : index
    %c0_33 = arith.constant 0 : index
    %53 = vector.load %arg2[%c2_31, %c128_32, %c0_33] : memref<3x192x64xbf16, #tpu.memory_space<vmem>>, vector<1x64x64xbf16>
    %54 = vector.shape_cast %53 : vector<1x64x64xbf16> to vector<64x64xbf16>
    %cst_34 = arith.constant dense<0.000000e+00> : vector<256x64xf32>
    %55 = tpu.matmul %52, %54, %cst_34 {dimension_numbers = #tpu.dot_dimension_numbers<[1], [0], [0], [1], [0, 0, 1, 1], [], []>} : vector<256x64xbf16>, vector<64x64xbf16>, vector<256x64xf32> -> vector<256x64xf32>
    %56 = arith.addf %50, %55 : vector<256x64xf32>
    %c0_35 = arith.constant 0 : index
    %c0_36 = arith.constant 0 : index
    %57 = vector.load %arg3[%c0_35, %c0_36] : memref<1x64xf32, #tpu.memory_space<vmem>>, vector<1x64xf32>
    %58 = vector.broadcast %57 : vector<1x64xf32> to vector<256x64xf32>
    %59 = arith.mulf %56, %58 : vector<256x64xf32>
    %c0_37 = arith.constant 0 : index
    %c0_38 = arith.constant 0 : index
    %60 = vector.load %arg4[%c0_37, %c0_38] : memref<1x64xf32, #tpu.memory_space<vmem>>, vector<1x64xf32>
    %61 = vector.broadcast %60 : vector<1x64xf32> to vector<256x64xf32>
    %62 = arith.addf %59, %61 : vector<256x64xf32>
    %cst_39 = arith.constant 0.000000e+00 : f32
    %63 = vector.broadcast %cst_39 : f32 to vector<256x64xf32>
    %64 = arith.maximumf %62, %63 : vector<256x64xf32>
    %65 = vector.shape_cast %64 : vector<256x64xf32> to vector<8x2x8x2x64xf32>
    %cst_40 = arith.constant dense<0xFF800000> : vector<8x2x8x64xf32>
    %66 = vector.multi_reduction <maximumf>, %65, %cst_40 [3] : vector<8x2x8x2x64xf32> to vector<8x2x8x64xf32>
    %cst_41 = arith.constant dense<0xFF800000> : vector<8x8x64xf32>
    %67 = vector.multi_reduction <maximumf>, %66, %cst_41 [1] : vector<8x2x8x64xf32> to vector<8x8x64xf32>
    %68 = arith.truncf %67 : vector<8x8x64xf32> to vector<8x8x64xbf16>
    %cst_42 = arith.constant 0.000000e+00 : bf16
    %69 = vector.broadcast %cst_42 : bf16 to vector<11x11x64xbf16>
    %c0_43 = arith.constant 0 : index
    %c0_44 = arith.constant 0 : index
    %c0_45 = arith.constant 0 : index
    %c0_46 = arith.constant 0 : index
    %70 = vector.load %arg5[%c0_43, %c0_44, %c0_45, %c0_46] : memref<1x11x11x64xbf16, #tpu.memory_space<vmem>>, vector<1x11x11x64xbf16>
    %71 = vector.shape_cast %70 : vector<1x11x11x64xbf16> to vector<11x11x64xbf16>
    %72 = vector.shape_cast %69 : vector<11x11x64xbf16> to vector<1x11x11x64xbf16>
    tpu.vector_store %arg5[%c0_43, %c0_44, %c0_45, %c0_46], %72 {strides = array<i32>} : memref<1x11x11x64xbf16, #tpu.memory_space<vmem>>, vector<1x11x11x64xbf16>,
    %c0_47 = arith.constant 0 : index
    %c2_48 = arith.constant 2 : index
    %c2_49 = arith.constant 2 : index
    %c0_50 = arith.constant 0 : index
    %73 = vector.load %arg5[%c0_47, %c2_48, %c2_49, %c0_50] : memref<1x11x11x64xbf16, #tpu.memory_space<vmem>>, vector<1x8x8x64xbf16>
    %74 = vector.shape_cast %73 : vector<1x8x8x64xbf16> to vector<8x8x64xbf16>
    %75 = vector.shape_cast %68 : vector<8x8x64xbf16> to vector<1x8x8x64xbf16>
    tpu.vector_store %arg5[%c0_47, %c2_48, %c2_49, %c0_50], %75 {strides = array<i32>} : memref<1x11x11x64xbf16, #tpu.memory_space<vmem>>, vector<1x8x8x64xbf16>,
    return
  }
  func.func @transform_0(%arg0: i32) -> (i32, i32, i32, i32) {
    %c0_i32 = arith.constant 0 : i32
    %c0_i32_0 = arith.constant 0 : i32
    %c0_i32_1 = arith.constant 0 : i32
    %c0_i32_2 = arith.constant 0 : i32
    return %arg0, %c0_i32, %c0_i32_0, %c0_i32_1 : i32, i32, i32, i32
  }
  func.func @transform_1(%arg0: i32) -> (i32, i32, i32) {
    %c0_i32 = arith.constant 0 : i32
    %c0_i32_0 = arith.constant 0 : i32
    %c0_i32_1 = arith.constant 0 : i32
    %c0_i32_2 = arith.constant 0 : i32
    return %c0_i32, %c0_i32_0, %c0_i32_1 : i32, i32, i32
  }
  func.func @transform_2(%arg0: i32) -> (i32, i32) {
    %c0_i32 = arith.constant 0 : i32
    %c0_i32_0 = arith.constant 0 : i32
    %c0_i32_1 = arith.constant 0 : i32
    return %c0_i32, %c0_i32_0 : i32, i32
  }
  func.func @transform_3(%arg0: i32) -> (i32, i32) {
    %c0_i32 = arith.constant 0 : i32
    %c0_i32_0 = arith.constant 0 : i32
    %c0_i32_1 = arith.constant 0 : i32
    return %c0_i32, %c0_i32_0 : i32, i32
  }
  func.func @transform_4(%arg0: i32) -> (i32, i32, i32, i32) {
    %c0_i32 = arith.constant 0 : i32
    %c0_i32_0 = arith.constant 0 : i32
    %c0_i32_1 = arith.constant 0 : i32
    %c0_i32_2 = arith.constant 0 : i32
    return %arg0, %c0_i32, %c0_i32_0, %c0_i32_1 : i32, i32, i32, i32
  }
}

module attributes {stable_mosaic.version = 11 : i64} {
  func.func @_conv_bn_relu_kernel(%arg0: i32, %arg1: memref<1x11x11x64xbf16, #tpu.memory_space<vmem>>, %arg2: memref<3x192x128xbf16, #tpu.memory_space<vmem>>, %arg3: memref<1x128xf32, #tpu.memory_space<vmem>>, %arg4: memref<1x128xf32, #tpu.memory_space<vmem>>, %arg5: memref<1x11x11x128xbf16, #tpu.memory_space<vmem>>) attributes {dimension_semantics = [#tpu.dimension_semantics<parallel>], iteration_bounds = array<i64: 2>, scalar_prefetch = 0 : i64, scratch_operands = 0 : i64, tpu.core_type = #tpu.core_type<tc>, window_params = [{transform_indices = @transform_0, window_bounds = array<i64: 1, 11, 11, 64>}, {pipeline_mode = #tpu.pipeline_mode<synchronous>, transform_indices = @transform_1, window_bounds = array<i64: 3, 192, 128>}, {pipeline_mode = #tpu.pipeline_mode<synchronous>, transform_indices = @transform_2, window_bounds = array<i64: 1, 128>}, {pipeline_mode = #tpu.pipeline_mode<synchronous>, transform_indices = @transform_3, window_bounds = array<i64: 1, 128>}, {transform_indices = @transform_4, window_bounds = array<i64: 1, 11, 11, 128>}]} {
    %c0 = arith.constant 0 : index
    %c0_0 = arith.constant 0 : index
    %c0_1 = arith.constant 0 : index
    %c0_2 = arith.constant 0 : index
    %0 = vector.load %arg1[%c0, %c0_0, %c0_1, %c0_2] : memref<1x11x11x64xbf16, #tpu.memory_space<vmem>>, vector<1x11x11x64xbf16>
    %1 = vector.shape_cast %0 : vector<1x11x11x64xbf16> to vector<11x11x64xbf16>
    %cst = arith.constant 0.000000e+00 : f32
    %2 = vector.broadcast %cst : f32 to vector<64x128xf32>
    %3 = vector.extract_strided_slice %1 {offsets = [1, 1, 0], sizes = [8, 8, 64], strides = [1, 1, 1]} : vector<11x11x64xbf16> to vector<8x8x64xbf16>
    %4 = vector.shape_cast %3 : vector<8x8x64xbf16> to vector<64x64xbf16>
    %c0_3 = arith.constant 0 : index
    %c0_4 = arith.constant 0 : index
    %c0_5 = arith.constant 0 : index
    %5 = vector.load %arg2[%c0_3, %c0_4, %c0_5] : memref<3x192x128xbf16, #tpu.memory_space<vmem>>, vector<1x64x128xbf16>
    %6 = vector.shape_cast %5 : vector<1x64x128xbf16> to vector<64x128xbf16>
    %cst_6 = arith.constant dense<0.000000e+00> : vector<64x128xf32>
    %7 = tpu.matmul %4, %6, %cst_6 {dimension_numbers = #tpu.dot_dimension_numbers<[1], [0], [0], [1], [0, 0, 1, 1], [], []>} : vector<64x64xbf16>, vector<64x128xbf16>, vector<64x128xf32> -> vector<64x128xf32>
    %8 = arith.addf %2, %7 : vector<64x128xf32>
    %9 = vector.extract_strided_slice %1 {offsets = [1, 2, 0], sizes = [8, 8, 64], strides = [1, 1, 1]} : vector<11x11x64xbf16> to vector<8x8x64xbf16>
    %10 = vector.shape_cast %9 : vector<8x8x64xbf16> to vector<64x64xbf16>
    %c0_7 = arith.constant 0 : index
    %c64 = arith.constant 64 : index
    %c0_8 = arith.constant 0 : index
    %11 = vector.load %arg2[%c0_7, %c64, %c0_8] : memref<3x192x128xbf16, #tpu.memory_space<vmem>>, vector<1x64x128xbf16>
    %12 = vector.shape_cast %11 : vector<1x64x128xbf16> to vector<64x128xbf16>
    %cst_9 = arith.constant dense<0.000000e+00> : vector<64x128xf32>
    %13 = tpu.matmul %10, %12, %cst_9 {dimension_numbers = #tpu.dot_dimension_numbers<[1], [0], [0], [1], [0, 0, 1, 1], [], []>} : vector<64x64xbf16>, vector<64x128xbf16>, vector<64x128xf32> -> vector<64x128xf32>
    %14 = arith.addf %8, %13 : vector<64x128xf32>
    %15 = vector.extract_strided_slice %1 {offsets = [1, 3, 0], sizes = [8, 8, 64], strides = [1, 1, 1]} : vector<11x11x64xbf16> to vector<8x8x64xbf16>
    %16 = vector.shape_cast %15 : vector<8x8x64xbf16> to vector<64x64xbf16>
    %c0_10 = arith.constant 0 : index
    %c128 = arith.constant 128 : index
    %c0_11 = arith.constant 0 : index
    %17 = vector.load %arg2[%c0_10, %c128, %c0_11] : memref<3x192x128xbf16, #tpu.memory_space<vmem>>, vector<1x64x128xbf16>
    %18 = vector.shape_cast %17 : vector<1x64x128xbf16> to vector<64x128xbf16>
    %cst_12 = arith.constant dense<0.000000e+00> : vector<64x128xf32>
    %19 = tpu.matmul %16, %18, %cst_12 {dimension_numbers = #tpu.dot_dimension_numbers<[1], [0], [0], [1], [0, 0, 1, 1], [], []>} : vector<64x64xbf16>, vector<64x128xbf16>, vector<64x128xf32> -> vector<64x128xf32>
    %20 = arith.addf %14, %19 : vector<64x128xf32>
    %21 = vector.extract_strided_slice %1 {offsets = [2, 1, 0], sizes = [8, 8, 64], strides = [1, 1, 1]} : vector<11x11x64xbf16> to vector<8x8x64xbf16>
    %22 = vector.shape_cast %21 : vector<8x8x64xbf16> to vector<64x64xbf16>
    %c1 = arith.constant 1 : index
    %c0_13 = arith.constant 0 : index
    %c0_14 = arith.constant 0 : index
    %23 = vector.load %arg2[%c1, %c0_13, %c0_14] : memref<3x192x128xbf16, #tpu.memory_space<vmem>>, vector<1x64x128xbf16>
    %24 = vector.shape_cast %23 : vector<1x64x128xbf16> to vector<64x128xbf16>
    %cst_15 = arith.constant dense<0.000000e+00> : vector<64x128xf32>
    %25 = tpu.matmul %22, %24, %cst_15 {dimension_numbers = #tpu.dot_dimension_numbers<[1], [0], [0], [1], [0, 0, 1, 1], [], []>} : vector<64x64xbf16>, vector<64x128xbf16>, vector<64x128xf32> -> vector<64x128xf32>
    %26 = arith.addf %20, %25 : vector<64x128xf32>
    %27 = vector.extract_strided_slice %1 {offsets = [2, 2, 0], sizes = [8, 8, 64], strides = [1, 1, 1]} : vector<11x11x64xbf16> to vector<8x8x64xbf16>
    %28 = vector.shape_cast %27 : vector<8x8x64xbf16> to vector<64x64xbf16>
    %c1_16 = arith.constant 1 : index
    %c64_17 = arith.constant 64 : index
    %c0_18 = arith.constant 0 : index
    %29 = vector.load %arg2[%c1_16, %c64_17, %c0_18] : memref<3x192x128xbf16, #tpu.memory_space<vmem>>, vector<1x64x128xbf16>
    %30 = vector.shape_cast %29 : vector<1x64x128xbf16> to vector<64x128xbf16>
    %cst_19 = arith.constant dense<0.000000e+00> : vector<64x128xf32>
    %31 = tpu.matmul %28, %30, %cst_19 {dimension_numbers = #tpu.dot_dimension_numbers<[1], [0], [0], [1], [0, 0, 1, 1], [], []>} : vector<64x64xbf16>, vector<64x128xbf16>, vector<64x128xf32> -> vector<64x128xf32>
    %32 = arith.addf %26, %31 : vector<64x128xf32>
    %33 = vector.extract_strided_slice %1 {offsets = [2, 3, 0], sizes = [8, 8, 64], strides = [1, 1, 1]} : vector<11x11x64xbf16> to vector<8x8x64xbf16>
    %34 = vector.shape_cast %33 : vector<8x8x64xbf16> to vector<64x64xbf16>
    %c1_20 = arith.constant 1 : index
    %c128_21 = arith.constant 128 : index
    %c0_22 = arith.constant 0 : index
    %35 = vector.load %arg2[%c1_20, %c128_21, %c0_22] : memref<3x192x128xbf16, #tpu.memory_space<vmem>>, vector<1x64x128xbf16>
    %36 = vector.shape_cast %35 : vector<1x64x128xbf16> to vector<64x128xbf16>
    %cst_23 = arith.constant dense<0.000000e+00> : vector<64x128xf32>
    %37 = tpu.matmul %34, %36, %cst_23 {dimension_numbers = #tpu.dot_dimension_numbers<[1], [0], [0], [1], [0, 0, 1, 1], [], []>} : vector<64x64xbf16>, vector<64x128xbf16>, vector<64x128xf32> -> vector<64x128xf32>
    %38 = arith.addf %32, %37 : vector<64x128xf32>
    %39 = vector.extract_strided_slice %1 {offsets = [3, 1, 0], sizes = [8, 8, 64], strides = [1, 1, 1]} : vector<11x11x64xbf16> to vector<8x8x64xbf16>
    %40 = vector.shape_cast %39 : vector<8x8x64xbf16> to vector<64x64xbf16>
    %c2 = arith.constant 2 : index
    %c0_24 = arith.constant 0 : index
    %c0_25 = arith.constant 0 : index
    %41 = vector.load %arg2[%c2, %c0_24, %c0_25] : memref<3x192x128xbf16, #tpu.memory_space<vmem>>, vector<1x64x128xbf16>
    %42 = vector.shape_cast %41 : vector<1x64x128xbf16> to vector<64x128xbf16>
    %cst_26 = arith.constant dense<0.000000e+00> : vector<64x128xf32>
    %43 = tpu.matmul %40, %42, %cst_26 {dimension_numbers = #tpu.dot_dimension_numbers<[1], [0], [0], [1], [0, 0, 1, 1], [], []>} : vector<64x64xbf16>, vector<64x128xbf16>, vector<64x128xf32> -> vector<64x128xf32>
    %44 = arith.addf %38, %43 : vector<64x128xf32>
    %45 = vector.extract_strided_slice %1 {offsets = [3, 2, 0], sizes = [8, 8, 64], strides = [1, 1, 1]} : vector<11x11x64xbf16> to vector<8x8x64xbf16>
    %46 = vector.shape_cast %45 : vector<8x8x64xbf16> to vector<64x64xbf16>
    %c2_27 = arith.constant 2 : index
    %c64_28 = arith.constant 64 : index
    %c0_29 = arith.constant 0 : index
    %47 = vector.load %arg2[%c2_27, %c64_28, %c0_29] : memref<3x192x128xbf16, #tpu.memory_space<vmem>>, vector<1x64x128xbf16>
    %48 = vector.shape_cast %47 : vector<1x64x128xbf16> to vector<64x128xbf16>
    %cst_30 = arith.constant dense<0.000000e+00> : vector<64x128xf32>
    %49 = tpu.matmul %46, %48, %cst_30 {dimension_numbers = #tpu.dot_dimension_numbers<[1], [0], [0], [1], [0, 0, 1, 1], [], []>} : vector<64x64xbf16>, vector<64x128xbf16>, vector<64x128xf32> -> vector<64x128xf32>
    %50 = arith.addf %44, %49 : vector<64x128xf32>
    %51 = vector.extract_strided_slice %1 {offsets = [3, 3, 0], sizes = [8, 8, 64], strides = [1, 1, 1]} : vector<11x11x64xbf16> to vector<8x8x64xbf16>
    %52 = vector.shape_cast %51 : vector<8x8x64xbf16> to vector<64x64xbf16>
    %c2_31 = arith.constant 2 : index
    %c128_32 = arith.constant 128 : index
    %c0_33 = arith.constant 0 : index
    %53 = vector.load %arg2[%c2_31, %c128_32, %c0_33] : memref<3x192x128xbf16, #tpu.memory_space<vmem>>, vector<1x64x128xbf16>
    %54 = vector.shape_cast %53 : vector<1x64x128xbf16> to vector<64x128xbf16>
    %cst_34 = arith.constant dense<0.000000e+00> : vector<64x128xf32>
    %55 = tpu.matmul %52, %54, %cst_34 {dimension_numbers = #tpu.dot_dimension_numbers<[1], [0], [0], [1], [0, 0, 1, 1], [], []>} : vector<64x64xbf16>, vector<64x128xbf16>, vector<64x128xf32> -> vector<64x128xf32>
    %56 = arith.addf %50, %55 : vector<64x128xf32>
    %c0_35 = arith.constant 0 : index
    %c0_36 = arith.constant 0 : index
    %57 = vector.load %arg3[%c0_35, %c0_36] : memref<1x128xf32, #tpu.memory_space<vmem>>, vector<1x128xf32>
    %58 = vector.broadcast %57 : vector<1x128xf32> to vector<64x128xf32>
    %59 = arith.mulf %56, %58 : vector<64x128xf32>
    %c0_37 = arith.constant 0 : index
    %c0_38 = arith.constant 0 : index
    %60 = vector.load %arg4[%c0_37, %c0_38] : memref<1x128xf32, #tpu.memory_space<vmem>>, vector<1x128xf32>
    %61 = vector.broadcast %60 : vector<1x128xf32> to vector<64x128xf32>
    %62 = arith.addf %59, %61 : vector<64x128xf32>
    %cst_39 = arith.constant 0.000000e+00 : f32
    %63 = vector.broadcast %cst_39 : f32 to vector<64x128xf32>
    %64 = arith.maximumf %62, %63 : vector<64x128xf32>
    %65 = vector.shape_cast %64 : vector<64x128xf32> to vector<8x8x128xf32>
    %66 = arith.truncf %65 : vector<8x8x128xf32> to vector<8x8x128xbf16>
    %cst_40 = arith.constant 0.000000e+00 : bf16
    %67 = vector.broadcast %cst_40 : bf16 to vector<11x11x128xbf16>
    %c0_41 = arith.constant 0 : index
    %c0_42 = arith.constant 0 : index
    %c0_43 = arith.constant 0 : index
    %c0_44 = arith.constant 0 : index
    %68 = vector.load %arg5[%c0_41, %c0_42, %c0_43, %c0_44] : memref<1x11x11x128xbf16, #tpu.memory_space<vmem>>, vector<1x11x11x128xbf16>
    %69 = vector.shape_cast %68 : vector<1x11x11x128xbf16> to vector<11x11x128xbf16>
    %70 = vector.shape_cast %67 : vector<11x11x128xbf16> to vector<1x11x11x128xbf16>
    tpu.vector_store %arg5[%c0_41, %c0_42, %c0_43, %c0_44], %70 {strides = array<i32>} : memref<1x11x11x128xbf16, #tpu.memory_space<vmem>>, vector<1x11x11x128xbf16>,
    %c0_45 = arith.constant 0 : index
    %c2_46 = arith.constant 2 : index
    %c2_47 = arith.constant 2 : index
    %c0_48 = arith.constant 0 : index
    %71 = vector.load %arg5[%c0_45, %c2_46, %c2_47, %c0_48] : memref<1x11x11x128xbf16, #tpu.memory_space<vmem>>, vector<1x8x8x128xbf16>
    %72 = vector.shape_cast %71 : vector<1x8x8x128xbf16> to vector<8x8x128xbf16>
    %73 = vector.shape_cast %66 : vector<8x8x128xbf16> to vector<1x8x8x128xbf16>
    tpu.vector_store %arg5[%c0_45, %c2_46, %c2_47, %c0_48], %73 {strides = array<i32>} : memref<1x11x11x128xbf16, #tpu.memory_space<vmem>>, vector<1x8x8x128xbf16>,
    return
  }
  func.func @transform_0(%arg0: i32) -> (i32, i32, i32, i32) {
    %c0_i32 = arith.constant 0 : i32
    %c0_i32_0 = arith.constant 0 : i32
    %c0_i32_1 = arith.constant 0 : i32
    %c0_i32_2 = arith.constant 0 : i32
    return %arg0, %c0_i32, %c0_i32_0, %c0_i32_1 : i32, i32, i32, i32
  }
  func.func @transform_1(%arg0: i32) -> (i32, i32, i32) {
    %c0_i32 = arith.constant 0 : i32
    %c0_i32_0 = arith.constant 0 : i32
    %c0_i32_1 = arith.constant 0 : i32
    %c0_i32_2 = arith.constant 0 : i32
    return %c0_i32, %c0_i32_0, %c0_i32_1 : i32, i32, i32
  }
  func.func @transform_2(%arg0: i32) -> (i32, i32) {
    %c0_i32 = arith.constant 0 : i32
    %c0_i32_0 = arith.constant 0 : i32
    %c0_i32_1 = arith.constant 0 : i32
    return %c0_i32, %c0_i32_0 : i32, i32
  }
  func.func @transform_3(%arg0: i32) -> (i32, i32) {
    %c0_i32 = arith.constant 0 : i32
    %c0_i32_0 = arith.constant 0 : i32
    %c0_i32_1 = arith.constant 0 : i32
    return %c0_i32, %c0_i32_0 : i32, i32
  }
  func.func @transform_4(%arg0: i32) -> (i32, i32, i32, i32) {
    %c0_i32 = arith.constant 0 : i32
    %c0_i32_0 = arith.constant 0 : i32
    %c0_i32_1 = arith.constant 0 : i32
    %c0_i32_2 = arith.constant 0 : i32
    return %arg0, %c0_i32, %c0_i32_0, %c0_i32_1 : i32, i32, i32, i32
  }
}

module attributes {stable_mosaic.version = 11 : i64} {
  func.func @_conv_bn_relu_kernel(%arg0: i32, %arg1: memref<1x11x11x128xbf16, #tpu.memory_space<vmem>>, %arg2: memref<3x384x128xbf16, #tpu.memory_space<vmem>>, %arg3: memref<1x128xf32, #tpu.memory_space<vmem>>, %arg4: memref<1x128xf32, #tpu.memory_space<vmem>>, %arg5: memref<1x7x7x128xbf16, #tpu.memory_space<vmem>>) attributes {dimension_semantics = [#tpu.dimension_semantics<parallel>], iteration_bounds = array<i64: 2>, scalar_prefetch = 0 : i64, scratch_operands = 0 : i64, tpu.core_type = #tpu.core_type<tc>, window_params = [{transform_indices = @transform_0, window_bounds = array<i64: 1, 11, 11, 128>}, {pipeline_mode = #tpu.pipeline_mode<synchronous>, transform_indices = @transform_1, window_bounds = array<i64: 3, 384, 128>}, {pipeline_mode = #tpu.pipeline_mode<synchronous>, transform_indices = @transform_2, window_bounds = array<i64: 1, 128>}, {pipeline_mode = #tpu.pipeline_mode<synchronous>, transform_indices = @transform_3, window_bounds = array<i64: 1, 128>}, {transform_indices = @transform_4, window_bounds = array<i64: 1, 7, 7, 128>}]} {
    %c0 = arith.constant 0 : index
    %c0_0 = arith.constant 0 : index
    %c0_1 = arith.constant 0 : index
    %c0_2 = arith.constant 0 : index
    %0 = vector.load %arg1[%c0, %c0_0, %c0_1, %c0_2] : memref<1x11x11x128xbf16, #tpu.memory_space<vmem>>, vector<1x11x11x128xbf16>
    %1 = vector.shape_cast %0 : vector<1x11x11x128xbf16> to vector<11x11x128xbf16>
    %cst = arith.constant 0.000000e+00 : f32
    %2 = vector.broadcast %cst : f32 to vector<64x128xf32>
    %3 = vector.extract_strided_slice %1 {offsets = [1, 0, 0], sizes = [8, 11, 128], strides = [1, 1, 1]} : vector<11x11x128xbf16> to vector<8x11x128xbf16>
    %4 = vector.extract_strided_slice %3 {offsets = [0, 1, 0], sizes = [8, 8, 128], strides = [1, 1, 1]} : vector<8x11x128xbf16> to vector<8x8x128xbf16>
    %5 = vector.extract_strided_slice %3 {offsets = [0, 2, 0], sizes = [8, 8, 128], strides = [1, 1, 1]} : vector<8x11x128xbf16> to vector<8x8x128xbf16>
    %6 = vector.extract_strided_slice %3 {offsets = [0, 3, 0], sizes = [8, 8, 128], strides = [1, 1, 1]} : vector<8x11x128xbf16> to vector<8x8x128xbf16>
    %7 = tpu.concatenate %4, %5, %6 in 2 : vector<8x8x128xbf16>, vector<8x8x128xbf16>, vector<8x8x128xbf16> -> vector<8x8x384xbf16>
    %8 = vector.shape_cast %7 : vector<8x8x384xbf16> to vector<64x384xbf16>
    %c0_3 = arith.constant 0 : index
    %c0_4 = arith.constant 0 : index
    %c0_5 = arith.constant 0 : index
    %9 = vector.load %arg2[%c0_3, %c0_4, %c0_5] : memref<3x384x128xbf16, #tpu.memory_space<vmem>>, vector<1x384x128xbf16>
    %10 = vector.shape_cast %9 : vector<1x384x128xbf16> to vector<384x128xbf16>
    %cst_6 = arith.constant dense<0.000000e+00> : vector<64x128xf32>
    %11 = tpu.matmul %8, %10, %cst_6 {dimension_numbers = #tpu.dot_dimension_numbers<[1], [0], [0], [1], [0, 0, 1, 1], [], []>} : vector<64x384xbf16>, vector<384x128xbf16>, vector<64x128xf32> -> vector<64x128xf32>
    %12 = arith.addf %2, %11 : vector<64x128xf32>
    %13 = vector.extract_strided_slice %1 {offsets = [2, 0, 0], sizes = [8, 11, 128], strides = [1, 1, 1]} : vector<11x11x128xbf16> to vector<8x11x128xbf16>
    %14 = vector.extract_strided_slice %13 {offsets = [0, 1, 0], sizes = [8, 8, 128], strides = [1, 1, 1]} : vector<8x11x128xbf16> to vector<8x8x128xbf16>
    %15 = vector.extract_strided_slice %13 {offsets = [0, 2, 0], sizes = [8, 8, 128], strides = [1, 1, 1]} : vector<8x11x128xbf16> to vector<8x8x128xbf16>
    %16 = vector.extract_strided_slice %13 {offsets = [0, 3, 0], sizes = [8, 8, 128], strides = [1, 1, 1]} : vector<8x11x128xbf16> to vector<8x8x128xbf16>
    %17 = tpu.concatenate %14, %15, %16 in 2 : vector<8x8x128xbf16>, vector<8x8x128xbf16>, vector<8x8x128xbf16> -> vector<8x8x384xbf16>
    %18 = vector.shape_cast %17 : vector<8x8x384xbf16> to vector<64x384xbf16>
    %c1 = arith.constant 1 : index
    %c0_7 = arith.constant 0 : index
    %c0_8 = arith.constant 0 : index
    %19 = vector.load %arg2[%c1, %c0_7, %c0_8] : memref<3x384x128xbf16, #tpu.memory_space<vmem>>, vector<1x384x128xbf16>
    %20 = vector.shape_cast %19 : vector<1x384x128xbf16> to vector<384x128xbf16>
    %cst_9 = arith.constant dense<0.000000e+00> : vector<64x128xf32>
    %21 = tpu.matmul %18, %20, %cst_9 {dimension_numbers = #tpu.dot_dimension_numbers<[1], [0], [0], [1], [0, 0, 1, 1], [], []>} : vector<64x384xbf16>, vector<384x128xbf16>, vector<64x128xf32> -> vector<64x128xf32>
    %22 = arith.addf %12, %21 : vector<64x128xf32>
    %23 = vector.extract_strided_slice %1 {offsets = [3, 0, 0], sizes = [8, 11, 128], strides = [1, 1, 1]} : vector<11x11x128xbf16> to vector<8x11x128xbf16>
    %24 = vector.extract_strided_slice %23 {offsets = [0, 1, 0], sizes = [8, 8, 128], strides = [1, 1, 1]} : vector<8x11x128xbf16> to vector<8x8x128xbf16>
    %25 = vector.extract_strided_slice %23 {offsets = [0, 2, 0], sizes = [8, 8, 128], strides = [1, 1, 1]} : vector<8x11x128xbf16> to vector<8x8x128xbf16>
    %26 = vector.extract_strided_slice %23 {offsets = [0, 3, 0], sizes = [8, 8, 128], strides = [1, 1, 1]} : vector<8x11x128xbf16> to vector<8x8x128xbf16>
    %27 = tpu.concatenate %24, %25, %26 in 2 : vector<8x8x128xbf16>, vector<8x8x128xbf16>, vector<8x8x128xbf16> -> vector<8x8x384xbf16>
    %28 = vector.shape_cast %27 : vector<8x8x384xbf16> to vector<64x384xbf16>
    %c2 = arith.constant 2 : index
    %c0_10 = arith.constant 0 : index
    %c0_11 = arith.constant 0 : index
    %29 = vector.load %arg2[%c2, %c0_10, %c0_11] : memref<3x384x128xbf16, #tpu.memory_space<vmem>>, vector<1x384x128xbf16>
    %30 = vector.shape_cast %29 : vector<1x384x128xbf16> to vector<384x128xbf16>
    %cst_12 = arith.constant dense<0.000000e+00> : vector<64x128xf32>
    %31 = tpu.matmul %28, %30, %cst_12 {dimension_numbers = #tpu.dot_dimension_numbers<[1], [0], [0], [1], [0, 0, 1, 1], [], []>} : vector<64x384xbf16>, vector<384x128xbf16>, vector<64x128xf32> -> vector<64x128xf32>
    %32 = arith.addf %22, %31 : vector<64x128xf32>
    %c0_13 = arith.constant 0 : index
    %c0_14 = arith.constant 0 : index
    %33 = vector.load %arg3[%c0_13, %c0_14] : memref<1x128xf32, #tpu.memory_space<vmem>>, vector<1x128xf32>
    %34 = vector.broadcast %33 : vector<1x128xf32> to vector<64x128xf32>
    %35 = arith.mulf %32, %34 : vector<64x128xf32>
    %c0_15 = arith.constant 0 : index
    %c0_16 = arith.constant 0 : index
    %36 = vector.load %arg4[%c0_15, %c0_16] : memref<1x128xf32, #tpu.memory_space<vmem>>, vector<1x128xf32>
    %37 = vector.broadcast %36 : vector<1x128xf32> to vector<64x128xf32>
    %38 = arith.addf %35, %37 : vector<64x128xf32>
    %cst_17 = arith.constant 0.000000e+00 : f32
    %39 = vector.broadcast %cst_17 : f32 to vector<64x128xf32>
    %40 = arith.maximumf %38, %39 : vector<64x128xf32>
    %41 = vector.shape_cast %40 : vector<64x128xf32> to vector<4x2x4x2x128xf32>
    %cst_18 = arith.constant dense<0xFF800000> : vector<4x2x4x128xf32>
    %42 = vector.multi_reduction <maximumf>, %41, %cst_18 [3] : vector<4x2x4x2x128xf32> to vector<4x2x4x128xf32>
    %cst_19 = arith.constant dense<0xFF800000> : vector<4x4x128xf32>
    %43 = vector.multi_reduction <maximumf>, %42, %cst_19 [1] : vector<4x2x4x128xf32> to vector<4x4x128xf32>
    %44 = arith.truncf %43 : vector<4x4x128xf32> to vector<4x4x128xbf16>
    %cst_20 = arith.constant 0.000000e+00 : bf16
    %45 = vector.broadcast %cst_20 : bf16 to vector<7x7x128xbf16>
    %c0_21 = arith.constant 0 : index
    %c0_22 = arith.constant 0 : index
    %c0_23 = arith.constant 0 : index
    %c0_24 = arith.constant 0 : index
    %46 = vector.load %arg5[%c0_21, %c0_22, %c0_23, %c0_24] : memref<1x7x7x128xbf16, #tpu.memory_space<vmem>>, vector<1x7x7x128xbf16>
    %47 = vector.shape_cast %46 : vector<1x7x7x128xbf16> to vector<7x7x128xbf16>
    %48 = vector.shape_cast %45 : vector<7x7x128xbf16> to vector<1x7x7x128xbf16>
    tpu.vector_store %arg5[%c0_21, %c0_22, %c0_23, %c0_24], %48 {strides = array<i32>} : memref<1x7x7x128xbf16, #tpu.memory_space<vmem>>, vector<1x7x7x128xbf16>,
    %c0_25 = arith.constant 0 : index
    %c2_26 = arith.constant 2 : index
    %c2_27 = arith.constant 2 : index
    %c0_28 = arith.constant 0 : index
    %49 = vector.load %arg5[%c0_25, %c2_26, %c2_27, %c0_28] : memref<1x7x7x128xbf16, #tpu.memory_space<vmem>>, vector<1x4x4x128xbf16>
    %50 = vector.shape_cast %49 : vector<1x4x4x128xbf16> to vector<4x4x128xbf16>
    %51 = vector.shape_cast %44 : vector<4x4x128xbf16> to vector<1x4x4x128xbf16>
    tpu.vector_store %arg5[%c0_25, %c2_26, %c2_27, %c0_28], %51 {strides = array<i32>} : memref<1x7x7x128xbf16, #tpu.memory_space<vmem>>, vector<1x4x4x128xbf16>,
    return
  }
  func.func @transform_0(%arg0: i32) -> (i32, i32, i32, i32) {
    %c0_i32 = arith.constant 0 : i32
    %c0_i32_0 = arith.constant 0 : i32
    %c0_i32_1 = arith.constant 0 : i32
    %c0_i32_2 = arith.constant 0 : i32
    return %arg0, %c0_i32, %c0_i32_0, %c0_i32_1 : i32, i32, i32, i32
  }
  func.func @transform_1(%arg0: i32) -> (i32, i32, i32) {
    %c0_i32 = arith.constant 0 : i32
    %c0_i32_0 = arith.constant 0 : i32
    %c0_i32_1 = arith.constant 0 : i32
    %c0_i32_2 = arith.constant 0 : i32
    return %c0_i32, %c0_i32_0, %c0_i32_1 : i32, i32, i32
  }
  func.func @transform_2(%arg0: i32) -> (i32, i32) {
    %c0_i32 = arith.constant 0 : i32
    %c0_i32_0 = arith.constant 0 : i32
    %c0_i32_1 = arith.constant 0 : i32
    return %c0_i32, %c0_i32_0 : i32, i32
  }
  func.func @transform_3(%arg0: i32) -> (i32, i32) {
    %c0_i32 = arith.constant 0 : i32
    %c0_i32_0 = arith.constant 0 : i32
    %c0_i32_1 = arith.constant 0 : i32
    return %c0_i32, %c0_i32_0 : i32, i32
  }
  func.func @transform_4(%arg0: i32) -> (i32, i32, i32, i32) {
    %c0_i32 = arith.constant 0 : i32
    %c0_i32_0 = arith.constant 0 : i32
    %c0_i32_1 = arith.constant 0 : i32
    %c0_i32_2 = arith.constant 0 : i32
    return %arg0, %c0_i32, %c0_i32_0, %c0_i32_1 : i32, i32, i32, i32
  }
}

module attributes {stable_mosaic.version = 11 : i64} {
  func.func @_conv_bn_relu_kernel(%arg0: i32, %arg1: memref<1x7x7x128xbf16, #tpu.memory_space<vmem>>, %arg2: memref<3x384x256xbf16, #tpu.memory_space<vmem>>, %arg3: memref<1x256xf32, #tpu.memory_space<vmem>>, %arg4: memref<1x256xf32, #tpu.memory_space<vmem>>, %arg5: memref<1x4x4x256xbf16, #tpu.memory_space<vmem>>) attributes {dimension_semantics = [#tpu.dimension_semantics<parallel>], iteration_bounds = array<i64: 2>, scalar_prefetch = 0 : i64, scratch_operands = 0 : i64, tpu.core_type = #tpu.core_type<tc>, window_params = [{transform_indices = @transform_0, window_bounds = array<i64: 1, 7, 7, 128>}, {pipeline_mode = #tpu.pipeline_mode<synchronous>, transform_indices = @transform_1, window_bounds = array<i64: 3, 384, 256>}, {pipeline_mode = #tpu.pipeline_mode<synchronous>, transform_indices = @transform_2, window_bounds = array<i64: 1, 256>}, {pipeline_mode = #tpu.pipeline_mode<synchronous>, transform_indices = @transform_3, window_bounds = array<i64: 1, 256>}, {transform_indices = @transform_4, window_bounds = array<i64: 1, 4, 4, 256>}]} {
    %c0 = arith.constant 0 : index
    %c0_0 = arith.constant 0 : index
    %c0_1 = arith.constant 0 : index
    %c0_2 = arith.constant 0 : index
    %0 = vector.load %arg1[%c0, %c0_0, %c0_1, %c0_2] : memref<1x7x7x128xbf16, #tpu.memory_space<vmem>>, vector<1x7x7x128xbf16>
    %1 = vector.shape_cast %0 : vector<1x7x7x128xbf16> to vector<7x7x128xbf16>
    %cst = arith.constant 0.000000e+00 : f32
    %2 = vector.broadcast %cst : f32 to vector<16x256xf32>
    %3 = vector.extract_strided_slice %1 {offsets = [1, 0, 0], sizes = [4, 7, 128], strides = [1, 1, 1]} : vector<7x7x128xbf16> to vector<4x7x128xbf16>
    %4 = vector.extract_strided_slice %3 {offsets = [0, 1, 0], sizes = [4, 4, 128], strides = [1, 1, 1]} : vector<4x7x128xbf16> to vector<4x4x128xbf16>
    %5 = vector.extract_strided_slice %3 {offsets = [0, 2, 0], sizes = [4, 4, 128], strides = [1, 1, 1]} : vector<4x7x128xbf16> to vector<4x4x128xbf16>
    %6 = vector.extract_strided_slice %3 {offsets = [0, 3, 0], sizes = [4, 4, 128], strides = [1, 1, 1]} : vector<4x7x128xbf16> to vector<4x4x128xbf16>
    %7 = tpu.concatenate %4, %5, %6 in 2 : vector<4x4x128xbf16>, vector<4x4x128xbf16>, vector<4x4x128xbf16> -> vector<4x4x384xbf16>
    %8 = vector.shape_cast %7 : vector<4x4x384xbf16> to vector<16x384xbf16>
    %c0_3 = arith.constant 0 : index
    %c0_4 = arith.constant 0 : index
    %c0_5 = arith.constant 0 : index
    %9 = vector.load %arg2[%c0_3, %c0_4, %c0_5] : memref<3x384x256xbf16, #tpu.memory_space<vmem>>, vector<1x384x256xbf16>
    %10 = vector.shape_cast %9 : vector<1x384x256xbf16> to vector<384x256xbf16>
    %cst_6 = arith.constant dense<0.000000e+00> : vector<16x256xf32>
    %11 = tpu.matmul %8, %10, %cst_6 {dimension_numbers = #tpu.dot_dimension_numbers<[1], [0], [0], [1], [0, 0, 1, 1], [], []>} : vector<16x384xbf16>, vector<384x256xbf16>, vector<16x256xf32> -> vector<16x256xf32>
    %12 = arith.addf %2, %11 : vector<16x256xf32>
    %13 = vector.extract_strided_slice %1 {offsets = [2, 0, 0], sizes = [4, 7, 128], strides = [1, 1, 1]} : vector<7x7x128xbf16> to vector<4x7x128xbf16>
    %14 = vector.extract_strided_slice %13 {offsets = [0, 1, 0], sizes = [4, 4, 128], strides = [1, 1, 1]} : vector<4x7x128xbf16> to vector<4x4x128xbf16>
    %15 = vector.extract_strided_slice %13 {offsets = [0, 2, 0], sizes = [4, 4, 128], strides = [1, 1, 1]} : vector<4x7x128xbf16> to vector<4x4x128xbf16>
    %16 = vector.extract_strided_slice %13 {offsets = [0, 3, 0], sizes = [4, 4, 128], strides = [1, 1, 1]} : vector<4x7x128xbf16> to vector<4x4x128xbf16>
    %17 = tpu.concatenate %14, %15, %16 in 2 : vector<4x4x128xbf16>, vector<4x4x128xbf16>, vector<4x4x128xbf16> -> vector<4x4x384xbf16>
    %18 = vector.shape_cast %17 : vector<4x4x384xbf16> to vector<16x384xbf16>
    %c1 = arith.constant 1 : index
    %c0_7 = arith.constant 0 : index
    %c0_8 = arith.constant 0 : index
    %19 = vector.load %arg2[%c1, %c0_7, %c0_8] : memref<3x384x256xbf16, #tpu.memory_space<vmem>>, vector<1x384x256xbf16>
    %20 = vector.shape_cast %19 : vector<1x384x256xbf16> to vector<384x256xbf16>
    %cst_9 = arith.constant dense<0.000000e+00> : vector<16x256xf32>
    %21 = tpu.matmul %18, %20, %cst_9 {dimension_numbers = #tpu.dot_dimension_numbers<[1], [0], [0], [1], [0, 0, 1, 1], [], []>} : vector<16x384xbf16>, vector<384x256xbf16>, vector<16x256xf32> -> vector<16x256xf32>
    %22 = arith.addf %12, %21 : vector<16x256xf32>
    %23 = vector.extract_strided_slice %1 {offsets = [3, 0, 0], sizes = [4, 7, 128], strides = [1, 1, 1]} : vector<7x7x128xbf16> to vector<4x7x128xbf16>
    %24 = vector.extract_strided_slice %23 {offsets = [0, 1, 0], sizes = [4, 4, 128], strides = [1, 1, 1]} : vector<4x7x128xbf16> to vector<4x4x128xbf16>
    %25 = vector.extract_strided_slice %23 {offsets = [0, 2, 0], sizes = [4, 4, 128], strides = [1, 1, 1]} : vector<4x7x128xbf16> to vector<4x4x128xbf16>
    %26 = vector.extract_strided_slice %23 {offsets = [0, 3, 0], sizes = [4, 4, 128], strides = [1, 1, 1]} : vector<4x7x128xbf16> to vector<4x4x128xbf16>
    %27 = tpu.concatenate %24, %25, %26 in 2 : vector<4x4x128xbf16>, vector<4x4x128xbf16>, vector<4x4x128xbf16> -> vector<4x4x384xbf16>
    %28 = vector.shape_cast %27 : vector<4x4x384xbf16> to vector<16x384xbf16>
    %c2 = arith.constant 2 : index
    %c0_10 = arith.constant 0 : index
    %c0_11 = arith.constant 0 : index
    %29 = vector.load %arg2[%c2, %c0_10, %c0_11] : memref<3x384x256xbf16, #tpu.memory_space<vmem>>, vector<1x384x256xbf16>
    %30 = vector.shape_cast %29 : vector<1x384x256xbf16> to vector<384x256xbf16>
    %cst_12 = arith.constant dense<0.000000e+00> : vector<16x256xf32>
    %31 = tpu.matmul %28, %30, %cst_12 {dimension_numbers = #tpu.dot_dimension_numbers<[1], [0], [0], [1], [0, 0, 1, 1], [], []>} : vector<16x384xbf16>, vector<384x256xbf16>, vector<16x256xf32> -> vector<16x256xf32>
    %32 = arith.addf %22, %31 : vector<16x256xf32>
    %c0_13 = arith.constant 0 : index
    %c0_14 = arith.constant 0 : index
    %33 = vector.load %arg3[%c0_13, %c0_14] : memref<1x256xf32, #tpu.memory_space<vmem>>, vector<1x256xf32>
    %34 = vector.broadcast %33 : vector<1x256xf32> to vector<16x256xf32>
    %35 = arith.mulf %32, %34 : vector<16x256xf32>
    %c0_15 = arith.constant 0 : index
    %c0_16 = arith.constant 0 : index
    %36 = vector.load %arg4[%c0_15, %c0_16] : memref<1x256xf32, #tpu.memory_space<vmem>>, vector<1x256xf32>
    %37 = vector.broadcast %36 : vector<1x256xf32> to vector<16x256xf32>
    %38 = arith.addf %35, %37 : vector<16x256xf32>
    %cst_17 = arith.constant 0.000000e+00 : f32
    %39 = vector.broadcast %cst_17 : f32 to vector<16x256xf32>
    %40 = arith.maximumf %38, %39 : vector<16x256xf32>
    %41 = vector.shape_cast %40 : vector<16x256xf32> to vector<4x4x256xf32>
    %42 = arith.truncf %41 : vector<4x4x256xf32> to vector<4x4x256xbf16>
    %c0_18 = arith.constant 0 : index
    %c0_19 = arith.constant 0 : index
    %c0_20 = arith.constant 0 : index
    %c0_21 = arith.constant 0 : index
    %43 = vector.load %arg5[%c0_18, %c0_19, %c0_20, %c0_21] : memref<1x4x4x256xbf16, #tpu.memory_space<vmem>>, vector<1x4x4x256xbf16>
    %44 = vector.shape_cast %43 : vector<1x4x4x256xbf16> to vector<4x4x256xbf16>
    %45 = vector.shape_cast %42 : vector<4x4x256xbf16> to vector<1x4x4x256xbf16>
    tpu.vector_store %arg5[%c0_18, %c0_19, %c0_20, %c0_21], %45 {strides = array<i32>} : memref<1x4x4x256xbf16, #tpu.memory_space<vmem>>, vector<1x4x4x256xbf16>,
    return
  }
  func.func @transform_0(%arg0: i32) -> (i32, i32, i32, i32) {
    %c0_i32 = arith.constant 0 : i32
    %c0_i32_0 = arith.constant 0 : i32
    %c0_i32_1 = arith.constant 0 : i32
    %c0_i32_2 = arith.constant 0 : i32
    return %arg0, %c0_i32, %c0_i32_0, %c0_i32_1 : i32, i32, i32, i32
  }
  func.func @transform_1(%arg0: i32) -> (i32, i32, i32) {
    %c0_i32 = arith.constant 0 : i32
    %c0_i32_0 = arith.constant 0 : i32
    %c0_i32_1 = arith.constant 0 : i32
    %c0_i32_2 = arith.constant 0 : i32
    return %c0_i32, %c0_i32_0, %c0_i32_1 : i32, i32, i32
  }
  func.func @transform_2(%arg0: i32) -> (i32, i32) {
    %c0_i32 = arith.constant 0 : i32
    %c0_i32_0 = arith.constant 0 : i32
    %c0_i32_1 = arith.constant 0 : i32
    return %c0_i32, %c0_i32_0 : i32, i32
  }
  func.func @transform_3(%arg0: i32) -> (i32, i32) {
    %c0_i32 = arith.constant 0 : i32
    %c0_i32_0 = arith.constant 0 : i32
    %c0_i32_1 = arith.constant 0 : i32
    return %c0_i32, %c0_i32_0 : i32, i32
  }
  func.func @transform_4(%arg0: i32) -> (i32, i32, i32, i32) {
    %c0_i32 = arith.constant 0 : i32
    %c0_i32_0 = arith.constant 0 : i32
    %c0_i32_1 = arith.constant 0 : i32
    %c0_i32_2 = arith.constant 0 : i32
    return %arg0, %c0_i32, %c0_i32_0, %c0_i32_1 : i32, i32, i32, i32
  }
}

module attributes {stable_mosaic.version = 11 : i64} {
  func.func @_linear_kernel(%arg0: i32, %arg1: memref<2x4096xbf16, #tpu.memory_space<vmem>>, %arg2: memref<2x4096xbf16, #tpu.memory_space<vmem>>, %arg3: memref<1x2xf32, #tpu.memory_space<vmem>>, %arg4: memref<2x2xf32, #tpu.memory_space<vmem>>, %arg5: memref<2x2xf32, #tpu.memory_space<vmem>>) attributes {dimension_semantics = [#tpu.dimension_semantics<arbitrary>], iteration_bounds = array<i64: 1>, scalar_prefetch = 0 : i64, scratch_operands = 1 : i64, tpu.core_type = #tpu.core_type<tc>, window_params = [{transform_indices = @transform_0, window_bounds = array<i64: 2, 4096>}, {transform_indices = @transform_1, window_bounds = array<i64: 2, 4096>}, {pipeline_mode = #tpu.pipeline_mode<synchronous>, transform_indices = @transform_2, window_bounds = array<i64: 1, 2>}, {pipeline_mode = #tpu.pipeline_mode<synchronous>, transform_indices = @transform_3, window_bounds = array<i64: 2, 2>}]} {
    %c0_i32 = arith.constant 0 : i32
    %0 = arith.cmpi eq, %arg0, %c0_i32 : i32
    %1 = arith.extui %0 : i1 to i32
    %c0_i32_0 = arith.constant 0 : i32
    %2 = arith.cmpi ne, %1, %c0_i32_0 : i32
    scf.if %2 {
      %cst_10 = arith.constant 0.000000e+00 : f32
      %12 = vector.broadcast %cst_10 : f32 to vector<2x2xf32>
      %c0_11 = arith.constant 0 : index
      %c0_12 = arith.constant 0 : index
      %13 = vector.load %arg5[%c0_11, %c0_12] : memref<2x2xf32, #tpu.memory_space<vmem>>, vector<2x2xf32>
      tpu.vector_store %arg5[%c0_11, %c0_12], %12 {strides = array<i32>} : memref<2x2xf32, #tpu.memory_space<vmem>>, vector<2x2xf32>,
    } else {
    }
    %c0 = arith.constant 0 : index
    %c0_1 = arith.constant 0 : index
    %3 = vector.load %arg5[%c0, %c0_1] : memref<2x2xf32, #tpu.memory_space<vmem>>, vector<2x2xf32>
    %c0_2 = arith.constant 0 : index
    %c0_3 = arith.constant 0 : index
    %4 = vector.load %arg1[%c0_2, %c0_3] : memref<2x4096xbf16, #tpu.memory_space<vmem>>, vector<2x4096xbf16>
    %c0_4 = arith.constant 0 : index
    %c0_5 = arith.constant 0 : index
    %5 = vector.load %arg2[%c0_4, %c0_5] : memref<2x4096xbf16, #tpu.memory_space<vmem>>, vector<2x4096xbf16>
    %cst = arith.constant dense<0.000000e+00> : vector<2x2xf32>
    %6 = tpu.matmul %4, %5, %cst {dimension_numbers = #tpu.dot_dimension_numbers<[1], [1], [0], [0], [0, 0, 1, 0], [], []>} : vector<2x4096xbf16>, vector<2x4096xbf16>, vector<2x2xf32> -> vector<2x2xf32>
    %7 = arith.addf %3, %6 : vector<2x2xf32>
    %c0_6 = arith.constant 0 : index
    %c0_7 = arith.constant 0 : index
    %8 = vector.load %arg5[%c0_6, %c0_7] : memref<2x2xf32, #tpu.memory_space<vmem>>, vector<2x2xf32>
    tpu.vector_store %arg5[%c0_6, %c0_7], %7 {strides = array<i32>} : memref<2x2xf32, #tpu.memory_space<vmem>>, vector<2x2xf32>,
    %c0_i32_8 = arith.constant 0 : i32
    %9 = arith.cmpi eq, %arg0, %c0_i32_8 : i32
    %10 = arith.extui %9 : i1 to i32
    %c0_i32_9 = arith.constant 0 : i32
    %11 = arith.cmpi ne, %10, %c0_i32_9 : i32
    scf.if %11 {
      %c0_10 = arith.constant 0 : index
      %c0_11 = arith.constant 0 : index
      %12 = vector.load %arg5[%c0_10, %c0_11] : memref<2x2xf32, #tpu.memory_space<vmem>>, vector<2x2xf32>
      %c0_12 = arith.constant 0 : index
      %c0_13 = arith.constant 0 : index
      %13 = vector.load %arg3[%c0_12, %c0_13] : memref<1x2xf32, #tpu.memory_space<vmem>>, vector<1x2xf32>
      %14 = vector.broadcast %13 : vector<1x2xf32> to vector<2x2xf32>
      %15 = arith.addf %12, %14 : vector<2x2xf32>
      %c0_14 = arith.constant 0 : index
      %c0_15 = arith.constant 0 : index
      %16 = vector.load %arg4[%c0_14, %c0_15] : memref<2x2xf32, #tpu.memory_space<vmem>>, vector<2x2xf32>
      tpu.vector_store %arg4[%c0_14, %c0_15], %15 {strides = array<i32>} : memref<2x2xf32, #tpu.memory_space<vmem>>, vector<2x2xf32>,
    } else {
    }
    return
  }
  func.func @transform_0(%arg0: i32) -> (i32, i32) {
    %c0_i32 = arith.constant 0 : i32
    %c0_i32_0 = arith.constant 0 : i32
    return %c0_i32, %arg0 : i32, i32
  }
  func.func @transform_1(%arg0: i32) -> (i32, i32) {
    %c0_i32 = arith.constant 0 : i32
    %c0_i32_0 = arith.constant 0 : i32
    return %c0_i32, %arg0 : i32, i32
  }
  func.func @transform_2(%arg0: i32) -> (i32, i32) {
    %c0_i32 = arith.constant 0 : i32
    %c0_i32_0 = arith.constant 0 : i32
    %c0_i32_1 = arith.constant 0 : i32
    return %c0_i32, %c0_i32_0 : i32, i32
  }
  func.func @transform_3(%arg0: i32) -> (i32, i32) {
    %c0_i32 = arith.constant 0 : i32
    %c0_i32_0 = arith.constant 0 : i32
    %c0_i32_1 = arith.constant 0 : i32
    return %c0_i32, %c0_i32_0 : i32, i32
  }
}

</mosaic_0001>

<bundles_post_ra>
// kernel: szcvi_forward.8
= control target key start
LH: loop header
LB: loop body
LE: loop exit
PB: predicated region body
PF: predicated region fallthrough
CT: control target
= control target key end

     0   :  { %s2387_s15 = smov 0   ;;  %s3011_s0 = inlined_call_operand.vmem [shape: bf16[2,11,11,64], index: 0, kind: input, shape index: {}]   ;;  %s3012_s1 = inlined_call_operand.vmem [shape: bf16[3,192,128], index: 1, kind: input, shape index: {}]   ;;  %s3013_s2 = inlined_call_operand.vmem [shape: f32[1,128], index: 2, kind: input, shape index: {}]   ;;  %s3014_s3 = inlined_call_operand.vmem [shape: f32[1,128], index: 3, kind: input, shape index: {}]   ;;  %s3015_s4 = inlined_call_operand.vmem [shape: bf16[2,11,11,128], index: 4, kind: output, shape index: {}]  }
   0x1 LB: > { %s1819_s16 = sadd.s32 4294967295, %s2359_s15   ;;  %p1823_p0 = scmp.ge.s32.totalorder %s2359_s15, 1  ;;  %s2359_s15 = sphi %s2387_s15, %s14_s15  }
   0x2   : > { %p162_p1 = scmp.lt.s32.totalorder %s2359_s15, 3 }
   0x4   : > { %p163_p2 = pnand %p1823_p0, %p162_p1 }
   0x5   : > { %v2317_v0 = vld [vmem:[%s3012_s1 + $0x20] sm:$0xff] (!%p163_p2)   ;;  %p188_p3 = scmp.lt.s32.totalorder (!%p163_p2), %s1819_s16, 1  ;;  %v2319_v2 = vld [vmem:[%s3012_s1 + $0x28] sm:$0xff] (!%p163_p2)   ;;  %v2321_v4 = vld [vmem:[%s3012_s1 + $0x30] sm:$0xff] (!%p163_p2)   ;;  %vm358_vm0 = vcmask (!%p163_p2), 1042432   ;;  %vm359_vm1 = vcmask (!%p163_p2), 1046532  }
   0x6   : > { %166 = sbr.rel (%p163_p2) target bundleno = 343 (0x157), region = 36  ;;  %v2318_v1 = vld [vmem:[%s3012_s1 + $0x80] sm:$0xff] (!%p163_p2)   ;;  %2091 = vmatprep.subr.bf16.mxu1 (!%p163_p2), %v2317_v0  ;;  %v2320_v3 = vld [vmem:[%s3012_s1 + $0x88] sm:$0xff] (!%p163_p2)   ;;  %v2322_v5 = vld [vmem:[%s3012_s1 + $0x90] sm:$0xff] (!%p163_p2)   ;;  %vm437_vm3 = vcmask (!%p163_p2), 523264   ;;  %vm1645_vm10 = vcmask (!%p163_p2), 1041408  }
   0x7   : > { %2155 = vmatprep.subr.bf16.mxu0 (!%p163_p2), %v2318_v1  ;;  %2092 = vmatpush3.bf16.msra.mxu1 (!%p163_p2), %v2317_v0  ;;  %v2323_v6 = vld [vmem:[%s3012_s1 + $0x38] sm:$0xff] (!%p163_p2)   ;;  %vm2442_vm2 = vmor (!%p163_p2), %vm358_vm0, %vm359_vm1  ;;  %v2459_v26 = vld [vmem:[%s3012_s1] sm:$0xff] (!%p163_p2)   ;;  %vm219_vm4 = vsmask.f32 (!%p163_p2), 3328  ;;  %vm220_vm5 = vsmask.f32 (!%p163_p2), 7440 }
   0x8   : > { %2156 = vmatpush3.bf16.msra.mxu0 (!%p163_p2), %v2318_v1  ;;  %2093 = vmatprep.subr.bf16.mxu1 (!%p163_p2), %v2319_v2  ;;  %v2324_v10 = vld [vmem:[%s3012_s1 + $0x98] sm:$0xff] (!%p163_p2)   ;;  %v2488_v38 = vld [vmem:[%s3012_s1 + $0xa0] sm:$0xff] (!%p163_p2)   ;;  %vm2514_vm6 = vmor (!%p163_p2), %vm219_vm4, %vm220_vm5  ;;  %vm628_vm7 = vsmask.f32 (!%p163_p2), 2304  ;;  %vm629_vm8 = vsmask.f32 (!%p163_p2), 6416 }
   0x9   : > { %2157 = vmatprep.subr.bf16.mxu0 (!%p163_p2), %v2320_v3  ;;  %vm2660_vm9 = vmor (!%p163_p2), %vm628_vm7, %vm629_vm8  ;;  %v2348_v63 = vld [vmem:[%s3012_s1 + $0xf8] sm:$0xff] (!%p163_p2)   ;;  %vm1646_vm11 = vsmask.f32 (!%p163_p2), 1280 }
   0xa   : > { %vm2929_vm12 = vmand (!%p163_p2), %vm1645_vm10, %vm1646_vm11 }
   0xb   : > { %2094 = vmatpush3.bf16.msra.mxu1 (!%p163_p2), %v2319_v2 }
   0xc   : > { %2158 = vmatpush3.bf16.msra.mxu0 (!%p163_p2), %v2320_v3  ;;  %2095 = vmatprep.subr.bf16.mxu1 (!%p163_p2), %v2321_v4 }
   0xd   : > { %s3025_s16 = smov (!%p188_p3, %s1819_s16), 1  ;;  %2159 = vmatprep.subr.bf16.mxu0 %v2322_v5 }
   0xe   : > { %s2307_s27 = smul.u32 88, %s3025_s16 }
   0xf   : > { %2096 = vmatpush3.bf16.msra.mxu1 %v2321_v4 }
  0x10   : > { %s2421_s6 = scalar_lea.vmem %s3011_s0, %s2307_s27  ;;  %2160 = vmatpush3.bf16.msra.mxu0 %v2322_v5  ;;  %2097 = vmatprep.subr.bf16.mxu1 %v2323_v6  ;;  %s2925_s26 = scalar_lea.vmem %s3015_s4, %s2307_s27 }
  0x11   : > { %v2427_v7 = vld [vmem:[%s2421_s6 + $0x8] sm:$0xf]  ;;  %v2430_v8 = vld [vmem:[%s2421_s6 + $0xc] sm:$0x3]  ;;  %v201_v9 = vld [vmem:[%s2421_s6 + $0x10] sm:$0xf]  ;;  %2161 = vmatprep.subr.bf16.mxu0 %v2324_v10 }
  0x12   : > { %v2437_v11 = vld [vmem:[%s2421_s6 + $0x14] sm:$0x3]  ;;  %v223_v12 = vshrl.u32 %v2427_v7, 16  ;;  %v226_v13 = vshll.u32 %v2427_v7, 16  ;;  %v237_v14 = vshrl.u32 %v201_v9, 16  ;;  %v240_v16 = vshll.u32 %v201_v9, 16 }
  0x13   : > { %v1826_v17 = vrot.slane %v2427_v7, 9  ;;  %v363_v18 = vrot.slane %v2430_v8, 5  ;;  %v246_v19 = vshll.u32 %v2437_v11, 16  ;;  %v1827_v20 = vrot.slane %v201_v9, 9  ;;  %v203_v25 = vld [vmem:[%s2421_s6 + $0x18] sm:$0xf]  ;;  %2098 = vmatpush3.bf16.msra.mxu1 %v2323_v6 }
  0x14   : > { %v2449_v21 = vrot.slane %v223_v12, 4  ;;  %v232_v22 = vshll.u32 %v2430_v8, 16  ;;  %v367_v24 = vrot.slane %v2437_v11, 5  ;;  %v2463_v27 = vrot.slane %v226_v13, 5  ;;  %v204_v31 = vld [vmem:[%s2421_s6 + $0x1c] sm:$0x3]  ;;  %2162 = vmatpush3.bf16.msra.mxu0 %v2324_v10  ;;  %2107 = vmatprep.subr.bf16.mxu1 %v2459_v26 }
  0x15   : > { %v364_v23 = vsel %vm2442_vm2, %v1826_v17, %v363_v18  ;;  %v2465_v28 = vrot.slane %v237_v14, 4  ;;  %v2467_v29 = vrot.slane %v240_v16, 5  ;;  %v2469_v30 = vrot.slane %v223_v12, 5  ;;  %v205_v36 = vld [vmem:[%s2421_s6 + $0x20] sm:$0xf]  ;;  %2171 = vmatprep.subr.bf16.mxu0 %v2488_v38  ;;  %v2327_v10 = vld [vmem:[%s3012_s1 + $0x8] sm:$0xff]  }
  0x16   : > { %v2474_v32 = vsel %vm2442_vm2, %v1827_v20, %v367_v24  ;;  %v2476_v33 = vrot.slane %v237_v14, 5  ;;  %v2478_v34 = vrot.slane %v240_v16, 6  ;;  %v645_v35 = vshrl.u32 %v2437_v11, 16  ;;  %v2483_v37 = vld [vmem:[%s2421_s6 + $0x24] sm:$0x3] }
  0x17   : > { %v1834_v39 = vcombine.low %v364_v23, %v2474_v32  ;;  %v2493_v40 = vrot.slane %v246_v19, 6  ;;  %v2496_v41 = vld [vmem:[%s2421_s6 + $0x28] sm:$0xf]  ;;  %v251_v42 = vshrl.u32 %v203_v25, 16  ;;  %v2501_v44 = vld [vmem:[%s2421_s6 + $0x2c] sm:$0x3] }
  0x18   : > { %v2498_v43 = vrot.slane %v645_v35, 5  ;;  %v254_v45 = vshll.u32 %v203_v25, 16  ;;  %v260_v46 = vshll.u32 %v204_v31, 16  ;;  %v265_v48 = vshrl.u32 %v205_v36, 16  ;;  %v2550_v35 = vld [vmem:[%s2421_s6 + $0x34] sm:$0x3] }
  0x19   : > { %2099 = vmatprep.mubr.msk.bf16.mxu1 %vm437_vm3, %v1834_v39  ;;  %v253_v47 = vrot.slane %v251_v42, 4  ;;  %v268_v49 = vshll.u32 %v205_v36, 16  ;;  %v274_v50 = vshll.u32 %v2483_v37, 16  ;;  %v279_v53 = vshrl.u32 %v2496_v41, 16 }
  0x1a   : > { %v256_v51 = vrot.slane %v254_v45, 5  ;;  %v262_v52 = vrot.slane %v260_v46, 5  ;;  %v282_v54 = vshll.u32 %v2496_v41, 16  ;;  %v267_v55 = vrot.slane %v265_v48, 4 }
  0x1b   : > { %v270_v56 = vrot.slane %v268_v49, 5  ;;  %v2509_v57 = vrot.slane %v274_v50, 5  ;;  %v288_v58 = vshll.u32 %v2501_v44, 16  ;;  %v1828_v60 = vrot.slane %v203_v25, 9  ;;  %v2547_v25 = vld [vmem:[%s2421_s6 + $0x30] sm:$0xf] }
  0x1c   : > { %v257_v59 = vor.u32 %v256_v51, %v253_v47  ;;  %v371_v61 = vrot.slane %v204_v31, 5  ;;  %v1829_v62 = vrot.slane %v205_v36, 9  ;;  %v375_v1 = vrot.slane %v2483_v37, 5  ;;  %v2329_v51 = vld [vmem:[%s3012_s1 + $0x10] sm:$0xff]  }
  0x1d   : > { %v271_v0 = vor.u32 %v270_v56, %v267_v55  ;;  %v1830_v2 = vrot.slane %v2496_v41, 9  ;;  %v379_v3 = vrot.slane %v2501_v44, 5  ;;  %v2523_v6 = vrot.slane %v251_v42, 5  ;;  %v2335_v41 = vld [vmem:[%s3012_s1 + $0x48] sm:$0xff]  }
  0x1e   : > { %v258_v4 = vrot.slane %v257_v59, 4  ;;  %v372_v5 = vsel %vm2442_vm2, %v1828_v60, %v371_v61  ;;  %v2525_v9 = vrot.slane %v254_v45, 6  ;;  %v376_v14 = vsel %vm2442_vm2, %v1829_v62, %v375_v1  ;;  %v2560_v45 = vld [vmem:[%s2421_s6 + $0x38] sm:$0xf]  ;;  %v2592_v60 = vld [vmem:[%s2421_s6 + $0x40] sm:$0xf] }
  0x1f   : > { %v2530_v12 = vrot.slane %v271_v0, 4  ;;  %v380_v16 = vsel %vm2442_vm2, %v1830_v2, %v379_v3  ;;  %v655_v17 = vshrl.u32 %v204_v31, 16  ;;  %v2540_v20 = vcombine.low %v372_v5, %v376_v14  ;;  %v2595_v61 = vld [vmem:[%s2421_s6 + $0x44] sm:$0x3]  ;;  %v2606_v3 = vld [vmem:[%s2421_s6 + $0x48] sm:$0xf] }
  0x20   : > { %v2538_v18 = vsel %vm2514_vm6, %v258_v4, %v262_v52  ;;  %v2542_v23 = vrot.slane %v260_v46, 6  ;;  %v2544_v24 = vrot.slane %v265_v48, 5  ;;  %v2554_v39 = vrot.slane %v268_v49, 6 }
  0x21   : > { %v2552_v36 = vrot.slane %v655_v17, 5  ;;  %v665_v31 = vshrl.u32 %v2483_v37, 16  ;;  %v2557_v42 = vrot.slane %v274_v50, 6  ;;  %v2564_v46 = vrot.slane %v279_v53, 5  ;;  %2100 = vmatmul.mubr.msk.bf16.vlgmr.msra.gmra.mrb[0].mxu1 %vm437_vm3, %v2540_v20  ;;  %v2328_v37 = vld [vmem:[%s3012_s1 + $0xa8] sm:$0xff]  }
  0x22   : > { %v2568_v47 = vrot.slane %v282_v54, 6  ;;  %v675_v48 = vshrl.u32 %v2501_v44, 16  ;;  %v2573_v49 = vrot.slane %v288_v58, 6  ;;  %v2581_v50 = vld [vmem:[%s2421_s6 + $0x3c] sm:$0x3]  ;;  %v1899_v55 = vcombine.low %v2474_v32, %v372_v5  ;;  %2108 = vmatpush3.bf16.msra.mxu1 %v2459_v26 }
  0x23   : > { %v2586_v52 = vrot.slane %v665_v31, 5  ;;  %v1900_v56 = vcombine.low %v376_v14, %v380_v16  ;;  %v1831_v59 = vrot.slane %v2547_v25, 9  ;;  %2109 = vmatprep.subr.bf16.mxu1 %v2327_v10  ;;  %v383_v0 = vrot.slane %v2550_v35, 5  ;;  %v2618_v31 = vld [vmem:[%s2421_s6 + $0x4c] sm:$0x3] }
  0x24   : > { %v2597_v62 = vrot.slane %v675_v48, 5  ;;  %v1832_v1 = vrot.slane %v2560_v45, 9  ;;  %v387_v2 = vrot.slane %v2581_v50, 5  ;;  %2163 = vmatprep.mubr.msk.bf16.mxu0 %vm437_vm3, %v1899_v55  ;;  %v1833_v26 = vrot.slane %v2592_v60, 9  ;;  %v2330_v55 = vld [vmem:[%s3012_s1 + $0xb0] sm:$0xff]  }
  0x25   : > { %v391_v32 = vrot.slane %v2595_v61, 5  ;;  %v229_v4 = vor.u32 %v2463_v27, %v2449_v21  ;;  %v243_v5 = vor.u32 %v2467_v29, %v2465_v28  ;;  %2164 = vmatmul.mubr.msk.bf16.vlgmr.msra.gmra.mrb[0].mxu0 %vm437_vm3, %v1900_v56  ;;  %v384_v14 = vsel %vm2442_vm2, %v1831_v59, %v383_v0  ;;  %v2331_v59 = vld [vmem:[%s3012_s1 + $0x18] sm:$0xff]  }
  0x26   : > { %v388_v17 = vsel %vm2442_vm2, %v1832_v1, %v387_v2  ;;  %v1890_v48 = vrot.slane %v2606_v3, 9  ;;  %v643_v21 = vor.u32 %v2478_v34, %v2476_v33  ;;  %2172 = vmatpush3.bf16.msra.mxu0 %v2488_v38  ;;  %2110 = vmatpush3.bf16.msra.mxu1 %v2327_v10  ;;  %v2627_v27 = vcombine.low %v380_v16, %v384_v14 }
  0x27   : > { %v1901_v28 = vcombine.low %v384_v14, %v388_v17  ;;  %v392_v29 = vsel %vm2442_vm2, %v1833_v26, %v391_v32  ;;  %v981_v56 = vrot.slane %v2618_v31, 5  ;;  %2173 = vmatprep.subr.bf16.mxu0 %v2328_v37  ;;  %2111 = vmatprep.subr.bf16.mxu1 %v2329_v51  ;;  %v649_v33 = vor.u32 %v2493_v40, %v2498_v43  ;;  %v2332_v43 = vld [vmem:[%s3012_s1 + $0xb8] sm:$0xff]  }
  0x28   : > { %v2635_v0 = vcombine.low %v388_v17, %v392_v29  ;;  %v653_v34 = vor.u32 %v2525_v9, %v2523_v6  ;;  %2103 = vmatprep.mubr.msk.bf16.mxu1 %vm437_vm3, %v2627_v27  ;;  %v230_v10 = vrot.slane %v229_v4, 4  ;;  %v234_v16 = vrot.slane %v232_v22, 5 }
  0x29   : > { %2167 = vmatprep.mubr.msk.bf16.mxu0 %vm437_vm3, %v1901_v28  ;;  %v2646_v38 = vsel %vm2442_vm2, %v1890_v48, %v981_v56  ;;  %v244_v1 = vrot.slane %v243_v5, 4  ;;  %v248_v6 = vrot.slane %v246_v19, 5  ;;  %v644_v26 = vrot.slane %v643_v21, 4 }
  0x2a   : > { %2104 = vmatmul.mubr.msk.bf16.gmra.mrb[4].mxu1 %vm437_vm3, %v2635_v0  ;;  %v1902_v40 = vcombine.low %v392_v29, %v2646_v38  ;;  %2174 = vmatpush3.bf16.msra.mxu0 %v2328_v37  ;;  %v235_v9 = vsel %vm2514_vm6, %v230_v10, %v234_v16  ;;  %v654_v32 = vrot.slane %v653_v34, 4  ;;  %v659_v4 = vor.u32 %v2542_v23, %v2552_v36 }
  0x2b   : > { %2112 = vmatpush3.bf16.msra.mxu1 %v2329_v51  ;;  %2175 = vmatprep.subr.bf16.mxu0 %v2330_v55  ;;  %v2668_v11 = vsel %vm2514_vm6, %v244_v1, %v248_v6  ;;  %v663_v19 = vor.u32 %v2554_v39, %v2544_v24  ;;  %v669_v37 = vor.u32 %v2557_v42, %v2586_v52  ;;  %v2333_v24 = vld [vmem:[%s3012_s1 + $0x40] sm:$0xff]   ;;  %v281_v17 = vrot.slane %v279_v53, 4 }
  0x2c   : > { %2113 = vmatprep.subr.bf16.mxu1 %v2331_v59  ;;  %v1846_v51 = vcombine.low %v235_v9, %v2668_v11  ;;  %v2677_v5 = vsel %vm2660_vm9, %v644_v26, %v649_v33  ;;  %v2681_v23 = vsel %vm2660_vm9, %v654_v32, %v659_v4  ;;  %v673_v36 = vor.u32 %v2568_v47, %v2564_v46 }
  0x2d   : > { %2168 = vmatmul.mubr.msk.bf16.gmra.mrb[4].mxu0 %vm437_vm3, %v1902_v40  ;;  %v664_v39 = vrot.slane %v663_v19, 4  ;;  %v679_v42 = vor.u32 %v2573_v49, %v2597_v62  ;;  %v1919_v52 = vcombine.low %v2677_v5, %v2681_v23  ;;  %v2697_v14 = vsel %vm2514_vm6, %v2530_v12, %v2509_v57  ;;  %v2334_v12 = vld [vmem:[%s3012_s1 + $0xc0] sm:$0xff]   ;;  %v2337_v40 = vld [vmem:[%s3012_s1 + $0x50] sm:$0xff]  }
  0x2e   : > { %2176 = vmatpush3.bf16.msra.mxu0 %v2330_v55  ;;  %v674_v46 = vrot.slane %v673_v36, 4  ;;  %v2701_v47 = vcombine.low %v2538_v18, %v2697_v14  ;;  %v284_v49 = vrot.slane %v282_v54, 5  ;;  %v2709_v62 = vrot.slane %v226_v13, 6  ;;  %2115 = vmatprep.mubr.msk.bf16.mxu1 %vm437_vm3, %v1846_v51 }
  0x2f   : > { %2114 = vmatpush3.bf16.msra.mxu1 %v2331_v59  ;;  %2177 = vmatprep.subr.bf16.mxu0 %v2332_v43  ;;  %v2714_v57 = vsel %vm2660_vm9, %v664_v39, %v669_v37  ;;  %v293_v53 = vshrl.u32 %v2547_v25, 16  ;;  %v296_v7 = vshll.u32 %v2547_v25, 16  ;;  %v290_v48 = vrot.slane %v288_v58, 5  ;;  %v2336_v25 = vld [vmem:[%s3012_s1 + $0xc8] sm:$0xff]  }
  0x30   : > { %v2726_v13 = vsel %vm2660_vm9, %v674_v46, %v679_v42  ;;  %2179 = vmatprep.mubr.msk.bf16.mxu0 %vm437_vm3, %v1919_v52  ;;  %2123 = vmatprep.subr.bf16.mxu1 %v2333_v24  ;;  %v285_v54 = vor.u32 %v284_v49, %v281_v17  ;;  %v302_v55 = vshll.u32 %v2550_v35, 16  ;;  %v307_v56 = vshrl.u32 %v2560_v45, 16 }
  0x31   : > { %v1920_v21 = vcombine.low %v2714_v57, %v2726_v13  ;;  %v295_v28 = vrot.slane %v293_v53, 4  ;;  %v298_v29 = vrot.slane %v296_v7, 5  ;;  %v310_v59 = vshll.u32 %v2560_v45, 16 }
  0x32   : > { %2116 = vmatmul.mubr.msk.bf16.vlgmr.msra.gmra.mrb[0].mxu1 %vm437_vm3, %v2701_v47  ;;  %2178 = vmatpush3.bf16.msra.mxu0 %v2332_v43  ;;  %v286_v44 = vrot.slane %v285_v54, 4  ;;  %v304_v58 = vrot.slane %v302_v55, 5  ;;  %v316_v33 = vshll.u32 %v2581_v50, 16  ;;  %v681_v10 = vrot.slane %v293_v53, 5 }
  0x33   : > { %2124 = vmatpush3.bf16.msra.mxu1 %v2333_v24  ;;  %2187 = vmatprep.subr.bf16.mxu0 %v2334_v12  ;;  %v299_v34 = vor.u32 %v298_v29, %v295_v28  ;;  %v682_v16 = vrot.slane %v296_v7, 6  ;;  %v685_v1 = vshrl.u32 %v2550_v35, 16  ;;  %v635_v43 = vshrl.u32 %v2430_v8, 16  ;;  %v2338_v24 = vld [vmem:[%s3012_s1 + $0xd0] sm:$0xff]  }
  0x34   : > { %2125 = vmatprep.subr.bf16.mxu1 %v2335_v41  ;;  %v688_v6 = vrot.slane %v302_v55, 6  ;;  %v691_v9 = vrot.slane %v307_v56, 5  ;;  %v692_v26 = vrot.slane %v310_v59, 6  ;;  %v2750_v45 = vsel %vm2514_vm6, %v286_v44, %v290_v48 }
  0x35   : > { %2180 = vmatmul.mubr.msk.bf16.vlgmr.msra.gmra.mrb[0].mxu0 %vm437_vm3, %v1920_v21  ;;  %v300_v32 = vrot.slane %v299_v34, 4  ;;  %v683_v4 = vor.u32 %v682_v16, %v681_v10  ;;  %v687_v19 = vrot.slane %v685_v1, 5  ;;  %v695_v37 = vshrl.u32 %v2581_v50, 16  ;;  %v2341_v10 = vld [vmem:[%s3012_s1 + $0x60] sm:$0xff]  }
  0x36   : > { %2188 = vmatpush3.bf16.msra.mxu0 %v2334_v12  ;;  %v693_v35 = vor.u32 %v692_v26, %v691_v9  ;;  %v698_v51 = vrot.slane %v316_v33, 6  ;;  %v309_v36 = vrot.slane %v307_v56, 4  ;;  %v312_v46 = vrot.slane %v310_v59, 5  ;;  %v2340_v56 = vld [vmem:[%s3012_s1 + $0xd8] sm:$0xff]   ;;  %v2793_v9 = vld [vmem:[%s2421_s6 + $0x50] sm:$0xf] }
  0x37   : > { %2126 = vmatpush3.bf16.msra.mxu1 %v2335_v41  ;;  %2189 = vmatprep.subr.bf16.mxu0 %v2336_v25  ;;  %v2758_v39 = vsel %vm2514_vm6, %v300_v32, %v304_v58  ;;  %v684_v42 = vrot.slane %v683_v4, 4  ;;  %v689_v52 = vor.u32 %v688_v6, %v687_v19  ;;  %v697_v49 = vrot.slane %v695_v37, 5  ;;  %v2339_v41 = vld [vmem:[%s3012_s1 + $0x58] sm:$0xff]  }
  0x38   : > { %2127 = vmatprep.subr.bf16.mxu1 %v2337_v40  ;;  %v2762_v17 = vcombine.low %v2750_v45, %v2758_v39  ;;  %v694_v50 = vrot.slane %v693_v35, 4  ;;  %v318_v12 = vrot.slane %v316_v33, 5  ;;  %v313_v7 = vor.u32 %v312_v46, %v309_v36 }
  0x39   : > { %v2769_v53 = vsel %vm2660_vm9, %v684_v42, %v689_v52  ;;  %v321_v54 = vshrl.u32 %v2592_v60, 16  ;;  %v324_v48 = vshll.u32 %v2592_v60, 16  ;;  %v699_v55 = vor.u32 %v698_v51, %v697_v49  ;;  %v2342_v51 = vld [vmem:[%s3012_s1 + $0xe0] sm:$0xff]  }
  0x3a   : > { %2190 = vmatpush3.bf16.msra.mxu0 %v2336_v25  ;;  %2119 = vmatprep.mubr.msk.bf16.mxu1 %vm437_vm3, %v2762_v17  ;;  %v330_v21 = vshll.u32 %v2595_v61, 16  ;;  %v705_v28 = vshrl.u32 %v2595_v61, 16  ;;  %v841_v29 = vshrl.u32 %v2606_v3, 16  ;;  %v314_v44 = vrot.slane %v313_v7, 4 }
  0x3b   : > { %v323_v58 = vrot.slane %v321_v54, 4  ;;  %v326_v59 = vrot.slane %v324_v48, 5  ;;  %v701_v60 = vrot.slane %v321_v54, 5  ;;  %2191 = vmatprep.subr.bf16.mxu0 %v2338_v24  ;;  %2128 = vmatpush3.bf16.msra.mxu1 %v2337_v40  ;;  %v638_v25 = vrot.slane %v232_v22, 6 }
  0x3c   : > { %v2785_v33 = vsel %vm2660_vm9, %v694_v50, %v699_v55  ;;  %v702_v61 = vrot.slane %v324_v48, 6  ;;  %v707_v34 = vrot.slane %v705_v28, 5  ;;  %2129 = vmatprep.subr.bf16.mxu1 %v2339_v41  ;;  %v332_v6 = vrot.slane %v330_v21, 5 }
  0x3d   : > { %v1921_v16 = vcombine.low %v2769_v53, %v2785_v33  ;;  %v327_v1 = vor.u32 %v326_v59, %v323_v58  ;;  %v708_v40 = vrot.slane %v330_v21, 6  ;;  %v844_v22 = vshll.u32 %v2606_v3, 16 }
  0x3e   : > { %v703_v8 = vor.u32 %v702_v61, %v701_v60  ;;  %v850_v26 = vshll.u32 %v2618_v31, 16  ;;  %v1105_v32 = vrot.slane %v841_v29, 5  ;;  %2192 = vmatpush3.bf16.msra.mxu0 %v2338_v24  ;;  %v637_v4 = vrot.slane %v635_v43, 5 }
  0x3f   : > { %2183 = vmatprep.mubr.msk.bf16.mxu0 %vm437_vm3, %v1921_v16  ;;  %v2800_v19 = vsel %vm2514_vm6, %v314_v44, %v318_v12  ;;  %v328_v35 = vrot.slane %v327_v1, 4  ;;  %v1109_v37 = vshrl.u32 %v2618_v31, 16  ;;  %2193 = vmatprep.subr.bf16.mxu0 %v2340_v56  ;;  %v709_v36 = vor.u32 %v708_v40, %v707_v34  ;;  %v2824_v44 = vld [vmem:[%s2421_s6 + $0x54] sm:$0x3] }
  0x40   : > { %v704_v3 = vrot.slane %v703_v8, 4  ;;  %v1106_v42 = vrot.slane %v844_v22, 6  ;;  %v1112_v52 = vrot.slane %v850_v26, 6  ;;  %2130 = vmatpush3.bf16.msra.mxu1 %v2339_v41  ;;  %v1238_v49 = vshrl.u32 %v2793_v9, 16  ;;  %v2345_v1 = vld [vmem:[%s3012_s1 + $0x70] sm:$0xff]  }
  0x41   : > { %v2808_v43 = vsel %vm2514_vm6, %v328_v35, %v332_v6  ;;  %v1111_v24 = vrot.slane %v1109_v37, 5  ;;  %2139 = vmatprep.subr.bf16.mxu1 %v2341_v10  ;;  %v633_v12 = vor.u32 %v2709_v62, %v2469_v30  ;;  %v1241_v54 = vshll.u32 %v2793_v9, 16  ;;  %v2350_v37 = vld [vmem:[%s3012_s1 + $0x108] sm:$0xff]  }
  0x42   : > { %v1849_v46 = vcombine.low %v2800_v19, %v2808_v43  ;;  %v1107_v31 = vor.u32 %v1106_v42, %v1105_v32  ;;  %2194 = vmatpush3.bf16.msra.mxu0 %v2340_v56  ;;  %v710_v41 = vsel %vm2660_vm9, %v704_v3, %v709_v36  ;;  %v639_v48 = vor.u32 %v638_v25, %v637_v4 }
  0x43   : > { %v1113_v50 = vor.u32 %v1112_v52, %v1111_v24  ;;  %2203 = vmatprep.subr.bf16.mxu0 %v2342_v51  ;;  %v634_v55 = vrot.slane %v633_v12, 4  ;;  %v843_v28 = vrot.slane %v841_v29, 4  ;;  %v846_v56 = vrot.slane %v844_v22, 5  ;;  %v2352_v52 = vld [vmem:[%s3012_s1 + $0x118] sm:$0xff]   ;;  %v1652_v24 = vld [vmem:[%s2925_s26 + $0xc] sm:$0x3] }
  0x44   : > { %2120 = vmatmul.mubr.msk.bf16.gmra.mrb[4].mxu1 %vm437_vm3, %v1849_v46  ;;  %v1108_v7 = vrot.slane %v1107_v31, 4  ;;  %v1240_v58 = vrot.slane %v1238_v49, 4  ;;  %v2831_v59 = vcombine.low %v2681_v23, %v2714_v57  ;;  %v1243_v25 = vrot.slane %v1241_v54, 5  ;;  %v2343_v23 = vld [vmem:[%s3012_s1 + $0x68] sm:$0xff]   ;;  %v1688_v12 = vld [vmem:[%s2925_s26 + $0x54] sm:$0x3] }
  0x45   : > { %v640_v62 = vsel %vm2660_vm9, %v634_v55, %v639_v48  ;;  %v2837_v29 = vcombine.low %v2726_v13, %v2769_v53  ;;  %v1247_v61 = vshll.u32 %v2824_v44, 16  ;;  %v847_v57 = vor.u32 %v846_v56, %v843_v28  ;;  %v1656_v48 = vld [vmem:[%s2925_s26 + $0x14] sm:$0x3]  ;;  %v1668_v56 = vld [vmem:[%s2925_s26 + $0x2c] sm:$0x3] }
  0x46   : > { %v2821_v21 = vsel %vm2660_vm9, %v1108_v7, %v1113_v50  ;;  %v1858_v60 = vcombine.low %v640_v62, %v2677_v5  ;;  %v1244_v5 = vor.u32 %v1243_v25, %v1240_v58  ;;  %v852_v53 = vrot.slane %v850_v26, 5  ;;  %v1680_v7 = vld [vmem:[%s2925_s26 + $0x44] sm:$0x3]  ;;  %v1672_v55 = vld [vmem:[%s2925_s26 + $0x34] sm:$0x3] }
  0x47   : > { %v1922_v30 = vcombine.low %v710_v41, %v2821_v21  ;;  %v848_v13 = vrot.slane %v847_v57, 4  ;;  %v1249_v16 = vrot.slane %v1247_v61, 5  ;;  %v1861_v6 = vcombine.low %v2785_v33, %v710_v41  ;;  %v2347_v33 = vld [vmem:[%s3012_s1 + $0x78] sm:$0xff]  }
  0x48   : > { %2131 = vmatprep.mubr.msk.bf16.mxu1 %vm437_vm3, %v1858_v60  ;;  %v1245_v34 = vrot.slane %v1244_v5, 4  ;;  %v1879_v22 = vcombine.low %v2697_v14, %v2750_v45  ;;  %v1478_v26 = vrot.slane %v1238_v49, 5  ;;  %v1479_v32 = vrot.slane %v1241_v54, 6  ;;  %v1660_v58 = vld [vmem:[%s2925_s26 + $0x1c] sm:$0x3] }
  0x49   : > { %2184 = vmatmul.mubr.msk.bf16.gmra.mrb[4].mxu0 %vm437_vm3, %v1922_v30  ;;  %v853_v40 = vsel %vm2514_vm6, %v848_v13, %v852_v53  ;;  %v1482_v4 = vshrl.u32 %v2824_v44, 16  ;;  %v1880_v35 = vcombine.low %v2758_v39, %v2800_v19  ;;  %v1948_v39 = vrot.slane %v2793_v9, 9  ;;  %v2351_v19 = vld [vmem:[%s3012_s1 + $0x110] sm:$0xff]  }
  0x4a   : > { %2195 = vmatprep.mubr.msk.bf16.mxu0 %vm437_vm3, %v2701_v47  ;;  %v2344_v47 = vld [vmem:[%s3012_s1 + $0xe8] sm:$0xff]   ;;  %v1250_v8 = vsel %vm2514_vm6, %v1245_v34, %v1249_v16  ;;  %v1480_v14 = vor.u32 %v1479_v32, %v1478_v26  ;;  %v1881_v3 = vcombine.low %v2808_v43, %v853_v40  ;;  %v1653_v50 = vsel %vm2929_vm12, 0, %v1652_v24 }
  0x4b   : > { %v1484_v45 = vrot.slane %v1482_v4, 5  ;;  %1654 = vst [vmem:[%s2925_s26 + $0xc] sm:$0x3] %v1653_v50  ;;  %v1689_v41 = vsel %vm2929_vm12, 0, %v1688_v12  ;;  %v1681_v54 = vsel %vm2929_vm12, 0, %v1680_v7  ;;  %v1673_v28 = vsel %vm2929_vm12, 0, %v1672_v55 }
  0x4c   : > { %2132 = vmatmul.mubr.msk.bf16.vlgmr.msra.gmra.mrb[0].mxu1 %vm437_vm3, %v2831_v59  ;;  %v1481_v36 = vrot.slane %v1480_v14, 4  ;;  %1690 = vst [vmem:[%s2925_s26 + $0x54] sm:$0x3] %v1689_v41  ;;  %1682 = vst [vmem:[%s2925_s26 + $0x44] sm:$0x3] %v1681_v54  ;;  %v1669_v30 = vsel %vm2929_vm12, 0, %v1668_v56 }
  0x4d   : > { %2140 = vmatpush3.bf16.msra.mxu1 %v2341_v10  ;;  %2135 = vmatprep.mubr.msk.bf16.mxu1 %vm437_vm3, %v2837_v29  ;;  %v1878_v10 = vcombine.low %v2668_v11, %v2538_v18  ;;  %v1939_v18 = vcombine.low %v853_v40, %v1250_v8  ;;  %v2349_v11 = vld [vmem:[%s3012_s1 + $0x100] sm:$0xff]   ;;  %1674 = vst [vmem:[%s2925_s26 + $0x34] sm:$0x3] %v1673_v28  ;;  %1670 = vst [vmem:[%s2925_s26 + $0x2c] sm:$0x3] %v1669_v30  ;;  %v1661_v60 = vsel %vm2929_vm12, 0, %v1660_v58 }
  0x4e   : > { %2141 = vmatprep.subr.bf16.mxu1 %v2343_v23  ;;  %1662 = vst [vmem:[%s2925_s26 + $0x1c] sm:$0x3] %v1661_v60 }
  0x51   : > { %2196 = vmatmul.mubr.msk.bf16.vlgmr.msra.gmra.mrb[0].mxu0 %vm437_vm3, %v2762_v17  ;;  %2142 = vmatpush3.bf16.msra.mxu1 %v2343_v23  ;;  %v2346_v17 = vld [vmem:[%s3012_s1 + $0xf0] sm:$0xff]  }
  0x52   : > { %2204 = vmatpush3.bf16.msra.mxu0 %v2342_v51  ;;  %2199 = vmatprep.mubr.msk.bf16.mxu0 %vm437_vm3, %v1849_v46  ;;  %v1485_v51 = vrot.slane %v1247_v61, 6  ;;  %v1664_v46 = vld [vmem:[%s2925_s26 + $0x24] sm:$0x3] }
  0x53   : > { %2205 = vmatprep.subr.bf16.mxu0 %v2344_v47  ;;  %2143 = vmatprep.subr.bf16.mxu1 %v2345_v1  ;;  %v1665_v49 = vsel %vm2929_vm12, 0, %v1664_v46 }
  0x54   : > { %2136 = vmatmul.mubr.msk.bf16.gmra.mrb[4].mxu1 %vm437_vm3, %v1861_v6  ;;  %v1486_v42 = vor.u32 %v1485_v51, %v1484_v45  ;;  %1666 = vst [vmem:[%s2925_s26 + $0x24] sm:$0x3] %v1665_v49 }
  0x55   : > { %2144 = vmatpush3.bf16.msra.mxu1 %v2345_v1  ;;  %2147 = vmatprep.mubr.msk.bf16.mxu1 %vm437_vm3, %v1878_v10 }
  0x56   : > { %2206 = vmatpush3.bf16.msra.mxu0 %v2344_v47  ;;  %2145 = vmatprep.subr.bf16.mxu1 %v2347_v33  ;;  %v1487_v43 = vsel %vm2660_vm9, %v1481_v36, %v1486_v42 }
  0x57   : > { %2207 = vmatprep.subr.bf16.mxu0 %v2346_v17  ;;  %v1974_v15 = vcombine.low %v2821_v21, %v1487_v43  ;;  %v1657_v21 = vsel %vm2929_vm12, 0, %v1656_v48 }
  0x58   : > { %1658 = vst [vmem:[%s2925_s26 + $0x14] sm:$0x3] %v1657_v21 }
  0x59   : > { %2200 = vmatmul.mubr.msk.bf16.gmra.mrb[4].mxu0 %vm437_vm3, %v1939_v18  ;;  %2146 = vmatpush3.bf16.msra.mxu1 %v2347_v33  ;;  %v1983_v33 = vld [vmem:[%s3013_s2] ss:$0 sm:$0xff] }
  0x5a   : > { %2208 = vmatpush3.bf16.msra.mxu0 %v2346_v17  ;;  %2211 = vmatprep.mubr.msk.bf16.mxu0 %vm437_vm3, %v2540_v20  ;;  %v1366_v20 = vrot.slane %v2824_v44, 5  ;;  %v1684_v44 = vld [vmem:[%s2925_s26 + $0x4c] sm:$0x3] }
  0x5b   : > { %2209 = vmatprep.subr.bf16.mxu0 %v2348_v63  ;;  %2235 = vmatprep.subr.bf16.mxu1 %v2349_v11  ;;  %v1685_v62 = vsel %vm2929_vm12, 0, %v1684_v44 }
  0x5c   : > { %2148 = vmatmul.mubr.msk.bf16.vlgmr.msra.gmra.mrb[0].mxu1 %vm437_vm3, %v1879_v22  ;;  %v1367_v9 = vsel %vm2442_vm2, %v1948_v39, %v1366_v20  ;;  %1686 = vst [vmem:[%s2925_s26 + $0x4c] sm:$0x3] %v1685_v62  ;;  %v1984_v22 = vld [vmem:[%s3014_s3] ss:$0 sm:$0xff] }
  0x5d   : > { %2239 = vmatpush3.bf16.msra.mxu1 %v2349_v11  ;;  %2151 = vmatprep.mubr.msk.bf16.mxu1 %vm437_vm3, %v1880_v35 }
  0x5e   : > { %2210 = vmatpush3.bf16.msra.mxu0 %v2348_v63  ;;  %2236 = vmatprep.subr.bf16.mxu1 %v2350_v37 }
  0x5f   : > { %2219 = vmatprep.subr.bf16.mxu0 %v2349_v11 }
  0x61   : > { %2212 = vmatmul.mubr.msk.bf16.vlgmr.msra.gmra.mrb[0].mxu0 %vm437_vm3, %v2627_v27  ;;  %2240 = vmatpush3.bf16.msra.mxu1 %v2350_v37  ;;  %v1957_v27 = vcombine.low %v2646_v38, %v1367_v9  ;;  %v2361_v38 = vmov 0  }
  0x62   : > { %2220 = vmatpush3.bf16.msra.mxu0 %v2349_v11  ;;  %2215 = vmatprep.mubr.msk.bf16.mxu0 %vm437_vm3, %v2635_v0  ;;  %v1648_v0 = vld [vmem:[%s2925_s26 + $0x4] sm:$0x3]  ;;  %1644 = vst [vmem:[%s2925_s26] sm:$0xf] %v2361_v38  ;;  %1651 = vst [vmem:[%s2925_s26 + $0x8] sm:$0xf] %v2361_v38 }
  0x63   : > { %2221 = vmatprep.subr.bf16.mxu0 %v2350_v37  ;;  %2237 = vmatprep.subr.bf16.mxu1 %v2351_v19  ;;  %1663 = vst [vmem:[%s2925_s26 + $0x20] sm:$0xf] %v2361_v38  ;;  %1687 = vst [vmem:[%s2925_s26 + $0x50] sm:$0xf] %v2361_v38  ;;  %v1649_v31 = vsel %vm2929_vm12, 0, %v1648_v0 }
  0x64   : > { %2152 = vmatmul.mubr.msk.bf16.gmra.mrb[4].mxu1 %vm437_vm3, %v1881_v3  ;;  %1655 = vst [vmem:[%s2925_s26 + $0x10] sm:$0xf] %v2361_v38  ;;  %1659 = vst [vmem:[%s2925_s26 + $0x18] sm:$0xf] %v2361_v38 }
  0x65   : > { %2241 = vmatpush3.bf16.msra.mxu1 %v2351_v19  ;;  %2231 = vmatprep.mubr.msk.bf16.mxu1 %vm437_vm3, %v1861_v6  ;;  %1667 = vst [vmem:[%s2925_s26 + $0x28] sm:$0xf] %v2361_v38  ;;  %1671 = vst [vmem:[%s2925_s26 + $0x30] sm:$0xf] %v2361_v38 }
  0x66   : > { %2222 = vmatpush3.bf16.msra.mxu0 %v2350_v37  ;;  %2238 = vmatprep.subr.bf16.mxu1 %v2352_v52  ;;  %1675 = vst [vmem:[%s2925_s26 + $0x38] sm:$0xf] %v2361_v38  ;;  %1679 = vst [vmem:[%s2925_s26 + $0x40] sm:$0xf] %v2361_v38 }
  0x67   : > { %2223 = vmatprep.subr.bf16.mxu0 %v2351_v19  ;;  %1683 = vst [vmem:[%s2925_s26 + $0x48] sm:$0xf] %v2361_v38  ;;  %1650 = vst [vmem:[%s2925_s26 + $0x4] sm:$0x3] %v1649_v31 }
  0x69   : > { %2216 = vmatmul.mubr.msk.bf16.gmra.mrb[4].mxu0 %vm437_vm3, %v1957_v27  ;;  %2242 = vmatpush3.bf16.msra.mxu1 %v2352_v52 }
  0x6a   : > { %2224 = vmatpush3.bf16.msra.mxu0 %v2351_v19  ;;  %2227 = vmatprep.mubr.msk.bf16.mxu0 %vm437_vm3, %v2831_v59  ;;  %v1676_v59 = vld [vmem:[%s2925_s26 + $0x3c] sm:$0x3] }
  0x6b   : > { %2225 = vmatprep.subr.bf16.mxu0 %v2352_v52  ;;  %v1677_v25 = vsel %vm2929_vm12, 0, %v1676_v59 }
  0x6c   : > { %2232 = vmatmul.mubr.msk.bf16.vlgmr.msra.gmra.mrb[8].mxu1 %vm437_vm3, %v1974_v15  ;;  %1678 = vst [vmem:[%s2925_s26 + $0x3c] sm:$0x3] %v1677_v25 }
  0x6e   : > { %2226 = vmatpush3.bf16.msra.mxu0 %v2352_v52 }
  0x71   : > { %2228 = vmatmul.mubr.msk.bf16.vlgmr.msra.gmra.mrb[0].mxu0 %vm437_vm3, %v2837_v29 }
 0x12f   : > { %v2149_v29 = vpop.f32.mrb[0].mxu1 }
 0x130   : > { %v938_v61 = vpop.f32.mrb[1].mxu1 }
 0x131   : > { %v2150_v23 = vpop.f32.mrb[2].mxu1 }
 0x132   : > { %v941_v57 = vpop.f32.mrb[3].mxu1 }
 0x137   : > { %v2153_v5 = vpop.f32.mrb[4].mxu1 }
 0x138   : > { %v954_v13 = vpop.f32.mrb[5].mxu1 }
 0x139   : > { %v2154_v53 = vpop.f32.mrb[6].mxu1 }
 0x13a   : > { %v957_v34 = vpop.f32.mrb[7].mxu1 }
 0x13c   : > { %v2217_v16 = vpop.f32.mrb[4].mxu0 }
 0x13d   : > { %v2247_v47 = vadd.f32 %v2217_v16, %v2153_v5  ;;  %v1455_v1 = vpop.f32.mrb[5].mxu0 }
 0x13e   : > { %v2249_v6 = vadd.f32 %v1455_v1, %v954_v13  ;;  %v2218_v10 = vpop.f32.mrb[6].mxu0 }
 0x13f   : > { %v2251_v40 = vadd.f32 %v2218_v10, %v2154_v53  ;;  %v1458_v8 = vpop.f32.mrb[7].mxu0  ;;  %v2233_v17 = vpop.f32.mrb[8].mxu1 }
 0x140   : > { %v2253_v18 = vadd.f32 %v1458_v8, %v957_v34  ;;  %v2248_v63 = vadd.f32 %v2247_v47, %v2233_v17  ;;  %v1575_v11 = vpop.f32.mrb[9].mxu1 }
 0x141   : > { %v2250_v26 = vadd.f32 %v2249_v6, %v1575_v11  ;;  %v2234_v32 = vpop.f32.mrb[10].mxu1 }
 0x142   : > { %v1611_v4 = vmul.f32 %v2248_v63, %v1983_v33  ;;  %v2252_v35 = vadd.f32 %v2251_v40, %v2234_v32  ;;  %v1578_v37 = vpop.f32.mrb[11].mxu1 }
 0x143   : > { %v1609_v14 = vmul.f32 %v2250_v26, %v1983_v33  ;;  %v2254_v45 = vadd.f32 %v2253_v18, %v1578_v37 }
 0x144   : > { %v2229_v51 = vpop.f32.mrb[0].mxu0  ;;  %v1626_v39 = vadd.f32 %v1984_v22, %v1611_v4  ;;  %v1612_v20 = vmul.f32 %v2252_v35, %v1983_v33 }
 0x145   : > { %v2243_v19 = vadd.f32 %v2229_v51, %v2149_v29  ;;  %v1559_v3 = vpop.f32.mrb[1].mxu0  ;;  %v1624_v36 = vadd.f32 %v1984_v22, %v1609_v14  ;;  %v1610_v42 = vmul.f32 %v2254_v45, %v1983_v33 }
 0x146   : > { %v1634_v9 = vmax.f32 %v1626_v39, 0.0  ;;  %v2244_v52 = vadd.f32 %v1559_v3, %v938_v61  ;;  %v2230_v43 = vpop.f32.mrb[2].mxu0  ;;  %v1627_v27 = vadd.f32 %v1984_v22, %v1612_v20 }
 0x147   : > { %v1607_v15 = vmul.f32 %v2243_v19, %v1983_v33  ;;  %v1632_v0 = vmax.f32 %v1624_v36, 0.0  ;;  %v2245_v38 = vadd.f32 %v2230_v43, %v2150_v23  ;;  %v1562_v2 = vpop.f32.mrb[3].mxu0  ;;  %v1625_v24 = vadd.f32 %v1984_v22, %v1610_v42 }
 0x148   : > { %v2017_v46 = vpack.c.bf16 %v1634_v9, %v1634_v9  ;;  %v1605_v31 = vmul.f32 %v2244_v52, %v1983_v33  ;;  %v1635_v50 = vmax.f32 %v1627_v27, 0.0  ;;  %v2246_v49 = vadd.f32 %v1562_v2, %v941_v57 }
 0x149   : > { %v1622_v12 = vadd.f32 %v1984_v22, %v1607_v15  ;;  %v2015_v41 = vpack.c.bf16 %v1632_v0, %v1632_v0  ;;  %v1608_v7 = vmul.f32 %v2245_v38, %v1983_v33  ;;  %v1633_v54 = vmax.f32 %v1625_v24, 0.0 }
 0x14a   : > { %v1727_v48 = vrot.slane %v2017_v46, 7  ;;  %v1620_v55 = vadd.f32 %v1984_v22, %v1605_v31  ;;  %v2018_v21 = vpack.c.bf16 %v1635_v50, %v1635_v50  ;;  %v1606_v28 = vmul.f32 %v2246_v49, %v1983_v33 }
 0x14b   : > { %v1630_v56 = vmax.f32 %v1622_v12, 0.0  ;;  %v1723_v44 = vrot.slane %v2015_v41, 7  ;;  %v1623_v30 = vadd.f32 %v1984_v22, %v1608_v7  ;;  %v2016_v62 = vpack.c.bf16 %v1633_v54, %v1633_v54 }
 0x14c   : > { %v1728_v58 = vrot.slane %v1727_v48, 4  ;;  %2005 = vst [vmem:[%s2925_s26 + $0x40] sm:$0xe] %v1727_v48  ;;  %v1628_v59 = vmax.f32 %v1620_v55, 0.0  ;;  %v1729_v60 = vrot.slane %v2018_v21, 7  ;;  %v1621_v25 = vadd.f32 %v1984_v22, %v1606_v28 }
 0x14d   : > { %v2013_v29 = vpack.c.bf16 %v1630_v56, %v1630_v56  ;;  %v1724_v61 = vrot.slane %v1723_v44, 4  ;;  %2001 = vst [vmem:[%s2925_s26 + $0x30] sm:$0xe] %v1723_v44  ;;  %v1631_v23 = vmax.f32 %v1623_v30, 0.0  ;;  %v1725_v57 = vrot.slane %v2016_v62, 7 }
 0x14e   : > { %2006 = vst [vmem:[%s2925_s26 + $0x44] sm:$0x1] %v1728_v58  ;;  %v2011_v5 = vpack.c.bf16 %v1628_v59, %v1628_v59  ;;  %v1730_v13 = vrot.slane %v1729_v60, 4  ;;  %2007 = vst [vmem:[%s2925_s26 + $0x48] sm:$0xe] %v1729_v60  ;;  %v1629_v53 = vmax.f32 %v1621_v25, 0.0 }
 0x14f   : > { %v1719_v34 = vrot.slane %v2013_v29, 7  ;;  %2002 = vst [vmem:[%s2925_s26 + $0x34] sm:$0x1] %v1724_v61  ;;  %v2014_v16 = vpack.c.bf16 %v1631_v23, %v1631_v23  ;;  %v1726_v47 = vrot.slane %v1725_v57, 4  ;;  %2003 = vst [vmem:[%s2925_s26 + $0x38] sm:$0xe] %v1725_v57 }
 0x150   : > { %v1715_v1 = vrot.slane %v2011_v5, 7  ;;  %2008 = vst [vmem:[%s2925_s26 + $0x4c] sm:$0x1] %v1730_v13  ;;  %v2012_v6 = vpack.c.bf16 %v1629_v53, %v1629_v53 }
 0x151   : > { %v1720_v10 = vrot.slane %v1719_v34, 4  ;;  %1997 = vst [vmem:[%s2925_s26 + $0x20] sm:$0xe] %v1719_v34  ;;  %v1721_v40 = vrot.slane %v2014_v16, 7  ;;  %2004 = vst [vmem:[%s2925_s26 + $0x3c] sm:$0x1] %v1726_v47 }
 0x152   : > { %v1716_v8 = vrot.slane %v1715_v1, 4  ;;  %1993 = vst [vmem:[%s2925_s26 + $0x10] sm:$0xe] %v1715_v1  ;;  %v1717_v33 = vrot.slane %v2012_v6, 7 }
 0x153   : > { %1998 = vst [vmem:[%s2925_s26 + $0x24] sm:$0x1] %v1720_v10  ;;  %v1722_v17 = vrot.slane %v1721_v40, 4  ;;  %1999 = vst [vmem:[%s2925_s26 + $0x28] sm:$0xe] %v1721_v40 }
 0x154   : > { %1994 = vst [vmem:[%s2925_s26 + $0x14] sm:$0x1] %v1716_v8  ;;  %v1718_v18 = vrot.slane %v1717_v33, 4  ;;  %1995 = vst [vmem:[%s2925_s26 + $0x18] sm:$0xe] %v1717_v33 }
 0x155   : > { %2000 = vst [vmem:[%s2925_s26 + $0x2c] sm:$0x1] %v1722_v17 }
 0x156   : > { %1996 = vst [vmem:[%s2925_s26 + $0x1c] sm:$0x1] %v1718_v18 }
 0x157 PF: > { %s14_s15 = sadd.s32 1, %s2359_s15  }
 0x158   : > { %p11_p4 = scmp.ge.s32.totalorder %s14_s15, 4  }
 0x15a   :  { %13 = sbr.rel (!%p11_p4) target bundleno = 1 (0x1), region = 69 }

// kernel: szcvi_forward.9
= control target key start
LH: loop header
LB: loop body
LE: loop exit
PB: predicated region body
PF: predicated region fallthrough
CT: control target
= control target key end

     0   :  { %s3110_s15 = smov 0   ;;  %s3829_s0 = inlined_call_operand.vmem [shape: bf16[2,11,11,128], index: 0, kind: input, shape index: {}]   ;;  %s3830_s1 = inlined_call_operand.vmem [shape: bf16[3,384,128], index: 1, kind: input, shape index: {}]   ;;  %s3831_s2 = inlined_call_operand.vmem [shape: f32[1,128], index: 2, kind: input, shape index: {}]   ;;  %s3832_s3 = inlined_call_operand.vmem [shape: f32[1,128], index: 3, kind: input, shape index: {}]   ;;  %s3833_s4 = inlined_call_operand.vmem [shape: bf16[2,7,7,128], index: 4, kind: output, shape index: {}]  }
   0x1 LB: > { %s2413_s16 = sadd.s32 4294967295, %s3082_s15   ;;  %p2417_p0 = scmp.ge.s32.totalorder %s3082_s15, 1  ;;  %s3082_s15 = sphi %s3110_s15, %s14_s15  }
   0x2   : > { %p162_p1 = scmp.lt.s32.totalorder %s3082_s15, 3 }
   0x4   : > { %p163_p2 = pnand %p2417_p0, %p162_p1 }
   0x5   : > { %v2994_v0 = vld [vmem:[%s3830_s1 + $0x100] sm:$0xff] (!%p163_p2)   ;;  %v2997_v3 = vld [vmem:[%s3830_s1 + $0x108] sm:$0xff] (!%p163_p2)   ;;  %v3000_v6 = vld [vmem:[%s3830_s1 + $0x110] sm:$0xff] (!%p163_p2)   ;;  %p188_p3 = scmp.lt.s32.totalorder (!%p163_p2), %s2413_s16, 1  ;;  %vm2430_vm0 = vcmask (!%p163_p2), 1043456  ;;  %vm1986_vm5 = vcmask (!%p163_p2), 1041408  }
   0x6   : > { %166 = sbr.rel (%p163_p2) target bundleno = 460 (0x1cc), region = 36  ;;  %v2995_v1 = vld [vmem:[%s3830_s1 + $0x140] sm:$0xff] (!%p163_p2)   ;;  %2715 = vmatprep.subr.bf16.mxu0 (!%p163_p2), %v2994_v0  ;;  %v2998_v4 = vld [vmem:[%s3830_s1 + $0x148] sm:$0xff] (!%p163_p2)   ;;  %v3001_v7 = vld [vmem:[%s3830_s1 + $0x150] sm:$0xff] (!%p163_p2)   ;;  %vm387_vm1 = vsmask.f32 (!%p163_p2), 3328 }
   0x7   : > { %v2996_v2 = vld [vmem:[%s3830_s1 + $0xc0] sm:$0xff] (!%p163_p2)   ;;  %2871 = vmatprep.subr.bf16.mxu1 (!%p163_p2), %v2995_v1  ;;  %v2999_v5 = vld [vmem:[%s3830_s1 + $0xc8] sm:$0xff] (!%p163_p2)   ;;  %v3002_v8 = vld [vmem:[%s3830_s1 + $0xd0] sm:$0xff] (!%p163_p2)   ;;  %vm388_vm2 = vsmask.f32 (!%p163_p2), 7440  ;;  %vm2330_vm6 = vcmask (!%p163_p2), 1043459  }
   0x8   : > { %2716 = vmatpush3.bf16.msra.mxu0 (!%p163_p2), %v2996_v2  ;;  %2872 = vmatpush3.bf16.msra.mxu1 (!%p163_p2), %v2995_v1  ;;  %v3003_v9 = vld [vmem:[%s3830_s1 + $0x118] sm:$0xff] (!%p163_p2)   ;;  %v3006_v12 = vld [vmem:[%s3830_s1 + $0x120] sm:$0xff] (!%p163_p2)   ;;  %v3009_v15 = vld [vmem:[%s3830_s1 + $0x128] sm:$0xff] (!%p163_p2)   ;;  %vm2332_vm7 = vcmask (!%p163_p2), 1044484   ;;  %vm2334_vm8 = vcmask (!%p163_p2), 1045509  }
   0x9   : > { %2717 = vmatprep.subr.bf16.mxu0 (!%p163_p2), %v2997_v3  ;;  %2873 = vmatprep.subr.bf16.mxu1 (!%p163_p2), %v2998_v4  ;;  %v3004_v10 = vld [vmem:[%s3830_s1 + $0x158] sm:$0xff] (!%p163_p2)   ;;  %v3007_v13 = vld [vmem:[%s3830_s1 + $0x160] sm:$0xff] (!%p163_p2)   ;;  %v3010_v16 = vld [vmem:[%s3830_s1 + $0x168] sm:$0xff] (!%p163_p2)  }
   0xa   : > { %v3005_v11 = vld [vmem:[%s3830_s1 + $0xd8] sm:$0xff] (!%p163_p2)   ;;  %v3008_v14 = vld [vmem:[%s3830_s1 + $0xe0] sm:$0xff] (!%p163_p2)   ;;  %v3011_v17 = vld [vmem:[%s3830_s1 + $0xe8] sm:$0xff] (!%p163_p2)  }
   0xb   : > { %v3012_v18 = vld [vmem:[%s3830_s1 + $0x130] sm:$0xff] (!%p163_p2)   ;;  %v3015_v24 = vld [vmem:[%s3830_s1 + $0x138] sm:$0xff] (!%p163_p2)   ;;  %v3022_v43 = vld [vmem:[%s3830_s1 + $0x40] sm:$0xff] (!%p163_p2)  }
   0xc   : > { %2718 = vmatpush3.bf16.msra.mxu0 (!%p163_p2), %v2999_v5  ;;  %2874 = vmatpush3.bf16.msra.mxu1 (!%p163_p2), %v2998_v4  ;;  %v3013_v19 = vld [vmem:[%s3830_s1 + $0x170] sm:$0xff] (!%p163_p2)   ;;  %v3016_v25 = vld [vmem:[%s3830_s1 + $0x178] sm:$0xff] (!%p163_p2)   ;;  %v3231_v47 = vld [vmem:[%s3830_s1 + $0x80] sm:$0xff] (!%p163_p2)  }
   0xd   : > { %2719 = vmatprep.subr.bf16.mxu0 %v3000_v6  ;;  %2875 = vmatprep.subr.bf16.mxu1 %v3001_v7  ;;  %s3839_s16 = smov (!%p188_p3, %s2413_s16), 1  ;;  %v3014_v20 = vld [vmem:[%s3830_s1 + $0xf0] sm:$0xff]   ;;  %v3017_v36 = vld [vmem:[%s3830_s1 + $0xf8] sm:$0xff]   ;;  %vm3244_vm3 = vmor %vm387_vm1, %vm388_vm2 }
   0xe   : > { %s2983_s27 = smul.u32 88, %s3839_s16  ;;  %vm3645_vm4 = vmand %vm2430_vm0, %vm387_vm1 }
   0xf   : > { %s2984_s23 = smul.u32 28, %s3839_s16 }
  0x10   : > { %2720 = vmatpush3.bf16.msra.mxu0 %v3002_v8  ;;  %2876 = vmatpush3.bf16.msra.mxu1 %v3001_v7  ;;  %s3188_s10 = scalar_lea.vmem %s3829_s0, %s2983_s27 }
  0x11   : > { %2721 = vmatprep.subr.bf16.mxu0 %v3003_v9  ;;  %2877 = vmatprep.subr.bf16.mxu1 %v3004_v10  ;;  %v201_v21 = vld [vmem:[%s3188_s10 + $0x10] sm:$0xf]  ;;  %v202_v22 = vld [vmem:[%s3188_s10 + $0x14] sm:$0x3]  ;;  %v203_v23 = vld [vmem:[%s3188_s10 + $0x18] sm:$0xf]  ;;  %s3641_s26 = scalar_lea.vmem %s3833_s4, %s2984_s23 }
  0x12   : > { %v204_v26 = vld [vmem:[%s3188_s10 + $0x1c] sm:$0x3]  ;;  %v2421_v27 = vcombine.low %v201_v21, %v202_v22  ;;  %v3204_v29 = vld [vmem:[%s3188_s10 + $0x8] sm:$0xf]  ;;  %v3207_v30 = vld [vmem:[%s3188_s10 + $0xc] sm:$0x3] }
  0x13   : > { %v2422_v28 = vcombine.low %v203_v23, %v204_v26  ;;  %v3210_v33 = vld [vmem:[%s3188_s10 + $0x20] sm:$0xf]  ;;  %v3213_v34 = vld [vmem:[%s3188_s10 + $0x24] sm:$0x3]  ;;  %v3217_v35 = vcombine.low %v3204_v29, %v3207_v30 }
  0x14   : > { %2722 = vmatpush3.bf16.msra.mxu0 %v3005_v11  ;;  %2878 = vmatpush3.bf16.msra.mxu1 %v3004_v10  ;;  %v267_v31 = vshrl.u32 %v2421_v27, 16  ;;  %v269_v32 = vshll.u32 %v2421_v27, 16  ;;  %v2423_v39 = vcombine.low %v3210_v33, %v3213_v34  ;;  %v316_v42 = vrot.slane %v2421_v27, 1 }
  0x15   : > { %2723 = vmatprep.subr.bf16.mxu0 %v3006_v12  ;;  %2879 = vmatprep.subr.bf16.mxu1 %v3007_v13  ;;  %v274_v37 = vshrl.u32 %v2422_v28, 16  ;;  %v276_v38 = vshll.u32 %v2422_v28, 16  ;;  %v315_v41 = vrot.slane %v3217_v35, 1  ;;  %v317_v46 = vrot.slane %v2422_v28, 1 }
  0x16   : > { %v271_v40 = vrot.slane %v269_v32, 1  ;;  %v283_v45 = vshll.u32 %v2423_v39, 16  ;;  %v281_v49 = vshrl.u32 %v2423_v39, 16  ;;  %v3233_v50 = vrot.slane %v2423_v39, 1 }
  0x17   : > { %v278_v44 = vrot.slane %v276_v38, 1  ;;  %v2429_v53 = vcombine.low %v315_v41, %v315_v41  ;;  %v2432_v54 = vcombine.high %v315_v41, %v315_v41  ;;  %v2434_v57 = vcombine.low %v316_v42, %v316_v42  ;;  %v3258_v38 = vld [vmem:[%s3188_s10 + $0x2c] sm:$0x3] }
  0x18   : > { %2724 = vmatpush3.bf16.msra.mxu0 %v3008_v14  ;;  %2880 = vmatpush3.bf16.msra.mxu1 %v3007_v13  ;;  %v272_v48 = vor.u32 %v271_v40, %v267_v31  ;;  %v285_v52 = vrot.slane %v283_v45, 1  ;;  %v2437_v58 = vcombine.high %v316_v42, %v316_v42  ;;  %v2439_v62 = vcombine.low %v317_v46, %v317_v46 }
  0x19   : > { %2725 = vmatprep.subr.bf16.mxu0 %v3009_v15  ;;  %2881 = vmatprep.subr.bf16.mxu1 %v3010_v16  ;;  %v279_v51 = vor.u32 %v278_v44, %v274_v37  ;;  %v2442_v2 = vcombine.high %v317_v46, %v317_v46  ;;  %v2444_v6 = vcombine.low %v3233_v50, %v3233_v50  ;;  %v405_v10 = vshrl.u32 %v2429_v53, 16  ;;  %v3255_v37 = vld [vmem:[%s3188_s10 + $0x28] sm:$0xf] }
  0x1a   : > { %v2433_v55 = vcombine.low %v201_v21, %v272_v48  ;;  %v2436_v56 = vsel %vm2430_vm0, %v202_v22, %v272_v48  ;;  %v286_v5 = vor.u32 %v285_v52, %v281_v49  ;;  %v2447_v9 = vcombine.high %v3233_v50, %v3233_v50  ;;  %v3025_v48 = vld [vmem:[%s3830_s1] sm:$0xff]  }
  0x1b   : > { %v2438_v59 = vcombine.low %v203_v23, %v279_v51  ;;  %v2441_v60 = vsel %vm2430_vm0, %v204_v26, %v279_v51  ;;  %v428_v61 = vshll.u32 %v2436_v56, 16  ;;  %v408_v14 = vshll.u32 %v2429_v53, 16  ;;  %v3026_v56 = vld [vmem:[%s3830_s1 + $0x48] sm:$0xff]  }
  0x1c   : > { %2726 = vmatpush3.bf16.msra.mxu0 %v3011_v17  ;;  %2882 = vmatpush3.bf16.msra.mxu1 %v3010_v16  ;;  %v419_v63 = vshrl.u32 %v2433_v55, 16  ;;  %v422_v0 = vshll.u32 %v2433_v55, 16  ;;  %v456_v1 = vshll.u32 %v2441_v60, 16  ;;  %v433_v17 = vshrl.u32 %v2434_v57, 16 }
  0x1d   : > { %2727 = vmatprep.subr.bf16.mxu0 %v3012_v18  ;;  %2883 = vmatprep.subr.bf16.mxu1 %v3013_v19  ;;  %v447_v3 = vshrl.u32 %v2438_v59, 16  ;;  %v450_v4 = vshll.u32 %v2438_v59, 16  ;;  %v430_v11 = vrot.slane %v428_v61, 5  ;;  %v436_v18 = vshll.u32 %v2434_v57, 16  ;;  %v3028_v61 = vld [vmem:[%s3830_s1 + $0x8] sm:$0xff]  }
  0x1e   : > { %v421_v7 = vrot.slane %v419_v63, 4  ;;  %v424_v8 = vrot.slane %v422_v0, 5  ;;  %v458_v16 = vrot.slane %v456_v1, 5  ;;  %v3248_v21 = vrot.slane %v405_v10, 4  ;;  %v3303_v10 = vld [vmem:[%s3188_s10 + $0x38] sm:$0xf] }
  0x1f   : > { %v449_v12 = vrot.slane %v447_v3, 4  ;;  %v452_v13 = vrot.slane %v450_v4, 5  ;;  %v3250_v22 = vshll.u32 %v2432_v54, 16  ;;  %v442_v23 = vshll.u32 %v2437_v58, 16  ;;  %v3029_v3 = vld [vmem:[%s3830_s1 + $0x50] sm:$0xff]  }
  0x20   : > { %2728 = vmatpush3.bf16.msra.mxu0 %v3014_v20  ;;  %2884 = vmatpush3.bf16.msra.mxu1 %v3013_v19  ;;  %v425_v15 = vor.u32 %v424_v8, %v421_v7  ;;  %v438_v26 = vrot.slane %v436_v18, 5  ;;  %v461_v27 = vshrl.u32 %v2439_v62, 16  ;;  %v3252_v31 = vrot.slane %v408_v14, 5  ;;  %v3300_v4 = vld [vmem:[%s3188_s10 + $0x34] sm:$0x3] }
  0x21   : > { %2729 = vmatprep.subr.bf16.mxu0 %v3015_v24  ;;  %2885 = vmatprep.subr.bf16.mxu1 %v3016_v25  ;;  %v453_v20 = vor.u32 %v452_v13, %v449_v12  ;;  %v444_v32 = vrot.slane %v442_v23, 5  ;;  %v470_v42 = vshll.u32 %v2442_v2, 16  ;;  %v2443_v44 = vcombine.low %v3210_v33, %v286_v5  ;;  %v3031_v23 = vld [vmem:[%s3830_s1 + $0x10] sm:$0xff]  }
  0x22   : > { %v426_v24 = vrot.slane %v425_v15, 4  ;;  %v463_v41 = vrot.slane %v461_v27, 4  ;;  %v489_v46 = vshrl.u32 %v2444_v6, 16  ;;  %v416_v51 = vrot.slane %v3250_v22, 5 }
  0x23   : > { %v454_v28 = vrot.slane %v453_v20, 4  ;;  %v472_v54 = vrot.slane %v470_v42, 5  ;;  %v492_v33 = vshll.u32 %v2444_v6, 16  ;;  %v411_v57 = vor.u32 %v3252_v31, %v3248_v21  ;;  %v3032_v31 = vld [vmem:[%s3830_s1 + $0x58] sm:$0xff]  }
  0x24   : > { %2730 = vmatpush3.bf16.msra.mxu0 %v3017_v36  ;;  %2886 = vmatpush3.bf16.msra.mxu1 %v3016_v25  ;;  %v435_v25 = vrot.slane %v433_v17, 4  ;;  %v464_v36 = vshll.u32 %v2439_v62, 16  ;;  %v3262_v39 = vsel %vm3244_vm3, %v426_v24, %v430_v11  ;;  %v491_v55 = vrot.slane %v489_v46, 4  ;;  %v3292_v62 = vld [vmem:[%s3188_s10 + $0x30] sm:$0xf] }
  0x25   : > { %2767 = vmatprep.subr.bf16.mxu0 %v3022_v43  ;;  %2895 = vmatprep.subr.bf16.mxu1 %v3231_v47  ;;  %v3266_v43 = vsel %vm3244_vm3, %v454_v28, %v458_v16  ;;  %v498_v59 = vshll.u32 %v2447_v9, 16  ;;  %v2424_v60 = vcombine.low %v3255_v37, %v3258_v38  ;;  %v494_v0 = vrot.slane %v492_v33, 5  ;;  %v3306_v11 = vld [vmem:[%s3188_s10 + $0x3c] sm:$0x3] }
  0x26   : > { %v439_v40 = vor.u32 %v438_v26, %v435_v25  ;;  %v466_v45 = vrot.slane %v464_v36, 5  ;;  %v2523_v49 = vcombine.high %v3262_v39, %v3266_v43  ;;  %v2522_v50 = vcombine.low %v3262_v39, %v3266_v43 }
  0x27   : > { %v2446_v1 = vsel %vm2430_vm0, %v3213_v34, %v286_v5  ;;  %v475_v2 = vshrl.u32 %v2443_v44, 16  ;;  %v500_v6 = vrot.slane %v498_v59, 5  ;;  %v319_v7 = vrot.slane %v2424_v60, 1 }
  0x28   : > { %v440_v52 = vrot.slane %v439_v40, 4  ;;  %v467_v53 = vor.u32 %v466_v45, %v463_v41  ;;  %984 = vmatprep.mubr.bf16.mxu0 %v2523_v49  ;;  %v288_v8 = vshrl.u32 %v2424_v60, 16  ;;  %v290_v9 = vshll.u32 %v2424_v60, 16  ;;  %v3037_v60 = vld [vmem:[%s3830_s1 + $0x60] sm:$0xff]  }
  0x29   : > { %985 = vmatmul.mubr.bf16.vlgmr.msra.gmra.mrb[0].mxu0 %v2522_v50  ;;  %v495_v34 = vor.u32 %v494_v0, %v491_v55  ;;  %v477_v5 = vrot.slane %v475_v2, 4  ;;  %v478_v13 = vshll.u32 %v2443_v44, 16  ;;  %v2449_v15 = vcombine.low %v319_v7, %v319_v7  ;;  %v3034_v55 = vld [vmem:[%s3830_s1 + $0x18] sm:$0xff]   ;;  %v3347_v2 = vld [vmem:[%s3188_s10 + $0x44] sm:$0x3] }
  0x2a   : > { %v3284_v58 = vsel %vm3244_vm3, %v440_v52, %v444_v32  ;;  %v468_v63 = vrot.slane %v467_v53, 4  ;;  %2768 = vmatpush3.bf16.msra.mxu0 %v3025_v48  ;;  %v2452_v16 = vcombine.high %v319_v7, %v319_v7  ;;  %v292_v17 = vrot.slane %v290_v9, 1 }
  0x2b   : > { %2769 = vmatprep.subr.bf16.mxu0 %v3026_v56  ;;  %v496_v18 = vrot.slane %v495_v34, 4  ;;  %v480_v20 = vrot.slane %v478_v13, 5  ;;  %v484_v21 = vshll.u32 %v2446_v1, 16  ;;  %v2425_v24 = vcombine.low %v3292_v62, %v3300_v4  ;;  %v3355_v34 = vld [vmem:[%s3188_s10 + $0x48] sm:$0xf] }
  0x2c   : > { %v3310_v12 = vsel %vm3244_vm3, %v468_v63, %v472_v54  ;;  %v517_v25 = vshrl.u32 %v2449_v15, 16  ;;  %v520_v26 = vshll.u32 %v2449_v15, 16  ;;  %v526_v27 = vshll.u32 %v2452_v16, 16  ;;  %v3039_v15 = vld [vmem:[%s3830_s1 + $0x20] sm:$0xff]   ;;  %v3369_v16 = vld [vmem:[%s3188_s10 + $0x4c] sm:$0x3] }
  0x2d   : > { %v2524_v14 = vcombine.low %v3284_v58, %v3310_v12  ;;  %v293_v28 = vor.u32 %v292_v17, %v288_v8  ;;  %v3322_v32 = vrot.slane %v411_v57, 4  ;;  %v481_v36 = vor.u32 %v480_v20, %v477_v5 }
  0x2e   : > { %2770 = vmatpush3.bf16.msra.mxu0 %v3028_v61  ;;  %v486_v40 = vrot.slane %v484_v21, 5  ;;  %v2426_v41 = vcombine.low %v3303_v10, %v3306_v11  ;;  %v3328_v42 = vsel %vm3244_vm3, %v496_v18, %v500_v6  ;;  %v519_v44 = vrot.slane %v517_v25, 4  ;;  %v3344_v61 = vld [vmem:[%s3188_s10 + $0x40] sm:$0xf]  ;;  %v3027_v6 = vld [vmem:[%s3830_s1 + $0x88] sm:$0xff]  }
  0x2f   : > { %2887 = vmatprep.mubr.bf16.mxu1 %v2524_v14  ;;  %2771 = vmatprep.subr.bf16.mxu0 %v3029_v3  ;;  %v522_v45 = vrot.slane %v520_v26, 5  ;;  %v528_v46 = vrot.slane %v526_v27, 5  ;;  %v2448_v48 = vcombine.low %v3255_v37, %v293_v28  ;;  %v2451_v49 = vsel %vm2430_vm0, %v3258_v38, %v293_v28 }
  0x30   : > { %v482_v50 = vrot.slane %v481_v36, 4  ;;  %v295_v52 = vshrl.u32 %v2425_v24, 16  ;;  %v512_v54 = vshll.u32 %v2451_v49, 16  ;;  %v297_v33 = vshll.u32 %v2425_v24, 16 }
  0x31   : > { %v523_v53 = vor.u32 %v522_v45, %v519_v44  ;;  %v302_v56 = vshrl.u32 %v2426_v41, 16  ;;  %v503_v37 = vshrl.u32 %v2448_v48, 16  ;;  %v506_v59 = vshll.u32 %v2448_v48, 16 }
  0x32   : > { %2772 = vmatpush3.bf16.msra.mxu0 %v3031_v23  ;;  %v3338_v57 = vsel %vm3244_vm3, %v482_v50, %v486_v40  ;;  %v304_v38 = vshll.u32 %v2426_v41, 16  ;;  %v514_v0 = vrot.slane %v512_v54, 5  ;;  %v299_v1 = vrot.slane %v297_v33, 1  ;;  %v3030_v40 = vld [vmem:[%s3830_s1 + $0x90] sm:$0xff]  }
  0x33   : > { %2773 = vmatprep.subr.bf16.mxu0 %v3032_v31  ;;  %v524_v63 = vrot.slane %v523_v53, 4  ;;  %v3349_v3 = vrot.slane %v2425_v24, 1  ;;  %v505_v7 = vrot.slane %v503_v37, 4  ;;  %v508_v8 = vrot.slane %v506_v59, 5  ;;  %v3040_v24 = vld [vmem:[%s3830_s1 + $0x68] sm:$0xff]  }
  0x34   : > { %v306_v9 = vrot.slane %v304_v38, 1  ;;  %v3359_v5 = vcombine.low %v3344_v61, %v3347_v2  ;;  %v300_v14 = vor.u32 %v299_v1, %v295_v52  ;;  %v3371_v17 = vrot.slane %v2426_v41, 1  ;;  %v3045_v38 = vld [vmem:[%s3830_s1 + $0x70] sm:$0xff]  }
  0x35   : > { %v3363_v13 = vsel %vm3244_vm3, %v524_v63, %v528_v46  ;;  %v3375_v18 = vcombine.low %v3349_v3, %v3349_v3  ;;  %v509_v21 = vor.u32 %v508_v8, %v505_v7  ;;  %v3389_v31 = vcombine.low %v3355_v34, %v3369_v16  ;;  %v3033_v7 = vld [vmem:[%s3830_s1 + $0x98] sm:$0xff]  }
  0x36   : > { %2774 = vmatpush3.bf16.msra.mxu0 %v3034_v55  ;;  %v2527_v20 = vcombine.low %v3328_v42, %v3363_v13  ;;  %v307_v23 = vor.u32 %v306_v9, %v302_v56  ;;  %v309_v25 = vshrl.u32 %v3359_v5, 16  ;;  %v2453_v26 = vcombine.low %v3292_v62, %v300_v14 }
  0x37   : > { %2775 = vmatprep.subr.bf16.mxu0 %v3037_v60  ;;  %v2456_v27 = vsel %vm2430_vm0, %v3300_v4, %v300_v14  ;;  %v311_v28 = vshll.u32 %v3359_v5, 16  ;;  %v510_v36 = vrot.slane %v509_v21, 4  ;;  %v668_v63 = vshrl.u32 %v3389_v31, 16 }
  0x38   : > { %2888 = vmatmul.mubr.bf16.vlgmr.msra.gmra.mrb[0].mxu1 %v2527_v20  ;;  %v2458_v41 = vcombine.low %v3303_v10, %v307_v23  ;;  %v2461_v62 = vsel %vm2430_vm0, %v3306_v11, %v307_v23  ;;  %v540_v44 = vshll.u32 %v2456_v27, 16  ;;  %v531_v4 = vshrl.u32 %v2453_v26, 16  ;;  %v3042_v10 = vld [vmem:[%s3830_s1 + $0x28] sm:$0xff]   ;;  %v3047_v23 = vld [vmem:[%s3830_s1 + $0x30] sm:$0xff]   ;;  %v3048_v27 = vld [vmem:[%s3830_s1 + $0x78] sm:$0xff]  }
  0x39   : > { %2896 = vmatpush3.bf16.msra.mxu1 %v3231_v47  ;;  %v534_v45 = vshll.u32 %v2453_v26, 16  ;;  %v568_v46 = vshll.u32 %v2461_v62, 16  ;;  %v313_v48 = vrot.slane %v311_v28, 1  ;;  %v3400_v49 = vsel %vm3244_vm3, %v510_v36, %v514_v0 }
  0x3a   : > { %2776 = vmatpush3.bf16.msra.mxu0 %v3039_v15  ;;  %2897 = vmatprep.subr.bf16.mxu1 %v3027_v6  ;;  %v542_v50 = vrot.slane %v540_v44, 5  ;;  %v559_v52 = vshrl.u32 %v2458_v41, 16  ;;  %v562_v53 = vshll.u32 %v2458_v41, 16  ;;  %v2526_v47 = vcombine.high %v3338_v57, %v3400_v49 }
  0x3b   : > { %2777 = vmatprep.subr.bf16.mxu0 %v3040_v24  ;;  %v2525_v11 = vcombine.low %v3338_v57, %v3400_v49  ;;  %v533_v54 = vrot.slane %v531_v4, 4  ;;  %v536_v55 = vrot.slane %v534_v45, 5  ;;  %v570_v37 = vrot.slane %v568_v46, 5 }
  0x3c   : > { %v561_v33 = vrot.slane %v559_v52, 4  ;;  %v564_v56 = vrot.slane %v562_v53, 5  ;;  %v314_v59 = vor.u32 %v313_v48, %v309_v25  ;;  %992 = vmatprep.mubr.bf16.mxu0 %v2526_v47  ;;  %v670_v0 = vshll.u32 %v3389_v31, 16 }
  0x3d   : > { %2898 = vmatpush3.bf16.msra.mxu1 %v3027_v6  ;;  %v537_v60 = vor.u32 %v536_v55, %v533_v54  ;;  %v2457_v1 = vcombine.high %v3349_v3, %v3349_v3  ;;  %993 = vmatmul.mubr.bf16.gmra.mrb[4].mxu0 %v2525_v11  ;;  %v545_v14 = vshrl.u32 %v3375_v18, 16  ;;  %v2459_v3 = vcombine.low %v3371_v17, %v3371_v17  ;;  %v3051_v11 = vld [vmem:[%s3830_s1 + $0x1c0] sm:$0xff]  }
  0x3e   : > { %2899 = vmatprep.subr.bf16.mxu1 %v3030_v40  ;;  %v565_v8 = vor.u32 %v564_v56, %v561_v33  ;;  %v2463_v9 = vcombine.low %v3344_v61, %v314_v59  ;;  %v2466_v6 = vsel %vm2430_vm0, %v3347_v2, %v314_v59  ;;  %2778 = vmatpush3.bf16.msra.mxu0 %v3042_v10  ;;  %v672_v21 = vrot.slane %v670_v0, 1  ;;  %v3038_v61 = vld [vmem:[%s3830_s1 + $0xa0] sm:$0xff]  }
  0x3f   : > { %v538_v15 = vrot.slane %v537_v60, 4  ;;  %v596_v20 = vshll.u32 %v2466_v6, 16  ;;  %v2462_v26 = vcombine.high %v3371_v17, %v3371_v17  ;;  %2779 = vmatprep.subr.bf16.mxu0 %v3045_v38  ;;  %v547_v62 = vrot.slane %v545_v14, 4 }
  0x40   : > { %v566_v24 = vrot.slane %v565_v8, 4  ;;  %v587_v25 = vshrl.u32 %v2463_v9, 16  ;;  %v590_v2 = vshll.u32 %v2463_v9, 16  ;;  %v673_v41 = vor.u32 %v672_v21, %v668_v63 }
  0x41   : > { %2900 = vmatpush3.bf16.msra.mxu1 %v3030_v40  ;;  %v3438_v28 = vsel %vm3244_vm3, %v538_v15, %v542_v50  ;;  %v598_v36 = vrot.slane %v596_v20, 5  ;;  %v548_v45 = vshll.u32 %v3375_v18, 16  ;;  %v3050_v40 = vld [vmem:[%s3830_s1 + $0x38] sm:$0xff]   ;;  %v554_v18 = vshll.u32 %v2457_v1, 16 }
  0x42   : > { %2901 = vmatprep.subr.bf16.mxu1 %v3033_v7  ;;  %v3442_v44 = vsel %vm3244_vm3, %v566_v24, %v570_v37  ;;  %v589_v4 = vrot.slane %v587_v25, 4  ;;  %v592_v17 = vrot.slane %v590_v2, 5  ;;  %v2469_v50 = vcombine.low %v3355_v34, %v673_v41  ;;  %2780 = vmatpush3.bf16.msra.mxu0 %v3047_v23  ;;  %v3041_v34 = vld [vmem:[%s3830_s1 + $0xa8] sm:$0xff]   ;;  %v3046_v24 = vld [vmem:[%s3830_s1 + $0xb0] sm:$0xff]  }
  0x43   : > { %v2529_v46 = vcombine.high %v3438_v28, %v3442_v44  ;;  %v2528_v48 = vcombine.low %v3438_v28, %v3442_v44  ;;  %v2472_v52 = vsel %vm2430_vm0, %v3369_v16, %v673_v41  ;;  %v550_v47 = vrot.slane %v548_v45, 5  ;;  %2781 = vmatprep.subr.bf16.mxu0 %v3048_v27 }
  0x44   : > { %v593_v53 = vor.u32 %v592_v17, %v589_v4  ;;  %v693_v10 = vshll.u32 %v2472_v52, 16  ;;  %v684_v54 = vshrl.u32 %v2469_v50, 16  ;;  %v687_v55 = vshll.u32 %v2469_v50, 16  ;;  %v3049_v52 = vld [vmem:[%s3830_s1 + $0xb8] sm:$0xff]  }
  0x45   : > { %2902 = vmatpush3.bf16.msra.mxu1 %v3033_v7  ;;  %1000 = vmatprep.mubr.bf16.mxu0 %v2529_v46  ;;  %v573_v33 = vshrl.u32 %v2459_v3, 16  ;;  %v576_v56 = vshll.u32 %v2459_v3, 16  ;;  %v551_v59 = vor.u32 %v550_v47, %v547_v62  ;;  %v556_v38 = vrot.slane %v554_v18, 5 }
  0x46   : > { %1001 = vmatmul.mubr.bf16.gmra.mrb[8].mxu0 %v2528_v48  ;;  %2903 = vmatprep.subr.bf16.mxu1 %v3038_v61  ;;  %v594_v16 = vrot.slane %v593_v53, 4  ;;  %v695_v37 = vrot.slane %v693_v10, 5  ;;  %v686_v60 = vrot.slane %v684_v54, 4  ;;  %v689_v63 = vrot.slane %v687_v55, 5 }
  0x47   : > { %v575_v0 = vrot.slane %v573_v33, 4  ;;  %v578_v1 = vrot.slane %v576_v56, 5  ;;  %2782 = vmatpush3.bf16.msra.mxu0 %v3050_v40  ;;  %v552_v8 = vrot.slane %v551_v59, 4  ;;  %v582_v9 = vshll.u32 %v2462_v26, 16 }
  0x48   : > { %v3463_v7 = vsel %vm3244_vm3, %v594_v16, %v598_v36  ;;  %v322_v6 = vrot.slane %v3359_v5, 1  ;;  %2819 = vmatprep.subr.bf16.mxu0 %v3051_v11  ;;  %v690_v14 = vor.u32 %v689_v63, %v686_v60  ;;  %v674_v20 = vrot.slane %v3389_v31, 1 }
  0x49   : > { %2904 = vmatpush3.bf16.msra.mxu1 %v3038_v61  ;;  %v579_v15 = vor.u32 %v578_v1, %v575_v0  ;;  %v260_v21 = vshrl.u32 %v3217_v35, 16  ;;  %v3470_v3 = vsel %vm3244_vm3, %v552_v8, %v556_v38  ;;  %v584_v23 = vrot.slane %v582_v9, 5 }
  0x4a   : > { %2905 = vmatprep.subr.bf16.mxu1 %v3041_v34  ;;  %v2464_v25 = vcombine.low %v322_v6, %v322_v6  ;;  %v2467_v5 = vcombine.high %v322_v6, %v322_v6  ;;  %v691_v2 = vrot.slane %v690_v14, 4  ;;  %v2470_v26 = vcombine.low %v674_v20, %v674_v20 }
  0x4b   : > { %v580_v61 = vrot.slane %v579_v15, 4  ;;  %v2473_v27 = vcombine.high %v674_v20, %v674_v20  ;;  %v262_v62 = vshll.u32 %v3217_v35, 16  ;;  %v417_v56 = vsel %vm3244_vm3, %v3322_v32, %v416_v51 }
  0x4c   : > { %v601_v36 = vshrl.u32 %v2464_v25, 16  ;;  %v604_v31 = vshll.u32 %v2464_v25, 16  ;;  %v610_v41 = vshll.u32 %v2467_v5, 16  ;;  %v3478_v4 = vsel %vm3244_vm3, %v691_v2, %v695_v37  ;;  %v3052_v37 = vld [vmem:[%s3830_s1 + $0x200] sm:$0xff]   ;;  %v3539_v2 = vld [vmem:[%s3188_s10 + $0x50] sm:$0xf] }
  0x4d   : > { %2906 = vmatpush3.bf16.msra.mxu1 %v3041_v34  ;;  %v3482_v17 = vsel %vm3244_vm3, %v580_v61, %v584_v23  ;;  %v698_v45 = vshrl.u32 %v2470_v26, 16  ;;  %v701_v40 = vshll.u32 %v2470_v26, 16  ;;  %v2532_v46 = vcombine.high %v3463_v7, %v3478_v4  ;;  %v3053_v25 = vld [vmem:[%s3830_s1 + $0x180] sm:$0xff]   ;;  %v3542_v61 = vld [vmem:[%s3188_s10 + $0x54] sm:$0x3]  ;;  %v3056_v26 = vld [vmem:[%s3830_s1 + $0x188] sm:$0xff]  }
  0x4e   : > { %v2531_v48 = vcombine.low %v3463_v7, %v3478_v4  ;;  %v2530_v35 = vcombine.low %v3470_v3, %v3482_v17  ;;  %2907 = vmatprep.subr.bf16.mxu1 %v3046_v24  ;;  %v603_v50 = vrot.slane %v601_v36, 4  ;;  %v606_v53 = vrot.slane %v604_v31, 5  ;;  %v3061_v31 = vld [vmem:[%s3830_s1 + $0x218] sm:$0xff]  }
  0x4f   : > { %v700_v10 = vrot.slane %v698_v45, 4  ;;  %v703_v47 = vrot.slane %v701_v40, 5  ;;  %1008 = vmatprep.mubr.bf16.mxu0 %v2532_v46  ;;  %v707_v18 = vshll.u32 %v2473_v27, 16  ;;  %v264_v11 = vrot.slane %v262_v62, 1  ;;  %v3062_v45 = vld [vmem:[%s3830_s1 + $0x198] sm:$0xff]   ;;  %v3063_v40 = vld [vmem:[%s3830_s1 + $0x1e0] sm:$0xff]  }
  0x50   : > { %2891 = vmatprep.mubr.bf16.mxu1 %v2530_v35  ;;  %1009 = vmatmul.mubr.bf16.gmra.mrb[12].mxu0 %v2531_v48  ;;  %v607_v54 = vor.u32 %v606_v53, %v603_v50  ;;  %v612_v55 = vrot.slane %v610_v41, 5  ;;  %v2560_v22 = vcombine.low %v417_v56, %v3284_v58  ;;  %v2563_v14 = vcombine.low %v3310_v12, %v3328_v42  ;;  %v3054_v42 = vld [vmem:[%s3830_s1 + $0x1c8] sm:$0xff]   ;;  %v3059_v41 = vld [vmem:[%s3830_s1 + $0x190] sm:$0xff]  }
  0x51   : > { %v704_v33 = vor.u32 %v703_v47, %v700_v10  ;;  %2908 = vmatpush3.bf16.msra.mxu1 %v3046_v24  ;;  %v709_v34 = vrot.slane %v707_v18, 5  ;;  %v265_v16 = vor.u32 %v264_v11, %v260_v21  ;;  %v3055_v21 = vld [vmem:[%s3830_s1 + $0x208] sm:$0xff]   ;;  %v3526_v12 = vcombine.high %v3266_v43, %v3338_v57  ;;  %v3070_v11 = vld [vmem:[%s3830_s1 + $0x230] sm:$0xff]  }
  0x52   : > { %2909 = vmatprep.subr.bf16.mxu1 %v3049_v52  ;;  %v608_v59 = vrot.slane %v607_v54, 4  ;;  %v3533_v5 = vcombine.low %v3363_v13, %v3470_v3  ;;  %v3057_v13 = vld [vmem:[%s3830_s1 + $0x1d0] sm:$0xff]   ;;  %v2594_v27 = vcombine.low %v3539_v2, %v3542_v61  ;;  %v3559_v36 = vcombine.low %v3266_v43, %v3338_v57  ;;  %v3060_v43 = vld [vmem:[%s3830_s1 + $0x1d8] sm:$0xff]   ;;  %v3067_v50 = vld [vmem:[%s3830_s1 + $0x228] sm:$0xff]  }
  0x53   : > { %v705_v38 = vrot.slane %v704_v33, 4  ;;  %v2428_v60 = vcombine.low %v3204_v29, %v265_v16  ;;  %v2431_v63 = vsel %vm2430_vm0, %v3207_v30, %v265_v16  ;;  %v3569_v62 = vcombine.high %v3400_v49, %v3438_v28  ;;  %v3066_v10 = vld [vmem:[%s3830_s1 + $0x1e8] sm:$0xff]  }
  0x54   : > { %v613_v0 = vsel %vm3244_vm3, %v608_v59, %v612_v55  ;;  %v400_v9 = vshll.u32 %v2431_v63, 16  ;;  %v1395_v57 = vrot.slane %v2594_v27, 1  ;;  %v1391_v46 = vshll.u32 %v2594_v27, 16  ;;  %v3068_v54 = vld [vmem:[%s3830_s1 + $0x1a8] sm:$0xff]   ;;  %v3069_v55 = vld [vmem:[%s3830_s1 + $0x1f0] sm:$0xff]   ;;  %v3073_v59 = vld [vmem:[%s3830_s1 + $0x238] sm:$0xff]  }
  0x55   : > { %v3509_v51 = vsel %vm3244_vm3, %v705_v38, %v709_v34  ;;  %2910 = vmatpush3.bf16.msra.mxu1 %v3049_v52  ;;  %v391_v1 = vshrl.u32 %v2428_v60, 16  ;;  %v394_v8 = vshll.u32 %v2428_v60, 16  ;;  %v3553_v3 = vcombine.low %v3482_v17, %v613_v0  ;;  %v3064_v17 = vld [vmem:[%s3830_s1 + $0x220] sm:$0xff]   ;;  %v3071_v38 = vld [vmem:[%s3830_s1 + $0x1b0] sm:$0xff]   ;;  %v3072_v60 = vld [vmem:[%s3830_s1 + $0x1f8] sm:$0xff]  }
  0x56   : > { %v2533_v32 = vcombine.low %v613_v0, %v3509_v51  ;;  %2919 = vmatprep.subr.bf16.mxu1 %v3052_v37  ;;  %v402_v58 = vrot.slane %v400_v9, 5  ;;  %v2596_v48 = vcombine.low %v1395_v57, %v1395_v57  ;;  %v2564_v35 = vcombine.low %v3400_v49, %v3438_v28  ;;  %v3065_v52 = vld [vmem:[%s3830_s1 + $0x1a0] sm:$0xff]  }
  0x57   : > { %v393_v29 = vrot.slane %v391_v1, 4  ;;  %v396_v6 = vrot.slane %v394_v8, 5  ;;  %v2568_v53 = vcombine.high %v3442_v44, %v3463_v7  ;;  %v1389_v47 = vshrl.u32 %v2594_v27, 16 }
  0x58   : > { %2892 = vmatmul.mubr.bf16.gmra.mrb[4].mxu1 %v2533_v32  ;;  %v1393_v49 = vrot.slane %v1391_v46, 1  ;;  %v1419_v28 = vshrl.u32 %v2596_v48, 16  ;;  %v1422_v18 = vshll.u32 %v2596_v48, 16  ;;  %v2599_v56 = vcombine.high %v1395_v57, %v1395_v57 }
  0x59   : > { %2911 = vmatprep.mubr.bf16.mxu1 %v2560_v22  ;;  %v397_v30 = vor.u32 %v396_v6, %v393_v29 }
  0x5a   : > { %v1394_v33 = vor.u32 %v1393_v49, %v1389_v47  ;;  %v1421_v34 = vrot.slane %v1419_v28, 4  ;;  %v1424_v16 = vrot.slane %v1422_v18, 5 }
  0x5b   : > { %v398_v15 = vrot.slane %v397_v30, 4 }
  0x5c   : > { %v2595_v63 = vcombine.low %v3539_v2, %v1394_v33  ;;  %v1425_v22 = vor.u32 %v1424_v16, %v1421_v34  ;;  %v2598_v30 = vsel %vm2430_vm0, %v3542_v61, %v1394_v33 }
  0x5d   : > { %v403_v20 = vsel %vm3244_vm3, %v398_v15, %v402_v58  ;;  %v1414_v15 = vshll.u32 %v2598_v30, 16 }
  0x5e   : > { %v2558_v23 = vcombine.low %v403_v20, %v3262_v39  ;;  %v2559_v24 = vcombine.high %v403_v20, %v3262_v39  ;;  %v3058_v39 = vld [vmem:[%s3830_s1 + $0x210] sm:$0xff]   ;;  %v1405_v0 = vshrl.u32 %v2595_v63, 16  ;;  %v1408_v32 = vshll.u32 %v2595_v63, 16 }
  0x5f   : > { %v1426_v1 = vrot.slane %v1425_v22, 4 }
  0x60   : > { %2912 = vmatmul.mubr.bf16.vlgmr.msra.gmra.mrb[0].mxu1 %v2563_v14  ;;  %1285 = vmatprep.mubr.bf16.mxu0 %v2559_v24  ;;  %v1407_v9 = vrot.slane %v1405_v0, 4  ;;  %v1410_v29 = vrot.slane %v1408_v32, 5 }
  0x61   : > { %2920 = vmatpush3.bf16.msra.mxu1 %v3052_v37  ;;  %1286 = vmatmul.mubr.bf16.vlgmr.msra.gmra.mrb[16].mxu0 %v2558_v23  ;;  %v2567_v37 = vcombine.low %v3442_v44, %v3463_v7  ;;  %v1428_v44 = vshll.u32 %v2599_v56, 16  ;;  %v3074_v7 = vld [vmem:[%s3830_s1 + $0x1b8] sm:$0xff]  }
  0x62   : > { %2921 = vmatprep.subr.bf16.mxu1 %v3055_v21  ;;  %2820 = vmatpush3.bf16.msra.mxu0 %v3053_v25 }
  0x63   : > { %1293 = vmatprep.mubr.bf16.mxu0 %v3526_v12  ;;  %2821 = vmatprep.subr.bf16.mxu0 %v3054_v42  ;;  %v1430_v8 = vrot.slane %v1428_v44, 5 }
  0x64   : > { %2915 = vmatprep.mubr.bf16.mxu1 %v3533_v5 }
  0x65   : > { %2922 = vmatpush3.bf16.msra.mxu1 %v3055_v21  ;;  %v1431_v6 = vsel %vm3244_vm3, %v1426_v1, %v1430_v8  ;;  %v1416_v21 = vrot.slane %v1414_v15, 5 }
  0x66   : > { %2923 = vmatprep.subr.bf16.mxu1 %v3058_v39  ;;  %2822 = vmatpush3.bf16.msra.mxu0 %v3056_v26  ;;  %v2650_v58 = vcombine.low %v3509_v51, %v1431_v6  ;;  %v2248_v51 = vld [vmem:[%s3641_s26 + $0x4] sm:$0xf] }
  0x67   : > { %2823 = vmatprep.subr.bf16.mxu0 %v3057_v13  ;;  %v2249_v42 = vsel %vm3645_vm4, 0, %v2248_v51 }
  0x68   : > { %2916 = vmatmul.mubr.bf16.gmra.mrb[4].mxu1 %v3553_v3  ;;  %2250 = vst [vmem:[%s3641_s26 + $0x4] sm:$0xf] %v2249_v42 }
  0x69   : > { %2924 = vmatpush3.bf16.msra.mxu1 %v3058_v39  ;;  %2935 = vmatprep.mubr.bf16.mxu1 %v2563_v14  ;;  %v1411_v14 = vor.u32 %v1410_v29, %v1407_v9  ;;  %v2263_v39 = vld [vmem:[%s3641_s26 + $0x18] sm:$0xf] }
  0x6a   : > { %1294 = vmatmul.mubr.bf16.gmra.mrb[20].mxu0 %v3559_v36  ;;  %2925 = vmatprep.subr.bf16.mxu1 %v3061_v31  ;;  %v2264_v26 = vsel %vm3645_vm4, 0, %v2263_v39 }
  0x6b   : > { %2824 = vmatpush3.bf16.msra.mxu0 %v3059_v41  ;;  %1301 = vmatprep.mubr.bf16.mxu0 %v3569_v62  ;;  %v1412_v20 = vrot.slane %v1411_v14, 4  ;;  %2265 = vst [vmem:[%s3641_s26 + $0x18] sm:$0xf] %v2264_v26 }
  0x6c   : > { %2825 = vmatprep.subr.bf16.mxu0 %v3060_v43  ;;  %v2254_v43 = vld [vmem:[%s3641_s26 + $0xc] sm:$0xf] }
  0x6d   : > { %2926 = vmatpush3.bf16.msra.mxu1 %v3061_v31  ;;  %v1417_v23 = vsel %vm3244_vm3, %v1412_v20, %v1416_v21  ;;  %v2260_v21 = vld [vmem:[%s3641_s26 + $0x14] sm:$0xf] }
  0x6e   : > { %2927 = vmatprep.subr.bf16.mxu1 %v3064_v17  ;;  %v2649_v24 = vcombine.high %v3478_v4, %v1417_v23  ;;  %v2648_v25 = vcombine.low %v3478_v4, %v1417_v23  ;;  %v2245_v4 = vld [vmem:[%s3641_s26] sm:$0xf]  ;;  %v2261_v23 = vsel %vm3645_vm4, 0, %v2260_v21 }
  0x6f   : > { %2826 = vmatpush3.bf16.msra.mxu0 %v3062_v45  ;;  %v2255_v45 = vsel %vm3645_vm4, 0, %v2254_v43  ;;  %2262 = vst [vmem:[%s3641_s26 + $0x14] sm:$0xf] %v2261_v23 }
  0x70   : > { %2827 = vmatprep.subr.bf16.mxu0 %v3063_v40  ;;  %2256 = vst [vmem:[%s3641_s26 + $0xc] sm:$0xf] %v2255_v45 }
  0x71   : > { %2928 = vmatpush3.bf16.msra.mxu1 %v3064_v17 }
  0x72   : > { %1302 = vmatmul.mubr.bf16.gmra.mrb[24].mxu0 %v2564_v35  ;;  %2929 = vmatprep.subr.bf16.mxu1 %v3067_v50 }
  0x73   : > { %2828 = vmatpush3.bf16.msra.mxu0 %v3065_v52  ;;  %1309 = vmatprep.mubr.bf16.mxu0 %v2568_v53 }
  0x74   : > { %2829 = vmatprep.subr.bf16.mxu0 %v3066_v10 }
  0x75   : > { %2930 = vmatpush3.bf16.msra.mxu1 %v3067_v50 }
  0x76   : > { %2931 = vmatprep.subr.bf16.mxu1 %v3070_v11 }
  0x77   : > { %2830 = vmatpush3.bf16.msra.mxu0 %v3068_v54 }
  0x78   : > { %2831 = vmatprep.subr.bf16.mxu0 %v3069_v55  ;;  %v2257_v55 = vld [vmem:[%s3641_s26 + $0x10] sm:$0xf] }
  0x79   : > { %2932 = vmatpush3.bf16.msra.mxu1 %v3070_v11  ;;  %v2258_v33 = vsel %vm3645_vm4, 0, %v2257_v55 }
  0x7a   : > { %1310 = vmatmul.mubr.bf16.gmra.mrb[28].mxu0 %v2567_v37  ;;  %2933 = vmatprep.subr.bf16.mxu1 %v3073_v59  ;;  %2259 = vst [vmem:[%s3641_s26 + $0x10] sm:$0xf] %v2258_v33 }
  0x7b   : > { %2832 = vmatpush3.bf16.msra.mxu0 %v3071_v38  ;;  %1666 = vmatprep.mubr.bf16.mxu0 %v3526_v12  ;;  %v2246_v12 = vsel %vm3645_vm4, 0, %v2245_v4 }
  0x7c   : > { %2833 = vmatprep.subr.bf16.mxu0 %v3072_v60  ;;  %2247 = vst [vmem:[%s3641_s26] sm:$0xf] %v2246_v12 }
  0x7d   : > { %2934 = vmatpush3.bf16.msra.mxu1 %v3073_v59 }
  0x7f   : > { %2834 = vmatpush3.bf16.msra.mxu0 %v3074_v7 }
  0x80   : > { %2936 = vmatmul.mubr.bf16.vlgmr.msra.gmra.mrb[0].mxu1 %v3533_v5  ;;  %v2251_v5 = vld [vmem:[%s3641_s26 + $0x8] sm:$0xf] }
  0x81   : > { %2939 = vmatprep.mubr.bf16.mxu1 %v3553_v3  ;;  %v2252_v61 = vsel %vm3645_vm4, 0, %v2251_v5 }
  0x82   : > { %1667 = vmatmul.mubr.bf16.vlgmr.msra.gmra.mrb[32].mxu0 %v3559_v36  ;;  %2253 = vst [vmem:[%s3641_s26 + $0x8] sm:$0xf] %v2252_v61 }
  0x83   : > { %1674 = vmatprep.mubr.bf16.mxu0 %v3569_v62 }
  0x88   : > { %2940 = vmatmul.mubr.bf16.gmra.mrb[4].mxu1 %v2650_v58 }
  0x8a   : > { %1675 = vmatmul.mubr.bf16.gmra.mrb[36].mxu0 %v2564_v35 }
  0x8b   : > { %1682 = vmatprep.mubr.bf16.mxu0 %v2568_v53 }
  0x92   : > { %1683 = vmatmul.mubr.bf16.gmra.mrb[40].mxu0 %v2567_v37 }
  0x93   : > { %1690 = vmatprep.mubr.bf16.mxu0 %v2649_v24 }
  0x9a   : > { %1691 = vmatmul.mubr.bf16.gmra.mrb[44].mxu0 %v2648_v25 }
  0xfc   : > { %v2731_v2 = vpop.f32.mrb[0].mxu0 }
  0xfd   : > { %v2732_v13 = vpop.f32.mrb[1].mxu0 }
  0xfe   : > { %v2733_v3 = vadd.f32 %v2732_v13, %v2731_v2  ;;  %v2734_v27 = vpop.f32.mrb[2].mxu0 }
  0xff   : > { %v2735_v36 = vpop.f32.mrb[3].mxu0 }
 0x100   : > { %v2736_v31 = vadd.f32 %v2735_v36, %v2734_v27 }
 0x110   : > { %v2737_v41 = vpop.f32.mrb[4].mxu0 }
 0x111   : > { %v2738_v62 = vpop.f32.mrb[5].mxu0 }
 0x112   : > { %v2739_v57 = vadd.f32 %v2738_v62, %v2737_v41  ;;  %v2740_v17 = vpop.f32.mrb[6].mxu0  ;;  %v1822_v62 = vlaneseq }
 0x113   : > { %v2741_v40 = vpop.f32.mrb[7].mxu0 }
 0x114   : > { %v2742_v46 = vadd.f32 %v2741_v40, %v2740_v17  ;;  %v3690_v40 = vld [vmem:[%s3831_s2] ss:$0 sm:$0xff] }
 0x119   : > { %v2743_v48 = vpop.f32.mrb[8].mxu0 }
 0x11a   : > { %v2744_v35 = vpop.f32.mrb[9].mxu0 }
 0x11b   : > { %v2745_v50 = vadd.f32 %v2744_v35, %v2743_v48  ;;  %v2746_v52 = vpop.f32.mrb[10].mxu0  ;;  %v1823_v35 = vshrl.u32 %v1822_v62, 7 }
 0x11c   : > { %v2747_v53 = vpop.f32.mrb[11].mxu0 }
 0x11d   : > { %v2748_v10 = vadd.f32 %v2747_v53, %v2746_v52  ;;  %v3697_v53 = vld [vmem:[%s3832_s3] ss:$0 sm:$0xff] }
 0x123   : > { %v2749_v47 = vpop.f32.mrb[12].mxu0 }
 0x124   : > { %v2750_v49 = vpop.f32.mrb[13].mxu0 }
 0x125   : > { %v2751_v28 = vadd.f32 %v2750_v49, %v2749_v47  ;;  %v2752_v18 = vpop.f32.mrb[14].mxu0 }
 0x126   : > { %v2753_v11 = vpop.f32.mrb[15].mxu0 }
 0x127   : > { %v2754_v54 = vadd.f32 %v2753_v11, %v2752_v18 }
 0x134   : > { %v2783_v56 = vpop.f32.mrb[16].mxu0 }
 0x135   : > { %v2784_v34 = vpop.f32.mrb[17].mxu0 }
 0x136   : > { %v2785_v16 = vadd.f32 %v2784_v34, %v2783_v56  ;;  %v2786_v37 = vpop.f32.mrb[18].mxu0 }
 0x137   : > { %v2787_v59 = vpop.f32.mrb[19].mxu0 }
 0x138   : > { %v2946_v38 = vadd.f32 %v2785_v16, %v2733_v3  ;;  %v2788_v60 = vadd.f32 %v2787_v59, %v2786_v37 }
 0x13a   : > { %v2952_v63 = vadd.f32 %v2788_v60, %v2736_v31  ;;  %v3084_v31 = vmov 1983009808  }
 0x13b   : > { %v1820_v41 = vunpack.c.l.s4 %v3084_v31 }
 0x13d   : > { %v2789_v22 = vpop.f32.mrb[20].mxu0  ;;  %v1821_v48 = vunpack.c.0.s8 %v1820_v41 }
 0x13e   : > { %v2790_v44 = vpop.f32.mrb[21].mxu0 }
 0x13f   : > { %v2791_v7 = vadd.f32 %v2790_v44, %v2789_v22  ;;  %v2792_v0 = vpop.f32.mrb[22].mxu0  ;;  %v3707_v33 = vsub.s32 %v1821_v48, %v1823_v35 }
 0x140   : > { %v2793_v32 = vpop.f32.mrb[23].mxu0 }
 0x141   : > { %v2943_v1 = vadd.f32 %v2791_v7, %v2739_v57  ;;  %v2794_v8 = vadd.f32 %v2793_v32, %v2792_v0 }
 0x143   : > { %v3673_v9 = vadd.f32 %v2794_v8, %v2742_v46 }
 0x145   : > { %v2795_v29 = vpop.f32.mrb[24].mxu0 }
 0x146   : > { %v2796_v6 = vpop.f32.mrb[25].mxu0 }
 0x147   : > { %v2797_v30 = vadd.f32 %v2796_v6, %v2795_v29  ;;  %v2798_v58 = vpop.f32.mrb[26].mxu0 }
 0x148   : > { %v2799_v14 = vpop.f32.mrb[27].mxu0 }
 0x149   : > { %v3675_v15 = vadd.f32 %v2797_v30, %v2745_v50  ;;  %v2800_v20 = vadd.f32 %v2799_v14, %v2798_v58 }
 0x14b   : > { %v3680_v24 = vadd.f32 %v2800_v20, %v2748_v10 }
 0x14d   : > { %v2801_v25 = vpop.f32.mrb[28].mxu0 }
 0x14e   : > { %v2802_v4 = vpop.f32.mrb[29].mxu0 }
 0x14f   : > { %v2803_v51 = vadd.f32 %v2802_v4, %v2801_v25  ;;  %v2804_v12 = vpop.f32.mrb[30].mxu0 }
 0x150   : > { %v2805_v42 = vpop.f32.mrb[31].mxu0 }
 0x151   : > { %v3683_v5 = vadd.f32 %v2803_v51, %v2751_v28  ;;  %v2806_v39 = vadd.f32 %v2805_v42, %v2804_v12 }
 0x153   : > { %v3685_v2 = vadd.f32 %v2806_v39, %v2754_v54  ;;  %v2937_v61 = vpop.f32.mrb[0].mxu1 }
 0x154   : > { %v1733_v26 = vpop.f32.mrb[1].mxu1 }
 0x155   : > { %v2835_v13 = vpop.f32.mrb[32].mxu0  ;;  %v2938_v3 = vpop.f32.mrb[2].mxu1 }
 0x156   : > { %v2836_v27 = vpop.f32.mrb[33].mxu0  ;;  %v1736_v19 = vpop.f32.mrb[3].mxu1 }
 0x157   : > { %v2837_v36 = vadd.f32 %v2836_v27, %v2835_v13  ;;  %v2838_v43 = vpop.f32.mrb[34].mxu0 }
 0x158   : > { %v2839_v57 = vpop.f32.mrb[35].mxu0 }
 0x159   : > { %v2947_v17 = vadd.f32 %v2946_v38, %v2837_v36  ;;  %v2840_v45 = vadd.f32 %v2839_v57, %v2838_v43 }
 0x15b   : > { %v2948_v46 = vadd.f32 %v2947_v17, %v1733_v26  ;;  %v2953_v50 = vadd.f32 %v2952_v63, %v2840_v45  ;;  %v3692_v52 = vpop.f32.mrb[4].mxu1 }
 0x15c   : > { %v3699_v10 = vpop.f32.mrb[5].mxu1 }
 0x15d   : > { %v1779_v47 = vmul.f32 %v2948_v46, %v3690_v40  ;;  %v2954_v49 = vadd.f32 %v2953_v50, %v1736_v19  ;;  %v2841_v28 = vpop.f32.mrb[36].mxu0  ;;  %v3702_v18 = vpop.f32.mrb[6].mxu1 }
 0x15e   : > { %v2842_v11 = vpop.f32.mrb[37].mxu0  ;;  %v3704_v54 = vpop.f32.mrb[7].mxu1 }
 0x15f   : > { %v1794_v55 = vadd.f32 %v3697_v53, %v1779_v47  ;;  %v1780_v56 = vmul.f32 %v2954_v49, %v3690_v40  ;;  %v2843_v34 = vadd.f32 %v2842_v11, %v2841_v28  ;;  %v2844_v16 = vpop.f32.mrb[38].mxu0 }
 0x160   : > { %v2845_v37 = vpop.f32.mrb[39].mxu0 }
 0x161   : > { %v1802_v59 = vmax.f32 %v1794_v55, 0.0  ;;  %v1795_v38 = vadd.f32 %v3697_v53, %v1780_v56  ;;  %v2944_v60 = vadd.f32 %v2943_v1, %v2843_v34  ;;  %v2846_v63 = vadd.f32 %v2845_v37, %v2844_v16 }
 0x163   : > { %v1818_v22 = vcombine.high %v1802_v59, %v1802_v59  ;;  %v1825_v44 = vrot.slane %v1802_v59, %v3707_v33  ;;  %v1803_v7 = vmax.f32 %v1795_v38, 0.0  ;;  %v2945_v0 = vadd.f32 %v2944_v60, %v2937_v61 }
 0x164   : > { %v2950_v32 = vadd.f32 %v3673_v9, %v2846_v63 }
 0x165   : > { %v1832_v8 = vrot.slane %v1818_v22, %v3707_v33  ;;  %v1833_v29 = vcombine.high %v1825_v44, %v1825_v44  ;;  %v1987_v6 = vsel %vm1986_vm5, %v1825_v44, -inf  ;;  %v1835_v30 = vcombine.high %v1803_v7, %v1803_v7  ;;  %v3715_v58 = vpop.f32.mrb[40].mxu0 }
 0x166   : > { %v1988_v14 = vrot.slane %v1987_v6, 4  ;;  %v1842_v1 = vrot.slane %v1803_v7, %v3707_v33  ;;  %v1781_v20 = vmul.f32 %v2945_v0, %v3690_v40  ;;  %v3719_v21 = vadd.f32 %v2950_v32, %v2938_v3  ;;  %v3721_v23 = vpop.f32.mrb[41].mxu0 }
 0x167   : > { %v1834_v25 = vcombine.high %v1832_v8, %v1832_v8  ;;  %v1994_v9 = vsel %vm1986_vm5, %v1833_v29, -inf  ;;  %v2001_v4 = vsel %vm1986_vm5, %v1832_v8, -inf  ;;  %v1849_v51 = vrot.slane %v1835_v30, %v3707_v33  ;;  %v3726_v12 = vpop.f32.mrb[42].mxu0 }
 0x168   : > { %v1989_v42 = vmax.f32 %v1987_v6, %v1988_v14  ;;  %v1995_v39 = vrot.slane %v1994_v9, 4  ;;  %v2002_v61 = vrot.slane %v2001_v4, 4  ;;  %v1850_v26 = vcombine.high %v1842_v1, %v1842_v1  ;;  %v3728_v13 = vpop.f32.mrb[43].mxu0 }
 0x169   : > { %v2008_v3 = vsel %vm1986_vm5, %v1834_v25, -inf  ;;  %v1851_v27 = vcombine.high %v1849_v51, %v1849_v51  ;;  %v2015_v19 = vsel %vm1986_vm5, %v1842_v1, -inf  ;;  %v2029_v36 = vsel %vm1986_vm5, %v1849_v51, -inf }
 0x16a   : > { %v1990_v31 = vrot.slane %v1989_v42, 2  ;;  %v1996_v41 = vmax.f32 %v1994_v9, %v1995_v39  ;;  %v2003_v62 = vmax.f32 %v2001_v4, %v2002_v61  ;;  %v2009_v43 = vrot.slane %v2008_v3, 4 }
 0x16b   : > { %v2016_v57 = vrot.slane %v2015_v19, 4  ;;  %v2022_v17 = vsel %vm1986_vm5, %v1850_v26, -inf  ;;  %v2030_v45 = vrot.slane %v2029_v36, 4  ;;  %v2036_v46 = vsel %vm1986_vm5, %v1851_v27, -inf }
 0x16c   : > { %v1991_v48 = vmax.f32 %v1989_v42, %v1990_v31  ;;  %v1997_v35 = vrot.slane %v1996_v41, 2  ;;  %v2004_v50 = vrot.slane %v2003_v62, 2  ;;  %v2010_v47 = vmax.f32 %v2008_v3, %v2009_v43 }
 0x16d   : > { %v2017_v49 = vmax.f32 %v2015_v19, %v2016_v57  ;;  %v2023_v28 = vrot.slane %v2022_v17, 4  ;;  %v2031_v11 = vmax.f32 %v2029_v36, %v2030_v45  ;;  %v2037_v55 = vrot.slane %v2036_v46, 4  ;;  %v3735_v56 = vpop.f32.mrb[44].mxu0 }
 0x16e   : > { %v1992_v34 = vrot.slane %v1991_v48, 1  ;;  %v1998_v16 = vmax.f32 %v1996_v41, %v1997_v35  ;;  %v2005_v37 = vmax.f32 %v2003_v62, %v2004_v50  ;;  %v2011_v59 = vrot.slane %v2010_v47, 2  ;;  %v3737_v38 = vpop.f32.mrb[45].mxu0 }
 0x16f   : > { %v2018_v60 = vrot.slane %v2017_v49, 2  ;;  %v2024_v63 = vmax.f32 %v2022_v17, %v2023_v28  ;;  %v2032_v22 = vrot.slane %v2031_v11, 2  ;;  %v2038_v44 = vmax.f32 %v2036_v46, %v2037_v55  ;;  %v3739_v7 = vpop.f32.mrb[46].mxu0 }
 0x170   : > { %v1993_v0 = vmax.f32 %v1991_v48, %v1992_v34  ;;  %v1999_v32 = vrot.slane %v1998_v16, 1  ;;  %v2006_v8 = vrot.slane %v2005_v37, 1  ;;  %v2012_v29 = vmax.f32 %v2010_v47, %v2011_v59  ;;  %v3741_v6 = vpop.f32.mrb[47].mxu0 }
 0x171   : > { %v2019_v30 = vmax.f32 %v2017_v49, %v2018_v60  ;;  %v2025_v14 = vrot.slane %v2024_v63, 2  ;;  %v2033_v1 = vmax.f32 %v2031_v11, %v2032_v22  ;;  %v2039_v25 = vrot.slane %v2038_v44, 2 }
 0x172   : > { %v2000_v9 = vmax.f32 %v1998_v16, %v1999_v32  ;;  %v2007_v4 = vmax.f32 %v2005_v37, %v2006_v8  ;;  %v2013_v51 = vrot.slane %v2012_v29, 1  ;;  %v1796_v42 = vadd.f32 %v3697_v53, %v1781_v20 }
 0x173   : > { %v2020_v39 = vrot.slane %v2019_v30, 1  ;;  %v2026_v61 = vmax.f32 %v2024_v63, %v2025_v14  ;;  %v2034_v26 = vrot.slane %v2033_v1, 1  ;;  %v2040_v3 = vmax.f32 %v2038_v44, %v2039_v25 }
 0x174   : > { %v2014_v27 = vmax.f32 %v2012_v29, %v2013_v51  ;;  %v1804_v19 = vmax.f32 %v1796_v42, 0.0  ;;  %v1782_v36 = vmul.f32 %v3719_v21, %v3690_v40  ;;  %v2849_v31 = vadd.f32 %v3721_v23, %v3715_v58 }
 0x175   : > { %v2021_v41 = vmax.f32 %v2019_v30, %v2020_v39  ;;  %v2027_v62 = vrot.slane %v2026_v61, 1  ;;  %v2035_v43 = vmax.f32 %v2033_v1, %v2034_v26  ;;  %v2041_v57 = vrot.slane %v2040_v3, 1 }
 0x176   : > { %v1852_v20 = vcombine.high %v1804_v19, %v1804_v19  ;;  %v1859_v17 = vrot.slane %v1804_v19, %v3707_v33  ;;  %v1797_v45 = vadd.f32 %v3697_v53, %v1782_v36  ;;  %v2959_v46 = vadd.f32 %v3675_v15, %v2849_v31 }
 0x177   : > { %v2028_v48 = vmax.f32 %v2026_v61, %v2027_v62  ;;  %v2042_v35 = vmax.f32 %v2040_v3, %v2041_v57  ;;  %v2211_v50 = vmax.f32 %v1993_v0, %v2021_v41  ;;  %v2213_v21 = vmax.f32 %v2007_v4, %v2035_v43 }
 0x178   : > { %v1866_v47 = vrot.slane %v1852_v20, %v3707_v33  ;;  %v1867_v58 = vcombine.high %v1859_v17, %v1859_v17  ;;  %v2043_v23 = vsel %vm1986_vm5, %v1859_v17, -inf  ;;  %v1805_v49 = vmax.f32 %v1797_v45, 0.0 }
 0x179   : > { %v2212_v28 = vmax.f32 %v2000_v9, %v2028_v48  ;;  %v2214_v11 = vmax.f32 %v2014_v27, %v2042_v35  ;;  %v2699_v55 = vpack.c.bf16 %v2211_v50, %v2211_v50  ;;  %v2701_v34 = vpack.c.bf16 %v2213_v21, %v2213_v21 }
 0x17a   : > { %v1868_v16 = vcombine.high %v1866_v47, %v1866_v47  ;;  %v2044_v37 = vrot.slane %v2043_v23, 4  ;;  %v2050_v59 = vsel %vm1986_vm5, %v1867_v58, -inf  ;;  %v2057_v15 = vsel %vm1986_vm5, %v1866_v47, -inf }
 0x17b   : > { %v2700_v60 = vpack.c.bf16 %v2212_v28, %v2212_v28  ;;  %v2702_v63 = vpack.c.bf16 %v2214_v11, %v2214_v11  ;;  %v2314_v22 = vunpack.c.l.b16 %v2699_v55  ;;  %v2316_v44 = vunpack.c.l.b16 %v2701_v34 }
 0x17c   : > { %v2045_v0 = vmax.f32 %v2043_v23, %v2044_v37  ;;  %v2051_v32 = vrot.slane %v2050_v59, 4  ;;  %v2058_v8 = vrot.slane %v2057_v15, 4  ;;  %v2064_v29 = vsel %vm1986_vm5, %v1868_v16, -inf }
 0x17d   : > { %v2315_v30 = vunpack.c.l.b16 %v2700_v60  ;;  %v2317_v14 = vunpack.c.l.b16 %v2702_v63  ;;  %v2065_v1 = vrot.slane %v2064_v29, 4  ;;  %v1869_v25 = vcombine.high %v1805_v49, %v1805_v49 }
 0x17e   : > { %v2046_v9 = vrot.slane %v2045_v0, 2  ;;  %v2052_v4 = vmax.f32 %v2050_v59, %v2051_v32  ;;  %v2059_v51 = vmax.f32 %v2057_v15, %v2058_v8  ;;  %v1876_v42 = vrot.slane %v1805_v49, %v3707_v33 }
 0x17f   : > { %v2331_v39 = vsel %vm2330_vm6, %v2315_v30, %v2314_v22  ;;  %v2066_v61 = vmax.f32 %v2064_v29, %v2065_v1  ;;  %v1883_v26 = vrot.slane %v1869_v25, %v3707_v33  ;;  %v2960_v3 = vadd.f32 %v2959_v46, %v3699_v10 }
 0x180   : > { %v2333_v27 = vsel %vm2332_vm7, %v2316_v44, %v2331_v39  ;;  %v2047_v19 = vmax.f32 %v2045_v0, %v2046_v9  ;;  %v2053_v36 = vrot.slane %v2052_v4, 2  ;;  %v2060_v31 = vrot.slane %v2059_v51, 2 }
 0x181   : > { %v2335_v41 = vsel %vm2334_vm8, %v2317_v14, %v2333_v27  ;;  %v2067_v62 = vrot.slane %v2066_v61, 2  ;;  %v1884_v43 = vcombine.high %v1876_v42, %v1876_v42  ;;  %v1885_v57 = vcombine.high %v1883_v26, %v1883_v26 }
 0x182   : > { %v2345_v20 = vpack.c.b16 %v2335_v41, %v2335_v41  ;;  %v2048_v17 = vrot.slane %v2047_v19, 1  ;;  %v2054_v45 = vmax.f32 %v2052_v4, %v2053_v36  ;;  %v2061_v48 = vmax.f32 %v2059_v51, %v2060_v31 }
 0x183   : > { %v2068_v35 = vmax.f32 %v2066_v61, %v2067_v62  ;;  %v2071_v50 = vsel %vm1986_vm5, %v1876_v42, -inf  ;;  %v2078_v10 = vsel %vm1986_vm5, %v1884_v43, -inf  ;;  %v2085_v46 = vsel %vm1986_vm5, %v1883_v26, -inf }
 0x184   : > { %2693 = vst [vmem:[%s3641_s26 + $0x8] sm:$0x6] %v2345_v20  ;;  %v2055_v21 = vrot.slane %v2054_v45, 1  ;;  %v2062_v47 = vrot.slane %v2061_v48, 1  ;;  %v2072_v58 = vrot.slane %v2071_v50, 4  ;;  %v2049_v23 = vmax.f32 %v2047_v19, %v2048_v17 }
 0x185   : > { %v2079_v49 = vrot.slane %v2078_v10, 4  ;;  %v2086_v28 = vrot.slane %v2085_v46, 4  ;;  %v2092_v11 = vsel %vm1986_vm5, %v1885_v57, -inf  ;;  %v2069_v34 = vrot.slane %v2068_v35, 1 }
 0x186   : > { %v2056_v55 = vmax.f32 %v2054_v45, %v2055_v21  ;;  %v2073_v16 = vmax.f32 %v2071_v50, %v2072_v58  ;;  %v2093_v37 = vrot.slane %v2092_v11, 4  ;;  %v2063_v59 = vmax.f32 %v2061_v48, %v2062_v47 }
 0x187   : > { %v2080_v15 = vmax.f32 %v2078_v10, %v2079_v49  ;;  %v2087_v60 = vmax.f32 %v2085_v46, %v2086_v28  ;;  %v1783_v63 = vmul.f32 %v2960_v3, %v3690_v40  ;;  %v2852_v0 = vadd.f32 %v3728_v13, %v3726_v12 }
 0x188   : > { %v2074_v22 = vrot.slane %v2073_v16, 2  ;;  %v2094_v44 = vmax.f32 %v2092_v11, %v2093_v37  ;;  %v2855_v32 = vadd.f32 %v3737_v38, %v3735_v56  ;;  %v2858_v14 = vadd.f32 %v3741_v6, %v3739_v7 }
 0x189   : > { %v2081_v8 = vrot.slane %v2080_v15, 2  ;;  %v2088_v29 = vrot.slane %v2087_v60, 2  ;;  %v1798_v30 = vadd.f32 %v3697_v53, %v1783_v63  ;;  %v2965_v9 = vadd.f32 %v3680_v24, %v2852_v0 }
 0x18a   : > { %v2075_v1 = vmax.f32 %v2073_v16, %v2074_v22  ;;  %v2095_v25 = vrot.slane %v2094_v44, 2  ;;  %v2956_v4 = vadd.f32 %v3683_v5, %v2855_v32  ;;  %v3778_v12 = vadd.f32 %v3685_v2, %v2858_v14 }
 0x18b   : > { %v2082_v51 = vmax.f32 %v2080_v15, %v2081_v8  ;;  %v2089_v42 = vmax.f32 %v2087_v60, %v2088_v29  ;;  %v1806_v39 = vmax.f32 %v1798_v30, 0.0  ;;  %v2966_v38 = vadd.f32 %v2965_v9, %v3704_v54 }
 0x18c   : > { %v2076_v13 = vrot.slane %v2075_v1, 1  ;;  %v2096_v56 = vmax.f32 %v2094_v44, %v2095_v25  ;;  %v2957_v61 = vadd.f32 %v2956_v4, %v3692_v52  ;;  %v2070_v24 = vmax.f32 %v2068_v35, %v2069_v34 }
 0x18d   : > { %v2083_v26 = vrot.slane %v2082_v51, 1  ;;  %v2090_v7 = vrot.slane %v2089_v42, 1  ;;  %v1886_v6 = vcombine.high %v1806_v39, %v1806_v39  ;;  %v1893_v3 = vrot.slane %v1806_v39, %v3707_v33 }
 0x18e   : > { %v2077_v27 = vmax.f32 %v2075_v1, %v2076_v13  ;;  %v2097_v5 = vrot.slane %v2096_v56, 1  ;;  %v1784_v19 = vmul.f32 %v2966_v38, %v3690_v40  ;;  %v1785_v63 = vmul.f32 %v2957_v61, %v3690_v40 }
 0x18f   : > { %v2084_v36 = vmax.f32 %v2082_v51, %v2083_v26  ;;  %v2091_v31 = vmax.f32 %v2089_v42, %v2090_v7  ;;  %v1900_v2 = vrot.slane %v1886_v6, %v3707_v33  ;;  %v1901_v41 = vcombine.high %v1893_v3, %v1893_v3 }
 0x190   : > { %v2098_v62 = vmax.f32 %v2096_v56, %v2097_v5  ;;  %v2215_v43 = vmax.f32 %v2049_v23, %v2077_v27  ;;  %v2099_v54 = vsel %vm1986_vm5, %v1893_v3, -inf  ;;  %v1799_v52 = vadd.f32 %v3697_v53, %v1784_v19 }
 0x191   : > { %v2216_v57 = vmax.f32 %v2056_v55, %v2084_v36  ;;  %v2217_v20 = vmax.f32 %v2063_v59, %v2091_v31  ;;  %v1902_v17 = vcombine.high %v1900_v2, %v1900_v2  ;;  %v2100_v45 = vrot.slane %v2099_v54, 4 }
 0x192   : > { %v2218_v48 = vmax.f32 %v2070_v24, %v2098_v62  ;;  %v2703_v35 = vpack.c.bf16 %v2215_v43, %v2215_v43  ;;  %v2106_v50 = vsel %vm1986_vm5, %v1901_v41, -inf  ;;  %v2113_v10 = vsel %vm1986_vm5, %v1900_v2, -inf }
 0x193   : > { %v2704_v46 = vpack.c.bf16 %v2216_v57, %v2216_v57  ;;  %v2705_v21 = vpack.c.bf16 %v2217_v20, %v2217_v20  ;;  %v2107_v47 = vrot.slane %v2106_v50, 4  ;;  %v2120_v23 = vsel %vm1986_vm5, %v1902_v17, -inf }
 0x194   : > { %v2706_v58 = vpack.c.bf16 %v2218_v48, %v2218_v48  ;;  %v2318_v49 = vunpack.c.l.b16 %v2703_v35  ;;  %v2114_v34 = vrot.slane %v2113_v10, 4  ;;  %v2101_v16 = vmax.f32 %v2099_v54, %v2100_v45 }
 0x195   : > { %v2319_v28 = vunpack.c.l.b16 %v2704_v46  ;;  %v2320_v11 = vunpack.c.l.b16 %v2705_v21  ;;  %v2121_v37 = vrot.slane %v2120_v23, 4  ;;  %v1807_v59 = vmax.f32 %v1799_v52, 0.0 }
 0x196   : > { %v2321_v55 = vunpack.c.l.b16 %v2706_v58  ;;  %v2108_v60 = vmax.f32 %v2106_v50, %v2107_v47  ;;  %v2115_v32 = vmax.f32 %v2113_v10, %v2114_v34  ;;  %v2102_v14 = vrot.slane %v2101_v16, 2 }
 0x197   : > { %v2336_v15 = vsel %vm2330_vm6, %v2319_v28, %v2318_v49  ;;  %v1903_v44 = vcombine.high %v1807_v59, %v1807_v59  ;;  %v2122_v8 = vmax.f32 %v2120_v23, %v2121_v37  ;;  %v1910_v29 = vrot.slane %v1807_v59, %v3707_v33 }
 0x198   : > { %v2337_v22 = vsel %vm2332_vm7, %v2320_v11, %v2336_v15  ;;  %v2109_v25 = vrot.slane %v2108_v60, 2  ;;  %v1800_v51 = vadd.f32 %v3697_v53, %v1785_v63  ;;  %v2116_v13 = vrot.slane %v2115_v32, 2 }
 0x199   : > { %v2338_v0 = vsel %vm2334_vm8, %v2321_v55, %v2337_v22  ;;  %v1917_v1 = vrot.slane %v1903_v44, %v3707_v33  ;;  %v1918_v9 = vcombine.high %v1910_v29, %v1910_v29  ;;  %v2127_v4 = vsel %vm1986_vm5, %v1910_v29, -inf }
 0x19a   : > { %v2346_v30 = vpack.c.b16 %v2338_v0, %v2338_v0  ;;  %v2128_v39 = vrot.slane %v2127_v4, 4  ;;  %v2123_v56 = vrot.slane %v2122_v8, 2  ;;  %v2103_v26 = vmax.f32 %v2101_v16, %v2102_v14 }
 0x19b   : > { %v1919_v42 = vcombine.high %v1917_v1, %v1917_v1  ;;  %v2134_v38 = vsel %vm1986_vm5, %v1918_v9, -inf  ;;  %v2141_v61 = vsel %vm1986_vm5, %v1917_v1, -inf  ;;  %v2110_v3 = vmax.f32 %v2108_v60, %v2109_v25 }
 0x19c   : > { %2694 = vst [vmem:[%s3641_s26 + $0xc] sm:$0x6] %v2346_v30  ;;  %v2129_v7 = vmax.f32 %v2127_v4, %v2128_v39  ;;  %v2135_v6 = vrot.slane %v2134_v38, 4  ;;  %v2142_v24 = vrot.slane %v2141_v61, 4  ;;  %v1808_v5 = vmax.f32 %v1800_v51, 0.0 }
 0x19d   : > { %v2148_v27 = vsel %vm1986_vm5, %v1919_v42, -inf  ;;  %v2117_v2 = vmax.f32 %v2115_v32, %v2116_v13  ;;  %v2124_v41 = vmax.f32 %v2122_v8, %v2123_v56  ;;  %v2104_v43 = vrot.slane %v2103_v26, 1 }
 0x19e   : > { %v2130_v19 = vrot.slane %v2129_v7, 2  ;;  %v2136_v36 = vmax.f32 %v2134_v38, %v2135_v6  ;;  %v2149_v31 = vrot.slane %v2148_v27, 4  ;;  %v2143_v62 = vmax.f32 %v2141_v61, %v2142_v24 }
 0x19f   : > { %v2111_v20 = vrot.slane %v2110_v3, 1  ;;  %v1920_v45 = vcombine.high %v1808_v5, %v1808_v5  ;;  %v1927_v10 = vrot.slane %v1808_v5, %v3707_v33  ;;  %v2118_v46 = vrot.slane %v2117_v2, 1 }
 0x1a0   : > { %v2131_v54 = vmax.f32 %v2129_v7, %v2130_v19  ;;  %v2137_v52 = vrot.slane %v2136_v36, 2  ;;  %v2150_v57 = vmax.f32 %v2148_v27, %v2149_v31  ;;  %v2144_v17 = vrot.slane %v2143_v62, 2 }
 0x1a1   : > { %v2125_v21 = vrot.slane %v2124_v41, 1  ;;  %v2105_v58 = vmax.f32 %v2103_v26, %v2104_v43  ;;  %v2112_v11 = vmax.f32 %v2110_v3, %v2111_v20  ;;  %v1934_v55 = vrot.slane %v1920_v45, %v3707_v33 }
 0x1a2   : > { %v2132_v48 = vrot.slane %v2131_v54, 1  ;;  %v2138_v35 = vmax.f32 %v2136_v36, %v2137_v52  ;;  %v2151_v50 = vrot.slane %v2150_v57, 2  ;;  %v2145_v47 = vmax.f32 %v2143_v62, %v2144_v17 }
 0x1a3   : > { %v1935_v15 = vcombine.high %v1927_v10, %v1927_v10  ;;  %v2119_v60 = vmax.f32 %v2117_v2, %v2118_v46  ;;  %v2126_v63 = vmax.f32 %v2124_v41, %v2125_v21  ;;  %v2155_v8 = vsel %vm1986_vm5, %v1927_v10, -inf }
 0x1a4   : > { %v2133_v23 = vmax.f32 %v2131_v54, %v2132_v48  ;;  %v2139_v49 = vrot.slane %v2138_v35, 1  ;;  %v2152_v28 = vmax.f32 %v2150_v57, %v2151_v50  ;;  %v2146_v34 = vrot.slane %v2145_v47, 1 }
 0x1a5   : > { %v1936_v30 = vcombine.high %v1934_v55, %v1934_v55  ;;  %v2162_v25 = vsel %vm1986_vm5, %v1935_v15, -inf  ;;  %v2156_v4 = vrot.slane %v2155_v8, 4  ;;  %v2169_v51 = vsel %vm1986_vm5, %v1934_v55, -inf }
 0x1a6   : > { %v2140_v16 = vmax.f32 %v2138_v35, %v2139_v49  ;;  %v2153_v37 = vrot.slane %v2152_v28, 1  ;;  %v2219_v59 = vmax.f32 %v2105_v58, %v2133_v23  ;;  %v2147_v22 = vmax.f32 %v2145_v47, %v2146_v34 }
 0x1a7   : > { %v2963_v56 = vadd.f32 %v3778_v12, %v3702_v18  ;;  %v2163_v61 = vrot.slane %v2162_v25, 4  ;;  %v2176_v26 = vsel %vm1986_vm5, %v1936_v30, -inf  ;;  %v2170_v3 = vrot.slane %v2169_v51, 4 }
 0x1a8   : > { %v2154_v44 = vmax.f32 %v2152_v28, %v2153_v37  ;;  %v2220_v0 = vmax.f32 %v2112_v11, %v2140_v16  ;;  %v2707_v32 = vpack.c.bf16 %v2219_v59, %v2219_v59  ;;  %v2221_v29 = vmax.f32 %v2119_v60, %v2147_v22 }
 0x1a9   : > { %v1786_v24 = vmul.f32 %v2963_v56, %v3690_v40  ;;  %v2157_v5 = vmax.f32 %v2155_v8, %v2156_v4  ;;  %v2177_v36 = vrot.slane %v2176_v26, 4  ;;  %v2164_v12 = vmax.f32 %v2162_v25, %v2163_v61 }
 0x1aa   : > { %v2222_v14 = vmax.f32 %v2126_v63, %v2154_v44  ;;  %v2708_v1 = vpack.c.bf16 %v2220_v0, %v2220_v0  ;;  %v2709_v9 = vpack.c.bf16 %v2221_v29, %v2221_v29  ;;  %v2322_v39 = vunpack.c.l.b16 %v2707_v32 }
 0x1ab   : > { %v1801_v31 = vadd.f32 %v3697_v53, %v1786_v24  ;;  %v2171_v2 = vmax.f32 %v2169_v51, %v2170_v3  ;;  %v2158_v62 = vrot.slane %v2157_v5, 2  ;;  %v2178_v43 = vmax.f32 %v2176_v26, %v2177_v36 }
 0x1ac   : > { %v2710_v42 = vpack.c.bf16 %v2222_v14, %v2222_v14  ;;  %v2323_v13 = vunpack.c.l.b16 %v2708_v1  ;;  %v2324_v38 = vunpack.c.l.b16 %v2709_v9  ;;  %v2165_v57 = vrot.slane %v2164_v12, 2 }
 0x1ad   : > { %v1809_v41 = vmax.f32 %v1801_v31, 0.0  ;;  %v2172_v40 = vrot.slane %v2171_v2, 2  ;;  %v2159_v48 = vmax.f32 %v2157_v5, %v2158_v62  ;;  %v2179_v53 = vrot.slane %v2178_v43, 2 }
 0x1ae   : > { %v2325_v7 = vunpack.c.l.b16 %v2710_v42  ;;  %v2339_v6 = vsel %vm2330_vm6, %v2323_v13, %v2322_v39  ;;  %v2166_v23 = vmax.f32 %v2164_v12, %v2165_v57 }
 0x1af   : > { %v2340_v27 = vsel %vm2332_vm7, %v2324_v38, %v2339_v6  ;;  %v1937_v54 = vcombine.high %v1809_v41, %v1809_v41  ;;  %v1944_v52 = vrot.slane %v1809_v41, %v3707_v33  ;;  %v2173_v49 = vmax.f32 %v2171_v2, %v2172_v40 }
 0x1b0   : > { %v2341_v19 = vsel %vm2334_vm8, %v2325_v7, %v2340_v27  ;;  %v2160_v16 = vrot.slane %v2159_v48, 1  ;;  %v2180_v37 = vmax.f32 %v2178_v43, %v2179_v53  ;;  %v2167_v22 = vrot.slane %v2166_v23, 1 }
 0x1b1   : > { %v2347_v18 = vpack.c.b16 %v2341_v19, %v2341_v19  ;;  %v1951_v20 = vrot.slane %v1937_v54, %v3707_v33  ;;  %v1952_v17 = vcombine.high %v1944_v52, %v1944_v52  ;;  %v2183_v45 = vsel %vm1986_vm5, %v1944_v52, -inf }
 0x1b2   : > { %v2184_v35 = vrot.slane %v2183_v45, 4  ;;  %v2174_v44 = vrot.slane %v2173_v49, 1  ;;  %v2161_v30 = vmax.f32 %v2159_v48, %v2160_v16  ;;  %v2181_v14 = vrot.slane %v2180_v37, 1 }
 0x1b3   : > { %2695 = vst [vmem:[%s3641_s26 + $0x10] sm:$0x6] %v2347_v18  ;;  %v1953_v50 = vcombine.high %v1951_v20, %v1951_v20  ;;  %v2190_v10 = vsel %vm1986_vm5, %v1952_v17, -inf  ;;  %v2197_v46 = vsel %vm1986_vm5, %v1951_v20, -inf  ;;  %v2168_v51 = vmax.f32 %v2166_v23, %v2167_v22 }
 0x1b4   : > { %v2185_v21 = vmax.f32 %v2183_v45, %v2184_v35  ;;  %v2191_v47 = vrot.slane %v2190_v10, 4  ;;  %v2198_v58 = vrot.slane %v2197_v46, 4  ;;  %v2175_v42 = vmax.f32 %v2173_v49, %v2174_v44 }
 0x1b5   : > { %v2204_v28 = vsel %vm1986_vm5, %v1953_v50, -inf  ;;  %v2182_v61 = vmax.f32 %v2180_v37, %v2181_v14 }
 0x1b6   : > { %v2186_v11 = vrot.slane %v2185_v21, 2  ;;  %v2192_v33 = vmax.f32 %v2190_v10, %v2191_v47  ;;  %v2199_v34 = vmax.f32 %v2197_v46, %v2198_v58  ;;  %v2205_v55 = vrot.slane %v2204_v28, 4 }
 0x1b8   : > { %v2187_v59 = vmax.f32 %v2185_v21, %v2186_v11  ;;  %v2193_v15 = vrot.slane %v2192_v33, 2  ;;  %v2200_v60 = vrot.slane %v2199_v34, 2  ;;  %v2206_v63 = vmax.f32 %v2204_v28, %v2205_v55 }
 0x1ba   : > { %v2188_v0 = vrot.slane %v2187_v59, 1  ;;  %v2194_v32 = vmax.f32 %v2192_v33, %v2193_v15  ;;  %v2201_v8 = vmax.f32 %v2199_v34, %v2200_v60  ;;  %v2207_v29 = vrot.slane %v2206_v63, 2 }
 0x1bc   : > { %v2189_v1 = vmax.f32 %v2187_v59, %v2188_v0  ;;  %v2195_v25 = vrot.slane %v2194_v32, 1  ;;  %v2202_v9 = vrot.slane %v2201_v8, 1  ;;  %v2208_v4 = vmax.f32 %v2206_v63, %v2207_v29 }
 0x1be   : > { %v2196_v39 = vmax.f32 %v2194_v32, %v2195_v25  ;;  %v2203_v13 = vmax.f32 %v2201_v8, %v2202_v9  ;;  %v2209_v56 = vrot.slane %v2208_v4, 1  ;;  %v2223_v38 = vmax.f32 %v2161_v30, %v2189_v1 }
 0x1c0   : > { %v2210_v26 = vmax.f32 %v2208_v4, %v2209_v56  ;;  %v2224_v7 = vmax.f32 %v2168_v51, %v2196_v39  ;;  %v2225_v6 = vmax.f32 %v2175_v42, %v2203_v13  ;;  %v2711_v3 = vpack.c.bf16 %v2223_v38, %v2223_v38 }
 0x1c2   : > { %v2226_v24 = vmax.f32 %v2182_v61, %v2210_v26  ;;  %v2712_v27 = vpack.c.bf16 %v2224_v7, %v2224_v7  ;;  %v2713_v5 = vpack.c.bf16 %v2225_v6, %v2225_v6  ;;  %v2326_v36 = vunpack.c.l.b16 %v2711_v3 }
 0x1c4   : > { %v2714_v19 = vpack.c.bf16 %v2226_v24, %v2226_v24  ;;  %v2327_v31 = vunpack.c.l.b16 %v2712_v27  ;;  %v2328_v18 = vunpack.c.l.b16 %v2713_v5 }
 0x1c6   : > { %v2329_v12 = vunpack.c.l.b16 %v2714_v19  ;;  %v2342_v2 = vsel %vm2330_vm6, %v2327_v31, %v2326_v36 }
 0x1c7   : > { %v2343_v41 = vsel %vm2332_vm7, %v2328_v18, %v2342_v2 }
 0x1c8   : > { %v2344_v62 = vsel %vm2334_vm8, %v2329_v12, %v2343_v41 }
 0x1c9   : > { %v2348_v43 = vpack.c.b16 %v2344_v62, %v2344_v62 }
 0x1cb   : > { %2696 = vst [vmem:[%s3641_s26 + $0x14] sm:$0x6] %v2348_v43 }
 0x1cc PF: > { %s14_s15 = sadd.s32 1, %s3082_s15  }
 0x1cd   : > { %p11_p4 = scmp.ge.s32.totalorder %s14_s15, 4  }
 0x1cf   :  { %13 = sbr.rel (!%p11_p4) target bundleno = 1 (0x1), region = 69 }

// kernel: szcvi_forward.6
= control target key start
LH: loop header
LB: loop body
LE: loop exit
PB: predicated region body
PF: predicated region fallthrough
CT: control target
= control target key end

     0   :  { %s4840_s15 = smov 0   ;;  %s6646_s0 = inlined_call_operand.vmem [shape: bf16[2,19,19,8], index: 0, kind: input, shape index: {}]   ;;  %s6647_s1 = inlined_call_operand.vmem [shape: bf16[3,24,64], index: 1, kind: input, shape index: {}]   ;;  %s6648_s2 = inlined_call_operand.vmem [shape: f32[1,64], index: 2, kind: input, shape index: {}]   ;;  %s6649_s3 = inlined_call_operand.vmem [shape: f32[1,64], index: 3, kind: input, shape index: {}]   ;;  %s6650_s4 = inlined_call_operand.vmem [shape: bf16[2,19,19,64], index: 4, kind: output, shape index: {}]  }
   0x1 LB: > { %s3723_s16 = sadd.s32 4294967295, %s4812_s15   ;;  %p3727_p0 = scmp.ge.s32.totalorder %s4812_s15, 1  ;;  %s4812_s15 = sphi %s4840_s15, %s14_s15  }
   0x2   : > { %p162_p1 = scmp.lt.s32.totalorder %s4812_s15, 3 }
   0x4   : > { %p163_p2 = pnand %p3727_p0, %p162_p1 }
   0x6   : > { %166 = sbr.rel (%p163_p2) target bundleno = 595 (0x253), region = 36 }
   0xd   : > { %v804_v0 = vld [vmem:[%s6647_s1 + $0x4] sm:$0xf]  ;;  %vm902_vm0 = vcmask 1043456   ;;  %v3861_v1 = vld [vmem:[%s6647_s1 + $0x10] sm:$0xf]  ;;  %p188_p3 = scmp.lt.s32.totalorder %s3723_s16, 1 }
   0xe   : > { %4785 = vmatprep.subr.msk.bf16.mxu1 %vm902_vm0, %v804_v0  ;;  %4789 = vmatprep.subr.msk.bf16.mxu0 %vm902_vm0, %v3861_v1  ;;  %v904_v2 = vsel %vm902_vm0, %v804_v0, 0  ;;  %v4858_v3 = vsel %vm902_vm0, %v3861_v1, 0  ;;  %v640_v4 = vld [vmem:[%s6647_s1] sm:$0xf]  ;;  %v3879_v5 = vld [vmem:[%s6647_s1 + $0x14] sm:$0xf] }
   0xf   : > { %6769 = vst [vmem:[#allocation2_spill] sm:$0xff] %v4858_v3  ;;  %4222 = vmatpush3.bf16.msra.mxu1 %v904_v2  ;;  %4358 = vmatpush3.bf16.msra.mxu0 %v4858_v3  ;;  %s6962_s16 = smov (!%p188_p3, %s3723_s16), 1  ;;  %v4875_v6 = vld [vmem:[%s6647_s1 + $0x18] sm:$0xf]  ;;  %vm689_vm1 = vcmask 1042432   ;;  %vm690_vm2 = vcmask 1046532  }
  0x10   : > { %4786 = vmatprep.subr.msk.bf16.mxu1 %vm902_vm0, %v640_v4  ;;  %s4795_s25 = smul.u32 228, %s6962_s16  ;;  %4791 = vmatprep.subr.msk.bf16.mxu0 %vm902_vm0, %v3879_v5  ;;  %vm853_vm3 = vcmask 64512   ;;  %v4880_v7 = vld [vmem:[%s6647_s1 + $0x8] sm:$0xf]  ;;  %v4890_v8 = vsel %vm902_vm0, %v640_v4, 0  ;;  %v4893_v9 = vsel %vm902_vm0, %v3879_v5, 0  ;;  %vm4914_vm6 = vmor %vm689_vm1, %vm690_vm2 }
  0x11   : > { %v4897_v10 = vsel %vm902_vm0, %v4875_v6, 0  ;;  %v4901_v11 = vsel %vm902_vm0, %v4880_v7, 0  ;;  %vm253_vm4 = vsmask.f32 3328  ;;  %vm254_vm5 = vsmask.f32 7440 }
  0x12   : > { %s4887_s6 = scalar_lea.vmem %s6646_s0, %s4795_s25  ;;  %vm4968_vm7 = vmor %vm253_vm4, %vm254_vm5  ;;  %vm1327_vm8 = vsmask.f32 2304  ;;  %vm1328_vm9 = vsmask.f32 6416  ;;  %s6254_s19 = scalar_lea.vmem %s6650_s4, %s4795_s25  ;;  %vm3307_vm11 = vcmask 519168   ;;  %vm3310_vm12 = vcmask 517120  }
  0x13   : > { %v199_v12 = vld [vmem:[%s4887_s6 + $0xc] sm:$0xf]  ;;  %v4905_v13 = vld [vmem:[%s4887_s6 + $0x10] sm:$0xf]  ;;  %v4908_v14 = vld [vmem:[%s4887_s6 + $0x14] sm:$0x3] }
  0x14   : > { %v257_v15 = vshrl.u32 %v199_v12, 16  ;;  %v260_v16 = vshll.u32 %v199_v12, 16  ;;  %v6657_v17 = vshll.u32 %v4905_v13, 16  ;;  %v270_v18 = vshrl.u32 %v4905_v13, 16  ;;  %v202_v32 = vld [vmem:[%s4887_s6 + $0x18] sm:$0xf]  ;;  %vm5156_vm10 = vmor %vm1327_vm8, %vm1328_vm9 }
  0x15   : > { %v6656_v20 = vshll.u32 %v4908_v14, 16  ;;  %v3730_v21 = vrot.slane %v199_v12, 9  ;;  %v694_v22 = vrot.slane %v4905_v13, 5  ;;  %v697_v23 = vrot.slane %v4908_v14, 5  ;;  %v203_v36 = vld [vmem:[%s4887_s6 + $0x1c] sm:$0xf] }
  0x16   : > { %v4921_v24 = vrot.slane %v257_v15, 4  ;;  %v4923_v25 = vrot.slane %v260_v16, 5  ;;  %v4925_v26 = vrot.slane %v270_v18, 4  ;;  %v4927_v27 = vrot.slane %v257_v15, 5  ;;  %v204_v39 = vld [vmem:[%s4887_s6 + $0x20] sm:$0x3] }
  0x17   : > { %v695_v28 = vsel %vm4914_vm6, %v3730_v21, %v694_v22  ;;  %v696_v29 = vrot.slane %v694_v22, 4  ;;  %v4931_v30 = vrot.slane %v260_v16, 6  ;;  %v4933_v31 = vrot.slane %v270_v18, 5  ;;  %v4964_v59 = vld [vmem:[%s4887_s6 + $0x24] sm:$0xf] }
  0x18   : > { %6772 = vst [vmem:[#allocation3_spill] sm:$0xff] %v4927_v27  ;;  %v4938_v33 = vrot.slane %v6657_v17, 6  ;;  %v1339_v34 = vshrl.u32 %v4908_v14, 16  ;;  %v4943_v35 = vrot.slane %v6656_v20, 6  ;;  %v281_v37 = vshrl.u32 %v202_v32, 16 }
  0x19   : > { %6773 = vst [vmem:[#allocation4_spill] sm:$0xff] %v4931_v30  ;;  %6774 = vst [vmem:[#allocation5_spill] sm:$0xff] %v4933_v31  ;;  %v698_v38 = vsel %vm4914_vm6, %v696_v29, %v697_v23  ;;  %v284_v40 = vshll.u32 %v202_v32, 16  ;;  %v290_v41 = vshll.u32 %v203_v36, 16  ;;  %v294_v42 = vshrl.u32 %v203_v36, 16 }
  0x1a   : > { %6775 = vst [vmem:[#allocation6_spill] sm:$0xff] %v4938_v33  ;;  %6776 = vst [vmem:[#allocation7_spill] sm:$0xff] %v4943_v35  ;;  %v3746_v43 = vcombine.low %v695_v28, %v698_v38  ;;  %v4949_v44 = vrot.slane %v1339_v34, 5  ;;  %v283_v45 = vrot.slane %v281_v37, 4  ;;  %v300_v46 = vshll.u32 %v204_v39, 16 }
  0x1b   : > { %v286_v47 = vrot.slane %v284_v40, 5  ;;  %v4951_v48 = vrot.slane %v290_v41, 5  ;;  %v296_v49 = vrot.slane %v294_v42, 4  ;;  %v3731_v50 = vrot.slane %v202_v32, 9  ;;  %v4977_v1 = vld [vmem:[%s4887_s6 + $0x28] sm:$0xf] }
  0x1c   : > { %6777 = vst [vmem:[#allocation8_spill] sm:$0xff] %v4949_v44  ;;  %4223 = vmatprep.mubr.msk.bf16.mxu1 %vm853_vm3, %v3746_v43  ;;  %v4954_v51 = vrot.slane %v300_v46, 5  ;;  %v701_v52 = vrot.slane %v203_v36, 5  ;;  %v704_v53 = vrot.slane %v204_v39, 5  ;;  %v4956_v54 = vrot.slane %v281_v37, 5 }
  0x1d   : > { %v287_v55 = vor.u32 %v286_v47, %v283_v45  ;;  %v297_v56 = vor.u32 %v296_v49, %v4951_v48  ;;  %v4959_v57 = vrot.slane %v284_v40, 6  ;;  %v4961_v58 = vrot.slane %v294_v42, 5  ;;  %v4986_v12 = vld [vmem:[%s4887_s6 + $0x2c] sm:$0x3]  ;;  %v4996_v23 = vld [vmem:[%s4887_s6 + $0x30] sm:$0xf] }
  0x1e   : > { %v702_v61 = vsel %vm4914_vm6, %v3731_v50, %v701_v52  ;;  %v703_v62 = vrot.slane %v701_v52, 4  ;;  %v4974_v63 = vrot.slane %v290_v41, 6  ;;  %v1354_v0 = vshrl.u32 %v204_v39, 16  ;;  %6780 = vst [vmem:[#allocation9_spill] sm:$0xff] %v4986_v12  ;;  %6781 = vst [vmem:[#allocation10_spill] sm:$0xff] %v4996_v23 }
  0x1f   : > { %v4979_v2 = vrot.slane %v287_v55, 4  ;;  %v4981_v4 = vrot.slane %v297_v56, 4  ;;  %v4983_v5 = vrot.slane %v300_v46, 6  ;;  %v6655_v15 = vshrl.u32 %v4964_v59, 16  ;;  %v5008_v36 = vld [vmem:[%s4887_s6 + $0x34] sm:$0xf] }
  0x20   : > { %v705_v16 = vsel %vm4914_vm6, %v703_v62, %v704_v53  ;;  %v4991_v18 = vrot.slane %v1354_v0, 5  ;;  %v6654_v21 = vshll.u32 %v4964_v59, 16  ;;  %v6653_v22 = vshll.u32 %v4977_v1, 16  ;;  %6782 = vst [vmem:[#allocation11_spill] sm:$0xff] %v5008_v36  ;;  %v5011_v37 = vld [vmem:[%s4887_s6 + $0x38] sm:$0x3] }
  0x21   : > { %v3747_v32 = vcombine.low %v702_v61, %v705_v16  ;;  %v6652_v34 = vshrl.u32 %v4977_v1, 16  ;;  %6783 = vst [vmem:[#allocation12_spill] sm:$0xff] %v5011_v37  ;;  %v6651_v38 = vshll.u32 %v4986_v12, 16  ;;  %v3732_v39 = vrot.slane %v4964_v59, 9  ;;  %v5018_v42 = vld [vmem:[%s4887_s6 + $0x3c] sm:$0xf] }
  0x22   : > { %v708_v40 = vrot.slane %v4977_v1, 5  ;;  %v711_v41 = vrot.slane %v4986_v12, 5  ;;  %v1360_v43 = vrot.slane %v6655_v15, 5  ;;  %v1361_v45 = vrot.slane %v6654_v21, 6  ;;  %v5031_v49 = vld [vmem:[%s4887_s6 + $0x40] sm:$0xf] }
  0x23   : > { %4359 = vmatprep.mubr.msk.bf16.mxu0 %vm853_vm3, %v3747_v32  ;;  %4224 = vmatmul.mubr.msk.bf16.vlgmr.msra.gmra.mrb[0].mxu1 %vm853_vm3, %v3747_v32  ;;  %v1364_v46 = vrot.slane %v6652_v34, 5  ;;  %v1365_v47 = vrot.slane %v6653_v22, 6  ;;  %6784 = vst [vmem:[#allocation13_spill] sm:$0xff] %v5031_v49  ;;  %v5034_v50 = vld [vmem:[%s4887_s6 + $0x44] sm:$0x3]  ;;  %v1369_v55 = vshrl.u32 %v4986_v12, 16 }
  0x24   : > { %6785 = vst [vmem:[#allocation14_spill] sm:$0xff] %v5034_v50  ;;  %4256 = vmatpush3.bf16.msra.mxu1 %v4890_v8  ;;  %v709_v52 = vsel %vm4914_vm6, %v3732_v39, %v708_v40  ;;  %v710_v53 = vrot.slane %v708_v40, 4  ;;  %v5042_v56 = vrot.slane %v6651_v38, 6  ;;  %v5045_v61 = vld [vmem:[%s4887_s6 + $0x48] sm:$0xf]  ;;  %v1362_v62 = vor.u32 %v1361_v45, %v1360_v43 }
  0x25   : > { %6786 = vst [vmem:[#allocation15_spill] sm:$0xff] %v5045_v61  ;;  %v5047_v0 = vor.u32 %v1365_v47, %v1364_v46  ;;  %v3733_v8 = vrot.slane %v4996_v23, 9  ;;  %v715_v16 = vrot.slane %v5008_v36, 5  ;;  %v5052_v32 = vld [vmem:[%s4887_s6 + $0x4c] sm:$0xf]  ;;  %4787 = vmatprep.subr.msk.bf16.mxu1 %vm902_vm0, %v4880_v7  ;;  %v5061_v43 = vrot.slane %v1369_v55, 5 }
  0x26   : > { %v5055_v39 = vld [vmem:[%s4887_s6 + $0x50] sm:$0x3]  ;;  %v712_v40 = vsel %vm4914_vm6, %v710_v53, %v711_v41  ;;  %v718_v45 = vrot.slane %v5011_v37, 5  ;;  %v3734_v46 = vrot.slane %v5018_v42, 9  ;;  %v5066_v47 = vld [vmem:[%s4887_s6 + $0x54] sm:$0xf] }
  0x27   : > { %6787 = vst [vmem:[#allocation16_spill] sm:$0xff] %v5066_v47  ;;  %v5068_v38 = vcombine.low %v709_v52, %v712_v40  ;;  %v5070_v34 = vrot.slane %v1362_v62, 4  ;;  %v716_v7 = vsel %vm4914_vm6, %v3733_v8, %v715_v16  ;;  %v717_v22 = vrot.slane %v715_v16, 4  ;;  %v5075_v21 = vld [vmem:[%s4887_s6 + $0x58] sm:$0xf] }
  0x28   : > { %v5078_v41 = vld [vmem:[%s4887_s6 + $0x5c] sm:$0x3]  ;;  %v722_v55 = vrot.slane %v5031_v49, 5  ;;  %v725_v52 = vrot.slane %v5034_v50, 5  ;;  %v3735_v62 = vrot.slane %v5045_v61, 9  ;;  %v729_v16 = vrot.slane %v5052_v32, 5 }
  0x29   : > { %6788 = vst [vmem:[#allocation17_spill] sm:$0xff] %v5068_v38  ;;  %v5086_v40 = vld [vmem:[%s4887_s6 + $0x60] sm:$0xf]  ;;  %4360 = vmatmul.mubr.msk.bf16.vlgmr.msra.gmra.mrb[0].mxu0 %vm853_vm3, %v5068_v38  ;;  %4227 = vmatprep.mubr.msk.bf16.mxu1 %vm853_vm3, %v5068_v38  ;;  %v719_v8 = vsel %vm4914_vm6, %v717_v22, %v718_v45  ;;  %v732_v15 = vrot.slane %v5055_v39, 5  ;;  %v3736_v28 = vrot.slane %v5066_v47, 9  ;;  %v736_v22 = vrot.slane %v5075_v21, 5 }
  0x2a   : > { %6789 = vst [vmem:[#allocation18_spill] sm:$0xff] %v5086_v40  ;;  %v5098_v29 = vld [vmem:[%s4887_s6 + $0x64] sm:$0xf]  ;;  %4392 = vmatpush3.bf16.msra.mxu0 %v4893_v9  ;;  %v5101_v20 = vcombine.low %v716_v7, %v719_v8  ;;  %v723_v17 = vsel %vm4914_vm6, %v3734_v46, %v722_v55  ;;  %v724_v53 = vrot.slane %v722_v55, 4  ;;  %v5107_v45 = vld [vmem:[%s4887_s6 + $0x68] sm:$0x3]  ;;  %v730_v38 = vsel %vm4914_vm6, %v3735_v62, %v729_v16 }
  0x2b   : > { %6791 = vst [vmem:[#allocation20_spill] sm:$0xff] %v5107_v45  ;;  %v5110_v3 = vld [vmem:[%s4887_s6 + $0x6c] sm:$0xf]  ;;  %v731_v35 = vrot.slane %v729_v16, 4  ;;  %v739_v9 = vrot.slane %v5078_v41, 5  ;;  %v3737_v7 = vrot.slane %v5086_v40, 9  ;;  %4792 = vmatprep.subr.msk.bf16.mxu0 %vm902_vm0, %v4875_v6  ;;  %v737_v55 = vsel %vm4914_vm6, %v3736_v28, %v736_v22 }
  0x2c   : > { %6790 = vst [vmem:[#allocation19_spill] sm:$0xff] %v5101_v20  ;;  %4363 = vmatprep.mubr.msk.bf16.mxu0 %vm853_vm3, %v5101_v20  ;;  %4228 = vmatmul.mubr.msk.bf16.gmra.mrb[4].mxu1 %vm853_vm3, %v5101_v20  ;;  %v726_v46 = vsel %vm4914_vm6, %v724_v53, %v725_v52  ;;  %v738_v62 = vrot.slane %v736_v22, 4  ;;  %v743_v8 = vrot.slane %v5098_v29, 5  ;;  %v5128_v16 = vld [vmem:[%s4887_s6 + $0x70] sm:$0xf]  ;;  %v746_v33 = vrot.slane %v5107_v45, 5 }
  0x2d   : > { %v5131_v44 = vld [vmem:[%s4887_s6 + $0x74] sm:$0x3]  ;;  %v5133_v6 = vcombine.low %v723_v17, %v726_v46  ;;  %v733_v20 = vsel %vm4914_vm6, %v731_v35, %v732_v15  ;;  %v3738_v53 = vrot.slane %v5110_v3, 9  ;;  %v5140_v52 = vld [vmem:[%s4887_s6 + $0x78] sm:$0xf]  ;;  %v750_v15 = vrot.slane %v5128_v16, 5 }
  0x2e   : > { %v5142_v28 = vcombine.low %v730_v38, %v733_v20  ;;  %v740_v22 = vsel %vm4914_vm6, %v738_v62, %v739_v9  ;;  %v744_v17 = vsel %vm4914_vm6, %v3737_v7, %v743_v8  ;;  %v745_v46 = vrot.slane %v743_v8, 4  ;;  %v5163_v9 = vld [vmem:[%s4887_s6 + $0x7c] sm:$0xf]  ;;  %v5166_v7 = vld [vmem:[%s4887_s6 + $0x80] sm:$0x3] }
  0x2f   : > { %6792 = vst [vmem:[#allocation21_spill] sm:$0xff] %v5133_v6  ;;  %4231 = vmatprep.mubr.msk.bf16.mxu1 %vm853_vm3, %v5133_v6  ;;  %v5150_v35 = vcombine.low %v737_v55, %v740_v22  ;;  %v753_v31 = vrot.slane %v5131_v44, 5  ;;  %v1347_v38 = vor.u32 %v4959_v57, %v4956_v54  ;;  %v1351_v62 = vor.u32 %v4974_v63, %v4961_v58  ;;  %v5176_v30 = vld [vmem:[%s4887_s6 + $0x84] sm:$0xf]  ;;  %v5185_v27 = vld [vmem:[%s4887_s6 + $0x88] sm:$0xf] }
  0x30   : > { %6793 = vst [vmem:[#allocation22_spill] sm:$0xff] %v5142_v28  ;;  %v747_v55 = vsel %vm4914_vm6, %v745_v46, %v746_v33  ;;  %v1358_v8 = vor.u32 %v4983_v5, %v4991_v18  ;;  %v3739_v22 = vrot.slane %v5140_v52, 9  ;;  %v751_v57 = vsel %vm4914_vm6, %v3738_v53, %v750_v15 }
  0x31   : > { %6794 = vst [vmem:[#allocation23_spill] sm:$0xff] %v5150_v35  ;;  %4364 = vmatmul.mubr.msk.bf16.gmra.mrb[4].mxu0 %vm853_vm3, %v5133_v6  ;;  %v5180_v54 = vcombine.low %v744_v17, %v747_v55  ;;  %v752_v33 = vrot.slane %v750_v15, 4  ;;  %v1348_v46 = vrot.slane %v1347_v38, 4  ;;  %v1353_v58 = vrot.slane %v1351_v62, 4  ;;  %v5196_v17 = vld [vmem:[%s4887_s6 + $0x8c] sm:$0x3] }
  0x32   : > { %4367 = vmatprep.mubr.msk.bf16.mxu0 %vm853_vm3, %v5142_v28  ;;  %v757_v63 = vrot.slane %v5163_v9, 5  ;;  %v760_v5 = vrot.slane %v5166_v7, 5  ;;  %v1367_v18 = vsel %vm5156_vm10, %v5070_v34, %v5047_v0  ;;  %v1368_v38 = vrot.slane %v5047_v0, 4 }
  0x33   : > { %6797 = vst [vmem:[#allocation24_spill] sm:$0xff] %v5180_v54  ;;  %v754_v53 = vsel %vm4914_vm6, %v752_v33, %v753_v31  ;;  %v1352_v15 = vsel %vm5156_vm10, %v1348_v46, %v1351_v62  ;;  %v3740_v55 = vrot.slane %v5176_v30, 9  ;;  %v1359_v34 = vsel %vm5156_vm10, %v1353_v58, %v1358_v8  ;;  %v6938_v20 = vld [vmem:[#allocation19_spill] sm:$0xff] }
  0x34   : > { %4232 = vmatmul.mubr.msk.bf16.gmra.mrb[8].mxu1 %vm853_vm3, %v5142_v28  ;;  %v5206_v6 = vcombine.low %v751_v57, %v754_v53  ;;  %v758_v12 = vsel %vm4914_vm6, %v3739_v22, %v757_v63  ;;  %v759_v31 = vrot.slane %v757_v63, 4  ;;  %v5214_v0 = vcombine.low %v1352_v15, %v1359_v34  ;;  %v5230_v53 = vld [vmem:[%s4887_s6 + $0x90] sm:$0xf]  ;;  %v5238_v34 = vld [vmem:[%s4887_s6 + $0x94] sm:$0xf] }
  0x35   : > { %4235 = vmatprep.mubr.msk.bf16.mxu1 %vm853_vm3, %v5150_v35  ;;  %v6800_v62 = vor.u32 %v5042_v56, %v5061_v43  ;;  %v764_v33 = vrot.slane %v5185_v27, 5  ;;  %v767_v8 = vrot.slane %v5196_v17, 5  ;;  %v6663_v58 = vshrl.u32 %v4996_v23, 16 }
  0x36   : > { %6798 = vst [vmem:[#allocation25_spill] sm:$0xff] %v5206_v6  ;;  %6799 = vst [vmem:[#allocation26_spill] sm:$0xff] %v5214_v0  ;;  %v761_v22 = vsel %vm4914_vm6, %v759_v31, %v760_v5  ;;  %v6664_v63 = vshll.u32 %v4996_v23, 16  ;;  %v6670_v5 = vshrl.u32 %v5008_v36, 16  ;;  %v6677_v23 = vshrl.u32 %v5031_v49, 16 }
  0x37   : > { %v1374_v57 = vsel %vm5156_vm10, %v1368_v38, %v6800_v62  ;;  %v5232_v56 = vcombine.low %v758_v12, %v761_v22  ;;  %v765_v43 = vsel %vm4914_vm6, %v3740_v55, %v764_v33  ;;  %v766_v15 = vrot.slane %v764_v33, 4  ;;  %v5247_v12 = vld [vmem:[%s4887_s6 + $0x98] sm:$0x3] }
  0x38   : > { %v5225_v46 = vcombine.low %v1367_v18, %v1374_v57  ;;  %v6666_v38 = vshll.u32 %v5008_v36, 16  ;;  %v1375_v31 = vrot.slane %v6663_v58, 5  ;;  %v1376_v62 = vrot.slane %v6664_v63, 6  ;;  %6803 = vst [vmem:[#allocation29_spill] sm:$0xff] %v5247_v12 }
  0x39   : > { %6802 = vst [vmem:[#allocation28_spill] sm:$0xff] %v5232_v56  ;;  %4368 = vmatmul.mubr.msk.bf16.gmra.mrb[8].mxu0 %vm853_vm3, %v5150_v35  ;;  %v768_v55 = vsel %vm4914_vm6, %v766_v15, %v767_v8  ;;  %v1384_v33 = vshrl.u32 %v5011_v37, 16  ;;  %v3741_v22 = vrot.slane %v5230_v53, 9  ;;  %v1379_v18 = vrot.slane %v6670_v5, 5 }
  0x3a   : > { %6801 = vst [vmem:[#allocation27_spill] sm:$0xff] %v5225_v46  ;;  %v1380_v57 = vrot.slane %v6666_v38, 6  ;;  %4371 = vmatprep.mubr.msk.bf16.mxu0 %vm853_vm3, %v5180_v54  ;;  %v5259_v58 = vcombine.low %v765_v43, %v768_v55  ;;  %v1377_v63 = vor.u32 %v1376_v62, %v1375_v31  ;;  %v6805_v35 = vshll.u32 %v5011_v37, 16  ;;  %v5278_v37 = vld [vmem:[%s4887_s6 + $0x9c] sm:$0xf] }
  0x3b   : > { %v1386_v15 = vrot.slane %v1384_v33, 5  ;;  %v771_v38 = vrot.slane %v5238_v34, 5  ;;  %v774_v28 = vrot.slane %v5247_v12, 5  ;;  %v6806_v55 = vshrl.u32 %v5018_v42, 16 }
  0x3c   : > { %6804 = vst [vmem:[#allocation30_spill] sm:$0xff] %v5259_v58  ;;  %v1387_v8 = vrot.slane %v6805_v35, 6  ;;  %4236 = vmatmul.mubr.msk.bf16.gmra.mrb[12].mxu1 %vm853_vm3, %v5180_v54  ;;  %v1378_v43 = vrot.slane %v1377_v63, 4  ;;  %v1381_v31 = vor.u32 %v1380_v57, %v1379_v18  ;;  %v5286_v54 = vld [vmem:[%s4887_s6 + $0xa0] sm:$0xf]  ;;  %v6808_v36 = vshll.u32 %v5031_v49, 16 }
  0x3d   : > { %4239 = vmatprep.mubr.msk.bf16.mxu1 %vm853_vm3, %v5206_v6  ;;  %v772_v33 = vsel %vm4914_vm6, %v3741_v22, %v771_v38  ;;  %v773_v5 = vrot.slane %v771_v38, 4  ;;  %v1390_v62 = vrot.slane %v6806_v55, 5  ;;  %v6807_v38 = vshll.u32 %v5018_v42, 16 }
  0x3e   : > { %v1388_v35 = vor.u32 %v1387_v8, %v1386_v15  ;;  %v1382_v63 = vsel %vm5156_vm10, %v1378_v43, %v1381_v31  ;;  %v1383_v18 = vrot.slane %v1381_v31, 4  ;;  %v1394_v15 = vrot.slane %v6677_v23, 5  ;;  %v5297_v31 = vld [vmem:[%s4887_s6 + $0xa4] sm:$0x3] }
  0x3f   : > { %v775_v8 = vsel %vm4914_vm6, %v773_v5, %v774_v28  ;;  %v1391_v22 = vrot.slane %v6807_v38, 6  ;;  %v1395_v43 = vrot.slane %v6808_v36, 6  ;;  %v1399_v12 = vshrl.u32 %v5034_v50, 16 }
  0x40   : > { %v1389_v57 = vsel %vm5156_vm10, %v1383_v18, %v1388_v35  ;;  %v5301_v55 = vcombine.low %v772_v33, %v775_v8  ;;  %v6810_v28 = vshll.u32 %v5034_v50, 16  ;;  %v3742_v36 = vrot.slane %v5278_v37, 9 }
  0x41   : > { %4372 = vmatmul.mubr.msk.bf16.gmra.mrb[12].mxu0 %vm853_vm3, %v5206_v6  ;;  %v5308_v38 = vcombine.low %v1382_v63, %v1389_v57  ;;  %v1392_v23 = vor.u32 %v1391_v22, %v1390_v62  ;;  %v1396_v49 = vor.u32 %v1395_v43, %v1394_v15  ;;  %v1401_v35 = vrot.slane %v1399_v12, 5  ;;  %v5324_v43 = vld [vmem:[%s4887_s6 + $0xa8] sm:$0xf]  ;;  %v5347_v62 = vld [vmem:[%s4887_s6 + $0xb0] sm:$0x3] }
  0x42   : > { %6809 = vst [vmem:[#allocation31_spill] sm:$0xff] %v5301_v55  ;;  %v1402_v5 = vrot.slane %v6810_v28, 6  ;;  %4393 = vmatprep.mubr.msk.bf16.mxu0 %vm853_vm3, %v5214_v0  ;;  %v778_v33 = vrot.slane %v5286_v54, 5  ;;  %v781_v18 = vrot.slane %v5297_v31, 5  ;;  %v6685_v8 = vshrl.u32 %v5045_v61, 16 }
  0x43   : > { %6811 = vst [vmem:[#allocation32_spill] sm:$0xff] %v5308_v38  ;;  %v1393_v28 = vrot.slane %v1392_v23, 4  ;;  %v1398_v6 = vrot.slane %v1396_v49, 4  ;;  %vm3311_vm13 = vsmask.f32 1280  ;;  %vm3618_vm15 = vcmask 519169  }
  0x44   : > { %4240 = vmatmul.mubr.msk.bf16.gmra.mrb[16].mxu1 %vm853_vm3, %v5232_v56  ;;  %v1403_v57 = vor.u32 %v1402_v5, %v1401_v35  ;;  %v779_v12 = vsel %vm4914_vm6, %v3742_v36, %v778_v33  ;;  %v780_v22 = vrot.slane %v778_v33, 4  ;;  %v1405_v63 = vrot.slane %v6685_v8, 5  ;;  %v5336_v36 = vld [vmem:[%s4887_s6 + $0xac] sm:$0xf]  ;;  %vm6332_vm14 = vmand %vm3310_vm12, %vm3311_vm13 }
  0x45   : > { %4243 = vmatprep.mubr.msk.bf16.mxu1 %vm853_vm3, %v5259_v58  ;;  %v1397_v23 = vsel %vm5156_vm10, %v1393_v28, %v1396_v49  ;;  %v6812_v5 = vshll.u32 %v5045_v61, 16  ;;  %v6813_v58 = vshrl.u32 %v5052_v32, 16  ;;  %v6814_v49 = vshll.u32 %v5052_v32, 16 }
  0x46   : > { %v1404_v33 = vsel %vm5156_vm10, %v1398_v6, %v1403_v57  ;;  %v782_v15 = vsel %vm4914_vm6, %v780_v22, %v781_v18  ;;  %v1414_v61 = vshrl.u32 %v5055_v39, 16  ;;  %v6817_v6 = vshll.u32 %v5055_v39, 16  ;;  %v5361_v22 = vld [vmem:[%s6647_s1 + $0x1c] sm:$0xf] }
  0x47   : > { %v1406_v35 = vrot.slane %v6812_v5, 6  ;;  %v1409_v56 = vrot.slane %v6813_v58, 5  ;;  %v1410_v28 = vrot.slane %v6814_v49, 6  ;;  %v5349_v8 = vcombine.low %v1397_v23, %v1404_v33  ;;  %6818 = vst [vmem:[#allocation35_spill] sm:$0xff] %v5361_v22 }
  0x48   : > { %v5351_v0 = vcombine.low %v779_v12, %v782_v15  ;;  %v1417_v57 = vrot.slane %v6817_v6, 6  ;;  %v3743_v18 = vrot.slane %v5324_v43, 9  ;;  %v785_v58 = vrot.slane %v5336_v36, 5  ;;  %v5381_v15 = vld [vmem:[%s4887_s6 + $0xb8] sm:$0xf] }
  0x49   : > { %6815 = vst [vmem:[#allocation33_spill] sm:$0xff] %v5349_v8  ;;  %v1407_v5 = vor.u32 %v1406_v35, %v1405_v63  ;;  %v1411_v50 = vor.u32 %v1410_v28, %v1409_v56  ;;  %4394 = vmatmul.mubr.msk.bf16.vlgmr.msra.gmra.mrb[0].mxu0 %vm853_vm3, %v5225_v46  ;;  %v1416_v12 = vrot.slane %v1414_v61, 5  ;;  %v788_v56 = vrot.slane %v5347_v62, 5 }
  0x4a   : > { %6816 = vst [vmem:[#allocation34_spill] sm:$0xff] %v5351_v0  ;;  %4426 = vmatpush3.bf16.msra.mxu0 %v4897_v10  ;;  %4397 = vmatprep.mubr.msk.bf16.mxu0 %vm853_vm3, %v5308_v38  ;;  %v786_v35 = vsel %vm4914_vm6, %v3743_v18, %v785_v58  ;;  %v787_v33 = vrot.slane %v785_v58, 4  ;;  %v6694_v49 = vshll.u32 %v5066_v47, 16  ;;  %v5378_v10 = vld [vmem:[%s4887_s6 + $0xb4] sm:$0xf]  ;;  %v6824_v46 = vshll.u32 %v5078_v41, 16 }
  0x4b   : > { %v1408_v63 = vrot.slane %v1407_v5, 4  ;;  %v1413_v23 = vrot.slane %v1411_v50, 4  ;;  %v1418_v28 = vor.u32 %v1417_v57, %v1416_v12  ;;  %4793 = vmatprep.subr.msk.bf16.mxu0 %vm902_vm0, %v5361_v22  ;;  %v6819_v57 = vshrl.u32 %v5066_v47, 16  ;;  %v5395_v12 = vld [vmem:[%s4887_s6 + $0xbc] sm:$0x3] }
  0x4c   : > { %4244 = vmatmul.mubr.msk.bf16.gmra.mrb[20].mxu1 %vm853_vm3, %v5301_v55  ;;  %v789_v18 = vsel %vm4914_vm6, %v787_v33, %v788_v56  ;;  %v6821_v56 = vshrl.u32 %v5075_v21, 16  ;;  %v1432_v22 = vrot.slane %v6824_v46, 6  ;;  %v3744_v47 = vrot.slane %v5378_v10, 9 }
  0x4d   : > { %v1412_v61 = vsel %vm5156_vm10, %v1408_v63, %v1411_v50  ;;  %v1420_v58 = vrot.slane %v6819_v57, 5  ;;  %v1421_v63 = vrot.slane %v6694_v49, 6  ;;  %4247 = vmatprep.mubr.msk.bf16.mxu1 %vm853_vm3, %v5351_v0  ;;  %v1419_v5 = vsel %vm5156_vm10, %v1413_v23, %v1418_v28 }
  0x4e   : > { %v5401_v6 = vcombine.low %v786_v35, %v789_v18  ;;  %v1424_v33 = vrot.slane %v6821_v56, 5  ;;  %v6822_v50 = vshll.u32 %v5075_v21, 16  ;;  %v5407_v57 = vcombine.low %v1412_v61, %v1419_v5  ;;  %v5432_v5 = vld [vmem:[%s4887_s6 + $0xc4] sm:$0xf] }
  0x4f   : > { %v1422_v38 = vor.u32 %v1421_v63, %v1420_v58  ;;  %v1429_v49 = vshrl.u32 %v5078_v41, 16  ;;  %v792_v23 = vrot.slane %v5381_v15, 5  ;;  %v795_v35 = vrot.slane %v5395_v12, 5 }
  0x50   : > { %6820 = vst [vmem:[#allocation36_spill] sm:$0xff] %v5401_v6  ;;  %v1425_v55 = vrot.slane %v6822_v50, 6  ;;  %6823 = vst [vmem:[#allocation37_spill] sm:$0xff] %v5407_v57  ;;  %v6704_v61 = vshrl.u32 %v5086_v40, 16  ;;  %v6711_v63 = vshrl.u32 %v5098_v29, 16  ;;  %v6825_v58 = vshll.u32 %v5086_v40, 16 }
  0x51   : > { %v1423_v28 = vrot.slane %v1422_v38, 4  ;;  %v1431_v18 = vrot.slane %v1429_v49, 5  ;;  %4398 = vmatmul.mubr.msk.bf16.gmra.mrb[4].mxu0 %vm853_vm3, %v5349_v8  ;;  %v794_v50 = vrot.slane %v792_v23, 4  ;;  %vm3487_vm1 = vcmask 1044484  }
  0x52   : > { %v1426_v0 = vor.u32 %v1425_v55, %v1424_v33  ;;  %v793_v55 = vsel %vm4914_vm6, %v3744_v47, %v792_v23  ;;  %4401 = vmatprep.mubr.msk.bf16.mxu0 %vm853_vm3, %v5407_v57  ;;  %v5429_v33 = vld [vmem:[%s4887_s6 + $0xc0] sm:$0xf]  ;;  %v1435_v23 = vrot.slane %v6704_v61, 5  ;;  %v1436_v57 = vrot.slane %v6825_v58, 6 }
  0x53   : > { %v1433_v49 = vor.u32 %v1432_v22, %v1431_v18  ;;  %v796_v47 = vsel %vm4914_vm6, %v794_v50, %v795_v35  ;;  %v1439_v35 = vrot.slane %v6711_v63, 5  ;;  %v1444_v50 = vshrl.u32 %v5107_v45, 16 }
  0x54   : > { %v1428_v46 = vrot.slane %v1426_v0, 4  ;;  %v1427_v38 = vsel %vm5156_vm10, %v1423_v28, %v1426_v0  ;;  %v6826_v0 = vshll.u32 %v5098_v29, 16  ;;  %v5443_v28 = vld [vmem:[%s4887_s6 + $0xc8] sm:$0x3]  ;;  %4248 = vmatmul.mubr.msk.bf16.gmra.mrb[24].mxu1 %vm853_vm3, %v5401_v6  ;;  %v5449_v56 = vcombine.low %v793_v55, %v796_v47 }
  0x55   : > { %v1437_v58 = vor.u32 %v1436_v57, %v1435_v23  ;;  %v3745_v40 = vrot.slane %v5429_v33, 9  ;;  %v799_v55 = vrot.slane %v5432_v5, 5  ;;  %v6713_v63 = vshrl.u32 %v5110_v3, 16 }
  0x56   : > { %v1440_v22 = vrot.slane %v6826_v0, 6  ;;  %v1434_v18 = vsel %vm5156_vm10, %v1428_v46, %v1433_v49  ;;  %6827 = vst [vmem:[#allocation38_spill] sm:$0xff] %v5449_v56  ;;  %v6828_v0 = vshll.u32 %v5107_v45, 16  ;;  %4251 = vmatprep.mubr.msk.bf16.mxu1 %vm853_vm3, %v5449_v56  ;;  %v1446_v46 = vrot.slane %v1444_v50, 5 }
  0x57   : > { %v5454_v61 = vcombine.low %v1427_v38, %v1434_v18  ;;  %v802_v49 = vrot.slane %v5443_v28, 5  ;;  %v1438_v47 = vrot.slane %v1437_v58, 4  ;;  %v6716_v38 = vshll.u32 %v5110_v3, 16 }
  0x58   : > { %v1447_v8 = vrot.slane %v6828_v0, 6  ;;  %v1441_v6 = vor.u32 %v1440_v22, %v1439_v35  ;;  %v6718_v57 = vshll.u32 %v5128_v16, 16  ;;  %v800_v0 = vsel %vm4914_vm6, %v3745_v40, %v799_v55 }
  0x59   : > { %v801_v45 = vrot.slane %v799_v55, 4  ;;  %4402 = vmatmul.mubr.msk.bf16.gmra.mrb[8].mxu0 %vm853_vm3, %v5454_v61  ;;  %v6717_v35 = vshrl.u32 %v5128_v16, 16  ;;  %v1450_v58 = vrot.slane %v6713_v63, 5  ;;  %v1459_v63 = vshrl.u32 %v5131_v44, 16 }
  0x5a   : > { %v1443_v23 = vrot.slane %v1441_v6, 4  ;;  %v1448_v18 = vor.u32 %v1447_v8, %v1446_v46  ;;  %v1442_v22 = vsel %vm5156_vm10, %v1438_v47, %v1441_v6  ;;  %v1451_v46 = vrot.slane %v6716_v38, 6 }
  0x5b   : > { %v803_v40 = vsel %vm4914_vm6, %v801_v45, %v802_v49  ;;  %v1455_v55 = vrot.slane %v6718_v57, 6  ;;  %v1454_v50 = vrot.slane %v6717_v35, 5  ;;  %v263_v45 = vor.u32 %v4923_v25, %v4921_v24 }
  0x5c   : > { %v1449_v8 = vsel %vm5156_vm10, %v1443_v23, %v1448_v18  ;;  %v5486_v47 = vcombine.low %v800_v0, %v803_v40  ;;  %v1452_v56 = vor.u32 %v1451_v46, %v1450_v58  ;;  %v6830_v23 = vshll.u32 %v5131_v44, 16 }
  0x5d   : > { %v5484_v6 = vcombine.low %v1442_v22, %v1449_v8  ;;  %v6831_v49 = vshll.u32 %v4905_v13, 16  ;;  %v1456_v0 = vor.u32 %v1455_v55, %v1454_v50  ;;  %v1461_v22 = vrot.slane %v1459_v63, 5 }
  0x5e   : > { %6829 = vst [vmem:[#allocation39_spill] sm:$0xff] %v5486_v47  ;;  %v1462_v18 = vrot.slane %v6830_v23, 6  ;;  %4252 = vmatmul.mubr.msk.bf16.gmra.mrb[28].mxu1 %vm853_vm3, %v5486_v47  ;;  %v6832_v8 = vshll.u32 %v4908_v14, 16  ;;  %v6732_v40 = vshrl.u32 %v5140_v52, 16  ;;  %v1453_v46 = vrot.slane %v1452_v56, 4 }
  0x5f   : > { %v268_v38 = vrot.slane %v6831_v49, 5  ;;  %4405 = vmatprep.mubr.msk.bf16.mxu0 %vm853_vm3, %v5484_v6  ;;  %v264_v23 = vrot.slane %v263_v45, 4  ;;  %v6731_v13 = vshll.u32 %v5140_v52, 16  ;;  %v1458_v25 = vrot.slane %v1456_v0, 4 }
  0x60   : > { %v278_v58 = vrot.slane %v6832_v8, 5  ;;  %v1463_v49 = vor.u32 %v1462_v18, %v1461_v22  ;;  %v6730_v35 = vshll.u32 %v5163_v9, 16  ;;  %v6725_v57 = vshrl.u32 %v5163_v9, 16 }
  0x61   : > { %v273_v24 = vor.u32 %v4925_v26, %v268_v38  ;;  %v1457_v63 = vsel %vm5156_vm10, %v1453_v46, %v1456_v0  ;;  %v269_v14 = vsel %vm4968_vm7, %v264_v23, %v268_v38  ;;  %v6723_v56 = vshll.u32 %v5166_v7, 16 }
  0x62   : > { %v1464_v26 = vsel %vm5156_vm10, %v1458_v25, %v1463_v49  ;;  %v1465_v55 = vrot.slane %v6732_v40, 5  ;;  %v1466_v18 = vrot.slane %v6731_v13, 6  ;;  %v1469_v45 = vrot.slane %v6725_v57, 5  ;;  %v6846_v13 = vld [vmem:[#allocation11_spill] sm:$0xff] }
  0x63   : > { %v274_v50 = vrot.slane %v273_v24, 4  ;;  %v5521_v22 = vcombine.low %v1457_v63, %v1464_v26  ;;  %v1470_v0 = vrot.slane %v6730_v35, 6  ;;  %v1474_v8 = vshrl.u32 %v5166_v7, 16 }
  0x64   : > { %v1467_v23 = vor.u32 %v1466_v18, %v1465_v55  ;;  %v1477_v24 = vrot.slane %v6723_v56, 6  ;;  %v6833_v25 = vsel %vm4968_vm7, %v4981_v4, %v4954_v51  ;;  %v6719_v26 = vshll.u32 %v5176_v30, 16 }
  0x65   : > { %v279_v38 = vsel %vm4968_vm7, %v274_v50, %v278_v58  ;;  %v6834_v58 = vsel %vm4968_vm7, %v4979_v2, %v4951_v48  ;;  %4406 = vmatmul.mubr.msk.bf16.gmra.mrb[12].mxu0 %vm853_vm3, %v5521_v22  ;;  %v1471_v63 = vor.u32 %v1470_v0, %v1469_v45  ;;  %v6722_v50 = vshrl.u32 %v5176_v30, 16  ;;  %v5553_v2 = vld [vmem:[%s6647_s1 + $0xc] sm:$0xf] }
  0x66   : > { %v3778_v46 = vcombine.low %v269_v14, %v279_v38  ;;  %v5540_v49 = vcombine.low %v6834_v58, %v6833_v25  ;;  %v1476_v14 = vrot.slane %v1474_v8, 5  ;;  %v1468_v55 = vrot.slane %v1467_v23, 4 }
  0x67   : > { %v6721_v51 = vshll.u32 %v5185_v27, 16  ;;  %v6720_v4 = vshrl.u32 %v5185_v27, 16  ;;  %v6724_v48 = vshll.u32 %v5196_v17, 16  ;;  %v1473_v18 = vrot.slane %v1471_v63, 4 }
  0x68   : > { %6835 = vst [vmem:[#allocation40_spill] sm:$0xff] %v5540_v49  ;;  %4257 = vmatprep.mubr.msk.bf16.mxu1 %vm853_vm3, %v3778_v46  ;;  %v1478_v45 = vor.u32 %v1477_v24, %v1476_v14  ;;  %v1480_v38 = vrot.slane %v6722_v50, 5  ;;  %v1481_v0 = vrot.slane %v6719_v26, 6  ;;  %v1472_v8 = vsel %vm5156_vm10, %v1468_v55, %v1471_v63 }
  0x69   : > { %4258 = vmatmul.mubr.msk.bf16.vlgmr.msra.gmra.mrb[0].mxu1 %vm853_vm3, %v5540_v49  ;;  %v1484_v46 = vrot.slane %v6720_v4, 5  ;;  %v1485_v23 = vrot.slane %v6721_v51, 6  ;;  %v1489_v24 = vshrl.u32 %v5196_v17, 16  ;;  %v1492_v14 = vrot.slane %v6724_v48, 6  ;;  %v6840_v48 = vld [vmem:[#allocation9_spill] sm:$0xff] }
  0x6a   : > { %4290 = vmatpush3.bf16.msra.mxu1 %v4901_v11  ;;  %v1479_v25 = vsel %vm5156_vm10, %v1473_v18, %v1478_v45  ;;  %v1482_v58 = vor.u32 %v1481_v0, %v1480_v38  ;;  %v6836_v26 = vshrl.u32 %v4964_v59, 16  ;;  %v6837_v51 = vshll.u32 %v4964_v59, 16 }
  0x6b   : > { %4788 = vmatprep.subr.msk.bf16.mxu1 %vm902_vm0, %v5553_v2  ;;  %v5577_v11 = vcombine.low %v1472_v8, %v1479_v25  ;;  %v1486_v55 = vor.u32 %v1485_v23, %v1484_v46  ;;  %v1491_v4 = vrot.slane %v1489_v24, 5  ;;  %v6838_v18 = vshll.u32 %v4977_v1, 16 }
  0x6c   : > { %v307_v63 = vrot.slane %v6836_v26, 4  ;;  %v310_v50 = vrot.slane %v6837_v51, 5  ;;  %v1483_v56 = vrot.slane %v1482_v58, 4  ;;  %v6839_v38 = vshrl.u32 %v4977_v1, 16 }
  0x6d   : > { %v316_v45 = vrot.slane %v6838_v18, 5  ;;  %v6841_v57 = vshll.u32 %v6840_v48, 16  ;;  %4409 = vmatprep.mubr.msk.bf16.mxu0 %vm853_vm3, %v5577_v11  ;;  %v1488_v8 = vrot.slane %v1486_v55, 4  ;;  %v1493_v25 = vor.u32 %v1492_v14, %v1491_v4  ;;  %v6842_v18 = vld [vmem:[#allocation29_spill] sm:$0xff] }
  0x6e   : > { %v320_v0 = vrot.slane %v6839_v38, 4  ;;  %v311_v46 = vor.u32 %v310_v50, %v307_v63  ;;  %v6729_v23 = vshrl.u32 %v5230_v53, 16  ;;  %v1487_v59 = vsel %vm5156_vm10, %v1483_v56, %v1486_v55 }
  0x6f   : > { %v326_v26 = vrot.slane %v6841_v57, 5  ;;  %v6727_v24 = vshll.u32 %v5230_v53, 16  ;;  %v6728_v1 = vshll.u32 %v5238_v34, 16  ;;  %v1494_v48 = vsel %vm5156_vm10, %v1488_v8, %v1493_v25 }
  0x70   : > { %v321_v51 = vor.u32 %v320_v0, %v316_v45  ;;  %v312_v57 = vrot.slane %v311_v46, 4  ;;  %v6726_v58 = vshrl.u32 %v5238_v34, 16  ;;  %v6735_v38 = vshll.u32 %v6842_v18, 16 }
  0x71   : > { %v5598_v4 = vcombine.low %v1487_v59, %v1494_v48  ;;  %v1495_v14 = vrot.slane %v6729_v23, 5  ;;  %v1496_v56 = vrot.slane %v6727_v24, 6  ;;  %v1500_v0 = vrot.slane %v6728_v1, 6 }
  0x72   : > { %v322_v50 = vrot.slane %v321_v51, 4  ;;  %v317_v63 = vsel %vm4968_vm7, %v312_v57, %v316_v45  ;;  %v1499_v55 = vrot.slane %v6726_v58, 5  ;;  %v1504_v8 = vshrl.u32 %v6842_v18, 16  ;;  %v6843_v51 = vld [vmem:[#allocation10_spill] sm:$0xff] }
  0x73   : > { %4410 = vmatmul.mubr.msk.bf16.gmra.mrb[16].mxu0 %vm853_vm3, %v5598_v4  ;;  %v1497_v46 = vor.u32 %v1496_v56, %v1495_v14  ;;  %v1507_v59 = vrot.slane %v6735_v38, 6  ;;  %v6844_v45 = vshrl.u32 %v6843_v51, 16  ;;  %v6845_v1 = vshll.u32 %v6843_v51, 16  ;;  %v6849_v14 = vld [vmem:[#allocation12_spill] sm:$0xff] }
  0x74   : > { %v327_v25 = vsel %vm4968_vm7, %v322_v50, %v326_v26  ;;  %v1501_v58 = vor.u32 %v1500_v0, %v1499_v55  ;;  %v1506_v24 = vrot.slane %v1504_v8, 5  ;;  %v6847_v40 = vshll.u32 %v6846_v13, 16 }
  0x75   : > { %v331_v48 = vrot.slane %v6844_v45, 4  ;;  %v5619_v57 = vcombine.low %v317_v63, %v327_v25  ;;  %v334_v23 = vrot.slane %v6845_v1, 5  ;;  %v1498_v35 = vrot.slane %v1497_v46, 4 }
  0x76   : > { %v340_v47 = vrot.slane %v6847_v40, 5  ;;  %v6848_v26 = vshrl.u32 %v6846_v13, 16  ;;  %v6850_v56 = vshll.u32 %v6849_v14, 16  ;;  %v1503_v63 = vrot.slane %v1501_v58, 4 }
  0x77   : > { %4261 = vmatprep.mubr.msk.bf16.mxu1 %vm853_vm3, %v5619_v57  ;;  %v1508_v25 = vor.u32 %v1507_v59, %v1506_v24  ;;  %v335_v55 = vor.u32 %v334_v23, %v331_v48  ;;  %v6739_v0 = vshrl.u32 %v5278_v37, 16  ;;  %v1502_v1 = vsel %vm5156_vm10, %v1498_v35, %v1501_v58 }
  0x78   : > { %v344_v50 = vrot.slane %v6848_v26, 4  ;;  %v350_v38 = vrot.slane %v6850_v56, 5  ;;  %v6738_v40 = vshll.u32 %v5278_v37, 16  ;;  %v6737_v13 = vshll.u32 %v5286_v54, 16 }
  0x79   : > { %v1509_v46 = vsel %vm5156_vm10, %v1503_v63, %v1508_v25  ;;  %v336_v51 = vrot.slane %v335_v55, 4  ;;  %v6736_v45 = vshrl.u32 %v5286_v54, 16  ;;  %v6741_v26 = vshll.u32 %v5297_v31, 16 }
  0x7a   : > { %v345_v8 = vor.u32 %v344_v50, %v340_v47  ;;  %v5640_v24 = vcombine.low %v1502_v1, %v1509_v46  ;;  %v1510_v59 = vrot.slane %v6739_v0, 5  ;;  %v1511_v35 = vrot.slane %v6738_v40, 6  ;;  %v6853_v40 = vld [vmem:[#allocation13_spill] sm:$0xff] }
  0x7b   : > { %v341_v58 = vsel %vm4968_vm7, %v336_v51, %v340_v47  ;;  %v1514_v48 = vrot.slane %v6736_v45, 5  ;;  %v1515_v50 = vrot.slane %v6737_v13, 6  ;;  %v1519_v14 = vshrl.u32 %v5297_v31, 16 }
  0x7c   : > { %v346_v23 = vrot.slane %v345_v8, 4  ;;  %4413 = vmatprep.mubr.msk.bf16.mxu0 %vm853_vm3, %v5640_v24  ;;  %v1512_v63 = vor.u32 %v1511_v35, %v1510_v59  ;;  %v1522_v25 = vrot.slane %v6741_v26, 6  ;;  %v6851_v47 = vshrl.u32 %v5018_v42, 16  ;;  %v6856_v59 = vld [vmem:[#allocation14_spill] sm:$0xff] }
  0x7d   : > { %v1516_v8 = vor.u32 %v1515_v50, %v1514_v48  ;;  %v1521_v46 = vrot.slane %v1519_v14, 5  ;;  %v6852_v51 = vshll.u32 %v5018_v42, 16  ;;  %v6854_v0 = vshll.u32 %v6853_v40, 16 }
  0x7e   : > { %v351_v56 = vsel %vm4968_vm7, %v346_v23, %v350_v38  ;;  %v355_v55 = vrot.slane %v6851_v47, 4  ;;  %v1513_v13 = vrot.slane %v1512_v63, 4  ;;  %v6855_v38 = vshrl.u32 %v6853_v40, 16 }
  0x7f   : > { %v5661_v1 = vcombine.low %v341_v58, %v351_v56  ;;  %v358_v45 = vrot.slane %v6852_v51, 5  ;;  %v364_v49 = vrot.slane %v6854_v0, 5  ;;  %v6857_v35 = vshll.u32 %v6856_v59, 16 }
  0x80   : > { %v368_v23 = vrot.slane %v6855_v38, 4  ;;  %v1518_v58 = vrot.slane %v1516_v8, 4  ;;  %v1523_v56 = vor.u32 %v1522_v25, %v1521_v46  ;;  %v6745_v50 = vshrl.u32 %v5324_v43, 16 }
  0x81   : > { %v374_v26 = vrot.slane %v6857_v35, 5  ;;  %4262 = vmatmul.mubr.msk.bf16.gmra.mrb[4].mxu1 %vm853_vm3, %v5661_v1  ;;  %v359_v48 = vor.u32 %v358_v45, %v355_v55  ;;  %v1517_v42 = vsel %vm5156_vm10, %v1513_v13, %v1516_v8  ;;  %v6744_v0 = vshll.u32 %v5324_v43, 16 }
  0x82   : > { %v369_v14 = vor.u32 %v368_v23, %v364_v49  ;;  %v6743_v40 = vshll.u32 %v5336_v36, 16  ;;  %v1524_v63 = vsel %vm5156_vm10, %v1518_v58, %v1523_v56  ;;  %v6742_v51 = vshrl.u32 %v5336_v36, 16 }
  0x83   : > { %v360_v47 = vrot.slane %v359_v48, 4  ;;  %v6752_v38 = vshll.u32 %v5347_v62, 16  ;;  %v5682_v25 = vcombine.low %v1517_v42, %v1524_v63  ;;  %v1525_v55 = vrot.slane %v6745_v50, 5  ;;  %v6859_v48 = vld [vmem:[#allocation15_spill] sm:$0xff] }
  0x84   : > { %v370_v45 = vrot.slane %v369_v14, 4  ;;  %v1526_v13 = vrot.slane %v6744_v0, 6  ;;  %v1529_v46 = vrot.slane %v6742_v51, 5  ;;  %v1530_v23 = vrot.slane %v6743_v40, 6 }
  0x85   : > { %6858 = vst [vmem:[#allocation9_spill] sm:$0xff] %v5682_v25  ;;  %v365_v8 = vsel %vm4968_vm7, %v360_v47, %v364_v49  ;;  %v1534_v59 = vshrl.u32 %v5347_v62, 16  ;;  %4414 = vmatmul.mubr.msk.bf16.gmra.mrb[20].mxu0 %vm853_vm3, %v5682_v25  ;;  %v1537_v56 = vrot.slane %v6752_v38, 6  ;;  %v6860_v49 = vshrl.u32 %v6859_v48, 16 }
  0x86   : > { %v375_v35 = vsel %vm4968_vm7, %v370_v45, %v374_v26  ;;  %v1527_v58 = vor.u32 %v1526_v13, %v1525_v55  ;;  %v1531_v63 = vor.u32 %v1530_v23, %v1529_v46  ;;  %v6861_v51 = vshll.u32 %v6859_v48, 16 }
  0x87   : > { %v379_v42 = vrot.slane %v6860_v49, 4  ;;  %v5703_v14 = vcombine.low %v365_v8, %v375_v35  ;;  %v1536_v47 = vrot.slane %v1534_v59, 5  ;;  %v6862_v50 = vshll.u32 %v5052_v32, 16 }
  0x88   : > { %v382_v40 = vrot.slane %v6861_v51, 5  ;;  %v1528_v0 = vrot.slane %v1527_v58, 4  ;;  %v6863_v26 = vshrl.u32 %v5052_v32, 16  ;;  %v6864_v55 = vshll.u32 %v5055_v39, 16 }
  0x89   : > { %v388_v25 = vrot.slane %v6862_v50, 5  ;;  %4265 = vmatprep.mubr.msk.bf16.mxu1 %vm853_vm3, %v5703_v14  ;;  %v1533_v8 = vrot.slane %v1531_v63, 4  ;;  %v1538_v35 = vor.u32 %v1537_v56, %v1536_v47  ;;  %v6751_v23 = vshrl.u32 %v5378_v10, 16 }
  0x8a   : > { %v392_v45 = vrot.slane %v6863_v26, 4  ;;  %v398_v13 = vrot.slane %v6864_v55, 5  ;;  %v383_v46 = vor.u32 %v382_v40, %v379_v42  ;;  %v1532_v51 = vsel %vm5156_vm10, %v1528_v0, %v1531_v63 }
  0x8b   : > { %v6750_v50 = vshll.u32 %v5378_v10, 16  ;;  %v6749_v32 = vshll.u32 %v5381_v15, 16  ;;  %v1539_v39 = vsel %vm5156_vm10, %v1533_v8, %v1538_v35  ;;  %v6748_v48 = vshrl.u32 %v5381_v15, 16 }
  0x8c   : > { %v393_v59 = vor.u32 %v392_v45, %v388_v25  ;;  %v384_v58 = vrot.slane %v383_v46, 4  ;;  %v6757_v49 = vshll.u32 %v5395_v12, 16  ;;  %v5724_v56 = vcombine.low %v1532_v51, %v1539_v39  ;;  %v6866_v46 = vld [vmem:[#allocation16_spill] sm:$0xff] }
  0x8d   : > { %v1540_v42 = vrot.slane %v6751_v23, 5  ;;  %v1541_v0 = vrot.slane %v6750_v50, 6  ;;  %v1544_v47 = vrot.slane %v6748_v48, 5  ;;  %v1545_v26 = vrot.slane %v6749_v32, 6 }
  0x8e   : > { %6865 = vst [vmem:[#allocation29_spill] sm:$0xff] %v5724_v56  ;;  %v394_v40 = vrot.slane %v393_v59, 4  ;;  %v389_v63 = vsel %vm4968_vm7, %v384_v58, %v388_v25  ;;  %v1549_v45 = vshrl.u32 %v5395_v12, 16  ;;  %4417 = vmatprep.mubr.msk.bf16.mxu0 %vm853_vm3, %v5724_v56  ;;  %v1552_v35 = vrot.slane %v6757_v49, 6  ;;  %v5804_v56 = vld [vmem:[%s4887_s6 + $0xd4] sm:$0x3] }
  0x8f   : > { %v1542_v8 = vor.u32 %v1541_v0, %v1540_v42  ;;  %v6867_v25 = vshrl.u32 %v6866_v46, 16  ;;  %v1546_v39 = vor.u32 %v1545_v26, %v1544_v47  ;;  %v6868_v48 = vshll.u32 %v6866_v46, 16 }
  0x90   : > { %v399_v55 = vsel %vm4968_vm7, %v394_v40, %v398_v13  ;;  %v1551_v58 = vrot.slane %v1549_v45, 5  ;;  %v6869_v23 = vshll.u32 %v5075_v21, 16  ;;  %v6870_v13 = vshrl.u32 %v5075_v21, 16 }
  0x91   : > { %v403_v51 = vrot.slane %v6867_v25, 4  ;;  %v5745_v59 = vcombine.low %v389_v63, %v399_v55  ;;  %v406_v32 = vrot.slane %v6868_v48, 5  ;;  %v1543_v50 = vrot.slane %v1542_v8, 4 }
  0x92   : > { %v412_v38 = vrot.slane %v6869_v23, 5  ;;  %v416_v40 = vrot.slane %v6870_v13, 4  ;;  %v6871_v42 = vshll.u32 %v5078_v41, 16  ;;  %v1548_v63 = vrot.slane %v1546_v39, 4 }
  0x93   : > { %4266 = vmatmul.mubr.msk.bf16.gmra.mrb[8].mxu1 %vm853_vm3, %v5745_v59  ;;  %v1553_v55 = vor.u32 %v1552_v35, %v1551_v58  ;;  %v407_v47 = vor.u32 %v406_v32, %v403_v51  ;;  %v6756_v26 = vshrl.u32 %v5429_v33, 16  ;;  %v1547_v48 = vsel %vm5156_vm10, %v1543_v50, %v1546_v39 }
  0x94   : > { %v422_v0 = vrot.slane %v6871_v42, 5  ;;  %v417_v45 = vor.u32 %v416_v40, %v412_v38  ;;  %v6755_v23 = vshll.u32 %v5429_v33, 16  ;;  %v6754_v21 = vshll.u32 %v5432_v5, 16 }
  0x95   : > { %v1554_v41 = vsel %vm5156_vm10, %v1548_v63, %v1553_v55  ;;  %v408_v8 = vrot.slane %v407_v47, 4  ;;  %v6753_v46 = vshrl.u32 %v5432_v5, 16  ;;  %v6758_v35 = vshll.u32 %v5443_v28, 16 }
  0x96   : > { %v5766_v32 = vcombine.low %v1547_v48, %v1554_v41  ;;  %v418_v25 = vrot.slane %v417_v45, 4  ;;  %v1555_v50 = vrot.slane %v6756_v26, 5  ;;  %v1556_v51 = vrot.slane %v6755_v23, 6  ;;  %v5788_v45 = vld [vmem:[%s4887_s6 + $0xcc] sm:$0xf] }
  0x97   : > { %v413_v39 = vsel %vm4968_vm7, %v408_v8, %v412_v38  ;;  %v1559_v58 = vrot.slane %v6753_v46, 5  ;;  %v1560_v13 = vrot.slane %v6754_v21, 6  ;;  %v1564_v40 = vshrl.u32 %v5443_v28, 16  ;;  %v6873_v38 = vld [vmem:[#allocation18_spill] sm:$0xff]  ;;  %v5795_v26 = vld [vmem:[%s4887_s6 + $0xd0] sm:$0xf] }
  0x98   : > { %6872 = vst [vmem:[#allocation10_spill] sm:$0xff] %v5766_v32  ;;  %4418 = vmatmul.mubr.msk.bf16.gmra.mrb[24].mxu0 %vm853_vm3, %v5766_v32  ;;  %v423_v42 = vsel %vm4968_vm7, %v418_v25, %v422_v0  ;;  %v1557_v63 = vor.u32 %v1556_v51, %v1555_v50  ;;  %v1567_v55 = vrot.slane %v6758_v35, 6  ;;  %v6874_v47 = vshrl.u32 %v6873_v38, 16  ;;  %v6878_v35 = vld [vmem:[#allocation20_spill] sm:$0xff] }
  0x99   : > { %v5790_v41 = vcombine.low %v413_v39, %v423_v42  ;;  %v1561_v8 = vor.u32 %v1560_v13, %v1559_v58  ;;  %v1566_v46 = vrot.slane %v1564_v40, 5  ;;  %v6875_v21 = vshll.u32 %v6873_v38, 16 }
  0x9a   : > { %v427_v48 = vrot.slane %v6874_v47, 4  ;;  %v1558_v49 = vrot.slane %v1557_v63, 4  ;;  %v6876_v0 = vshll.u32 %v5098_v29, 16  ;;  %v6877_v50 = vshrl.u32 %v5098_v29, 16 }
  0x9b   : > { %v430_v23 = vrot.slane %v6875_v21, 5  ;;  %v6879_v47 = vshll.u32 %v6878_v35, 16  ;;  %4269 = vmatprep.mubr.msk.bf16.mxu1 %vm853_vm3, %v5790_v41  ;;  %v1563_v39 = vrot.slane %v1561_v8, 4  ;;  %v1568_v58 = vor.u32 %v1567_v55, %v1566_v46 }
  0x9c   : > { %v436_v25 = vrot.slane %v6876_v0, 5  ;;  %v440_v51 = vrot.slane %v6877_v50, 4  ;;  %v6766_v13 = vshrl.u32 %v5788_v45, 16  ;;  %v1562_v40 = vsel %vm5156_vm10, %v1558_v49, %v1561_v8 }
  0x9d   : > { %v446_v32 = vrot.slane %v6879_v47, 5  ;;  %v431_v21 = vor.u32 %v430_v23, %v427_v48  ;;  %v6765_v29 = vshll.u32 %v5788_v45, 16  ;;  %v6764_v63 = vshll.u32 %v5795_v26, 16 }
  0x9e   : > { %v441_v42 = vor.u32 %v440_v51, %v436_v25  ;;  %v1569_v35 = vsel %vm5156_vm10, %v1563_v39, %v1568_v58  ;;  %v6763_v0 = vshrl.u32 %v5795_v26, 16  ;;  %v1883_v50 = vshll.u32 %v5804_v56, 16 }
  0x9f   : > { %v432_v38 = vrot.slane %v431_v21, 4  ;;  %v5817_v46 = vcombine.low %v1562_v40, %v1569_v35  ;;  %v2304_v55 = vrot.slane %v6766_v13, 5  ;;  %v2305_v49 = vrot.slane %v6765_v29, 6 }
  0xa0   : > { %v442_v23 = vrot.slane %v441_v42, 4  ;;  %v2308_v8 = vrot.slane %v6763_v0, 5  ;;  %v2309_v51 = vrot.slane %v6764_v63, 6  ;;  %v2313_v47 = vshrl.u32 %v5804_v56, 16 }
  0xa1   : > { %6880 = vst [vmem:[#allocation11_spill] sm:$0xff] %v5817_v46  ;;  %v437_v48 = vsel %vm4968_vm7, %v432_v38, %v436_v25  ;;  %4421 = vmatprep.mubr.msk.bf16.mxu0 %vm853_vm3, %v5817_v46  ;;  %v2306_v58 = vor.u32 %v2305_v49, %v2304_v55  ;;  %v2316_v21 = vrot.slane %v1883_v50, 6  ;;  %v6881_v25 = vshrl.u32 %v5110_v3, 16 }
  0xa2   : > { %v447_v39 = vsel %vm4968_vm7, %v442_v23, %v446_v32  ;;  %v2310_v35 = vor.u32 %v2309_v51, %v2308_v8  ;;  %v2315_v38 = vrot.slane %v2313_v47, 5  ;;  %v6882_v0 = vshll.u32 %v5110_v3, 16 }
  0xa3   : > { %v451_v40 = vrot.slane %v6881_v25, 4  ;;  %v5838_v42 = vcombine.low %v437_v48, %v447_v39  ;;  %v2307_v29 = vrot.slane %v2306_v58, 4  ;;  %v6883_v13 = vshll.u32 %v5128_v16, 16 }
  0xa4   : > { %v454_v63 = vrot.slane %v6882_v0, 5  ;;  %v6884_v32 = vshrl.u32 %v5128_v16, 16  ;;  %v6885_v55 = vshll.u32 %v5131_v44, 16  ;;  %v2312_v48 = vrot.slane %v2310_v35, 4 }
  0xa5   : > { %v460_v46 = vrot.slane %v6883_v13, 5  ;;  %4270 = vmatmul.mubr.msk.bf16.gmra.mrb[12].mxu1 %vm853_vm3, %v5838_v42  ;;  %v2317_v39 = vor.u32 %v2316_v21, %v2315_v38  ;;  %v6886_v51 = vshrl.u32 %v5140_v52, 16  ;;  %v2311_v0 = vsel %vm5156_vm10, %v2307_v29, %v2310_v35 }
  0xa6   : > { %v464_v23 = vrot.slane %v6884_v32, 4  ;;  %v470_v49 = vrot.slane %v6885_v55, 5  ;;  %v455_v8 = vor.u32 %v454_v63, %v451_v40  ;;  %v6887_v13 = vshll.u32 %v5140_v52, 16 }
  0xa7   : > { %v475_v3 = vrot.slane %v6886_v51, 4  ;;  %v6888_v58 = vshll.u32 %v5163_v9, 16  ;;  %v2318_v25 = vsel %vm5156_vm10, %v2312_v48, %v2317_v39  ;;  %v6889_v21 = vshrl.u32 %v5163_v9, 16 }
  0xa8   : > { %v465_v47 = vor.u32 %v464_v23, %v460_v46  ;;  %v478_v16 = vrot.slane %v6887_v13, 5  ;;  %v456_v32 = vrot.slane %v455_v8, 4  ;;  %v6890_v40 = vshll.u32 %v5166_v7, 16  ;;  %v6891_v23 = vld [vmem:[#allocation35_spill] sm:$0xff] }
  0xa9   : > { %v484_v44 = vrot.slane %v6888_v58, 5  ;;  %v488_v63 = vrot.slane %v6889_v21, 4  ;;  %v5864_v55 = vcombine.low %v2311_v0, %v2318_v25  ;;  %v2768_v52 = vsel %vm902_vm0, %v6891_v23, 0 }
  0xaa   : > { %v494_v38 = vrot.slane %v6890_v40, 5  ;;  %v466_v29 = vrot.slane %v465_v47, 4  ;;  %v479_v35 = vor.u32 %v478_v16, %v475_v3  ;;  %v461_v51 = vsel %vm4968_vm7, %v456_v32, %v460_v46 }
  0xab   : > { %v489_v13 = vor.u32 %v488_v63, %v484_v44  ;;  %v6892_v48 = vshrl.u32 %v5176_v30, 16  ;;  %v6893_v9 = vshll.u32 %v5176_v30, 16  ;;  %4422 = vmatmul.mubr.msk.bf16.gmra.mrb[28].mxu0 %vm853_vm3, %v5864_v55  ;;  %v6894_v0 = vshll.u32 %v5185_v27, 16 }
  0xac   : > { %v471_v7 = vsel %vm4968_vm7, %v466_v29, %v470_v49  ;;  %v480_v3 = vrot.slane %v479_v35, 4  ;;  %v6895_v16 = vshrl.u32 %v5185_v27, 16  ;;  %4427 = vmatprep.mubr.msk.bf16.mxu0 %vm853_vm3, %v5619_v57  ;;  %v6896_v32 = vshll.u32 %v5196_v17, 16 }
  0xad   : > { %v499_v39 = vrot.slane %v6892_v48, 4  ;;  %v502_v8 = vrot.slane %v6893_v9, 5  ;;  %v508_v47 = vrot.slane %v6894_v0, 5  ;;  %v5882_v58 = vcombine.low %v461_v51, %v471_v7 }
  0xae   : > { %v512_v46 = vrot.slane %v6895_v16, 4  ;;  %v490_v30 = vrot.slane %v489_v13, 4  ;;  %v518_v21 = vrot.slane %v6896_v32, 5  ;;  %v485_v49 = vsel %vm4968_vm7, %v480_v3, %v484_v44 }
  0xaf   : > { %v503_v25 = vor.u32 %v502_v8, %v499_v39  ;;  %v6897_v40 = vshrl.u32 %v5230_v53, 16  ;;  %v6898_v27 = vshll.u32 %v5230_v53, 16  ;;  %4273 = vmatprep.mubr.msk.bf16.mxu1 %vm853_vm3, %v5882_v58  ;;  %v6899_v17 = vshll.u32 %v5238_v34, 16 }
  0xb0   : > { %v513_v63 = vor.u32 %v512_v46, %v508_v47  ;;  %v495_v23 = vsel %vm4968_vm7, %v490_v30, %v494_v38  ;;  %v6900_v48 = vshrl.u32 %v5238_v34, 16  ;;  %v6901_v53 = vshll.u32 %v6842_v18, 16 }
  0xb1   : > { %v523_v29 = vrot.slane %v6897_v40, 4  ;;  %v526_v35 = vrot.slane %v6898_v27, 5  ;;  %v504_v51 = vrot.slane %v503_v25, 4  ;;  %v532_v13 = vrot.slane %v6899_v17, 5 }
  0xb2   : > { %v536_v44 = vrot.slane %v6900_v48, 4  ;;  %v5902_v39 = vcombine.low %v485_v49, %v495_v23  ;;  %v514_v9 = vrot.slane %v513_v63, 4  ;;  %v542_v7 = vrot.slane %v6901_v53, 5 }
  0xb3   : > { %v527_v8 = vor.u32 %v526_v35, %v523_v29  ;;  %v509_v3 = vsel %vm4968_vm7, %v504_v51, %v508_v47  ;;  %v6902_v38 = vshrl.u32 %v5278_v37, 16  ;;  %v6903_v46 = vshll.u32 %v5278_v37, 16  ;;  %v5927_v35 = vld [vmem:[%s6647_s1 + $0x20] sm:$0xf]  ;;  %4428 = vmatmul.mubr.msk.bf16.vlgmr.msra.gmra.mrb[0].mxu0 %vm853_vm3, %v5661_v1 }
  0xb4   : > { %v537_v0 = vor.u32 %v536_v44, %v532_v13  ;;  %4274 = vmatmul.mubr.msk.bf16.gmra.mrb[16].mxu1 %vm853_vm3, %v5902_v39  ;;  %v519_v34 = vsel %vm4968_vm7, %v514_v9, %v518_v21  ;;  %v6904_v18 = vshll.u32 %v5286_v54, 16  ;;  %v6905_v49 = vshrl.u32 %v5286_v54, 16  ;;  %4460 = vmatpush3.bf16.msra.mxu0 %v2768_v52 }
  0xb5   : > { %v547_v16 = vrot.slane %v6902_v38, 4  ;;  %v550_v30 = vrot.slane %v6903_v46, 5  ;;  %v528_v25 = vrot.slane %v527_v8, 4  ;;  %v5920_v63 = vcombine.low %v509_v3, %v519_v34  ;;  %4431 = vmatprep.mubr.msk.bf16.mxu0 %vm853_vm3, %v5703_v14  ;;  %4794 = vmatprep.subr.msk.bf16.mxu0 %vm902_vm0, %v5927_v35 }
  0xb6   : > { %v556_v32 = vrot.slane %v6904_v18, 5  ;;  %v560_v47 = vrot.slane %v6905_v49, 4  ;;  %v538_v40 = vrot.slane %v537_v0, 4  ;;  %v6906_v37 = vshll.u32 %v5297_v31, 16 }
  0xb7   : > { %v551_v29 = vor.u32 %v550_v30, %v547_v16  ;;  %v533_v21 = vsel %vm4968_vm7, %v528_v25, %v532_v13  ;;  %v6907_v23 = vshrl.u32 %v5324_v43, 16  ;;  %v6908_v17 = vshll.u32 %v5324_v43, 16  ;;  %4277 = vmatprep.mubr.msk.bf16.mxu1 %vm853_vm3, %v5920_v63 }
  0xb8   : > { %v566_v27 = vrot.slane %v6906_v37, 5  ;;  %v561_v54 = vor.u32 %v560_v47, %v556_v32  ;;  %v543_v31 = vsel %vm4968_vm7, %v538_v40, %v542_v7  ;;  %v6909_v9 = vshll.u32 %v5336_v36, 16 }
  0xb9   : > { %v571_v51 = vrot.slane %v6907_v23, 4  ;;  %v574_v48 = vrot.slane %v6908_v17, 5  ;;  %v552_v44 = vrot.slane %v551_v29, 4  ;;  %v6910_v13 = vshrl.u32 %v5336_v36, 16 }
  0xba   : > { %v580_v8 = vrot.slane %v6909_v9, 5  ;;  %v5947_v3 = vcombine.low %v533_v21, %v543_v31  ;;  %v562_v43 = vrot.slane %v561_v54, 4  ;;  %v6911_v0 = vshll.u32 %v5347_v62, 16 }
  0xbb   : > { %v584_v53 = vrot.slane %v6910_v13, 4  ;;  %v575_v52 = vor.u32 %v574_v48, %v571_v51  ;;  %v557_v7 = vsel %vm4968_vm7, %v552_v44, %v556_v32  ;;  %v6912_v36 = vshrl.u32 %v5378_v10, 16  ;;  %4432 = vmatmul.mubr.msk.bf16.gmra.mrb[4].mxu0 %vm853_vm3, %v5745_v59 }
  0xbc   : > { %v590_v38 = vrot.slane %v6911_v0, 5  ;;  %v6913_v30 = vshll.u32 %v5378_v10, 16  ;;  %v567_v25 = vsel %vm4968_vm7, %v562_v43, %v566_v27  ;;  %v6914_v62 = vshll.u32 %v5381_v15, 16  ;;  %4278 = vmatmul.mubr.msk.bf16.gmra.mrb[20].mxu1 %vm853_vm3, %v5947_v3  ;;  %4435 = vmatprep.mubr.msk.bf16.mxu0 %vm853_vm3, %v5790_v41  ;;  %v6921_v0 = vld [vmem:[#allocation3_spill] sm:$0xff] }
  0xbd   : > { %v585_v16 = vor.u32 %v584_v53, %v580_v8  ;;  %v595_v46 = vrot.slane %v6912_v36, 4  ;;  %v576_v18 = vrot.slane %v575_v52, 4  ;;  %v6915_v47 = vshrl.u32 %v5381_v15, 16 }
  0xbe   : > { %v598_v34 = vrot.slane %v6913_v30, 5  ;;  %v604_v49 = vrot.slane %v6914_v62, 5  ;;  %v5965_v29 = vcombine.low %v557_v7, %v567_v25  ;;  %v6916_v21 = vshll.u32 %v5395_v12, 16  ;;  %v6927_v62 = vld [vmem:[#allocation7_spill] sm:$0xff] }
  0xbf   : > { %v608_v40 = vrot.slane %v6915_v47, 4  ;;  %v586_v32 = vrot.slane %v585_v16, 4  ;;  %v581_v10 = vsel %vm4968_vm7, %v576_v18, %v580_v8  ;;  %v6917_v23 = vshrl.u32 %v5429_v33, 16  ;;  %v6923_v16 = vld [vmem:[#allocation5_spill] sm:$0xff]  ;;  %v6926_v18 = vld [vmem:[#allocation8_spill] sm:$0xff] }
  0xc0   : > { %v599_v37 = vor.u32 %v598_v34, %v595_v46  ;;  %v614_v54 = vrot.slane %v6916_v21, 5  ;;  %v6918_v15 = vshll.u32 %v5429_v33, 16  ;;  %4281 = vmatprep.mubr.msk.bf16.mxu1 %vm853_vm3, %v5965_v29  ;;  %v6919_v31 = vshll.u32 %v5432_v5, 16 }
  0xc1   : > { %v609_v27 = vor.u32 %v608_v40, %v604_v49  ;;  %v619_v51 = vrot.slane %v6917_v23, 4  ;;  %v591_v12 = vsel %vm4968_vm7, %v586_v32, %v590_v38  ;;  %v6920_v9 = vshrl.u32 %v5432_v5, 16  ;;  %v6922_v38 = vld [vmem:[#allocation4_spill] sm:$0xff]  ;;  %v6924_v5 = vld [vmem:[#allocation6_spill] sm:$0xff] }
  0xc2   : > { %v622_v17 = vrot.slane %v6918_v15, 5  ;;  %v600_v48 = vrot.slane %v599_v37, 4  ;;  %v628_v44 = vrot.slane %v6919_v31, 5  ;;  %v5987_v13 = vcombine.low %v581_v10, %v591_v12  ;;  %v250_v15 = vld [vmem:[%s4887_s6 + $0xd8] sm:$0xf] }
  0xc3   : > { %v632_v8 = vrot.slane %v6920_v9, 4  ;;  %v610_v33 = vrot.slane %v609_v27, 4  ;;  %v1332_v7 = vor.u32 %v6922_v38, %v6921_v0  ;;  %v1336_v36 = vor.u32 %v6924_v5, %v6923_v16  ;;  %4436 = vmatmul.mubr.msk.bf16.gmra.mrb[8].mxu0 %vm853_vm3, %v5838_v42  ;;  %v6029_v31 = vld [vmem:[%s4887_s6 + $0xe0] sm:$0x3] }
  0xc4   : > { %v623_v53 = vor.u32 %v622_v17, %v619_v51  ;;  %v605_v43 = vsel %vm4968_vm7, %v600_v48, %v604_v49  ;;  %v6925_v34 = vshll.u32 %v5443_v28, 16  ;;  %v1343_v47 = vor.u32 %v6927_v62, %v6926_v18  ;;  %4282 = vmatmul.mubr.msk.bf16.gmra.mrb[24].mxu1 %vm853_vm3, %v5987_v13  ;;  %4439 = vmatprep.mubr.msk.bf16.mxu0 %vm853_vm3, %v5882_v58  ;;  %v251_v17 = vld [vmem:[%s4887_s6 + $0xdc] sm:$0xf] }
  0xc5   : > { %v633_v52 = vor.u32 %v632_v8, %v628_v44  ;;  %v615_v46 = vsel %vm4968_vm7, %v610_v33, %v614_v54  ;;  %v1333_v32 = vrot.slane %v1332_v7, 4  ;;  %v1338_v37 = vrot.slane %v1336_v36, 4 }
  0xc6   : > { %v624_v30 = vrot.slane %v623_v53, 4  ;;  %v638_v25 = vrot.slane %v6925_v34, 5  ;;  %v6003_v40 = vcombine.low %v605_v43, %v615_v46  ;;  %v3860_v51 = vrot.slane %v5788_v45, 9 }
  0xc7   : > { %v634_v49 = vrot.slane %v633_v52, 4  ;;  %v1337_v21 = vsel %vm5156_vm10, %v1333_v32, %v1336_v36  ;;  %v1344_v54 = vsel %vm5156_vm10, %v1338_v37, %v1343_v47  ;;  %v2096_v12 = vrot.slane %v5795_v26, 5  ;;  %v6928_v36 = vld [vmem:[#allocation26_spill] sm:$0xff] }
  0xc8   : > { %v3810_v28 = vcombine.low %v1337_v21, %v1344_v54  ;;  %4285 = vmatprep.mubr.msk.bf16.mxu1 %vm853_vm3, %v6003_v40  ;;  %v629_v10 = vsel %vm4968_vm7, %v624_v30, %v628_v44  ;;  %v2099_v48 = vrot.slane %v5804_v56, 5  ;;  %v3915_v44 = vrot.slane %v250_v15, 9 }
  0xc9   : > { %v639_v27 = vsel %vm4968_vm7, %v634_v49, %v638_v25  ;;  %v2755_v9 = vrot.slane %v251_v17, 5  ;;  %v2097_v8 = vsel %vm4914_vm6, %v3860_v51, %v2096_v12  ;;  %v2098_v33 = vrot.slane %v2096_v12, 4  ;;  %v6933_v49 = vld [vmem:[#allocation27_spill] sm:$0xff]  ;;  %v6934_v12 = vld [vmem:[#allocation32_spill] sm:$0xff] }
  0xca   : > { %v6021_v23 = vcombine.low %v629_v10, %v639_v27  ;;  %v2758_v53 = vrot.slane %v6029_v31, 5  ;;  %v1896_v5 = vsel %vm902_vm0, %v5553_v2, 0  ;;  %v6929_v46 = vshrl.u32 %v5788_v45, 16 }
  0xcb   : > { %v6038_v43 = vsel %vm4914_vm6, %v3915_v44, %v2755_v9  ;;  %v2757_v52 = vrot.slane %v2755_v9, 4  ;;  %v2100_v0 = vsel %vm4914_vm6, %v2098_v33, %v2099_v48  ;;  %4440 = vmatmul.mubr.msk.bf16.gmra.mrb[12].mxu0 %vm853_vm3, %v5902_v39  ;;  %v6930_v34 = vshll.u32 %v5788_v45, 16  ;;  %v4805_v45 = vld [vmem:[%s6647_s1 + $0x10] sm:$0xf]  ;;  %v6935_v9 = vld [vmem:[#allocation33_spill] sm:$0xff] }
  0xcc   : > { %4286 = vmatmul.mubr.msk.bf16.gmra.mrb[28].mxu1 %vm853_vm3, %v6021_v23  ;;  %v6045_v38 = vcombine.low %v2097_v8, %v2100_v0  ;;  %4443 = vmatprep.mubr.msk.bf16.mxu0 %vm853_vm3, %v5920_v63  ;;  %v1866_v30 = vrot.slane %v6929_v46, 4  ;;  %v6931_v25 = vshll.u32 %v5795_v26, 16  ;;  %v6932_v62 = vshrl.u32 %v5795_v26, 16 }
  0xcd   : > { %4291 = vmatprep.mubr.msk.bf16.mxu1 %vm853_vm3, %v3810_v28  ;;  %v6049_v7 = vsel %vm4914_vm6, %v2757_v52, %v2758_v53  ;;  %v1869_v19 = vrot.slane %v6930_v34, 5  ;;  %v2523_v2 = vshrl.u32 %v250_v15, 16  ;;  %v2526_v32 = vshll.u32 %v250_v15, 16 }
  0xce   : > { %v3917_v16 = vcombine.low %v6038_v43, %v6049_v7  ;;  %v1875_v18 = vrot.slane %v6931_v25, 5  ;;  %v1879_v47 = vrot.slane %v6932_v62, 4  ;;  %v2532_v26 = vshll.u32 %v251_v17, 16 }
  0xcf   : > { %v2536_v37 = vshrl.u32 %v251_v17, 16  ;;  %v1870_v21 = vor.u32 %v1869_v19, %v1866_v30  ;;  %v2525_v28 = vrot.slane %v2523_v2, 4  ;;  %v2528_v10 = vrot.slane %v2526_v32, 5 }
  0xd0   : > { %v1880_v54 = vor.u32 %v1879_v47, %v1875_v18  ;;  %v2534_v27 = vrot.slane %v2532_v26, 5  ;;  %v1885_v44 = vrot.slane %v1883_v50, 5  ;;  %v2542_v33 = vshll.u32 %v6029_v31, 16 }
  0xd1   : > { %v2538_v51 = vrot.slane %v2536_v37, 4  ;;  %v1871_v15 = vrot.slane %v1870_v21, 4  ;;  %v2529_v17 = vor.u32 %v2528_v10, %v2525_v28  ;;  %v2963_v46 = vrot.slane %v2523_v2, 5  ;;  %v6937_v10 = vld [vmem:[#allocation17_spill] sm:$0xff] }
  0xd2   : > { %v1881_v48 = vrot.slane %v1880_v54, 4  ;;  %v2964_v30 = vrot.slane %v2526_v32, 6  ;;  %v2967_v34 = vrot.slane %v2536_v37, 5  ;;  %v2968_v19 = vrot.slane %v2532_v26, 6 }
  0xd3   : > { %4444 = vmatmul.mubr.msk.bf16.gmra.mrb[16].mxu0 %vm853_vm3, %v5947_v3  ;;  %v2539_v8 = vor.u32 %v2538_v51, %v2534_v27  ;;  %v1876_v53 = vsel %vm4968_vm7, %v1871_v15, %v1875_v18  ;;  %v2530_v50 = vrot.slane %v2529_v17, 4  ;;  %v2972_v18 = vshrl.u32 %v6029_v31, 16  ;;  %v6939_v51 = vld [vmem:[#allocation21_spill] sm:$0xff]  ;;  %v6944_v17 = vld [vmem:[#allocation10_spill] sm:$0xff] }
  0xd4   : > { %4292 = vmatmul.mubr.msk.bf16.vlgmr.msra.gmra.mrb[0].mxu1 %vm853_vm3, %v6928_v36  ;;  %4447 = vmatprep.mubr.msk.bf16.mxu0 %vm853_vm3, %v5965_v29  ;;  %v1886_v56 = vsel %vm4968_vm7, %v1881_v48, %v1885_v44  ;;  %v6936_v36 = vld [vmem:[#allocation37_spill] sm:$0xff]  ;;  %v2965_v47 = vor.u32 %v2964_v30, %v2963_v46  ;;  %v2975_v2 = vrot.slane %v2542_v33, 6  ;;  %v6941_v48 = vld [vmem:[#allocation22_spill] sm:$0xff]  ;;  %v6952_v46 = vld [vmem:[#allocation31_spill] sm:$0xff]  ;;  %vm3621_vm2 = vcmask 516096  }
  0xd5   : > { %4324 = vmatpush3.bf16.msra.mxu1 %v1896_v5  ;;  %4295 = vmatprep.mubr.msk.bf16.mxu1 %vm853_vm3, %v6933_v49  ;;  %v6092_v52 = vcombine.low %v1876_v53, %v1886_v56  ;;  %v2540_v0 = vrot.slane %v2539_v8, 4  ;;  %v2544_v5 = vrot.slane %v2542_v33, 5  ;;  %v2535_v25 = vsel %vm4968_vm7, %v2530_v50, %v2534_v27  ;;  %v6940_v15 = vld [vmem:[#allocation9_spill] sm:$0xff]  ;;  %v6945_v8 = vld [vmem:[#allocation24_spill] sm:$0xff]  ;;  %v6947_v53 = vld [vmem:[#allocation11_spill] sm:$0xff] }
  0xd6   : > { %4790 = vmatprep.subr.msk.bf16.mxu1 %vm902_vm0, %v4805_v45  ;;  %v2969_v45 = vor.u32 %v2968_v19, %v2967_v34  ;;  %v2974_v32 = vrot.slane %v2972_v18, 5  ;;  %v2966_v37 = vrot.slane %v2965_v47, 4  ;;  %v2986_v27 = vsel %vm902_vm0, %v5927_v35, 0  ;;  %v6942_v35 = vld [vmem:[#allocation23_spill] sm:$0xff]  ;;  %v6943_v44 = vld [vmem:[#allocation29_spill] sm:$0xff]  ;;  %v6948_v56 = vld [vmem:[#allocation40_spill] sm:$0xff] }
  0xd7   : > { %v2545_v62 = vsel %vm4968_vm7, %v2540_v0, %v2544_v5  ;;  %v6946_v33 = vld [vmem:[#allocation25_spill] sm:$0xff]  ;;  %v6949_v50 = vld [vmem:[#allocation28_spill] sm:$0xff]  ;;  %v6950_v0 = vld [vmem:[#allocation30_spill] sm:$0xff]  ;;  %vm3486_vm0 = vcmask 1040384  }
  0xd8   : > { %v2971_v26 = vrot.slane %v2969_v45, 4  ;;  %v3898_v21 = vcombine.low %v2535_v25, %v2545_v62  ;;  %v2976_v54 = vor.u32 %v2975_v2, %v2974_v32  ;;  %v2970_v28 = vsel %vm5156_vm10, %v2966_v37, %v2969_v45  ;;  %v6951_v5 = vld [vmem:[#allocation2_spill] sm:$0xff]  ;;  %v6954_v34 = vld [vmem:[#allocation36_spill] sm:$0xff]  ;;  %v3373_v18 = vld [vmem:[%s6254_s19 + $0x98] sm:$0x3] }
  0xd9   : > { %v6953_v30 = vld [vmem:[#allocation34_spill] sm:$0xff]  ;;  %v3374_v62 = vsel %vm6332_vm14, 0, %v3373_v18  ;;  %v3388_v47 = vld [vmem:[%s6254_s19 + $0xbc] sm:$0x3]  ;;  %v3383_v2 = vld [vmem:[%s6254_s19 + $0xb0] sm:$0x3] }
  0xda   : > { %v2977_v31 = vsel %vm5156_vm10, %v2971_v26, %v2976_v54  ;;  %v3378_v19 = vld [vmem:[%s6254_s19 + $0xa4] sm:$0x3]  ;;  %3375 = vst [vmem:[%s6254_s19 + $0x98] sm:$0x3] %v3374_v62  ;;  %v3389_v45 = vsel %vm6332_vm14, 0, %v3388_v47  ;;  %v3384_v32 = vsel %vm6332_vm14, 0, %v3383_v2 }
  0xdb   : > { %4448 = vmatmul.mubr.msk.bf16.gmra.mrb[20].mxu0 %vm853_vm3, %v5987_v13  ;;  %v6115_v60 = vcombine.low %v2970_v28, %v2977_v31  ;;  %v3379_v25 = vsel %vm6332_vm14, 0, %v3378_v19  ;;  %3390 = vst [vmem:[%s6254_s19 + $0xbc] sm:$0x3] %v3389_v45  ;;  %3385 = vst [vmem:[%s6254_s19 + $0xb0] sm:$0x3] %v3384_v32 }
  0xdc   : > { %4296 = vmatmul.mubr.msk.bf16.gmra.mrb[4].mxu1 %vm853_vm3, %v6934_v12  ;;  %4451 = vmatprep.mubr.msk.bf16.mxu0 %vm853_vm3, %v6003_v40  ;;  %3380 = vst [vmem:[%s6254_s19 + $0xa4] sm:$0x3] %v3379_v25  ;;  %v3398_v37 = vld [vmem:[%s6254_s19 + $0xd4] sm:$0x3] }
  0xdd   : > { %4299 = vmatprep.mubr.msk.bf16.mxu1 %vm853_vm3, %v6935_v9  ;;  %v3399_v26 = vsel %vm6332_vm14, 0, %v3398_v37 }
  0xde   : > { %3400 = vst [vmem:[%s6254_s19 + $0xd4] sm:$0x3] %v3399_v26 }
  0xe3   : > { %4452 = vmatmul.mubr.msk.bf16.gmra.mrb[24].mxu0 %vm853_vm3, %v6021_v23 }
  0xe4   : > { %4300 = vmatmul.mubr.msk.bf16.gmra.mrb[8].mxu1 %vm853_vm3, %v6936_v36  ;;  %4455 = vmatprep.mubr.msk.bf16.mxu0 %vm853_vm3, %v6092_v52 }
  0xe5   : > { %4303 = vmatprep.mubr.msk.bf16.mxu1 %vm853_vm3, %v5454_v61 }
  0xeb   : > { %4456 = vmatmul.mubr.msk.bf16.gmra.mrb[28].mxu0 %vm853_vm3, %v3898_v21  ;;  %v3393_v21 = vld [vmem:[%s6254_s19 + $0xc8] sm:$0x3] }
  0xec   : > { %4304 = vmatmul.mubr.msk.bf16.gmra.mrb[12].mxu1 %vm853_vm3, %v5484_v6  ;;  %4461 = vmatprep.mubr.msk.bf16.mxu0 %vm853_vm3, %v6937_v10  ;;  %v3394_v54 = vsel %vm6332_vm14, 0, %v3393_v21 }
  0xed   : > { %4307 = vmatprep.mubr.msk.bf16.mxu1 %vm853_vm3, %v5521_v22  ;;  %3395 = vst [vmem:[%s6254_s19 + $0xc8] sm:$0x3] %v3394_v54 }
  0xf3   : > { %4462 = vmatmul.mubr.msk.bf16.vlgmr.msra.gmra.mrb[0].mxu0 %vm853_vm3, %v6938_v20 }
  0xf4   : > { %4308 = vmatmul.mubr.msk.bf16.gmra.mrb[16].mxu1 %vm853_vm3, %v5577_v11  ;;  %4494 = vmatpush3.bf16.msra.mxu0 %v2986_v27 }
  0xf5   : > { %4311 = vmatprep.mubr.msk.bf16.mxu1 %vm853_vm3, %v5598_v4  ;;  %4465 = vmatprep.mubr.msk.bf16.mxu0 %vm853_vm3, %v6939_v51 }
  0xfb   : > { %4466 = vmatmul.mubr.msk.bf16.gmra.mrb[4].mxu0 %vm853_vm3, %v6941_v48 }
  0xfc   : > { %4312 = vmatmul.mubr.msk.bf16.gmra.mrb[20].mxu1 %vm853_vm3, %v5640_v24  ;;  %4469 = vmatprep.mubr.msk.bf16.mxu0 %vm853_vm3, %v6942_v35 }
  0xfd   : > { %4315 = vmatprep.mubr.msk.bf16.mxu1 %vm853_vm3, %v6940_v15 }
 0x103   : > { %4470 = vmatmul.mubr.msk.bf16.gmra.mrb[8].mxu0 %vm853_vm3, %v6945_v8 }
 0x104   : > { %4316 = vmatmul.mubr.msk.bf16.gmra.mrb[24].mxu1 %vm853_vm3, %v6943_v44  ;;  %4473 = vmatprep.mubr.msk.bf16.mxu0 %vm853_vm3, %v6946_v33 }
 0x105   : > { %4319 = vmatprep.mubr.msk.bf16.mxu1 %vm853_vm3, %v6944_v17 }
 0x10b   : > { %4474 = vmatmul.mubr.msk.bf16.gmra.mrb[12].mxu0 %vm853_vm3, %v6949_v50 }
 0x10c   : > { %4320 = vmatmul.mubr.msk.bf16.gmra.mrb[28].mxu1 %vm853_vm3, %v6947_v53  ;;  %4477 = vmatprep.mubr.msk.bf16.mxu0 %vm853_vm3, %v6950_v0 }
 0x10d   : > { %4325 = vmatprep.mubr.msk.bf16.mxu1 %vm853_vm3, %v6948_v56 }
 0x113   : > { %4478 = vmatmul.mubr.msk.bf16.gmra.mrb[16].mxu0 %vm853_vm3, %v6952_v46 }
 0x114   : > { %4326 = vmatmul.mubr.msk.bf16.vlgmr.msra.gmra.mrb[0].mxu1 %vm853_vm3, %v5619_v57  ;;  %4481 = vmatprep.mubr.msk.bf16.mxu0 %vm853_vm3, %v6953_v30  ;;  %v6955_v57 = vld [vmem:[#allocation38_spill] sm:$0xff] }
 0x115   : > { %4528 = vmatpush3.bf16.msra.mxu1 %v6951_v5  ;;  %4329 = vmatprep.mubr.msk.bf16.mxu1 %vm853_vm3, %v5661_v1  ;;  %v6956_v1 = vld [vmem:[#allocation39_spill] sm:$0xff] }
 0x11b   : > { %4482 = vmatmul.mubr.msk.bf16.gmra.mrb[20].mxu0 %vm853_vm3, %v6954_v34 }
 0x11c   : > { %4330 = vmatmul.mubr.msk.bf16.gmra.mrb[4].mxu1 %vm853_vm3, %v5703_v14  ;;  %4485 = vmatprep.mubr.msk.bf16.mxu0 %vm853_vm3, %v6955_v57  ;;  %v3328_v14 = vld [vmem:[%s6254_s19 + $0x2c] sm:$0x3] }
 0x11d   : > { %4333 = vmatprep.mubr.msk.bf16.mxu1 %vm853_vm3, %v5745_v59  ;;  %v3403_v59 = vld [vmem:[%s6254_s19 + $0xe0] sm:$0x3] }
 0x123   : > { %4486 = vmatmul.mubr.msk.bf16.gmra.mrb[24].mxu0 %vm853_vm3, %v6956_v1 }
 0x124   : > { %4334 = vmatmul.mubr.msk.bf16.gmra.mrb[8].mxu1 %vm853_vm3, %v5790_v41  ;;  %4489 = vmatprep.mubr.msk.bf16.mxu0 %vm853_vm3, %v6045_v38  ;;  %v3329_v41 = vsel %vm6332_vm14, 0, %v3328_v14 }
 0x125   : > { %4337 = vmatprep.mubr.msk.bf16.mxu1 %vm853_vm3, %v5838_v42  ;;  %v3404_v42 = vsel %vm6332_vm14, 0, %v3403_v59  ;;  %3330 = vst [vmem:[%s6254_s19 + $0x2c] sm:$0x3] %v3329_v41 }
 0x126   : > { %3405 = vst [vmem:[%s6254_s19 + $0xe0] sm:$0x3] %v3404_v42 }
 0x12b   : > { %4490 = vmatmul.mubr.msk.bf16.gmra.mrb[28].mxu0 %vm853_vm3, %v3917_v16  ;;  %v3353_v16 = vld [vmem:[%s6254_s19 + $0x68] sm:$0x3] }
 0x12c   : > { %4338 = vmatmul.mubr.msk.bf16.gmra.mrb[12].mxu1 %vm853_vm3, %v5882_v58  ;;  %4495 = vmatprep.mubr.msk.bf16.mxu0 %vm853_vm3, %v6933_v49  ;;  %v3354_v49 = vsel %vm6332_vm14, 0, %v3353_v16 }
 0x12d   : > { %4341 = vmatprep.mubr.msk.bf16.mxu1 %vm853_vm3, %v5902_v39  ;;  %v3338_v39 = vld [vmem:[%s6254_s19 + $0x44] sm:$0x3]  ;;  %3355 = vst [vmem:[%s6254_s19 + $0x68] sm:$0x3] %v3354_v49 }
 0x133   : > { %4496 = vmatmul.mubr.msk.bf16.vlgmr.msra.gmra.mrb[0].mxu0 %vm853_vm3, %v6934_v12  ;;  %v3368_v12 = vld [vmem:[%s6254_s19 + $0x8c] sm:$0x3] }
 0x134   : > { %4342 = vmatmul.mubr.msk.bf16.gmra.mrb[16].mxu1 %vm853_vm3, %v5920_v63  ;;  %4499 = vmatprep.mubr.msk.bf16.mxu0 %vm853_vm3, %v6935_v9  ;;  %v3339_v63 = vsel %vm6332_vm14, 0, %v3338_v39  ;;  %v3369_v9 = vsel %vm6332_vm14, 0, %v3368_v12 }
 0x135   : > { %4345 = vmatprep.mubr.msk.bf16.mxu1 %vm853_vm3, %v5947_v3  ;;  %v3333_v3 = vld [vmem:[%s6254_s19 + $0x38] sm:$0x3]  ;;  %3340 = vst [vmem:[%s6254_s19 + $0x44] sm:$0x3] %v3339_v63  ;;  %3370 = vst [vmem:[%s6254_s19 + $0x8c] sm:$0x3] %v3369_v9 }
 0x13b   : > { %4500 = vmatmul.mubr.msk.bf16.gmra.mrb[4].mxu0 %vm853_vm3, %v6936_v36 }
 0x13c   : > { %4346 = vmatmul.mubr.msk.bf16.gmra.mrb[20].mxu1 %vm853_vm3, %v5965_v29  ;;  %4503 = vmatprep.mubr.msk.bf16.mxu0 %vm853_vm3, %v5454_v61  ;;  %v4814_v61 = vmov 0   ;;  %v3334_v29 = vsel %vm6332_vm14, 0, %v3333_v3 }
 0x13d   : > { %4349 = vmatprep.mubr.msk.bf16.mxu1 %vm853_vm3, %v5987_v13  ;;  %3326 = vst.msk [vmem:[%s6254_s19 + $0x24] sm:$0xf] %vm3307_vm11, %v4814_v61  ;;  %3308 = vst.msk [vmem:[%s6254_s19] sm:$0xf] %vm3307_vm11, %v4814_v61  ;;  %v3348_v13 = vld [vmem:[%s6254_s19 + $0x5c] sm:$0x3] }
 0x13e   : > { %3309 = vst.msk [vmem:[%s6254_s19 + $0x4] sm:$0xf] %vm3307_vm11, %v4814_v61  ;;  %3316 = vst.msk [vmem:[%s6254_s19 + $0xc] sm:$0xf] %vm3307_vm11, %v4814_v61 }
 0x13f   : > { %3317 = vst.msk [vmem:[%s6254_s19 + $0x10] sm:$0xf] %vm3307_vm11, %v4814_v61  ;;  %3321 = vst.msk [vmem:[%s6254_s19 + $0x18] sm:$0xf] %vm3307_vm11, %v4814_v61 }
 0x140   : > { %3322 = vst.msk [vmem:[%s6254_s19 + $0x1c] sm:$0xf] %vm3307_vm11, %v4814_v61  ;;  %3327 = vst.msk [vmem:[%s6254_s19 + $0x28] sm:$0xf] %vm3307_vm11, %v4814_v61 }
 0x141   : > { %3331 = vst.msk [vmem:[%s6254_s19 + $0x30] sm:$0xf] %vm3307_vm11, %v4814_v61  ;;  %3332 = vst.msk [vmem:[%s6254_s19 + $0x34] sm:$0xf] %vm3307_vm11, %v4814_v61 }
 0x142   : > { %3336 = vst.msk [vmem:[%s6254_s19 + $0x3c] sm:$0xf] %vm3307_vm11, %v4814_v61  ;;  %3337 = vst.msk [vmem:[%s6254_s19 + $0x40] sm:$0xf] %vm3307_vm11, %v4814_v61 }
 0x143   : > { %4504 = vmatmul.mubr.msk.bf16.gmra.mrb[8].mxu0 %vm853_vm3, %v5484_v6  ;;  %3341 = vst.msk [vmem:[%s6254_s19 + $0x48] sm:$0xf] %vm3307_vm11, %v4814_v61  ;;  %3342 = vst.msk [vmem:[%s6254_s19 + $0x4c] sm:$0xf] %vm3307_vm11, %v4814_v61 }
 0x144   : > { %4350 = vmatmul.mubr.msk.bf16.gmra.mrb[24].mxu1 %vm853_vm3, %v6003_v40  ;;  %4507 = vmatprep.mubr.msk.bf16.mxu0 %vm853_vm3, %v5521_v22  ;;  %3346 = vst.msk [vmem:[%s6254_s19 + $0x54] sm:$0xf] %vm3307_vm11, %v4814_v61  ;;  %3347 = vst.msk [vmem:[%s6254_s19 + $0x58] sm:$0xf] %vm3307_vm11, %v4814_v61  ;;  %v3313_v22 = vld [vmem:[%s6254_s19 + $0x8] sm:$0x3] }
 0x145   : > { %4353 = vmatprep.mubr.msk.bf16.mxu1 %vm853_vm3, %v6021_v23  ;;  %3351 = vst.msk [vmem:[%s6254_s19 + $0x60] sm:$0xf] %vm3307_vm11, %v4814_v61  ;;  %3352 = vst.msk [vmem:[%s6254_s19 + $0x64] sm:$0xf] %vm3307_vm11, %v4814_v61  ;;  %v3349_v40 = vsel %vm6332_vm14, 0, %v3348_v13 }
 0x146   : > { %3356 = vst.msk [vmem:[%s6254_s19 + $0x6c] sm:$0xf] %vm3307_vm11, %v4814_v61  ;;  %3357 = vst.msk [vmem:[%s6254_s19 + $0x70] sm:$0xf] %vm3307_vm11, %v4814_v61  ;;  %v3343_v23 = vld [vmem:[%s6254_s19 + $0x50] sm:$0x3] }
 0x147   : > { %3361 = vst.msk [vmem:[%s6254_s19 + $0x78] sm:$0xf] %vm3307_vm11, %v4814_v61  ;;  %3362 = vst.msk [vmem:[%s6254_s19 + $0x7c] sm:$0xf] %vm3307_vm11, %v4814_v61  ;;  %v3344_v43 = vsel %vm6332_vm14, 0, %v3343_v23 }
 0x148   : > { %3366 = vst.msk [vmem:[%s6254_s19 + $0x84] sm:$0xf] %vm3307_vm11, %v4814_v61  ;;  %3367 = vst.msk [vmem:[%s6254_s19 + $0x88] sm:$0xf] %vm3307_vm11, %v4814_v61 }
 0x149   : > { %3371 = vst.msk [vmem:[%s6254_s19 + $0x90] sm:$0xf] %vm3307_vm11, %v4814_v61  ;;  %3372 = vst.msk [vmem:[%s6254_s19 + $0x94] sm:$0xf] %vm3307_vm11, %v4814_v61 }
 0x14a   : > { %3376 = vst.msk [vmem:[%s6254_s19 + $0x9c] sm:$0xf] %vm3307_vm11, %v4814_v61  ;;  %3377 = vst.msk [vmem:[%s6254_s19 + $0xa0] sm:$0xf] %vm3307_vm11, %v4814_v61 }
 0x14b   : > { %4508 = vmatmul.mubr.msk.bf16.gmra.mrb[12].mxu0 %vm853_vm3, %v5577_v11  ;;  %3381 = vst.msk [vmem:[%s6254_s19 + $0xa8] sm:$0xf] %vm3307_vm11, %v4814_v61  ;;  %3382 = vst.msk [vmem:[%s6254_s19 + $0xac] sm:$0xf] %vm3307_vm11, %v4814_v61  ;;  %v3318_v11 = vld [vmem:[%s6254_s19 + $0x14] sm:$0x3] }
 0x14c   : > { %4354 = vmatmul.mubr.msk.bf16.gmra.mrb[28].mxu1 %vm853_vm3, %v6092_v52  ;;  %4511 = vmatprep.mubr.msk.bf16.mxu0 %vm853_vm3, %v5598_v4  ;;  %3386 = vst.msk [vmem:[%s6254_s19 + $0xb4] sm:$0xf] %vm3307_vm11, %v4814_v61  ;;  %3387 = vst.msk [vmem:[%s6254_s19 + $0xb8] sm:$0xf] %vm3307_vm11, %v4814_v61  ;;  %v3314_v4 = vsel %vm6332_vm14, 0, %v3313_v22 }
 0x14d   : > { %4375 = vmatprep.mubr.msk.bf16.mxu1 %vm853_vm3, %v6949_v50  ;;  %3391 = vst.msk [vmem:[%s6254_s19 + $0xc0] sm:$0xf] %vm3307_vm11, %v4814_v61  ;;  %3392 = vst.msk [vmem:[%s6254_s19 + $0xc4] sm:$0xf] %vm3307_vm11, %v4814_v61  ;;  %v3363_v52 = vld [vmem:[%s6254_s19 + $0x80] sm:$0x3] }
 0x14e   : > { %3396 = vst.msk [vmem:[%s6254_s19 + $0xcc] sm:$0xf] %vm3307_vm11, %v4814_v61  ;;  %3397 = vst.msk [vmem:[%s6254_s19 + $0xd0] sm:$0xf] %vm3307_vm11, %v4814_v61  ;;  %v3364_v36 = vsel %vm6332_vm14, 0, %v3363_v52 }
 0x14f   : > { %3401 = vst.msk [vmem:[%s6254_s19 + $0xd8] sm:$0xf] %vm3307_vm11, %v4814_v61  ;;  %3402 = vst.msk [vmem:[%s6254_s19 + $0xdc] sm:$0xf] %vm3307_vm11, %v4814_v61 }
 0x150   : > { %3315 = vst [vmem:[%s6254_s19 + $0x8] sm:$0x3] %v3314_v4  ;;  %3335 = vst [vmem:[%s6254_s19 + $0x38] sm:$0x3] %v3334_v29 }
 0x151   : > { %3350 = vst [vmem:[%s6254_s19 + $0x5c] sm:$0x3] %v3349_v40  ;;  %3345 = vst [vmem:[%s6254_s19 + $0x50] sm:$0x3] %v3344_v43 }
 0x152   : > { %3365 = vst [vmem:[%s6254_s19 + $0x80] sm:$0x3] %v3364_v36 }
 0x153   : > { %4512 = vmatmul.mubr.msk.bf16.gmra.mrb[16].mxu0 %vm853_vm3, %v5640_v24  ;;  %v3319_v24 = vsel %vm6332_vm14, 0, %v3318_v11 }
 0x154   : > { %4376 = vmatmul.mubr.msk.bf16.vlgmr.msra.gmra.mrb[16].mxu1 %vm853_vm3, %v6950_v0  ;;  %4515 = vmatprep.mubr.msk.bf16.mxu0 %vm853_vm3, %v6940_v15  ;;  %3320 = vst [vmem:[%s6254_s19 + $0x14] sm:$0x3] %v3319_v24  ;;  %v6431_v0 = vld [vmem:[%s6648_s2] ss:$0 sm:$0xff] }
 0x155   : > { %4379 = vmatprep.mubr.msk.bf16.mxu1 %vm853_vm3, %v6952_v46 }
 0x15b   : > { %4516 = vmatmul.mubr.msk.bf16.gmra.mrb[20].mxu0 %vm853_vm3, %v6943_v44 }
 0x15c   : > { %4380 = vmatmul.mubr.msk.bf16.gmra.mrb[20].mxu1 %vm853_vm3, %v6953_v30  ;;  %4519 = vmatprep.mubr.msk.bf16.mxu0 %vm853_vm3, %v6944_v17  ;;  %v6436_v30 = vld [vmem:[%s6649_s3] ss:$0 sm:$0xff] }
 0x15d   : > { %4383 = vmatprep.mubr.msk.bf16.mxu1 %vm853_vm3, %v6954_v34 }
 0x163   : > { %4520 = vmatmul.mubr.msk.bf16.gmra.mrb[24].mxu0 %vm853_vm3, %v6947_v53 }
 0x164   : > { %4384 = vmatmul.mubr.msk.bf16.gmra.mrb[24].mxu1 %vm853_vm3, %v6955_v57  ;;  %4523 = vmatprep.mubr.msk.bf16.mxu0 %vm853_vm3, %v5864_v55  ;;  %v3323_v55 = vld [vmem:[%s6254_s19 + $0x20] sm:$0x3] }
 0x165   : > { %4387 = vmatprep.mubr.msk.bf16.mxu1 %vm853_vm3, %v6956_v1  ;;  %v3324_v58 = vsel %vm6332_vm14, 0, %v3323_v55 }
 0x166   : > { %3325 = vst [vmem:[%s6254_s19 + $0x20] sm:$0x3] %v3324_v58 }
 0x16b   : > { %4524 = vmatmul.mubr.msk.bf16.gmra.mrb[28].mxu0 %vm853_vm3, %v6115_v60 }
 0x16c   : > { %4388 = vmatmul.mubr.msk.bf16.gmra.mrb[28].mxu1 %vm853_vm3, %v6045_v38  ;;  %v3358_v38 = vld [vmem:[%s6254_s19 + $0x74] sm:$0x3]  ;;  %vm6448_vm3 = vmor %vm3486_vm0, %vm3487_vm1 }
 0x16d   : > { %v3359_v7 = vsel %vm6332_vm14, 0, %v3358_v38 }
 0x16e   : > { %3360 = vst [vmem:[%s6254_s19 + $0x74] sm:$0x3] %v3359_v7 }
 0x1e7   : > { %v4327_v28 = vpop.f32.mrb[0].mxu1 }
 0x1e8   : > { %v1932_v31 = vpop.f32.mrb[1].mxu1 }
 0x1e9   : > { %v4328_v60 = vpop.f32.mrb[2].mxu1 }
 0x1ea   : > { %v1935_v10 = vpop.f32.mrb[3].mxu1 }
 0x1ef   : > { %v4331_v27 = vpop.f32.mrb[4].mxu1 }
 0x1f0   : > { %v1948_v20 = vpop.f32.mrb[5].mxu1 }
 0x1f1   : > { %v4332_v51 = vpop.f32.mrb[6].mxu1 }
 0x1f2   : > { %v1951_v15 = vpop.f32.mrb[7].mxu1 }
 0x1f7   : > { %v6412_v48 = vpop.f32.mrb[8].mxu1 }
 0x1f8   : > { %v6414_v35 = vpop.f32.mrb[9].mxu1 }
 0x1f9   : > { %v6416_v44 = vpop.f32.mrb[10].mxu1 }
 0x1fa   : > { %v6418_v17 = vpop.f32.mrb[11].mxu1 }
 0x1ff   : > { %v6420_v8 = vpop.f32.mrb[12].mxu1 }
 0x200   : > { %v6422_v33 = vpop.f32.mrb[13].mxu1 }
 0x201   : > { %v6424_v53 = vpop.f32.mrb[14].mxu1 }
 0x202   : > { %v6426_v56 = vpop.f32.mrb[15].mxu1 }
 0x206   : > { %v4497_v50 = vpop.f32.mrb[0].mxu0 }
 0x207   : > { %v4529_v5 = vadd.f32 %v4497_v50, %v4327_v28  ;;  %v3022_v46 = vpop.f32.mrb[1].mxu0 }
 0x208   : > { %v4530_v34 = vadd.f32 %v3022_v46, %v1932_v31  ;;  %v4498_v57 = vpop.f32.mrb[2].mxu0 }
 0x209   : > { %v3190_v1 = vmul.f32 %v4529_v5, %v6431_v0  ;;  %v4531_v61 = vadd.f32 %v4498_v57, %v4328_v60  ;;  %v3025_v6 = vpop.f32.mrb[3].mxu0 }
 0x20a   : > { %v3188_v22 = vmul.f32 %v4530_v34, %v6431_v0  ;;  %v4532_v11 = vadd.f32 %v3025_v6, %v1935_v10 }
 0x20b   : > { %v3229_v4 = vadd.f32 %v6436_v30, %v3190_v1  ;;  %v3191_v24 = vmul.f32 %v4531_v61, %v6431_v0 }
 0x20c   : > { %v3227_v14 = vadd.f32 %v6436_v30, %v3188_v22  ;;  %v3189_v59 = vmul.f32 %v4532_v11, %v6431_v0 }
 0x20d   : > { %v3261_v41 = vmax.f32 %v3229_v4, 0.0  ;;  %v3230_v42 = vadd.f32 %v6436_v30, %v3191_v24 }
 0x20e   : > { %v3259_v55 = vmax.f32 %v3227_v14, 0.0  ;;  %v3228_v58 = vadd.f32 %v6436_v30, %v3189_v59  ;;  %v4501_v39 = vpop.f32.mrb[4].mxu0 }
 0x20f   : > { %v4038_v63 = vpack.c.bf16 %v3261_v41, %v3261_v41  ;;  %v3262_v3 = vmax.f32 %v3230_v42, 0.0  ;;  %v4533_v29 = vadd.f32 %v4501_v39, %v4331_v27  ;;  %v3038_v13 = vpop.f32.mrb[5].mxu0 }
 0x210   : > { %v4036_v40 = vpack.c.bf16 %v3259_v55, %v3259_v55  ;;  %v3260_v23 = vmax.f32 %v3228_v58, 0.0  ;;  %v4534_v43 = vadd.f32 %v3038_v13, %v1948_v20  ;;  %v4502_v38 = vpop.f32.mrb[6].mxu0 }
 0x211   : > { %v3494_v7 = vrot.slane %v4038_v63, 7  ;;  %v4039_v16 = vpack.c.bf16 %v3262_v3, %v3262_v3  ;;  %v3194_v49 = vmul.f32 %v4533_v29, %v6431_v0  ;;  %v4535_v12 = vadd.f32 %v4502_v38, %v4332_v51  ;;  %v3041_v9 = vpop.f32.mrb[7].mxu0 }
 0x212   : > { %v3489_v52 = vrot.slane %v4036_v40, 7  ;;  %v4037_v19 = vpack.c.bf16 %v3260_v23, %v3260_v23  ;;  %v3192_v25 = vmul.f32 %v4534_v43, %v6431_v0  ;;  %v4536_v18 = vadd.f32 %v3041_v9, %v1951_v15 }
 0x213   : > { %v3495_v62 = vrot.slane %v3494_v7, 4  ;;  %3989 = vst.msk [vmem:[%s6254_s19 + $0x24] sm:$0xe] %vm3618_vm15, %v3494_v7  ;;  %v3496_v47 = vrot.slane %v4039_v16, 7  ;;  %v3233_v45 = vadd.f32 %v6436_v30, %v3194_v49  ;;  %v3195_v2 = vmul.f32 %v4535_v12, %v6431_v0 }
 0x214   : > { %v3490_v32 = vrot.slane %v3489_v52, 4  ;;  %3986 = vst.msk [vmem:[%s6254_s19 + $0x18] sm:$0xe] %vm3618_vm15, %v3489_v52  ;;  %v3491_v37 = vrot.slane %v4037_v19, 7  ;;  %v3231_v26 = vadd.f32 %v6436_v30, %v3192_v25  ;;  %v3193_v21 = vmul.f32 %v4536_v18, %v6431_v0 }
 0x215   : > { %v3497_v54 = vsel %vm6448_vm3, %v3495_v62, %v3496_v47  ;;  %v3498_v28 = vrot.slane %v3496_v47, 4  ;;  %v3265_v31 = vmax.f32 %v3233_v45, 0.0  ;;  %v3234_v60 = vadd.f32 %v6436_v30, %v3195_v2 }
 0x216   : > { %3990 = vst.msk [vmem:[%s6254_s19 + $0x28] sm:$0xf] %vm3307_vm11, %v3497_v54  ;;  %v3492_v10 = vsel %vm6448_vm3, %v3490_v32, %v3491_v37  ;;  %v3493_v27 = vrot.slane %v3491_v37, 4  ;;  %v3263_v20 = vmax.f32 %v3231_v26, 0.0  ;;  %v3232_v51 = vadd.f32 %v6436_v30, %v3193_v21  ;;  %v4505_v15 = vpop.f32.mrb[8].mxu0 }
 0x217   : > { %3991 = vst.msk [vmem:[%s6254_s19 + $0x2c] sm:$0x1] %vm3621_vm2, %v3498_v28  ;;  %v4042_v50 = vpack.c.bf16 %v3265_v31, %v3265_v31  ;;  %v3266_v5 = vmax.f32 %v3234_v60, 0.0  ;;  %v4537_v46 = vadd.f32 %v4505_v15, %v6412_v48  ;;  %v3054_v34 = vpop.f32.mrb[9].mxu0 }
 0x218   : > { %3987 = vst.msk [vmem:[%s6254_s19 + $0x1c] sm:$0xf] %vm3307_vm11, %v3492_v10  ;;  %v4040_v57 = vpack.c.bf16 %v3263_v20, %v3263_v20  ;;  %v3264_v1 = vmax.f32 %v3232_v51, 0.0  ;;  %v4538_v61 = vadd.f32 %v3054_v34, %v6414_v35  ;;  %v4506_v6 = vpop.f32.mrb[10].mxu0 }
 0x219   : > { %3988 = vst.msk [vmem:[%s6254_s19 + $0x20] sm:$0x1] %vm3621_vm2, %v3493_v27  ;;  %v3504_v22 = vrot.slane %v4042_v50, 7  ;;  %v4043_v11 = vpack.c.bf16 %v3266_v5, %v3266_v5  ;;  %v3198_v4 = vmul.f32 %v4537_v46, %v6431_v0  ;;  %v4539_v24 = vadd.f32 %v4506_v6, %v6416_v44  ;;  %v3057_v14 = vpop.f32.mrb[11].mxu0 }
 0x21a   : > { %v3499_v59 = vrot.slane %v4040_v57, 7  ;;  %v4041_v41 = vpack.c.bf16 %v3264_v1, %v3264_v1  ;;  %v3196_v48 = vmul.f32 %v4538_v61, %v6431_v0  ;;  %v4540_v42 = vadd.f32 %v3057_v14, %v6418_v17 }
 0x21b   : > { %v3505_v55 = vrot.slane %v3504_v22, 4  ;;  %3995 = vst.msk [vmem:[%s6254_s19 + $0x3c] sm:$0xe] %vm3618_vm15, %v3504_v22  ;;  %v3506_v35 = vrot.slane %v4043_v11, 7  ;;  %v3237_v58 = vadd.f32 %v6436_v30, %v3198_v4  ;;  %v3199_v39 = vmul.f32 %v4539_v24, %v6431_v0 }
 0x21c   : > { %v3500_v63 = vrot.slane %v3499_v59, 4  ;;  %3992 = vst.msk [vmem:[%s6254_s19 + $0x30] sm:$0xe] %vm3618_vm15, %v3499_v59  ;;  %v3501_v44 = vrot.slane %v4041_v41, 7  ;;  %v3235_v3 = vadd.f32 %v6436_v30, %v3196_v48  ;;  %v3197_v29 = vmul.f32 %v4540_v42, %v6431_v0 }
 0x21d   : > { %v3507_v17 = vsel %vm6448_vm3, %v3505_v55, %v3506_v35  ;;  %v3508_v13 = vrot.slane %v3506_v35, 4  ;;  %v3269_v40 = vmax.f32 %v3237_v58, 0.0  ;;  %v3238_v23 = vadd.f32 %v6436_v30, %v3199_v39 }
 0x21e   : > { %3996 = vst.msk [vmem:[%s6254_s19 + $0x40] sm:$0xf] %vm3307_vm11, %v3507_v17  ;;  %v3502_v43 = vsel %vm6448_vm3, %v3500_v63, %v3501_v44  ;;  %v3503_v38 = vrot.slane %v3501_v44, 4  ;;  %v3267_v7 = vmax.f32 %v3235_v3, 0.0  ;;  %v3236_v16 = vadd.f32 %v6436_v30, %v3197_v29  ;;  %v4509_v49 = vpop.f32.mrb[12].mxu0 }
 0x21f   : > { %3997 = vst.msk [vmem:[%s6254_s19 + $0x44] sm:$0x1] %vm3621_vm2, %v3508_v13  ;;  %v4046_v12 = vpack.c.bf16 %v3269_v40, %v3269_v40  ;;  %v3270_v9 = vmax.f32 %v3238_v23, 0.0  ;;  %v4541_v52 = vadd.f32 %v4509_v49, %v6420_v8  ;;  %v3070_v19 = vpop.f32.mrb[13].mxu0 }
 0x220   : > { %3993 = vst.msk [vmem:[%s6254_s19 + $0x34] sm:$0xf] %vm3307_vm11, %v3502_v43  ;;  %v4044_v25 = vpack.c.bf16 %v3267_v7, %v3267_v7  ;;  %v3268_v18 = vmax.f32 %v3236_v16, 0.0  ;;  %v4542_v62 = vadd.f32 %v3070_v19, %v6422_v33  ;;  %v4510_v47 = vpop.f32.mrb[14].mxu0 }
 0x221   : > { %3994 = vst.msk [vmem:[%s6254_s19 + $0x38] sm:$0x1] %vm3621_vm2, %v3503_v38  ;;  %v3514_v45 = vrot.slane %v4046_v12, 7  ;;  %v4047_v2 = vpack.c.bf16 %v3270_v9, %v3270_v9  ;;  %v3202_v32 = vmul.f32 %v4541_v52, %v6431_v0  ;;  %v4543_v37 = vadd.f32 %v4510_v47, %v6424_v53  ;;  %v3073_v26 = vpop.f32.mrb[15].mxu0 }
 0x222   : > { %v3509_v21 = vrot.slane %v4044_v25, 7  ;;  %v4045_v54 = vpack.c.bf16 %v3268_v18, %v3268_v18  ;;  %v3200_v8 = vmul.f32 %v4542_v62, %v6431_v0  ;;  %v4544_v28 = vadd.f32 %v3073_v26, %v6426_v56 }
 0x223   : > { %v3515_v31 = vrot.slane %v3514_v45, 4  ;;  %4001 = vst.msk [vmem:[%s6254_s19 + $0x54] sm:$0xe] %vm3618_vm15, %v3514_v45  ;;  %v3516_v33 = vrot.slane %v4047_v2, 7  ;;  %v3241_v60 = vadd.f32 %v6436_v30, %v3202_v32  ;;  %v3203_v10 = vmul.f32 %v4543_v37, %v6431_v0 }
 0x224   : > { %v3510_v27 = vrot.slane %v3509_v21, 4  ;;  %3998 = vst.msk [vmem:[%s6254_s19 + $0x48] sm:$0xe] %vm3618_vm15, %v3509_v21  ;;  %v3511_v53 = vrot.slane %v4045_v54, 7  ;;  %v3239_v20 = vadd.f32 %v6436_v30, %v3200_v8  ;;  %v3201_v51 = vmul.f32 %v4544_v28, %v6431_v0 }
 0x225   : > { %v3517_v15 = vsel %vm6448_vm3, %v3515_v31, %v3516_v33  ;;  %v3518_v50 = vrot.slane %v3516_v33, 4  ;;  %v3273_v5 = vmax.f32 %v3241_v60, 0.0  ;;  %v3242_v46 = vadd.f32 %v6436_v30, %v3203_v10 }
 0x226   : > { %4002 = vst.msk [vmem:[%s6254_s19 + $0x58] sm:$0xf] %vm3307_vm11, %v3517_v15  ;;  %v3512_v57 = vsel %vm6448_vm3, %v3510_v27, %v3511_v53  ;;  %v3513_v1 = vrot.slane %v3511_v53, 4  ;;  %v3271_v61 = vmax.f32 %v3239_v20, 0.0  ;;  %v3240_v6 = vadd.f32 %v6436_v30, %v3201_v51  ;;  %v4513_v22 = vpop.f32.mrb[16].mxu0 }
 0x227   : > { %v4377_v56 = vpop.f32.mrb[16].mxu1  ;;  %4003 = vst.msk [vmem:[%s6254_s19 + $0x5c] sm:$0x1] %vm3621_vm2, %v3518_v50  ;;  %v4050_v4 = vpack.c.bf16 %v3273_v5, %v3273_v5  ;;  %v3274_v24 = vmax.f32 %v3242_v46, 0.0  ;;  %v3086_v59 = vpop.f32.mrb[17].mxu0 }
 0x228   : > { %v2209_v34 = vpop.f32.mrb[17].mxu1  ;;  %3999 = vst.msk [vmem:[%s6254_s19 + $0x4c] sm:$0xf] %vm3307_vm11, %v3512_v57  ;;  %v4545_v14 = vadd.f32 %v4513_v22, %v4377_v56  ;;  %v4048_v48 = vpack.c.bf16 %v3271_v61, %v3271_v61  ;;  %v3272_v42 = vmax.f32 %v3240_v6, 0.0  ;;  %v4514_v35 = vpop.f32.mrb[18].mxu0 }
 0x229   : > { %v4378_v11 = vpop.f32.mrb[18].mxu1  ;;  %4000 = vst.msk [vmem:[%s6254_s19 + $0x50] sm:$0x1] %vm3621_vm2, %v3513_v1  ;;  %v4546_v55 = vadd.f32 %v3086_v59, %v2209_v34  ;;  %v3524_v58 = vrot.slane %v4050_v4, 7  ;;  %v4051_v39 = vpack.c.bf16 %v3274_v24, %v3274_v24  ;;  %v3089_v3 = vpop.f32.mrb[19].mxu0 }
 0x22a   : > { %v2212_v41 = vpop.f32.mrb[19].mxu1  ;;  %v3206_v63 = vmul.f32 %v4545_v14, %v6431_v0  ;;  %v4547_v44 = vadd.f32 %v4514_v35, %v4378_v11  ;;  %v3519_v29 = vrot.slane %v4048_v48, 7  ;;  %v4049_v17 = vpack.c.bf16 %v3272_v42, %v3272_v42 }
 0x22b   : > { %v3204_v13 = vmul.f32 %v4546_v55, %v6431_v0  ;;  %v4548_v40 = vadd.f32 %v3089_v3, %v2212_v41  ;;  %v3525_v23 = vrot.slane %v3524_v58, 4  ;;  %4007 = vst.msk [vmem:[%s6254_s19 + $0x6c] sm:$0xe] %vm3618_vm15, %v3524_v58  ;;  %v3526_v43 = vrot.slane %v4051_v39, 7 }
 0x22c   : > { %v3245_v38 = vadd.f32 %v6436_v30, %v3206_v63  ;;  %v3207_v7 = vmul.f32 %v4547_v44, %v6431_v0  ;;  %v3520_v16 = vrot.slane %v3519_v29, 4  ;;  %4004 = vst.msk [vmem:[%s6254_s19 + $0x60] sm:$0xe] %vm3618_vm15, %v3519_v29  ;;  %v3521_v49 = vrot.slane %v4049_v17, 7 }
 0x22d   : > { %v3243_v12 = vadd.f32 %v6436_v30, %v3204_v13  ;;  %v3205_v9 = vmul.f32 %v4548_v40, %v6431_v0  ;;  %v3527_v19 = vsel %vm6448_vm3, %v3525_v23, %v3526_v43  ;;  %v3528_v25 = vrot.slane %v3526_v43, 4 }
 0x22e   : > { %v3277_v18 = vmax.f32 %v3245_v38, 0.0  ;;  %v3246_v62 = vadd.f32 %v6436_v30, %v3207_v7  ;;  %4008 = vst.msk [vmem:[%s6254_s19 + $0x70] sm:$0xf] %vm3307_vm11, %v3527_v19  ;;  %v3522_v45 = vsel %vm6448_vm3, %v3520_v16, %v3521_v49  ;;  %v3523_v2 = vrot.slane %v3521_v49, 4  ;;  %v4517_v26 = vpop.f32.mrb[20].mxu0 }
 0x22f   : > { %v4381_v52 = vpop.f32.mrb[20].mxu1  ;;  %v3275_v32 = vmax.f32 %v3243_v12, 0.0  ;;  %v3244_v37 = vadd.f32 %v6436_v30, %v3205_v9  ;;  %4009 = vst.msk [vmem:[%s6254_s19 + $0x74] sm:$0x1] %vm3621_vm2, %v3528_v25  ;;  %v3102_v31 = vpop.f32.mrb[21].mxu0 }
 0x230   : > { %v2225_v47 = vpop.f32.mrb[21].mxu1  ;;  %4005 = vst.msk [vmem:[%s6254_s19 + $0x64] sm:$0xf] %vm3307_vm11, %v3522_v45  ;;  %v4054_v54 = vpack.c.bf16 %v3277_v18, %v3277_v18  ;;  %v3278_v8 = vmax.f32 %v3246_v62, 0.0  ;;  %v4549_v28 = vadd.f32 %v4517_v26, %v4381_v52  ;;  %v4518_v53 = vpop.f32.mrb[22].mxu0 }
 0x231   : > { %v4382_v21 = vpop.f32.mrb[22].mxu1  ;;  %4006 = vst.msk [vmem:[%s6254_s19 + $0x68] sm:$0x1] %vm3621_vm2, %v3523_v2  ;;  %v4052_v60 = vpack.c.bf16 %v3275_v32, %v3275_v32  ;;  %v3276_v10 = vmax.f32 %v3244_v37, 0.0  ;;  %v4550_v27 = vadd.f32 %v3102_v31, %v2225_v47  ;;  %v3105_v50 = vpop.f32.mrb[23].mxu0 }
 0x232   : > { %v2228_v33 = vpop.f32.mrb[23].mxu1  ;;  %v3534_v20 = vrot.slane %v4054_v54, 7  ;;  %v4055_v51 = vpack.c.bf16 %v3278_v8, %v3278_v8  ;;  %v3210_v56 = vmul.f32 %v4549_v28, %v6431_v0  ;;  %v4551_v15 = vadd.f32 %v4518_v53, %v4382_v21 }
 0x233   : > { %v3529_v5 = vrot.slane %v4052_v60, 7  ;;  %v4053_v46 = vpack.c.bf16 %v3276_v10, %v3276_v10  ;;  %v3208_v34 = vmul.f32 %v4550_v27, %v6431_v0  ;;  %v4552_v57 = vadd.f32 %v3105_v50, %v2228_v33 }
 0x234   : > { %v3535_v1 = vrot.slane %v3534_v20, 4  ;;  %4013 = vst.msk [vmem:[%s6254_s19 + $0x84] sm:$0xe] %vm3618_vm15, %v3534_v20  ;;  %v3536_v61 = vrot.slane %v4055_v51, 7  ;;  %v3249_v6 = vadd.f32 %v6436_v30, %v3210_v56  ;;  %v3211_v22 = vmul.f32 %v4551_v15, %v6431_v0 }
 0x235   : > { %v3530_v11 = vrot.slane %v3529_v5, 4  ;;  %4010 = vst.msk [vmem:[%s6254_s19 + $0x78] sm:$0xe] %vm3618_vm15, %v3529_v5  ;;  %v3531_v4 = vrot.slane %v4053_v46, 7  ;;  %v3247_v24 = vadd.f32 %v6436_v30, %v3208_v34  ;;  %v3209_v14 = vmul.f32 %v4552_v57, %v6431_v0 }
 0x236   : > { %v3537_v41 = vsel %vm6448_vm3, %v3535_v1, %v3536_v61  ;;  %v3538_v48 = vrot.slane %v3536_v61, 4  ;;  %v3281_v42 = vmax.f32 %v3249_v6, 0.0  ;;  %v3250_v55 = vadd.f32 %v6436_v30, %v3211_v22  ;;  %v4521_v3 = vpop.f32.mrb[24].mxu0 }
 0x237   : > { %v4385_v59 = vpop.f32.mrb[24].mxu1  ;;  %4014 = vst.msk [vmem:[%s6254_s19 + $0x88] sm:$0xf] %vm3307_vm11, %v3537_v41  ;;  %v3532_v58 = vsel %vm6448_vm3, %v3530_v11, %v3531_v4  ;;  %v3533_v39 = vrot.slane %v3531_v4, 4  ;;  %v3279_v63 = vmax.f32 %v3247_v24, 0.0  ;;  %v3248_v44 = vadd.f32 %v6436_v30, %v3209_v14  ;;  %v3118_v23 = vpop.f32.mrb[25].mxu0 }
 0x238   : > { %v2241_v35 = vpop.f32.mrb[25].mxu1  ;;  %4015 = vst.msk [vmem:[%s6254_s19 + $0x8c] sm:$0x1] %vm3621_vm2, %v3538_v48  ;;  %v4058_v17 = vpack.c.bf16 %v3281_v42, %v3281_v42  ;;  %v3282_v13 = vmax.f32 %v3250_v55, 0.0  ;;  %v4553_v40 = vadd.f32 %v4521_v3, %v4385_v59  ;;  %v4522_v49 = vpop.f32.mrb[26].mxu0 }
 0x239   : > { %v4386_v29 = vpop.f32.mrb[26].mxu1  ;;  %4011 = vst.msk [vmem:[%s6254_s19 + $0x7c] sm:$0xf] %vm3307_vm11, %v3532_v58  ;;  %v4056_v38 = vpack.c.bf16 %v3279_v63, %v3279_v63  ;;  %v3280_v7 = vmax.f32 %v3248_v44, 0.0  ;;  %v4554_v16 = vadd.f32 %v3118_v23, %v2241_v35  ;;  %v3121_v25 = vpop.f32.mrb[27].mxu0 }
 0x23a   : > { %v2244_v43 = vpop.f32.mrb[27].mxu1  ;;  %4012 = vst.msk [vmem:[%s6254_s19 + $0x80] sm:$0x1] %vm3621_vm2, %v3533_v39  ;;  %v3544_v12 = vrot.slane %v4058_v17, 7  ;;  %v4059_v9 = vpack.c.bf16 %v3282_v13, %v3282_v13  ;;  %v3214_v52 = vmul.f32 %v4553_v40, %v6431_v0  ;;  %v4555_v19 = vadd.f32 %v4522_v49, %v4386_v29 }
 0x23b   : > { %v3539_v18 = vrot.slane %v4056_v38, 7  ;;  %v4057_v62 = vpack.c.bf16 %v3280_v7, %v3280_v7  ;;  %v3212_v47 = vmul.f32 %v4554_v16, %v6431_v0  ;;  %v4556_v45 = vadd.f32 %v3121_v25, %v2244_v43 }
 0x23c   : > { %v3545_v2 = vrot.slane %v3544_v12, 4  ;;  %4019 = vst.msk [vmem:[%s6254_s19 + $0x9c] sm:$0xe] %vm3618_vm15, %v3544_v12  ;;  %v3546_v32 = vrot.slane %v4059_v9, 7  ;;  %v3253_v37 = vadd.f32 %v6436_v30, %v3214_v52  ;;  %v3215_v26 = vmul.f32 %v4555_v19, %v6431_v0 }
 0x23d   : > { %v3540_v21 = vrot.slane %v3539_v18, 4  ;;  %4016 = vst.msk [vmem:[%s6254_s19 + $0x90] sm:$0xe] %vm3618_vm15, %v3539_v18  ;;  %v3541_v54 = vrot.slane %v4057_v62, 7  ;;  %v3251_v8 = vadd.f32 %v6436_v30, %v3212_v47  ;;  %v3213_v28 = vmul.f32 %v4556_v45, %v6431_v0 }
 0x23e   : > { %v3547_v33 = vsel %vm6448_vm3, %v3545_v2, %v3546_v32  ;;  %v3548_v60 = vrot.slane %v3546_v32, 4  ;;  %v3285_v10 = vmax.f32 %v3253_v37, 0.0  ;;  %v3254_v27 = vadd.f32 %v6436_v30, %v3215_v26  ;;  %v4525_v50 = vpop.f32.mrb[28].mxu0 }
 0x23f   : > { %v4389_v31 = vpop.f32.mrb[28].mxu1  ;;  %4020 = vst.msk [vmem:[%s6254_s19 + $0xa0] sm:$0xf] %vm3307_vm11, %v3547_v33  ;;  %v3542_v20 = vsel %vm6448_vm3, %v3540_v21, %v3541_v54  ;;  %v3543_v51 = vrot.slane %v3541_v54, 4  ;;  %v3283_v56 = vmax.f32 %v3251_v8, 0.0  ;;  %v3252_v15 = vadd.f32 %v6436_v30, %v3213_v28  ;;  %v3134_v1 = vpop.f32.mrb[29].mxu0 }
 0x240   : > { %v2257_v53 = vpop.f32.mrb[29].mxu1  ;;  %4021 = vst.msk [vmem:[%s6254_s19 + $0xa4] sm:$0x1] %vm3621_vm2, %v3548_v60  ;;  %v4062_v46 = vpack.c.bf16 %v3285_v10, %v3285_v10  ;;  %v3286_v34 = vmax.f32 %v3254_v27, 0.0  ;;  %v4557_v57 = vadd.f32 %v4525_v50, %v4389_v31  ;;  %v4526_v4 = vpop.f32.mrb[30].mxu0 }
 0x241   : > { %v4390_v5 = vpop.f32.mrb[30].mxu1  ;;  %4017 = vst.msk [vmem:[%s6254_s19 + $0x94] sm:$0xf] %vm3307_vm11, %v3542_v20  ;;  %v4060_v6 = vpack.c.bf16 %v3283_v56, %v3283_v56  ;;  %v3284_v22 = vmax.f32 %v3252_v15, 0.0  ;;  %v4558_v11 = vadd.f32 %v3134_v1, %v2257_v53  ;;  %v3137_v48 = vpop.f32.mrb[31].mxu0 }
 0x242   : > { %v2260_v61 = vpop.f32.mrb[31].mxu1  ;;  %4018 = vst.msk [vmem:[%s6254_s19 + $0x98] sm:$0x1] %vm3621_vm2, %v3543_v51  ;;  %v3554_v24 = vrot.slane %v4062_v46, 7  ;;  %v4063_v14 = vpack.c.bf16 %v3286_v34, %v3286_v34  ;;  %v3218_v59 = vmul.f32 %v4557_v57, %v6431_v0  ;;  %v4559_v41 = vadd.f32 %v4526_v4, %v4390_v5 }
 0x243   : > { %v3549_v42 = vrot.slane %v4060_v6, 7  ;;  %v4061_v55 = vpack.c.bf16 %v3284_v22, %v3284_v22  ;;  %v3216_v35 = vmul.f32 %v4558_v11, %v6431_v0  ;;  %v4560_v58 = vadd.f32 %v3137_v48, %v2260_v61 }
 0x244   : > { %v3555_v39 = vrot.slane %v3554_v24, 4  ;;  %4025 = vst.msk [vmem:[%s6254_s19 + $0xb4] sm:$0xe] %vm3618_vm15, %v3554_v24  ;;  %v3556_v63 = vrot.slane %v4063_v14, 7  ;;  %v3257_v44 = vadd.f32 %v6436_v30, %v3218_v59  ;;  %v3219_v3 = vmul.f32 %v4559_v41, %v6431_v0 }
 0x245   : > { %v3550_v29 = vrot.slane %v3549_v42, 4  ;;  %4022 = vst.msk [vmem:[%s6254_s19 + $0xa8] sm:$0xe] %vm3618_vm15, %v3549_v42  ;;  %v3551_v17 = vrot.slane %v4061_v55, 7  ;;  %v3255_v13 = vadd.f32 %v6436_v30, %v3216_v35  ;;  %v3217_v40 = vmul.f32 %v4560_v58, %v6431_v0 }
 0x246   : > { %v3557_v23 = vsel %vm6448_vm3, %v3555_v39, %v3556_v63  ;;  %v3558_v43 = vrot.slane %v3556_v63, 4  ;;  %v3289_v38 = vmax.f32 %v3257_v44, 0.0  ;;  %v3258_v7 = vadd.f32 %v6436_v30, %v3219_v3 }
 0x247   : > { %4026 = vst.msk [vmem:[%s6254_s19 + $0xb8] sm:$0xf] %vm3307_vm11, %v3557_v23  ;;  %v3552_v16 = vsel %vm6448_vm3, %v3550_v29, %v3551_v17  ;;  %v3553_v49 = vrot.slane %v3551_v17, 4  ;;  %v3287_v12 = vmax.f32 %v3255_v13, 0.0  ;;  %v3256_v9 = vadd.f32 %v6436_v30, %v3217_v40 }
 0x248   : > { %4027 = vst.msk [vmem:[%s6254_s19 + $0xbc] sm:$0x1] %vm3621_vm2, %v3558_v43  ;;  %v4066_v0 = vpack.c.bf16 %v3289_v38, %v3289_v38  ;;  %v3290_v52 = vmax.f32 %v3258_v7, 0.0 }
 0x249   : > { %4023 = vst.msk [vmem:[%s6254_s19 + $0xac] sm:$0xf] %vm3307_vm11, %v3552_v16  ;;  %v4064_v19 = vpack.c.bf16 %v3287_v12, %v3287_v12  ;;  %v3288_v25 = vmax.f32 %v3256_v9, 0.0 }
 0x24a   : > { %4024 = vst.msk [vmem:[%s6254_s19 + $0xb0] sm:$0x1] %vm3621_vm2, %v3553_v49  ;;  %v3564_v18 = vrot.slane %v4066_v0, 7  ;;  %v4067_v62 = vpack.c.bf16 %v3290_v52, %v3290_v52 }
 0x24b   : > { %v3559_v47 = vrot.slane %v4064_v19, 7  ;;  %v4065_v45 = vpack.c.bf16 %v3288_v25, %v3288_v25 }
 0x24c   : > { %v3565_v30 = vrot.slane %v3564_v18, 4  ;;  %4031 = vst.msk [vmem:[%s6254_s19 + $0xcc] sm:$0xe] %vm3618_vm15, %v3564_v18  ;;  %v3566_v2 = vrot.slane %v4067_v62, 7 }
 0x24d   : > { %v3560_v32 = vrot.slane %v3559_v47, 4  ;;  %4028 = vst.msk [vmem:[%s6254_s19 + $0xc0] sm:$0xe] %vm3618_vm15, %v3559_v47  ;;  %v3561_v37 = vrot.slane %v4065_v45, 7 }
 0x24e   : > { %v3567_v26 = vsel %vm6448_vm3, %v3565_v30, %v3566_v2  ;;  %v3568_v21 = vrot.slane %v3566_v2, 4 }
 0x24f   : > { %4032 = vst.msk [vmem:[%s6254_s19 + $0xd0] sm:$0xf] %vm3307_vm11, %v3567_v26  ;;  %v3562_v54 = vsel %vm6448_vm3, %v3560_v32, %v3561_v37  ;;  %v3563_v8 = vrot.slane %v3561_v37, 4 }
 0x250   : > { %4033 = vst.msk [vmem:[%s6254_s19 + $0xd4] sm:$0x1] %vm3621_vm2, %v3568_v21 }
 0x251   : > { %4029 = vst.msk [vmem:[%s6254_s19 + $0xc4] sm:$0xf] %vm3307_vm11, %v3562_v54 }
 0x252   : > { %4030 = vst.msk [vmem:[%s6254_s19 + $0xc8] sm:$0x1] %vm3621_vm2, %v3563_v8 }
 0x253 PF: > { %s14_s15 = sadd.s32 1, %s4812_s15  }
 0x254   : > { %p11_p4 = scmp.ge.s32.totalorder %s14_s15, 4  }
 0x256   :  { %13 = sbr.rel (!%p11_p4) target bundleno = 1 (0x1), region = 69 }

// kernel: szcvi_forward.7
= control target key start
LH: loop header
LB: loop body
LE: loop exit
PB: predicated region body
PF: predicated region fallthrough
CT: control target
= control target key end

     0   :  { %s7214_s15 = smov 0   ;;  %s9526_s0 = inlined_call_operand.vmem [shape: bf16[2,19,19,64], index: 0, kind: input, shape index: {}]   ;;  %s9527_s1 = inlined_call_operand.vmem [shape: bf16[3,192,64], index: 1, kind: input, shape index: {}]   ;;  %s9528_s2 = inlined_call_operand.vmem [shape: f32[1,64], index: 2, kind: input, shape index: {}]   ;;  %s9529_s3 = inlined_call_operand.vmem [shape: f32[1,64], index: 3, kind: input, shape index: {}]   ;;  %s9530_s4 = inlined_call_operand.vmem [shape: bf16[2,11,11,64], index: 4, kind: output, shape index: {}]  }
   0x1 LB: > { %s5863_s16 = sadd.s32 4294967295, %s7185_s15   ;;  %p5867_p0 = scmp.ge.s32.totalorder %s7185_s15, 1  ;;  %s7185_s15 = sphi %s7214_s15, %s14_s15  }
   0x2   : > { %p162_p1 = scmp.lt.s32.totalorder %s7185_s15, 3 }
   0x4   : > { %p163_p2 = pnand %p5867_p0, %p162_p1 }
   0x6   : > { %166 = sbr.rel (%p163_p2) target bundleno = 932 (0x3a4), region = 36 }
   0xd   : > { %v7134_v0 = vld [vmem:[%s9527_s1 + $0x20] sm:$0xff]   ;;  %p188_p3 = scmp.lt.s32.totalorder %s5863_s16, 1  ;;  %v7136_v2 = vld [vmem:[%s9527_s1 + $0x28] sm:$0xff]   ;;  %v7138_v4 = vld [vmem:[%s9527_s1 + $0x30] sm:$0xff]   ;;  %vm696_vm0 = vcmask 1042432   ;;  %vm697_vm1 = vcmask 1046532  }
   0xe   : > { %v7135_v1 = vld [vmem:[%s9527_s1 + $0x80] sm:$0xff]   ;;  %6498 = vmatprep.subr.bf16.mxu1 %v7134_v0  ;;  %v7137_v3 = vld [vmem:[%s9527_s1 + $0x88] sm:$0xff]   ;;  %v7139_v5 = vld [vmem:[%s9527_s1 + $0x90] sm:$0xff]   ;;  %vm891_vm3 = vcmask 523264   ;;  %vm253_vm4 = vsmask.f32 3328 }
   0xf   : > { %s9845_s16 = smov (!%p188_p3, %s5863_s16), 1  ;;  %6658 = vmatprep.subr.bf16.mxu0 %v7135_v1  ;;  %6499 = vmatpush3.bf16.msra.mxu1 %v7134_v0  ;;  %v7140_v6 = vld [vmem:[%s9527_s1 + $0x38] sm:$0xff]   ;;  %vm7262_vm2 = vmor %vm696_vm0, %vm697_vm1  ;;  %v7288_v30 = vld [vmem:[%s9527_s1] sm:$0xff]   ;;  %vm254_vm5 = vsmask.f32 7440  ;;  %vm4246_vm10 = vcmask 517120  }
  0x10   : > { %6659 = vmatpush3.bf16.msra.mxu0 %v7135_v1  ;;  %6500 = vmatprep.subr.bf16.mxu1 %v7136_v2  ;;  %s7122_s27 = smul.u32 228, %s9845_s16  ;;  %v7141_v10 = vld [vmem:[%s9527_s1 + $0x98] sm:$0xff]   ;;  %v7304_v35 = vld [vmem:[%s9527_s1 + $0xa0] sm:$0xff]   ;;  %vm7324_vm6 = vmor %vm253_vm4, %vm254_vm5  ;;  %vm1382_vm7 = vsmask.f32 2304  ;;  %vm5399_vm11 = vcmask 519168  }
  0x11   : > { %6660 = vmatprep.subr.bf16.mxu0 %v7137_v3  ;;  %vm1383_vm8 = vsmask.f32 6416  ;;  %s7123_s30 = smul.u32 88, %s9845_s16  ;;  %vm5402_vm12 = vsmask.f32 1280  ;;  %vm5703_vm14 = vcmask 1043459  }
  0x12   : > { %s7246_s6 = scalar_lea.vmem %s9526_s0, %s7122_s27  ;;  %vm7542_vm9 = vmor %vm1382_vm7, %vm1383_vm8  ;;  %vm5705_vm15 = vcmask 1044484   ;;  %vm5707_vm0 = vcmask 1045509   ;;  %vm5709_vm1 = vcmask 1046534   ;;  %vm5713_vm4 = vcmask 1041409  }
  0x13   : > { %6501 = vmatpush3.bf16.msra.mxu1 %v7136_v2  ;;  %v199_v7 = vld [vmem:[%s7246_s6 + $0xc] sm:$0xf]  ;;  %v7253_v8 = vld [vmem:[%s7246_s6 + $0x10] sm:$0xf]  ;;  %v7256_v9 = vld [vmem:[%s7246_s6 + $0x14] sm:$0x3]  ;;  %s8696_s8 = scalar_lea.vmem %s9530_s4, %s7123_s30 }
  0x14   : > { %6661 = vmatpush3.bf16.msra.mxu0 %v7137_v3  ;;  %6502 = vmatprep.subr.bf16.mxu1 %v7138_v4  ;;  %v257_v11 = vshrl.u32 %v199_v7, 16  ;;  %v260_v12 = vshll.u32 %v199_v7, 16  ;;  %v270_v13 = vshrl.u32 %v7253_v8, 16  ;;  %v9537_v15 = vshll.u32 %v7253_v8, 16  ;;  %v202_v23 = vld [vmem:[%s7246_s6 + $0x18] sm:$0xf]  ;;  %vm8702_vm13 = vmand %vm4246_vm10, %vm5402_vm12 }
  0x15   : > { %6662 = vmatprep.subr.bf16.mxu0 %v7139_v5  ;;  %v5870_v16 = vrot.slane %v199_v7, 9  ;;  %v701_v17 = vrot.slane %v7253_v8, 5  ;;  %v704_v18 = vrot.slane %v7256_v9, 5  ;;  %v9536_v22 = vshll.u32 %v7256_v9, 16  ;;  %v203_v28 = vld [vmem:[%s7246_s6 + $0x1c] sm:$0xf] }
  0x16   : > { %v7269_v19 = vrot.slane %v257_v11, 4  ;;  %v7271_v20 = vrot.slane %v260_v12, 5  ;;  %v7273_v21 = vrot.slane %v270_v13, 4  ;;  %v7279_v26 = vrot.slane %v257_v11, 5  ;;  %v204_v29 = vld [vmem:[%s7246_s6 + $0x20] sm:$0x3] }
  0x17   : > { %6503 = vmatpush3.bf16.msra.mxu1 %v7138_v4  ;;  %v702_v24 = vsel %vm7262_vm2, %v5870_v16, %v701_v17  ;;  %v703_v25 = vrot.slane %v701_v17, 4  ;;  %v7281_v27 = vrot.slane %v260_v12, 6  ;;  %v7290_v31 = vrot.slane %v270_v13, 5  ;;  %v7320_v54 = vld [vmem:[%s7246_s6 + $0x24] sm:$0xf]  ;;  %v7145_v7 = vld [vmem:[%s9527_s1 + $0x8] sm:$0xff]  }
  0x18   : > { %6663 = vmatpush3.bf16.msra.mxu0 %v7139_v5  ;;  %6504 = vmatprep.subr.bf16.mxu1 %v7140_v6  ;;  %9652 = vst [vmem:[#allocation2_spill] sm:$0xff] %v7279_v26  ;;  %v7294_v32 = vrot.slane %v9537_v15, 6  ;;  %v7299_v34 = vrot.slane %v9536_v22, 6  ;;  %v281_v37 = vshrl.u32 %v202_v23, 16  ;;  %v284_v38 = vshll.u32 %v202_v23, 16 }
  0x19   : > { %9653 = vst [vmem:[#allocation3_spill] sm:$0xff] %v7281_v27  ;;  %6664 = vmatprep.subr.bf16.mxu0 %v7141_v10  ;;  %9654 = vst [vmem:[#allocation4_spill] sm:$0xff] %v7290_v31  ;;  %v705_v36 = vsel %vm7262_vm2, %v703_v25, %v704_v18  ;;  %v290_v40 = vshll.u32 %v203_v28, 16  ;;  %v294_v41 = vshrl.u32 %v203_v28, 16  ;;  %v300_v44 = vshll.u32 %v204_v29, 16 }
  0x1a   : > { %9655 = vst [vmem:[#allocation5_spill] sm:$0xff] %v7294_v32  ;;  %9656 = vst [vmem:[#allocation6_spill] sm:$0xff] %v7299_v34  ;;  %v5886_v39 = vcombine.low %v702_v24, %v705_v36  ;;  %v283_v42 = vrot.slane %v281_v37, 4  ;;  %v286_v43 = vrot.slane %v284_v38, 5  ;;  %v5871_v45 = vrot.slane %v202_v23, 9 }
  0x1b   : > { %6505 = vmatpush3.bf16.msra.mxu1 %v7140_v6  ;;  %v7310_v46 = vrot.slane %v290_v40, 5  ;;  %v296_v47 = vrot.slane %v294_v41, 4  ;;  %v708_v48 = vrot.slane %v203_v28, 5  ;;  %v711_v49 = vrot.slane %v204_v29, 5  ;;  %v7334_v60 = vld [vmem:[%s7246_s6 + $0x28] sm:$0xf] }
  0x1c   : > { %6665 = vmatpush3.bf16.msra.mxu0 %v7141_v10  ;;  %6538 = vmatprep.subr.bf16.mxu1 %v7288_v30  ;;  %v287_v50 = vor.u32 %v286_v43, %v283_v42  ;;  %v7313_v51 = vrot.slane %v300_v44, 5  ;;  %v7315_v52 = vrot.slane %v281_v37, 5  ;;  %v7317_v53 = vrot.slane %v284_v38, 6  ;;  %v7343_v1 = vld [vmem:[%s7246_s6 + $0x2c] sm:$0x3] }
  0x1d   : > { %6506 = vmatprep.mubr.msk.bf16.mxu1 %vm891_vm3, %v5886_v39  ;;  %6698 = vmatprep.subr.bf16.mxu0 %v7304_v35  ;;  %v297_v56 = vor.u32 %v296_v47, %v7310_v46  ;;  %v709_v57 = vsel %vm7262_vm2, %v5871_v45, %v708_v48  ;;  %v710_v58 = vrot.slane %v708_v48, 4  ;;  %v7331_v59 = vrot.slane %v294_v41, 5  ;;  %9659 = vst [vmem:[#allocation7_spill] sm:$0xff] %v7343_v1  ;;  %v7352_v6 = vld [vmem:[%s7246_s6 + $0x30] sm:$0xf] }
  0x1e   : > { %v7336_v61 = vrot.slane %v287_v50, 4  ;;  %v7338_v62 = vrot.slane %v290_v40, 6  ;;  %v1409_v63 = vshrl.u32 %v204_v29, 16  ;;  %v7340_v0 = vrot.slane %v300_v44, 6  ;;  %9660 = vst [vmem:[#allocation8_spill] sm:$0xff] %v7352_v6 }
  0x1f   : > { %v7345_v2 = vrot.slane %v297_v56, 4  ;;  %v712_v3 = vsel %vm7262_vm2, %v710_v58, %v711_v49  ;;  %v9535_v4 = vshrl.u32 %v7320_v54, 16  ;;  %v9534_v5 = vshll.u32 %v7320_v54, 16  ;;  %v7365_v16 = vld [vmem:[%s7246_s6 + $0x34] sm:$0xf] }
  0x20   : > { %v5887_v11 = vcombine.low %v709_v57, %v712_v3  ;;  %v7361_v12 = vrot.slane %v1409_v63, 5  ;;  %v9533_v13 = vshll.u32 %v7334_v60, 16  ;;  %9661 = vst [vmem:[#allocation9_spill] sm:$0xff] %v7365_v16  ;;  %v7368_v17 = vld [vmem:[%s7246_s6 + $0x38] sm:$0x3]  ;;  %v9532_v23 = vshrl.u32 %v7334_v60, 16 }
  0x21   : > { %9662 = vst [vmem:[#allocation10_spill] sm:$0xff] %v7368_v17  ;;  %v9531_v24 = vshll.u32 %v7343_v1, 16  ;;  %v5872_v25 = vrot.slane %v7320_v54, 9  ;;  %v7378_v28 = vld [vmem:[%s7246_s6 + $0x3c] sm:$0xf]  ;;  %v715_v36 = vrot.slane %v7334_v60, 5 }
  0x22   : > { %9663 = vst [vmem:[#allocation11_spill] sm:$0xff] %v7378_v28  ;;  %v7381_v29 = vld [vmem:[%s7246_s6 + $0x40] sm:$0xf]  ;;  %6666 = vmatprep.mubr.msk.bf16.mxu0 %vm891_vm3, %v5887_v11  ;;  %6507 = vmatmul.mubr.msk.bf16.vlgmr.msra.gmra.mrb[0].mxu1 %vm891_vm3, %v5887_v11  ;;  %v718_v37 = vrot.slane %v7343_v1, 5  ;;  %v1415_v38 = vrot.slane %v9535_v4, 5  ;;  %v1416_v39 = vrot.slane %v9534_v5, 6 }
  0x23   : > { %9664 = vst [vmem:[#allocation12_spill] sm:$0xff] %v7381_v29  ;;  %v1419_v40 = vrot.slane %v9532_v23, 5  ;;  %v1420_v41 = vrot.slane %v9533_v13, 6  ;;  %v1424_v42 = vshrl.u32 %v7343_v1, 16  ;;  %v7398_v43 = vrot.slane %v9531_v24, 6  ;;  %6539 = vmatpush3.bf16.msra.mxu1 %v7288_v30  ;;  %v7148_v11 = vld [vmem:[%s9527_s1 + $0x10] sm:$0xff]  }
  0x24   : > { %v7402_v44 = vld [vmem:[%s7246_s6 + $0x44] sm:$0x3]  ;;  %v716_v45 = vsel %vm7262_vm2, %v5872_v25, %v715_v36  ;;  %v717_v47 = vrot.slane %v715_v36, 4  ;;  %v1417_v48 = vor.u32 %v1416_v39, %v1415_v38  ;;  %v5873_v49 = vrot.slane %v7352_v6, 9  ;;  %v7408_v50 = vld [vmem:[%s7246_s6 + $0x48] sm:$0xf]  ;;  %6540 = vmatprep.subr.bf16.mxu1 %v7145_v7 }
  0x25   : > { %9665 = vst [vmem:[#allocation13_spill] sm:$0xff] %v7402_v44  ;;  %v7411_v56 = vld [vmem:[%s7246_s6 + $0x4c] sm:$0xf]  ;;  %v7413_v57 = vor.u32 %v1420_v41, %v1419_v40  ;;  %v7415_v58 = vrot.slane %v1424_v42, 5  ;;  %v722_v30 = vrot.slane %v7365_v16, 5  ;;  %v725_v63 = vrot.slane %v7368_v17, 5 }
  0x26   : > { %v7420_v3 = vld [vmem:[%s7246_s6 + $0x50] sm:$0x3]  ;;  %v719_v25 = vsel %vm7262_vm2, %v717_v47, %v718_v37  ;;  %v7427_v36 = vrot.slane %v1417_v48, 4  ;;  %v5874_v38 = vrot.slane %v7378_v28, 9  ;;  %v729_v39 = vrot.slane %v7381_v29, 5  ;;  %v7144_v37 = vld [vmem:[%s9527_s1 + $0xa8] sm:$0xff]  }
  0x27   : > { %9666 = vst [vmem:[#allocation14_spill] sm:$0xff] %v7420_v3  ;;  %v7431_v40 = vcombine.low %v716_v45, %v719_v25  ;;  %v723_v42 = vsel %vm7262_vm2, %v5873_v49, %v722_v30  ;;  %v724_v33 = vrot.slane %v722_v30, 4  ;;  %v7441_v47 = vld [vmem:[%s7246_s6 + $0x54] sm:$0xf]  ;;  %6541 = vmatpush3.bf16.msra.mxu1 %v7145_v7  ;;  %v732_v25 = vrot.slane %v7402_v44, 5  ;;  %v7150_v13 = vld [vmem:[%s9527_s1 + $0x18] sm:$0xff]  }
  0x28   : > { %v730_v48 = vsel %vm7262_vm2, %v5874_v38, %v729_v39  ;;  %v731_v45 = vrot.slane %v729_v39, 4  ;;  %v5875_v24 = vrot.slane %v7408_v50, 9  ;;  %v7448_v23 = vld [vmem:[%s7246_s6 + $0x58] sm:$0xf]  ;;  %6542 = vmatprep.subr.bf16.mxu1 %v7148_v11  ;;  %v736_v49 = vrot.slane %v7411_v56, 5 }
  0x29   : > { %9667 = vst [vmem:[#allocation15_spill] sm:$0xff] %v7431_v40  ;;  %9668 = vst [vmem:[#allocation16_spill] sm:$0xff] %v7448_v23  ;;  %6667 = vmatmul.mubr.msk.bf16.vlgmr.msra.gmra.mrb[0].mxu0 %vm891_vm3, %v7431_v40  ;;  %6510 = vmatprep.mubr.msk.bf16.mxu1 %vm891_vm3, %v7431_v40  ;;  %v726_v7 = vsel %vm7262_vm2, %v724_v33, %v725_v63  ;;  %v739_v30 = vrot.slane %v7420_v3, 5  ;;  %v7459_v38 = vld [vmem:[%s7246_s6 + $0x5c] sm:$0x3]  ;;  %v5876_v39 = vrot.slane %v7441_v47, 9 }
  0x2a   : > { %9669 = vst [vmem:[#allocation17_spill] sm:$0xff] %v7459_v38  ;;  %6699 = vmatpush3.bf16.msra.mxu0 %v7304_v35  ;;  %v7466_v5 = vcombine.low %v723_v42, %v726_v7  ;;  %v733_v33 = vsel %vm7262_vm2, %v731_v45, %v732_v25  ;;  %v743_v63 = vrot.slane %v7448_v23, 5  ;;  %v746_v4 = vrot.slane %v7459_v38, 5  ;;  %v7146_v35 = vld [vmem:[%s9527_s1 + $0xb0] sm:$0xff]   ;;  %v7480_v42 = vld [vmem:[%s7246_s6 + $0x60] sm:$0xf] }
  0x2b   : > { %v7472_v10 = vcombine.low %v730_v48, %v733_v33  ;;  %6700 = vmatprep.subr.bf16.mxu0 %v7144_v37  ;;  %v737_v18 = vsel %vm7262_vm2, %v5875_v24, %v736_v49  ;;  %v738_v22 = vrot.slane %v736_v49, 4  ;;  %9672 = vst [vmem:[#allocation20_spill] sm:$0xff] %v7480_v42  ;;  %v7483_v45 = vld [vmem:[%s7246_s6 + $0x64] sm:$0xf]  ;;  %v1402_v25 = vor.u32 %v7317_v53, %v7315_v52  ;;  %v7494_v7 = vld [vmem:[%s7246_s6 + $0x68] sm:$0x3] }
  0x2c   : > { %9670 = vst [vmem:[#allocation18_spill] sm:$0xff] %v7466_v5  ;;  %6543 = vmatpush3.bf16.msra.mxu1 %v7148_v11  ;;  %6670 = vmatprep.mubr.msk.bf16.mxu0 %vm891_vm3, %v7466_v5  ;;  %v744_v24 = vsel %vm7262_vm2, %v5876_v39, %v743_v63  ;;  %v745_v48 = vrot.slane %v743_v63, 4  ;;  %v5877_v49 = vrot.slane %v7480_v42, 9  ;;  %v750_v33 = vrot.slane %v7483_v45, 5  ;;  %v7501_v52 = vld [vmem:[%s9527_s1 + $0x40] sm:$0xff]  }
  0x2d   : > { %9671 = vst [vmem:[#allocation19_spill] sm:$0xff] %v7472_v10  ;;  %6511 = vmatmul.mubr.msk.bf16.gmra.mrb[4].mxu1 %vm891_vm3, %v7466_v5  ;;  %v740_v53 = vsel %vm7262_vm2, %v738_v22, %v739_v30  ;;  %v753_v11 = vrot.slane %v7494_v7, 5  ;;  %v7509_v39 = vld [vmem:[%s7246_s6 + $0x6c] sm:$0xf]  ;;  %v7512_v63 = vld [vmem:[%s7246_s6 + $0x70] sm:$0xf]  ;;  %v1406_v41 = vor.u32 %v7338_v62, %v7331_v59  ;;  %6544 = vmatprep.subr.bf16.mxu1 %v7150_v13 }
  0x2e   : > { %6514 = vmatprep.mubr.msk.bf16.mxu1 %vm891_vm3, %v7472_v10  ;;  %v1403_v15 = vrot.slane %v1402_v25, 4  ;;  %6701 = vmatpush3.bf16.msra.mxu0 %v7144_v37  ;;  %v7516_v5 = vcombine.low %v737_v18, %v740_v53  ;;  %v747_v40 = vsel %vm7262_vm2, %v745_v48, %v746_v4  ;;  %v751_v22 = vsel %vm7262_vm2, %v5877_v49, %v750_v33  ;;  %v7523_v34 = vld [vmem:[%s7246_s6 + $0x74] sm:$0x3]  ;;  %v7147_v4 = vld [vmem:[%s9527_s1 + $0xb8] sm:$0xff]  }
  0x2f   : > { %v752_v30 = vrot.slane %v750_v33, 4  ;;  %v7525_v32 = vcombine.low %v744_v24, %v747_v40  ;;  %6702 = vmatprep.subr.bf16.mxu0 %v7146_v35  ;;  %v5878_v25 = vrot.slane %v7509_v39, 9  ;;  %v757_v59 = vrot.slane %v7512_v63, 5  ;;  %v7549_v33 = vld [vmem:[%s7246_s6 + $0x78] sm:$0xf] }
  0x30   : > { %9673 = vst [vmem:[#allocation21_spill] sm:$0xff] %v7516_v5  ;;  %v760_v62 = vrot.slane %v7523_v34, 5  ;;  %6545 = vmatpush3.bf16.msra.mxu1 %v7150_v13  ;;  %v1408_v40 = vrot.slane %v1406_v41, 4  ;;  %v1413_v49 = vor.u32 %v7340_v0, %v7361_v12  ;;  %v7552_v53 = vld [vmem:[%s7246_s6 + $0x7c] sm:$0xf]  ;;  %v5879_v0 = vrot.slane %v7549_v33, 9 }
  0x31   : > { %9674 = vst [vmem:[#allocation22_spill] sm:$0xff] %v7525_v32  ;;  %v754_v18 = vsel %vm7262_vm2, %v752_v30, %v753_v11  ;;  %6578 = vmatprep.subr.bf16.mxu1 %v7501_v52  ;;  %6671 = vmatmul.mubr.msk.bf16.gmra.mrb[4].mxu0 %vm891_vm3, %v7472_v10  ;;  %v758_v24 = vsel %vm7262_vm2, %v5878_v25, %v757_v59  ;;  %v759_v48 = vrot.slane %v757_v59, 4  ;;  %v7557_v11 = vld [vmem:[%s9527_s1 + $0xc0] sm:$0xff]   ;;  %v764_v12 = vrot.slane %v7552_v53, 5 }
  0x32   : > { %v7538_v37 = vcombine.low %v751_v22, %v754_v18  ;;  %6674 = vmatprep.mubr.msk.bf16.mxu0 %vm891_vm3, %v7516_v5  ;;  %6703 = vmatpush3.bf16.msra.mxu0 %v7146_v35  ;;  %v1407_v22 = vsel %vm7542_vm9, %v1403_v15, %v1406_v41  ;;  %v7564_v30 = vld [vmem:[%s7246_s6 + $0x80] sm:$0x3]  ;;  %v1422_v25 = vsel %vm7542_vm9, %v7427_v36, %v7413_v57  ;;  %v1423_v59 = vrot.slane %v7413_v57, 4 }
  0x33   : > { %v761_v35 = vsel %vm7262_vm2, %v759_v48, %v760_v62  ;;  %6704 = vmatprep.subr.bf16.mxu0 %v7147_v4  ;;  %v1414_v15 = vsel %vm7542_vm9, %v1408_v40, %v1413_v49  ;;  %v767_v41 = vrot.slane %v7564_v30, 5  ;;  %v765_v36 = vsel %vm7262_vm2, %v5879_v0, %v764_v12  ;;  %v7587_v48 = vld [vmem:[%s7246_s6 + $0x84] sm:$0xf]  ;;  %v7600_v49 = vld [vmem:[%s7246_s6 + $0x8c] sm:$0x3] }
  0x34   : > { %9675 = vst [vmem:[#allocation23_spill] sm:$0xff] %v7538_v37  ;;  %v7580_v18 = vcombine.low %v758_v24, %v761_v35  ;;  %v7582_v10 = vcombine.low %v1407_v22, %v1414_v15  ;;  %v766_v62 = vrot.slane %v764_v12, 4  ;;  %v9680_v57 = vor.u32 %v7398_v43, %v7415_v58  ;;  %v7597_v24 = vld [vmem:[%s7246_s6 + $0x88] sm:$0xf]  ;;  %v9823_v13 = vld [vmem:[#allocation18_spill] sm:$0xff] }
  0x35   : > { %6515 = vmatmul.mubr.msk.bf16.gmra.mrb[8].mxu1 %vm891_vm3, %v7516_v5  ;;  %v5880_v22 = vrot.slane %v7587_v48, 9  ;;  %v771_v58 = vrot.slane %v7597_v24, 5  ;;  %v774_v15 = vrot.slane %v7600_v49, 5  ;;  %v9542_v0 = vshll.u32 %v7352_v6, 16 }
  0x36   : > { %9678 = vst [vmem:[#allocation24_spill] sm:$0xff] %v7580_v18  ;;  %9679 = vst [vmem:[#allocation25_spill] sm:$0xff] %v7582_v10  ;;  %6518 = vmatprep.mubr.msk.bf16.mxu1 %vm891_vm3, %v7525_v32  ;;  %v1429_v40 = vsel %vm7542_vm9, %v1423_v59, %v9680_v57  ;;  %6705 = vmatpush3.bf16.msra.mxu0 %v7147_v4  ;;  %v768_v35 = vsel %vm7262_vm2, %v766_v62, %v767_v41  ;;  %v7613_v59 = vld [vmem:[%s7246_s6 + $0x90] sm:$0xf]  ;;  %v9543_v12 = vshrl.u32 %v7365_v16, 16  ;;  %vm5790_vm5 = vcmask 519169  }
  0x37   : > { %v7608_v43 = vcombine.low %v1422_v25, %v1429_v40  ;;  %v7615_v57 = vcombine.low %v765_v36, %v768_v35  ;;  %6738 = vmatprep.subr.bf16.mxu0 %v7557_v11  ;;  %v7622_v41 = vld [vmem:[%s7246_s6 + $0x94] sm:$0xf]  ;;  %v772_v25 = vsel %vm7262_vm2, %v5880_v22, %v771_v58  ;;  %v773_v62 = vrot.slane %v771_v58, 4  ;;  %v7639_v58 = vld [vmem:[%s7246_s6 + $0x98] sm:$0x3] }
  0x38   : > { %9683 = vst [vmem:[#allocation28_spill] sm:$0xff] %v7622_v41  ;;  %v9550_v40 = vshll.u32 %v7368_v17, 16  ;;  %v9684_v5 = vshrl.u32 %v7352_v6, 16  ;;  %v1431_v35 = vrot.slane %v9542_v0, 6  ;;  %v1434_v4 = vrot.slane %v9543_v12, 5 }
  0x39   : > { %9681 = vst [vmem:[#allocation26_spill] sm:$0xff] %v7608_v43  ;;  %9682 = vst [vmem:[#allocation27_spill] sm:$0xff] %v7615_v57  ;;  %6675 = vmatmul.mubr.msk.bf16.gmra.mrb[8].mxu0 %vm891_vm3, %v7525_v32  ;;  %v9685_v31 = vshll.u32 %v7365_v16, 16  ;;  %v1439_v22 = vshrl.u32 %v7368_v17, 16  ;;  %v5881_v12 = vrot.slane %v7613_v59, 9  ;;  %v778_v32 = vrot.slane %v7622_v41, 5 }
  0x3a   : > { %v1430_v36 = vrot.slane %v9684_v5, 5  ;;  %6678 = vmatprep.mubr.msk.bf16.mxu0 %vm891_vm3, %v7538_v37  ;;  %v775_v5 = vsel %vm7262_vm2, %v773_v62, %v774_v15  ;;  %v1442_v0 = vrot.slane %v9550_v40, 6  ;;  %v781_v62 = vrot.slane %v7639_v58, 5  ;;  %v7658_v17 = vld [vmem:[%s7246_s6 + $0x9c] sm:$0xf] }
  0x3b   : > { %v1435_v27 = vrot.slane %v9685_v31, 6  ;;  %v7649_v31 = vcombine.low %v772_v25, %v775_v5  ;;  %v1441_v6 = vrot.slane %v1439_v22, 5  ;;  %v779_v1 = vsel %vm7262_vm2, %v5881_v12, %v778_v32  ;;  %v7661_v41 = vld [vmem:[%s7246_s6 + $0xa0] sm:$0xf] }
  0x3c   : > { %v1432_v26 = vor.u32 %v1431_v35, %v1430_v36  ;;  %v780_v15 = vrot.slane %v778_v32, 4  ;;  %v7667_v35 = vld [vmem:[%s7246_s6 + $0xa4] sm:$0x3]  ;;  %v9555_v22 = vshrl.u32 %v7381_v29, 16  ;;  %v9691_v5 = vshll.u32 %v7381_v29, 16 }
  0x3d   : > { %9686 = vst [vmem:[#allocation29_spill] sm:$0xff] %v7649_v31  ;;  %v1436_v16 = vor.u32 %v1435_v27, %v1434_v4  ;;  %6519 = vmatmul.mubr.msk.bf16.gmra.mrb[12].mxu1 %vm891_vm3, %v7538_v37  ;;  %v1443_v25 = vor.u32 %v1442_v0, %v1441_v6  ;;  %v9688_v0 = vshrl.u32 %v7378_v28, 16  ;;  %v7708_v29 = vld [vmem:[%s7246_s6 + $0xac] sm:$0xf] }
  0x3e   : > { %6522 = vmatprep.mubr.msk.bf16.mxu1 %vm891_vm3, %v7580_v18  ;;  %v1433_v27 = vrot.slane %v1432_v26, 4  ;;  %v782_v32 = vsel %vm7262_vm2, %v780_v15, %v781_v62  ;;  %v9690_v15 = vshll.u32 %v7378_v28, 16  ;;  %v1449_v12 = vrot.slane %v9555_v22, 5 }
  0x3f   : > { %v1438_v4 = vrot.slane %v1436_v16, 4  ;;  %v7678_v6 = vcombine.low %v779_v1, %v782_v32  ;;  %v1445_v36 = vrot.slane %v9688_v0, 5  ;;  %v1454_v1 = vshrl.u32 %v7402_v44, 16 }
  0x40   : > { %v1437_v40 = vsel %vm7542_vm9, %v1433_v27, %v1436_v16  ;;  %v1446_v62 = vrot.slane %v9690_v15, 6  ;;  %v1450_v16 = vrot.slane %v9691_v5, 6  ;;  %v9692_v27 = vshll.u32 %v7402_v44, 16  ;;  %v7705_v44 = vld [vmem:[%s7246_s6 + $0xa8] sm:$0xf] }
  0x41   : > { %v1444_v26 = vsel %vm7542_vm9, %v1438_v4, %v1443_v25  ;;  %9687 = vst [vmem:[#allocation30_spill] sm:$0xff] %v7678_v6  ;;  %6679 = vmatmul.mubr.msk.bf16.gmra.mrb[12].mxu0 %vm891_vm3, %v7580_v18  ;;  %v5882_v4 = vrot.slane %v7658_v17, 9  ;;  %v785_v25 = vrot.slane %v7661_v41, 5  ;;  %v788_v5 = vrot.slane %v7667_v35, 5 }
  0x42   : > { %v7682_v37 = vcombine.low %v1437_v40, %v1444_v26  ;;  %v1457_v40 = vrot.slane %v9692_v27, 6  ;;  %6706 = vmatprep.mubr.msk.bf16.mxu0 %vm891_vm3, %v7582_v10  ;;  %v1447_v32 = vor.u32 %v1446_v62, %v1445_v36  ;;  %v1451_v26 = vor.u32 %v1450_v16, %v1449_v12 }
  0x43   : > { %v9567_v0 = vshrl.u32 %v7408_v50, 16  ;;  %v1456_v15 = vrot.slane %v1454_v1, 5  ;;  %v786_v22 = vsel %vm7262_vm2, %v5882_v4, %v785_v25  ;;  %v787_v18 = vrot.slane %v785_v25, 4  ;;  %v7715_v1 = vld [vmem:[%s7246_s6 + $0xb0] sm:$0x3] }
  0x44   : > { %9689 = vst [vmem:[#allocation31_spill] sm:$0xff] %v7682_v37  ;;  %v1448_v36 = vrot.slane %v1447_v32, 4  ;;  %v1453_v12 = vrot.slane %v1451_v26, 4  ;;  %v9568_v27 = vshll.u32 %v7420_v3, 16  ;;  %v9694_v16 = vshll.u32 %v7408_v50, 16 }
  0x45   : > { %6523 = vmatmul.mubr.msk.bf16.gmra.mrb[16].mxu1 %vm891_vm3, %v7615_v57  ;;  %v1458_v4 = vor.u32 %v1457_v40, %v1456_v15  ;;  %v789_v25 = vsel %vm7262_vm2, %v787_v18, %v788_v5  ;;  %v1460_v57 = vrot.slane %v9567_v0, 5  ;;  %v9695_v28 = vshrl.u32 %v7411_v56, 16 }
  0x46   : > { %6526 = vmatprep.mubr.msk.bf16.mxu1 %vm891_vm3, %v7649_v31  ;;  %v1452_v32 = vsel %vm7542_vm9, %v1448_v36, %v1451_v26  ;;  %v7726_v62 = vcombine.low %v786_v22, %v789_v25  ;;  %v1461_v10 = vrot.slane %v9694_v16, 6  ;;  %v9696_v18 = vshll.u32 %v7411_v56, 16  ;;  %v7151_v22 = vld [vmem:[%s9527_s1 + $0xc8] sm:$0xff]  }
  0x47   : > { %v1464_v31 = vrot.slane %v9695_v28, 5  ;;  %v1459_v40 = vsel %vm7542_vm9, %v1453_v12, %v1458_v4  ;;  %v1469_v15 = vshrl.u32 %v7420_v3, 16  ;;  %v1472_v0 = vrot.slane %v9568_v27, 6 }
  0x48   : > { %9693 = vst [vmem:[#allocation32_spill] sm:$0xff] %v7726_v62  ;;  %v1465_v5 = vrot.slane %v9696_v18, 6  ;;  %v7742_v26 = vcombine.low %v1452_v32, %v1459_v40  ;;  %v1462_v36 = vor.u32 %v1461_v10, %v1460_v57  ;;  %v5883_v28 = vrot.slane %v7705_v44, 9  ;;  %v7777_v18 = vld [vmem:[%s7246_s6 + $0xbc] sm:$0x3] }
  0x49   : > { %v792_v12 = vrot.slane %v7708_v29, 5  ;;  %6707 = vmatmul.mubr.msk.bf16.vlgmr.msra.gmra.mrb[0].mxu0 %vm891_vm3, %v7608_v43  ;;  %v1471_v4 = vrot.slane %v1469_v15, 5  ;;  %v795_v25 = vrot.slane %v7715_v1, 5  ;;  %v1484_v43 = vshrl.u32 %v7459_v38, 16 }
  0x4a   : > { %9697 = vst [vmem:[#allocation33_spill] sm:$0xff] %v7742_v26  ;;  %v1466_v16 = vor.u32 %v1465_v5, %v1464_v31  ;;  %6739 = vmatpush3.bf16.msra.mxu0 %v7557_v11  ;;  %6710 = vmatprep.mubr.msk.bf16.mxu0 %vm891_vm3, %v7682_v37  ;;  %v1463_v10 = vrot.slane %v1462_v36, 4  ;;  %v7757_v31 = vld [vmem:[%s7246_s6 + $0xb4] sm:$0xf]  ;;  %v7762_v11 = vld [vmem:[%s7246_s6 + $0xb8] sm:$0xf] }
  0x4b   : > { %v793_v57 = vsel %vm7262_vm2, %v5883_v28, %v792_v12  ;;  %v794_v32 = vrot.slane %v792_v12, 4  ;;  %v1473_v15 = vor.u32 %v1472_v0, %v1471_v4  ;;  %6740 = vmatprep.subr.bf16.mxu0 %v7151_v22  ;;  %v7153_v36 = vld [vmem:[%s9527_s1 + $0xd0] sm:$0xff]   ;;  %v9698_v4 = vshrl.u32 %v7441_v47, 16 }
  0x4c   : > { %v1468_v5 = vrot.slane %v1466_v16, 4  ;;  %v1467_v28 = vsel %vm7542_vm9, %v1463_v10, %v1466_v16  ;;  %v9700_v16 = vshll.u32 %v7441_v47, 16 }
  0x4d   : > { %6527 = vmatmul.mubr.msk.bf16.gmra.mrb[20].mxu1 %vm891_vm3, %v7678_v6  ;;  %v796_v0 = vsel %vm7262_vm2, %v794_v32, %v795_v25  ;;  %v1475_v27 = vrot.slane %v9698_v4, 5  ;;  %v9701_v25 = vshrl.u32 %v7448_v23, 16  ;;  %v9703_v4 = vshll.u32 %v7448_v23, 16  ;;  %v7813_v23 = vld [vmem:[%s7246_s6 + $0xc4] sm:$0xf] }
  0x4e   : > { %6530 = vmatprep.mubr.msk.bf16.mxu1 %vm891_vm3, %v7726_v62  ;;  %v1474_v40 = vsel %vm7542_vm9, %v1468_v5, %v1473_v15  ;;  %v7783_v6 = vcombine.low %v793_v57, %v796_v0  ;;  %v1476_v10 = vrot.slane %v9700_v16, 6  ;;  %v9704_v62 = vshll.u32 %v7459_v38, 16  ;;  %6741 = vmatpush3.bf16.msra.mxu0 %v7151_v22  ;;  %v7810_v38 = vld [vmem:[%s7246_s6 + $0xc0] sm:$0xf] }
  0x4f   : > { %v1479_v32 = vrot.slane %v9701_v25, 5  ;;  %v7789_v12 = vcombine.low %v1467_v28, %v1474_v40  ;;  %v1480_v37 = vrot.slane %v9703_v4, 6  ;;  %v5884_v5 = vrot.slane %v7757_v31, 9  ;;  %6742 = vmatprep.subr.bf16.mxu0 %v7153_v36  ;;  %v7155_v28 = vld [vmem:[%s9527_s1 + $0xd8] sm:$0xff]  }
  0x50   : > { %9699 = vst [vmem:[#allocation34_spill] sm:$0xff] %v7783_v6  ;;  %v1487_v3 = vrot.slane %v9704_v62, 6  ;;  %v1477_v57 = vor.u32 %v1476_v10, %v1475_v27  ;;  %v799_v15 = vrot.slane %v7762_v11, 5  ;;  %v802_v40 = vrot.slane %v7777_v18, 5 }
  0x51   : > { %9702 = vst [vmem:[#allocation35_spill] sm:$0xff] %v7789_v12  ;;  %v1481_v0 = vor.u32 %v1480_v37, %v1479_v32  ;;  %v1486_v16 = vrot.slane %v1484_v43, 5  ;;  %v9583_v62 = vshrl.u32 %v7480_v42, 16  ;;  %6711 = vmatmul.mubr.msk.bf16.gmra.mrb[4].mxu0 %vm891_vm3, %v7742_v26  ;;  %v7816_v37 = vld [vmem:[%s7246_s6 + $0xc8] sm:$0x3]  ;;  %v9588_v22 = vshrl.u32 %v7483_v45, 16 }
  0x52   : > { %v1478_v27 = vrot.slane %v1477_v57, 4  ;;  %v800_v10 = vsel %vm7262_vm2, %v5884_v5, %v799_v15  ;;  %v801_v25 = vrot.slane %v799_v15, 4  ;;  %6714 = vmatprep.mubr.msk.bf16.mxu0 %vm891_vm3, %v7789_v12  ;;  %6743 = vmatpush3.bf16.msra.mxu0 %v7153_v36  ;;  %v7825_v5 = vld [vmem:[%s9527_s1 + $0xe0] sm:$0xff]   ;;  %v9708_v26 = vshll.u32 %v7494_v7, 16 }
  0x53   : > { %v1483_v43 = vrot.slane %v1481_v0, 4  ;;  %v1488_v32 = vor.u32 %v1487_v3, %v1486_v16  ;;  %v1490_v12 = vrot.slane %v9583_v62, 5  ;;  %v9705_v3 = vshll.u32 %v7480_v42, 16  ;;  %6744 = vmatprep.subr.bf16.mxu0 %v7155_v28 }
  0x54   : > { %v1482_v15 = vsel %vm7542_vm9, %v1478_v27, %v1481_v0  ;;  %v803_v4 = vsel %vm7262_vm2, %v801_v25, %v802_v40  ;;  %v1494_v0 = vrot.slane %v9588_v22, 5  ;;  %v9707_v40 = vshll.u32 %v7483_v45, 16 }
  0x55   : > { %v1491_v16 = vrot.slane %v9705_v3, 6  ;;  %6531 = vmatmul.mubr.msk.bf16.gmra.mrb[24].mxu1 %vm891_vm3, %v7783_v6  ;;  %v1489_v36 = vsel %vm7542_vm9, %v1483_v43, %v1488_v32  ;;  %v7839_v57 = vcombine.low %v800_v10, %v803_v4  ;;  %v1499_v3 = vshrl.u32 %v7494_v7, 16 }
  0x56   : > { %v1495_v27 = vrot.slane %v9707_v40, 6  ;;  %v7845_v25 = vcombine.low %v1482_v15, %v1489_v36  ;;  %v1502_v42 = vrot.slane %v9708_v26, 6  ;;  %v5885_v10 = vrot.slane %v7810_v38, 9  ;;  %6745 = vmatpush3.bf16.msra.mxu0 %v7155_v28 }
  0x57   : > { %9706 = vst [vmem:[#allocation36_spill] sm:$0xff] %v7839_v57  ;;  %v1492_v62 = vor.u32 %v1491_v16, %v1490_v12  ;;  %6534 = vmatprep.mubr.msk.bf16.mxu1 %vm891_vm3, %v7839_v57  ;;  %v806_v4 = vrot.slane %v7813_v23, 5  ;;  %v809_v32 = vrot.slane %v7816_v37, 5  ;;  %v1501_v15 = vrot.slane %v1499_v3, 5  ;;  %6778 = vmatprep.subr.bf16.mxu0 %v7825_v5 }
  0x58   : > { %v1496_v43 = vor.u32 %v1495_v27, %v1494_v0  ;;  %v9593_v12 = vshrl.u32 %v7509_v39, 16  ;;  %v9594_v3 = vshrl.u32 %v7512_v63, 16  ;;  %v9595_v22 = vshll.u32 %v7523_v34, 16 }
  0x59   : > { %v1493_v40 = vrot.slane %v1492_v62, 4  ;;  %v807_v36 = vsel %vm7262_vm2, %v5885_v10, %v806_v4  ;;  %v808_v0 = vrot.slane %v806_v4, 4  ;;  %6715 = vmatmul.mubr.msk.bf16.gmra.mrb[8].mxu0 %vm891_vm3, %v7845_v25  ;;  %v1503_v62 = vor.u32 %v1502_v42, %v1501_v15 }
  0x5a   : > { %v1498_v26 = vrot.slane %v1496_v43, 4  ;;  %v1505_v10 = vrot.slane %v9593_v12, 5  ;;  %v9709_v4 = vshll.u32 %v7509_v39, 16  ;;  %v9710_v57 = vshll.u32 %v7512_v63, 16 }
  0x5b   : > { %v1497_v28 = vsel %vm7542_vm9, %v1493_v40, %v1496_v43  ;;  %v810_v16 = vsel %vm7262_vm2, %v808_v0, %v809_v32  ;;  %v1509_v40 = vrot.slane %v9594_v3, 5  ;;  %v1514_v15 = vshrl.u32 %v7523_v34, 16 }
  0x5c   : > { %v1506_v27 = vrot.slane %v9709_v4, 6  ;;  %v1510_v6 = vrot.slane %v9710_v57, 6  ;;  %v1504_v43 = vsel %vm7542_vm9, %v1498_v26, %v1503_v62  ;;  %v7877_v42 = vcombine.low %v807_v36, %v810_v16 }
  0x5d   : > { %v7882_v32 = vcombine.low %v1497_v28, %v1504_v43  ;;  %v1517_v12 = vrot.slane %v9595_v22, 6  ;;  %v9712_v4 = vor.u32 %v7271_v20, %v7269_v19  ;;  %v1516_v26 = vrot.slane %v1514_v15, 5 }
  0x5e   : > { %9711 = vst [vmem:[#allocation37_spill] sm:$0xff] %v7877_v42  ;;  %v1507_v0 = vor.u32 %v1506_v27, %v1505_v10  ;;  %6535 = vmatmul.mubr.msk.bf16.gmra.mrb[28].mxu1 %vm891_vm3, %v7877_v42  ;;  %v1511_v16 = vor.u32 %v1510_v6, %v1509_v40  ;;  %v9713_v36 = vshll.u32 %v7253_v8, 16  ;;  %v9714_v3 = vshll.u32 %v7256_v9, 16 }
  0x5f   : > { %v264_v57 = vrot.slane %v9712_v4, 4  ;;  %6718 = vmatprep.mubr.msk.bf16.mxu0 %vm891_vm3, %v7882_v32  ;;  %v9610_v10 = vshrl.u32 %v7549_v33, 16  ;;  %v9608_v19 = vshll.u32 %v7549_v33, 16  ;;  %v9603_v20 = vshll.u32 %v7552_v53, 16 }
  0x60   : > { %v268_v62 = vrot.slane %v9713_v36, 5  ;;  %v278_v28 = vrot.slane %v9714_v3, 5  ;;  %v1508_v27 = vrot.slane %v1507_v0, 4  ;;  %v1513_v43 = vrot.slane %v1511_v16, 4 }
  0x61   : > { %v1518_v4 = vor.u32 %v1517_v12, %v1516_v26  ;;  %v9597_v40 = vshrl.u32 %v7552_v53, 16  ;;  %v9596_v15 = vshll.u32 %v7564_v30, 16  ;;  %v1520_v0 = vrot.slane %v9610_v10, 5 }
  0x62   : > { %v269_v6 = vsel %vm7324_vm6, %v264_v57, %v268_v62  ;;  %v273_v8 = vor.u32 %v7273_v21, %v268_v62  ;;  %v1512_v3 = vsel %vm7542_vm9, %v1508_v27, %v1511_v16  ;;  %v1521_v12 = vrot.slane %v9608_v19, 6 }
  0x63   : > { %v1519_v36 = vsel %vm7542_vm9, %v1513_v43, %v1518_v4  ;;  %v1525_v21 = vrot.slane %v9603_v20, 6  ;;  %v1524_v16 = vrot.slane %v9597_v40, 5  ;;  %v1529_v26 = vshrl.u32 %v7564_v30, 16  ;;  %v9724_v20 = vld [vmem:[#allocation28_spill] sm:$0xff] }
  0x64   : > { %v274_v22 = vrot.slane %v273_v8, 4  ;;  %v7915_v57 = vcombine.low %v1512_v3, %v1519_v36  ;;  %v1532_v62 = vrot.slane %v9596_v15, 6  ;;  %v1522_v43 = vor.u32 %v1521_v12, %v1520_v0 }
  0x65   : > { %v9715_v4 = vsel %vm7324_vm6, %v7345_v2, %v7313_v51  ;;  %v9716_v8 = vsel %vm7324_vm6, %v7336_v61, %v7310_v46  ;;  %v9601_v36 = vshrl.u32 %v7587_v48, 16  ;;  %v9599_v0 = vshll.u32 %v7587_v48, 16  ;;  %v7154_v46 = vld [vmem:[%s9527_s1 + $0x48] sm:$0xff]  }
  0x66   : > { %v279_v27 = vsel %vm7324_vm6, %v274_v22, %v278_v28  ;;  %v7934_v3 = vcombine.low %v9716_v8, %v9715_v4  ;;  %6719 = vmatmul.mubr.msk.bf16.gmra.mrb[12].mxu0 %vm891_vm3, %v7915_v57  ;;  %v1526_v22 = vor.u32 %v1525_v21, %v1524_v16  ;;  %v1531_v28 = vrot.slane %v1529_v26, 5 }
  0x67   : > { %v5922_v15 = vcombine.low %v269_v6, %v279_v27  ;;  %v1523_v12 = vrot.slane %v1522_v43, 4  ;;  %v9600_v51 = vshll.u32 %v7597_v24, 16  ;;  %v9598_v2 = vshrl.u32 %v7597_v24, 16 }
  0x68   : > { %9717 = vst [vmem:[#allocation38_spill] sm:$0xff] %v7934_v3  ;;  %v9602_v40 = vshll.u32 %v7600_v49, 16  ;;  %v1528_v61 = vrot.slane %v1526_v22, 4  ;;  %v1533_v4 = vor.u32 %v1532_v62, %v1531_v28  ;;  %v1535_v6 = vrot.slane %v9601_v36, 5 }
  0x69   : > { %6546 = vmatprep.mubr.msk.bf16.mxu1 %vm891_vm3, %v5922_v15  ;;  %v1536_v21 = vrot.slane %v9599_v0, 6  ;;  %v1527_v16 = vsel %vm7542_vm9, %v1523_v12, %v1526_v22  ;;  %v1539_v26 = vrot.slane %v9598_v2, 5  ;;  %v1540_v15 = vrot.slane %v9600_v51, 6 }
  0x6a   : > { %6547 = vmatmul.mubr.msk.bf16.vlgmr.msra.gmra.mrb[0].mxu1 %vm891_vm3, %v7934_v3  ;;  %v1544_v62 = vshrl.u32 %v7600_v49, 16  ;;  %v1534_v27 = vsel %vm7542_vm9, %v1528_v61, %v1533_v4  ;;  %v1547_v8 = vrot.slane %v9602_v40, 6  ;;  %v9718_v22 = vshrl.u32 %v7320_v54, 16  ;;  %v7156_v61 = vld [vmem:[%s9527_s1 + $0x50] sm:$0xff]  }
  0x6b   : > { %v1537_v43 = vor.u32 %v1536_v21, %v1535_v6  ;;  %6579 = vmatpush3.bf16.msra.mxu1 %v7501_v52  ;;  %v7967_v12 = vcombine.low %v1527_v16, %v1534_v27  ;;  %v1541_v2 = vor.u32 %v1540_v15, %v1539_v26  ;;  %v9719_v51 = vshll.u32 %v7320_v54, 16  ;;  %v9738_v3 = vld [vmem:[#allocation12_spill] sm:$0xff] }
  0x6c   : > { %v307_v28 = vrot.slane %v9718_v22, 4  ;;  %v1546_v0 = vrot.slane %v1544_v62, 5  ;;  %6580 = vmatprep.subr.bf16.mxu1 %v7154_v46  ;;  %v9720_v6 = vshll.u32 %v7334_v60, 16  ;;  %v9721_v52 = vshrl.u32 %v7334_v60, 16  ;;  %v9722_v22 = vld [vmem:[#allocation7_spill] sm:$0xff] }
  0x6d   : > { %v310_v36 = vrot.slane %v9719_v51, 5  ;;  %v1538_v4 = vrot.slane %v1537_v43, 4  ;;  %v9723_v16 = vshll.u32 %v9722_v22, 16  ;;  %6722 = vmatprep.mubr.msk.bf16.mxu0 %vm891_vm3, %v7967_v12  ;;  %v1543_v54 = vrot.slane %v1541_v2, 4 }
  0x6e   : > { %v316_v21 = vrot.slane %v9720_v6, 5  ;;  %v320_v40 = vrot.slane %v9721_v52, 4  ;;  %v1548_v51 = vor.u32 %v1547_v8, %v1546_v0  ;;  %v9607_v15 = vshrl.u32 %v7613_v59, 16 }
  0x6f   : > { %v326_v27 = vrot.slane %v9723_v16, 5  ;;  %v311_v26 = vor.u32 %v310_v36, %v307_v28  ;;  %v1542_v62 = vsel %vm7542_vm9, %v1538_v4, %v1541_v2  ;;  %v9605_v6 = vshll.u32 %v7613_v59, 16  ;;  %6581 = vmatpush3.bf16.msra.mxu1 %v7154_v46  ;;  %v7158_v36 = vld [vmem:[%s9527_s1 + $0x58] sm:$0xff]  }
  0x70   : > { %v321_v43 = vor.u32 %v320_v40, %v316_v21  ;;  %v9606_v60 = vshll.u32 %v9724_v20, 16  ;;  %v1549_v52 = vsel %vm7542_vm9, %v1543_v54, %v1548_v51  ;;  %v9604_v16 = vshrl.u32 %v9724_v20, 16  ;;  %6582 = vmatprep.subr.bf16.mxu1 %v7156_v61 }
  0x71   : > { %v312_v22 = vrot.slane %v311_v26, 4  ;;  %v9609_v0 = vshll.u32 %v7639_v58, 16  ;;  %v7994_v2 = vcombine.low %v1542_v62, %v1549_v52  ;;  %v1550_v8 = vrot.slane %v9607_v15, 5  ;;  %v9726_v52 = vld [vmem:[#allocation8_spill] sm:$0xff] }
  0x72   : > { %v322_v40 = vrot.slane %v321_v43, 4  ;;  %v1551_v46 = vrot.slane %v9605_v6, 6  ;;  %v1554_v4 = vrot.slane %v9604_v16, 5  ;;  %v1555_v54 = vrot.slane %v9606_v60, 6 }
  0x73   : > { %9725 = vst [vmem:[#allocation7_spill] sm:$0xff] %v7994_v2  ;;  %v317_v28 = vsel %vm7324_vm6, %v312_v22, %v316_v21  ;;  %v1559_v51 = vshrl.u32 %v7639_v58, 16  ;;  %6723 = vmatmul.mubr.msk.bf16.gmra.mrb[16].mxu0 %vm891_vm3, %v7994_v2  ;;  %v1562_v43 = vrot.slane %v9609_v0, 6  ;;  %v9727_v21 = vshrl.u32 %v9726_v52, 16  ;;  %6583 = vmatpush3.bf16.msra.mxu1 %v7156_v61 }
  0x74   : > { %v327_v26 = vsel %vm7324_vm6, %v322_v40, %v326_v27  ;;  %v1552_v62 = vor.u32 %v1551_v46, %v1550_v8  ;;  %v1556_v6 = vor.u32 %v1555_v54, %v1554_v4  ;;  %v9728_v15 = vshll.u32 %v9726_v52, 16  ;;  %6584 = vmatprep.subr.bf16.mxu1 %v7158_v36  ;;  %v8022_v27 = vld [vmem:[%s9527_s1 + $0x60] sm:$0xff]   ;;  %v9729_v8 = vld [vmem:[#allocation9_spill] sm:$0xff] }
  0x75   : > { %v331_v22 = vrot.slane %v9727_v21, 4  ;;  %v8015_v16 = vcombine.low %v317_v28, %v327_v26  ;;  %v1561_v60 = vrot.slane %v1559_v51, 5  ;;  %v9730_v46 = vshll.u32 %v9729_v8, 16  ;;  %v9732_v28 = vld [vmem:[#allocation10_spill] sm:$0xff] }
  0x76   : > { %v334_v19 = vrot.slane %v9728_v15, 5  ;;  %v1553_v40 = vrot.slane %v1552_v62, 4  ;;  %v9731_v21 = vshrl.u32 %v9729_v8, 16  ;;  %v9733_v26 = vshll.u32 %v9732_v28, 16 }
  0x77   : > { %v340_v0 = vrot.slane %v9730_v46, 5  ;;  %6550 = vmatprep.mubr.msk.bf16.mxu1 %vm891_vm3, %v8015_v16  ;;  %v1558_v15 = vrot.slane %v1556_v6, 4  ;;  %v1563_v54 = vor.u32 %v1562_v43, %v1561_v60  ;;  %v9614_v52 = vshrl.u32 %v7658_v17, 16  ;;  %6585 = vmatpush3.bf16.msra.mxu1 %v7158_v36 }
  0x78   : > { %v344_v61 = vrot.slane %v9731_v21, 4  ;;  %v350_v4 = vrot.slane %v9733_v26, 5  ;;  %v335_v51 = vor.u32 %v334_v19, %v331_v22  ;;  %v1557_v62 = vsel %vm7542_vm9, %v1553_v40, %v1556_v6  ;;  %6618 = vmatprep.subr.bf16.mxu1 %v8022_v27 }
  0x79   : > { %v9612_v46 = vshll.u32 %v7658_v17, 16  ;;  %v9613_v8 = vshll.u32 %v7661_v41, 16  ;;  %v1564_v21 = vsel %vm7542_vm9, %v1558_v15, %v1563_v54  ;;  %v9611_v26 = vshrl.u32 %v7661_v41, 16 }
  0x7a   : > { %v345_v10 = vor.u32 %v344_v61, %v340_v0  ;;  %v336_v28 = vrot.slane %v335_v51, 4  ;;  %v9622_v60 = vshll.u32 %v7667_v35, 16  ;;  %v8042_v19 = vcombine.low %v1557_v62, %v1564_v21  ;;  %v9735_v62 = vld [vmem:[#allocation11_spill] sm:$0xff] }
  0x7b   : > { %v1565_v6 = vrot.slane %v9614_v52, 5  ;;  %v1566_v22 = vrot.slane %v9612_v46, 6  ;;  %v1569_v40 = vrot.slane %v9611_v26, 5  ;;  %v1570_v61 = vrot.slane %v9613_v8, 6 }
  0x7c   : > { %9734 = vst [vmem:[#allocation28_spill] sm:$0xff] %v8042_v19  ;;  %v346_v43 = vrot.slane %v345_v10, 4  ;;  %v341_v36 = vsel %vm7324_vm6, %v336_v28, %v340_v0  ;;  %v1574_v15 = vshrl.u32 %v7667_v35, 16  ;;  %6726 = vmatprep.mubr.msk.bf16.mxu0 %vm891_vm3, %v8042_v19  ;;  %v1577_v51 = vrot.slane %v9622_v60, 6 }
  0x7d   : > { %v1567_v54 = vor.u32 %v1566_v22, %v1565_v6  ;;  %v9736_v0 = vshrl.u32 %v9735_v62, 16  ;;  %v1571_v26 = vor.u32 %v1570_v61, %v1569_v40  ;;  %v9737_v8 = vshll.u32 %v9735_v62, 16  ;;  %v9741_v6 = vld [vmem:[#allocation13_spill] sm:$0xff] }
  0x7e   : > { %v351_v10 = vsel %vm7324_vm6, %v346_v43, %v350_v4  ;;  %v1576_v46 = vrot.slane %v1574_v15, 5  ;;  %v9739_v19 = vshll.u32 %v9738_v3, 16  ;;  %v9740_v4 = vshrl.u32 %v9738_v3, 16 }
  0x7f   : > { %v355_v21 = vrot.slane %v9736_v0, 4  ;;  %v8063_v28 = vcombine.low %v341_v36, %v351_v10  ;;  %v358_v52 = vrot.slane %v9737_v8, 5  ;;  %v1568_v42 = vrot.slane %v1567_v54, 4 }
  0x80   : > { %v364_v2 = vrot.slane %v9739_v19, 5  ;;  %v368_v43 = vrot.slane %v9740_v4, 4  ;;  %v9742_v22 = vshll.u32 %v9741_v6, 16  ;;  %v1573_v36 = vrot.slane %v1571_v26, 4 }
  0x81   : > { %6551 = vmatmul.mubr.msk.bf16.gmra.mrb[4].mxu1 %vm891_vm3, %v8063_v28  ;;  %v1578_v10 = vor.u32 %v1577_v51, %v1576_v46  ;;  %v359_v40 = vor.u32 %v358_v52, %v355_v21  ;;  %v9626_v61 = vshrl.u32 %v7705_v44, 16  ;;  %v1572_v8 = vsel %vm7542_vm9, %v1568_v42, %v1571_v26 }
  0x82   : > { %v374_v60 = vrot.slane %v9742_v22, 5  ;;  %v369_v15 = vor.u32 %v368_v43, %v364_v2  ;;  %v9625_v19 = vshll.u32 %v7705_v44, 16  ;;  %v9624_v3 = vshll.u32 %v7708_v29, 16 }
  0x83   : > { %v1579_v54 = vsel %vm7542_vm9, %v1573_v36, %v1578_v10  ;;  %v360_v62 = vrot.slane %v359_v40, 4  ;;  %v9623_v0 = vshrl.u32 %v7708_v29, 16  ;;  %v9627_v4 = vshll.u32 %v7715_v1, 16 }
  0x84   : > { %v8084_v46 = vcombine.low %v1572_v8, %v1579_v54  ;;  %v370_v52 = vrot.slane %v369_v15, 4  ;;  %v1580_v51 = vrot.slane %v9626_v61, 5  ;;  %v1581_v42 = vrot.slane %v9625_v19, 6 }
  0x85   : > { %v365_v26 = vsel %vm7324_vm6, %v360_v62, %v364_v2  ;;  %v1584_v21 = vrot.slane %v9623_v0, 5  ;;  %v1585_v43 = vrot.slane %v9624_v3, 6  ;;  %v1589_v6 = vshrl.u32 %v7715_v1, 16 }
  0x86   : > { %9743 = vst [vmem:[#allocation8_spill] sm:$0xff] %v8084_v46  ;;  %6727 = vmatmul.mubr.msk.bf16.gmra.mrb[20].mxu0 %vm891_vm3, %v8084_v46  ;;  %v375_v22 = vsel %vm7324_vm6, %v370_v52, %v374_v60  ;;  %v1582_v36 = vor.u32 %v1581_v42, %v1580_v51  ;;  %v1592_v10 = vrot.slane %v9627_v4, 6  ;;  %v9744_v2 = vshrl.u32 %v7408_v50, 16  ;;  %v9748_v51 = vld [vmem:[#allocation14_spill] sm:$0xff]  ;;  %v8206_v46 = vld [vmem:[%s7246_s6 + $0xd4] sm:$0x3] }
  0x87   : > { %v8105_v8 = vcombine.low %v365_v26, %v375_v22  ;;  %v1586_v15 = vor.u32 %v1585_v43, %v1584_v21  ;;  %v1591_v54 = vrot.slane %v1589_v6, 5  ;;  %v9745_v62 = vshll.u32 %v7408_v50, 16 }
  0x88   : > { %v379_v40 = vrot.slane %v9744_v2, 4  ;;  %v1583_v3 = vrot.slane %v1582_v36, 4  ;;  %v9746_v19 = vshll.u32 %v7411_v56, 16  ;;  %v9747_v60 = vshrl.u32 %v7411_v56, 16 }
  0x89   : > { %v382_v0 = vrot.slane %v9745_v62, 5  ;;  %v9749_v42 = vshll.u32 %v9748_v51, 16  ;;  %6554 = vmatprep.mubr.msk.bf16.mxu1 %vm891_vm3, %v8105_v8  ;;  %v1588_v26 = vrot.slane %v1586_v15, 4  ;;  %v1593_v22 = vor.u32 %v1592_v10, %v1591_v54 }
  0x8a   : > { %v388_v61 = vrot.slane %v9746_v19, 5  ;;  %v392_v52 = vrot.slane %v9747_v60, 4  ;;  %v9631_v43 = vshrl.u32 %v7757_v31, 16  ;;  %v1587_v50 = vsel %vm7542_vm9, %v1583_v3, %v1586_v15 }
  0x8b   : > { %v398_v4 = vrot.slane %v9749_v42, 5  ;;  %v383_v21 = vor.u32 %v382_v0, %v379_v40  ;;  %v9630_v19 = vshll.u32 %v7757_v31, 16  ;;  %v9629_v56 = vshll.u32 %v7762_v11, 16 }
  0x8c   : > { %v393_v6 = vor.u32 %v392_v52, %v388_v61  ;;  %v1594_v36 = vsel %vm7542_vm9, %v1588_v26, %v1593_v22  ;;  %v9628_v62 = vshrl.u32 %v7762_v11, 16  ;;  %v9634_v60 = vshll.u32 %v7777_v18, 16 }
  0x8d   : > { %v384_v2 = vrot.slane %v383_v21, 4  ;;  %v8126_v10 = vcombine.low %v1587_v50, %v1594_v36  ;;  %v1595_v40 = vrot.slane %v9631_v43, 5  ;;  %v1596_v3 = vrot.slane %v9630_v19, 6  ;;  %v9753_v19 = vld [vmem:[#allocation16_spill] sm:$0xff] }
  0x8e   : > { %v394_v0 = vrot.slane %v393_v6, 4  ;;  %v1599_v54 = vrot.slane %v9628_v62, 5  ;;  %v1600_v52 = vrot.slane %v9629_v56, 6  ;;  %v1604_v51 = vshrl.u32 %v7777_v18, 16 }
  0x8f   : > { %9750 = vst [vmem:[#allocation9_spill] sm:$0xff] %v8126_v10  ;;  %v389_v15 = vsel %vm7324_vm6, %v384_v2, %v388_v61  ;;  %6730 = vmatprep.mubr.msk.bf16.mxu0 %vm891_vm3, %v8126_v10  ;;  %v1597_v26 = vor.u32 %v1596_v3, %v1595_v40  ;;  %v1607_v22 = vrot.slane %v9634_v60, 6  ;;  %v9751_v61 = vshrl.u32 %v7441_v47, 16  ;;  %v9756_v40 = vld [vmem:[#allocation17_spill] sm:$0xff] }
  0x90   : > { %v399_v42 = vsel %vm7324_vm6, %v394_v0, %v398_v4  ;;  %v1601_v6 = vor.u32 %v1600_v52, %v1599_v54  ;;  %v1606_v36 = vrot.slane %v1604_v51, 5  ;;  %v9752_v2 = vshll.u32 %v7441_v47, 16 }
  0x91   : > { %v403_v21 = vrot.slane %v9751_v61, 4  ;;  %v8147_v50 = vcombine.low %v389_v15, %v399_v42  ;;  %v1598_v56 = vrot.slane %v1597_v26, 4  ;;  %v9754_v43 = vshll.u32 %v9753_v19, 16 }
  0x92   : > { %v406_v62 = vrot.slane %v9752_v2, 5  ;;  %v9755_v4 = vshrl.u32 %v9753_v19, 16  ;;  %v9757_v3 = vshll.u32 %v9756_v40, 16  ;;  %v1603_v15 = vrot.slane %v1601_v6, 4 }
  0x93   : > { %v412_v10 = vrot.slane %v9754_v43, 5  ;;  %6555 = vmatmul.mubr.msk.bf16.gmra.mrb[8].mxu1 %vm891_vm3, %v8147_v50  ;;  %v1608_v42 = vor.u32 %v1607_v22, %v1606_v36  ;;  %v9638_v52 = vshrl.u32 %v7810_v38, 16  ;;  %v1602_v47 = vsel %vm7542_vm9, %v1598_v56, %v1601_v6 }
  0x94   : > { %v416_v0 = vrot.slane %v9755_v4, 4  ;;  %v422_v60 = vrot.slane %v9757_v3, 5  ;;  %v407_v54 = vor.u32 %v406_v62, %v403_v21  ;;  %v9637_v43 = vshll.u32 %v7810_v38, 16 }
  0x95   : > { %v9636_v19 = vshll.u32 %v7813_v23, 16  ;;  %v1609_v26 = vsel %vm7542_vm9, %v1603_v15, %v1608_v42  ;;  %v9635_v2 = vshrl.u32 %v7813_v23, 16  ;;  %v9641_v22 = vshll.u32 %v7816_v37, 16 }
  0x96   : > { %v417_v51 = vor.u32 %v416_v0, %v412_v10  ;;  %v408_v61 = vrot.slane %v407_v54, 4  ;;  %v8168_v62 = vcombine.low %v1602_v47, %v1609_v26  ;;  %v1610_v56 = vrot.slane %v9638_v52, 5  ;;  %v8197_v52 = vld [vmem:[%s7246_s6 + $0xd0] sm:$0xf] }
  0x97   : > { %v1611_v6 = vrot.slane %v9637_v43, 6  ;;  %v1614_v4 = vrot.slane %v9635_v2, 5  ;;  %v1615_v0 = vrot.slane %v9636_v19, 6  ;;  %v1619_v40 = vshrl.u32 %v7816_v37, 16 }
  0x98   : > { %9758 = vst [vmem:[#allocation10_spill] sm:$0xff] %v8168_v62  ;;  %v418_v21 = vrot.slane %v417_v51, 4  ;;  %v413_v36 = vsel %vm7324_vm6, %v408_v61, %v412_v10  ;;  %6731 = vmatmul.mubr.msk.bf16.gmra.mrb[24].mxu0 %vm891_vm3, %v8168_v62  ;;  %v1622_v42 = vrot.slane %v9641_v22, 6  ;;  %v9759_v10 = vld [vmem:[#allocation20_spill] sm:$0xff]  ;;  %v8190_v51 = vld [vmem:[%s7246_s6 + $0xcc] sm:$0xf] }
  0x99   : > { %v1612_v15 = vor.u32 %v1611_v6, %v1610_v56  ;;  %v9760_v54 = vshrl.u32 %v9759_v10, 16  ;;  %v1616_v61 = vor.u32 %v1615_v0, %v1614_v4  ;;  %v1621_v2 = vrot.slane %v1619_v40, 5 }
  0x9a   : > { %v423_v3 = vsel %vm7324_vm6, %v418_v21, %v422_v60  ;;  %v9761_v19 = vshll.u32 %v9759_v10, 16  ;;  %v9762_v60 = vshll.u32 %v7483_v45, 16  ;;  %v9763_v56 = vshrl.u32 %v7483_v45, 16 }
  0x9b   : > { %v427_v47 = vrot.slane %v9760_v54, 4  ;;  %v8192_v26 = vcombine.low %v413_v36, %v423_v3  ;;  %v1613_v62 = vrot.slane %v1612_v15, 4  ;;  %v9764_v54 = vshll.u32 %v7494_v7, 16 }
  0x9c   : > { %v430_v43 = vrot.slane %v9761_v19, 5  ;;  %v436_v21 = vrot.slane %v9762_v60, 5  ;;  %v440_v6 = vrot.slane %v9763_v56, 4  ;;  %v1618_v36 = vrot.slane %v1616_v61, 4 }
  0x9d   : > { %v446_v22 = vrot.slane %v9764_v54, 5  ;;  %6558 = vmatprep.mubr.msk.bf16.mxu1 %vm891_vm3, %v8192_v26  ;;  %v1623_v4 = vor.u32 %v1622_v42, %v1621_v2  ;;  %v9647_v0 = vshrl.u32 %v8190_v51, 16  ;;  %v1617_v40 = vsel %vm7542_vm9, %v1613_v62, %v1616_v61 }
  0x9e   : > { %v431_v19 = vor.u32 %v430_v43, %v427_v47  ;;  %v441_v3 = vor.u32 %v440_v6, %v436_v21  ;;  %v9646_v45 = vshll.u32 %v8190_v51, 16  ;;  %v9645_v15 = vshll.u32 %v8197_v52, 16 }
  0x9f   : > { %v1624_v7 = vsel %vm7542_vm9, %v1618_v36, %v1623_v4  ;;  %v9644_v60 = vshrl.u32 %v8197_v52, 16  ;;  %v1966_v56 = vshll.u32 %v8206_v46, 16  ;;  %v2443_v42 = vrot.slane %v9647_v0, 5 }
  0xa0   : > { %v432_v10 = vrot.slane %v431_v19, 4  ;;  %v8219_v2 = vcombine.low %v1617_v40, %v1624_v7  ;;  %v442_v43 = vrot.slane %v441_v3, 4  ;;  %v2444_v62 = vrot.slane %v9646_v45, 6 }
  0xa1   : > { %v2447_v61 = vrot.slane %v9644_v60, 5  ;;  %v2448_v6 = vrot.slane %v9645_v15, 6  ;;  %v2452_v54 = vshrl.u32 %v8206_v46, 16  ;;  %v2455_v19 = vrot.slane %v1966_v56, 6 }
  0xa2   : > { %9765 = vst [vmem:[#allocation11_spill] sm:$0xff] %v8219_v2  ;;  %v437_v47 = vsel %vm7324_vm6, %v432_v10, %v436_v21  ;;  %6734 = vmatprep.mubr.msk.bf16.mxu0 %vm891_vm3, %v8219_v2  ;;  %v447_v36 = vsel %vm7324_vm6, %v442_v43, %v446_v22  ;;  %v2445_v4 = vor.u32 %v2444_v62, %v2443_v42  ;;  %v9766_v21 = vshrl.u32 %v7509_v39, 16 }
  0xa3   : > { %v8240_v3 = vcombine.low %v437_v47, %v447_v36  ;;  %v2449_v7 = vor.u32 %v2448_v6, %v2447_v61  ;;  %v2454_v10 = vrot.slane %v2452_v54, 5  ;;  %v9767_v60 = vshll.u32 %v7509_v39, 16 }
  0xa4   : > { %v451_v40 = vrot.slane %v9766_v21, 4  ;;  %v2446_v45 = vrot.slane %v2445_v4, 4  ;;  %v9768_v0 = vshll.u32 %v7512_v63, 16  ;;  %v9769_v22 = vshrl.u32 %v7512_v63, 16 }
  0xa5   : > { %v454_v15 = vrot.slane %v9767_v60, 5  ;;  %v9770_v42 = vshll.u32 %v7523_v34, 16  ;;  %6559 = vmatmul.mubr.msk.bf16.gmra.mrb[12].mxu1 %vm891_vm3, %v8240_v3  ;;  %v2451_v47 = vrot.slane %v2449_v7, 4  ;;  %v2456_v36 = vor.u32 %v2455_v19, %v2454_v10 }
  0xa6   : > { %v460_v2 = vrot.slane %v9768_v0, 5  ;;  %v464_v43 = vrot.slane %v9769_v22, 4  ;;  %v9771_v6 = vshrl.u32 %v7549_v33, 16  ;;  %v2450_v60 = vsel %vm7542_vm9, %v2446_v45, %v2449_v7 }
  0xa7   : > { %v470_v62 = vrot.slane %v9770_v42, 5  ;;  %v455_v61 = vor.u32 %v454_v15, %v451_v40  ;;  %v9772_v0 = vshll.u32 %v7549_v33, 16  ;;  %v9773_v4 = vshll.u32 %v7552_v53, 16 }
  0xa8   : > { %v475_v39 = vrot.slane %v9771_v6, 4  ;;  %v465_v54 = vor.u32 %v464_v43, %v460_v2  ;;  %v2457_v21 = vsel %vm7542_vm9, %v2451_v47, %v2456_v36  ;;  %v9774_v19 = vshrl.u32 %v7552_v53, 16 }
  0xa9   : > { %v478_v63 = vrot.slane %v9772_v0, 5  ;;  %v484_v34 = vrot.slane %v9773_v4, 5  ;;  %v456_v22 = vrot.slane %v455_v61, 4  ;;  %v9775_v40 = vshll.u32 %v7564_v30, 16 }
  0xaa   : > { %v488_v15 = vrot.slane %v9774_v19, 4  ;;  %v8266_v42 = vcombine.low %v2450_v60, %v2457_v21  ;;  %v466_v45 = vrot.slane %v465_v54, 4  ;;  %v9776_v33 = vshrl.u32 %v7587_v48, 16 }
  0xab   : > { %v494_v10 = vrot.slane %v9775_v40, 5  ;;  %v479_v7 = vor.u32 %v478_v63, %v475_v39  ;;  %v461_v6 = vsel %vm7324_vm6, %v456_v22, %v460_v2  ;;  %v9777_v47 = vshll.u32 %v7587_v48, 16 }
  0xac   : > { %v499_v43 = vrot.slane %v9776_v33, 4  ;;  %v489_v0 = vor.u32 %v488_v15, %v484_v34  ;;  %v9778_v53 = vshll.u32 %v7597_v24, 16  ;;  %6735 = vmatmul.mubr.msk.bf16.gmra.mrb[28].mxu0 %vm891_vm3, %v8266_v42  ;;  %v471_v30 = vsel %vm7324_vm6, %v466_v45, %v470_v62 }
  0xad   : > { %v502_v36 = vrot.slane %v9777_v47, 5  ;;  %v480_v39 = vrot.slane %v479_v7, 4  ;;  %v9779_v60 = vshrl.u32 %v7597_v24, 16  ;;  %v9780_v63 = vshll.u32 %v7600_v49, 16  ;;  %6746 = vmatprep.mubr.msk.bf16.mxu0 %vm891_vm3, %v8015_v16 }
  0xae   : > { %v508_v61 = vrot.slane %v9778_v53, 5  ;;  %v8284_v4 = vcombine.low %v461_v6, %v471_v30  ;;  %v490_v48 = vrot.slane %v489_v0, 4  ;;  %v9781_v22 = vshrl.u32 %v7613_v59, 16 }
  0xaf   : > { %v512_v54 = vrot.slane %v9779_v60, 4  ;;  %v518_v2 = vrot.slane %v9780_v63, 5  ;;  %v503_v21 = vor.u32 %v502_v36, %v499_v43  ;;  %v485_v62 = vsel %vm7324_vm6, %v480_v39, %v484_v34 }
  0xb0   : > { %v523_v19 = vrot.slane %v9781_v22, 4  ;;  %v9782_v24 = vshll.u32 %v7613_v59, 16  ;;  %v9783_v49 = vshll.u32 %v9724_v20, 16  ;;  %6562 = vmatprep.mubr.msk.bf16.mxu1 %vm891_vm3, %v8284_v4  ;;  %v495_v7 = vsel %vm7324_vm6, %v490_v48, %v494_v10 }
  0xb1   : > { %v513_v15 = vor.u32 %v512_v54, %v508_v61  ;;  %v504_v33 = vrot.slane %v503_v21, 4  ;;  %v9784_v43 = vshrl.u32 %v9724_v20, 16  ;;  %v9785_v0 = vshll.u32 %v7639_v58, 16 }
  0xb2   : > { %v526_v40 = vrot.slane %v9782_v24, 5  ;;  %v532_v45 = vrot.slane %v9783_v49, 5  ;;  %v8304_v47 = vcombine.low %v485_v62, %v495_v7  ;;  %v9786_v53 = vshrl.u32 %v7658_v17, 16 }
  0xb3   : > { %v536_v6 = vrot.slane %v9784_v43, 4  ;;  %v542_v34 = vrot.slane %v9785_v0, 5  ;;  %v514_v59 = vrot.slane %v513_v15, 4  ;;  %v509_v39 = vsel %vm7324_vm6, %v504_v33, %v508_v61 }
  0xb4   : > { %v527_v36 = vor.u32 %v526_v40, %v523_v19  ;;  %v547_v30 = vrot.slane %v9786_v53, 4  ;;  %v9787_v10 = vshll.u32 %v7658_v17, 16  ;;  %v9788_v20 = vshll.u32 %v7661_v41, 16  ;;  %6563 = vmatmul.mubr.msk.bf16.gmra.mrb[16].mxu1 %vm891_vm3, %v8304_v47  ;;  %v7159_v17 = vld [vmem:[%s9527_s1 + $0xe8] sm:$0xff]   ;;  %6747 = vmatmul.mubr.msk.bf16.vlgmr.msra.gmra.mrb[0].mxu0 %vm891_vm3, %v8063_v28 }
  0xb5   : > { %v537_v60 = vor.u32 %v536_v6, %v532_v45  ;;  %v519_v58 = vsel %vm7324_vm6, %v514_v59, %v518_v2  ;;  %v9789_v21 = vshrl.u32 %v7661_v41, 16  ;;  %v9790_v19 = vshll.u32 %v7667_v35, 16  ;;  %6779 = vmatpush3.bf16.msra.mxu0 %v7825_v5  ;;  %6750 = vmatprep.mubr.msk.bf16.mxu0 %vm891_vm3, %v8105_v8 }
  0xb6   : > { %v550_v54 = vrot.slane %v9787_v10, 5  ;;  %v556_v63 = vrot.slane %v9788_v20, 5  ;;  %v528_v48 = vrot.slane %v527_v36, 4  ;;  %v8325_v62 = vcombine.low %v509_v39, %v519_v58  ;;  %6780 = vmatprep.subr.bf16.mxu0 %v7159_v17 }
  0xb7   : > { %v560_v22 = vrot.slane %v9789_v21, 4  ;;  %v566_v61 = vrot.slane %v9790_v19, 5  ;;  %v538_v15 = vrot.slane %v537_v60, 4  ;;  %v9791_v40 = vshrl.u32 %v7705_v44, 16 }
  0xb8   : > { %v551_v24 = vor.u32 %v550_v54, %v547_v30  ;;  %v533_v41 = vsel %vm7324_vm6, %v528_v48, %v532_v45  ;;  %v9792_v35 = vshll.u32 %v7705_v44, 16  ;;  %v9793_v33 = vshll.u32 %v7708_v29, 16  ;;  %6566 = vmatprep.mubr.msk.bf16.mxu1 %vm891_vm3, %v8325_v62 }
  0xb9   : > { %v571_v49 = vrot.slane %v9791_v40, 4  ;;  %v561_v2 = vor.u32 %v560_v22, %v556_v63  ;;  %v543_v6 = vsel %vm7324_vm6, %v538_v15, %v542_v34  ;;  %v9794_v59 = vshrl.u32 %v7708_v29, 16  ;;  %v7161_v34 = vld [vmem:[%s9527_s1 + $0xf0] sm:$0xff]   ;;  %6781 = vmatpush3.bf16.msra.mxu0 %v7159_v17 }
  0xba   : > { %v574_v7 = vrot.slane %v9792_v35, 5  ;;  %v580_v43 = vrot.slane %v9793_v33, 5  ;;  %v552_v0 = vrot.slane %v551_v24, 4  ;;  %v9795_v45 = vshll.u32 %v7715_v1, 16  ;;  %6782 = vmatprep.subr.bf16.mxu0 %v7161_v34 }
  0xbb   : > { %v584_v36 = vrot.slane %v9794_v59, 4  ;;  %v8348_v44 = vcombine.low %v533_v41, %v543_v6  ;;  %v562_v30 = vrot.slane %v561_v2, 4  ;;  %v9796_v39 = vshrl.u32 %v7757_v31, 16 }
  0xbc   : > { %v590_v53 = vrot.slane %v9795_v45, 5  ;;  %v575_v5 = vor.u32 %v574_v7, %v571_v49  ;;  %v557_v29 = vsel %vm7324_vm6, %v552_v0, %v556_v63  ;;  %v9797_v10 = vshll.u32 %v7757_v31, 16  ;;  %6751 = vmatmul.mubr.msk.bf16.gmra.mrb[4].mxu0 %vm891_vm3, %v8147_v50 }
  0xbd   : > { %v595_v60 = vrot.slane %v9796_v39, 4  ;;  %v585_v1 = vor.u32 %v584_v36, %v580_v43  ;;  %v9798_v20 = vshll.u32 %v7762_v11, 16  ;;  %v9799_v48 = vshrl.u32 %v7256_v9, 16  ;;  %6567 = vmatmul.mubr.msk.bf16.gmra.mrb[20].mxu1 %vm891_vm3, %v8348_v44  ;;  %6754 = vmatprep.mubr.msk.bf16.mxu0 %vm891_vm3, %v8192_v26 }
  0xbe   : > { %v598_v54 = vrot.slane %v9797_v10, 5  ;;  %v567_v22 = vsel %vm7324_vm6, %v562_v30, %v566_v61  ;;  %v576_v19 = vrot.slane %v575_v5, 4  ;;  %v9800_v15 = vshrl.u32 %v7762_v11, 16  ;;  %v9806_v30 = vld [vmem:[#allocation2_spill] sm:$0xff]  ;;  %v9807_v5 = vld [vmem:[#allocation3_spill] sm:$0xff]  ;;  %6783 = vmatpush3.bf16.msra.mxu0 %v7161_v34 }
  0xbf   : > { %v604_v58 = vrot.slane %v9798_v20, 5  ;;  %v1396_v21 = vrot.slane %v9799_v48, 5  ;;  %v8367_v40 = vcombine.low %v557_v29, %v567_v22  ;;  %v586_v63 = vrot.slane %v585_v1, 4  ;;  %v9810_v1 = vld [vmem:[#allocation6_spill] sm:$0xff] }
  0xc0   : > { %v608_v24 = vrot.slane %v9800_v15, 4  ;;  %v599_v49 = vor.u32 %v598_v54, %v595_v60  ;;  %v9801_v31 = vshrl.u32 %v7810_v38, 16  ;;  %v9802_v2 = vshll.u32 %v7777_v18, 16  ;;  %v9809_v60 = vld [vmem:[#allocation5_spill] sm:$0xff] }
  0xc1   : > { %v9803_v61 = vshll.u32 %v7810_v38, 16  ;;  %v9804_v11 = vshll.u32 %v7813_v23, 16  ;;  %6570 = vmatprep.mubr.msk.bf16.mxu1 %vm891_vm3, %v8367_v40  ;;  %v581_v17 = vsel %vm7324_vm6, %v576_v19, %v580_v43  ;;  %v591_v6 = vsel %vm7324_vm6, %v586_v63, %v590_v53  ;;  %v7163_v38 = vld [vmem:[%s9527_s1 + $0xf8] sm:$0xff]   ;;  %v9808_v53 = vld [vmem:[#allocation4_spill] sm:$0xff] }
  0xc2   : > { %v619_v41 = vrot.slane %v9801_v31, 4  ;;  %v609_v9 = vor.u32 %v608_v24, %v604_v58  ;;  %v614_v35 = vrot.slane %v9802_v2, 5  ;;  %v600_v0 = vrot.slane %v599_v49, 4  ;;  %6784 = vmatprep.subr.bf16.mxu0 %v7163_v38 }
  0xc3   : > { %v622_v7 = vrot.slane %v9803_v61, 5  ;;  %v628_v33 = vrot.slane %v9804_v11, 5  ;;  %v9805_v18 = vshrl.u32 %v7813_v23, 16  ;;  %v1387_v39 = vor.u32 %v9807_v5, %v9806_v30  ;;  %6785 = vmatpush3.bf16.msra.mxu0 %v7163_v38  ;;  %v8440_v11 = vld [vmem:[%s7246_s6 + $0xdc] sm:$0xf] }
  0xc4   : > { %v610_v36 = vrot.slane %v609_v9, 4  ;;  %v605_v43 = vsel %vm7324_vm6, %v600_v0, %v604_v58  ;;  %v1391_v29 = vor.u32 %v9809_v60, %v9808_v53  ;;  %v1398_v10 = vor.u32 %v9810_v1, %v1396_v21  ;;  %v8412_v21 = vld [vmem:[%s9527_s1 + $0x100] sm:$0xff]   ;;  %6755 = vmatmul.mubr.msk.bf16.gmra.mrb[8].mxu0 %vm891_vm3, %v8240_v3 }
  0xc5   : > { %v632_v59 = vrot.slane %v9805_v18, 4  ;;  %v623_v45 = vor.u32 %v622_v7, %v619_v41  ;;  %v8401_v54 = vcombine.low %v581_v17, %v591_v6  ;;  %v9811_v48 = vshll.u32 %v7816_v37, 16  ;;  %6818 = vmatprep.subr.bf16.mxu0 %v8412_v21  ;;  %6758 = vmatprep.mubr.msk.bf16.mxu0 %vm891_vm3, %v8284_v4 }
  0xc6   : > { %v615_v20 = vsel %vm7324_vm6, %v610_v36, %v614_v35  ;;  %v1388_v19 = vrot.slane %v1387_v39, 4  ;;  %v1393_v63 = vrot.slane %v1391_v29, 4  ;;  %v6023_v9 = vrot.slane %v8190_v51, 9  ;;  %v8435_v35 = vld [vmem:[%s7246_s6 + $0xd8] sm:$0xf] }
  0xc7   : > { %v633_v23 = vor.u32 %v632_v59, %v628_v33  ;;  %v638_v22 = vrot.slane %v9811_v48, 5  ;;  %v8407_v15 = vcombine.low %v605_v43, %v615_v20  ;;  %v624_v24 = vrot.slane %v623_v45, 4  ;;  %6571 = vmatmul.mubr.msk.bf16.gmra.mrb[24].mxu1 %vm891_vm3, %v8401_v54  ;;  %v7162_v43 = vld [vmem:[%s9527_s1 + $0x68] sm:$0xff]  }
  0xc8   : > { %v1392_v49 = vsel %vm7542_vm9, %v1388_v19, %v1391_v29  ;;  %v1399_v37 = vsel %vm7542_vm9, %v1393_v63, %v1398_v10  ;;  %v2207_v61 = vrot.slane %v8197_v52, 5  ;;  %v2210_v7 = vrot.slane %v8206_v46, 5 }
  0xc9   : > { %v634_v58 = vrot.slane %v633_v23, 4  ;;  %v5958_v34 = vcombine.low %v1392_v49, %v1399_v37  ;;  %6574 = vmatprep.mubr.msk.bf16.mxu1 %vm891_vm3, %v8407_v15  ;;  %v629_v31 = vsel %vm7324_vm6, %v624_v24, %v628_v33  ;;  %v8443_v33 = vld [vmem:[%s7246_s6 + $0xe0] sm:$0x3]  ;;  %v6111_v17 = vrot.slane %v8435_v35, 9  ;;  %v9812_v23 = vld [vmem:[#allocation25_spill] sm:$0xff]  ;;  %v7164_v24 = vld [vmem:[%s9527_s1 + $0x70] sm:$0xff]  }
  0xca   : > { %v2208_v6 = vsel %vm7262_vm2, %v6023_v9, %v2207_v61  ;;  %v2209_v0 = vrot.slane %v2207_v61, 4  ;;  %v2950_v18 = vrot.slane %v8440_v11, 5  ;;  %v2953_v59 = vrot.slane %v8443_v33, 5  ;;  %v9818_v9 = vld [vmem:[#allocation31_spill] sm:$0xff] }
  0xcb   : > { %v639_v41 = vsel %vm7324_vm6, %v634_v58, %v638_v22  ;;  %v9813_v53 = vshrl.u32 %v8190_v51, 16  ;;  %v9814_v14 = vshll.u32 %v8190_v51, 16  ;;  %v9815_v1 = vshll.u32 %v8197_v52, 16  ;;  %v9817_v22 = vld [vmem:[#allocation26_spill] sm:$0xff] }
  0xcc   : > { %v8432_v2 = vcombine.low %v629_v31, %v639_v41  ;;  %v2211_v38 = vsel %vm7262_vm2, %v2209_v0, %v2210_v7  ;;  %v8456_v36 = vsel %vm7262_vm2, %v6111_v17, %v2950_v18  ;;  %v2952_v45 = vrot.slane %v2950_v18, 4  ;;  %6759 = vmatmul.mubr.msk.bf16.gmra.mrb[12].mxu0 %vm891_vm3, %v8304_v47 }
  0xcd   : > { %v8459_v30 = vcombine.low %v2208_v6, %v2211_v38  ;;  %6762 = vmatprep.mubr.msk.bf16.mxu0 %vm891_vm3, %v8325_v62  ;;  %v1949_v60 = vrot.slane %v9813_v53, 4  ;;  %v1952_v29 = vrot.slane %v9814_v14, 5  ;;  %v1958_v10 = vrot.slane %v9815_v1, 5 }
  0xce   : > { %v8465_v5 = vsel %vm7262_vm2, %v2952_v45, %v2953_v59  ;;  %v9816_v20 = vshrl.u32 %v8197_v52, 16  ;;  %v2690_v19 = vshrl.u32 %v8435_v35, 16  ;;  %v2693_v51 = vshll.u32 %v8435_v35, 16  ;;  %v7170_v59 = vld [vmem:[%s9527_s1 + $0x80] sm:$0xff]  }
  0xcf   : > { %6575 = vmatmul.mubr.msk.bf16.gmra.mrb[28].mxu1 %vm891_vm3, %v8432_v2  ;;  %v6120_v39 = vcombine.low %v8456_v36, %v8465_v5  ;;  %v2703_v52 = vshrl.u32 %v8440_v11, 16  ;;  %v1953_v58 = vor.u32 %v1952_v29, %v1949_v60  ;;  %v1968_v7 = vrot.slane %v1966_v56, 5  ;;  %v5416_v5 = vld [vmem:[%s8696_s8 + $0x1c] sm:$0x3] }
  0xd0   : > { %6586 = vmatprep.mubr.msk.bf16.mxu1 %vm891_vm3, %v5958_v34  ;;  %v1962_v48 = vrot.slane %v9816_v20, 4  ;;  %v2692_v49 = vrot.slane %v2690_v19, 4  ;;  %v2695_v37 = vrot.slane %v2693_v51, 5  ;;  %v7166_v34 = vld [vmem:[%s9527_s1 + $0x78] sm:$0xff]   ;;  %v2709_v0 = vshll.u32 %v8443_v33, 16 }
  0xd1   : > { %v2705_v41 = vrot.slane %v2703_v52, 4  ;;  %v1954_v35 = vrot.slane %v1953_v58, 4  ;;  %v3186_v53 = vrot.slane %v2690_v19, 5  ;;  %v3187_v60 = vrot.slane %v2693_v51, 6 }
  0xd2   : > { %v1963_v63 = vor.u32 %v1962_v48, %v1958_v10  ;;  %v2696_v17 = vor.u32 %v2695_v37, %v2692_v49  ;;  %v3190_v14 = vrot.slane %v2703_v52, 5  ;;  %v3198_v19 = vrot.slane %v2709_v0, 6  ;;  %v9821_v37 = vld [vmem:[#allocation15_spill] sm:$0xff] }
  0xd3   : > { %v1959_v18 = vsel %vm7324_vm6, %v1954_v35, %v1958_v10  ;;  %v3195_v10 = vshrl.u32 %v8443_v33, 16  ;;  %v3188_v48 = vor.u32 %v3187_v60, %v3186_v53  ;;  %v7168_v35 = vld [vmem:[%s9527_s1 + $0x110] sm:$0xff]   ;;  %v9835_v53 = vld [vmem:[#allocation27_spill] sm:$0xff]  ;;  %v9836_v60 = vld [vmem:[#allocation29_spill] sm:$0xff]  ;;  %vm5711_vm2 = vcmask 1047559  }
  0xd4   : > { %6763 = vmatmul.mubr.msk.bf16.gmra.mrb[16].mxu0 %vm891_vm3, %v8348_v44  ;;  %v1964_v61 = vrot.slane %v1963_v63, 4  ;;  %v2697_v56 = vrot.slane %v2696_v17, 4  ;;  %v9826_v17 = vld [vmem:[#allocation8_spill] sm:$0xff] }
  0xd5   : > { %6766 = vmatprep.mubr.msk.bf16.mxu0 %vm891_vm3, %v8367_v40  ;;  %v3197_v51 = vrot.slane %v3195_v10, 5  ;;  %v3189_v52 = vrot.slane %v3188_v48, 4  ;;  %v9840_v10 = vld [vmem:[#allocation36_spill] sm:$0xff] }
  0xd6   : > { %v1969_v46 = vsel %vm7324_vm6, %v1964_v61, %v1968_v7  ;;  %v9825_v61 = vld [vmem:[#allocation28_spill] sm:$0xff]  ;;  %v7169_v7 = vld [vmem:[%s9527_s1 + $0x118] sm:$0xff]  }
  0xd7   : > { %6587 = vmatmul.mubr.msk.bf16.vlgmr.msra.gmra.mrb[0].mxu1 %vm891_vm3, %v9812_v23  ;;  %v8519_v38 = vcombine.low %v1959_v18, %v1969_v46  ;;  %v9820_v23 = vld [vmem:[#allocation35_spill] sm:$0xff]  ;;  %v3199_v63 = vor.u32 %v3198_v19, %v3197_v51  ;;  %v9830_v18 = vld [vmem:[#allocation10_spill] sm:$0xff]  ;;  %v7188_v19 = vmov 1983009808  }
  0xd8   : > { %6619 = vmatpush3.bf16.msra.mxu1 %v8022_v27  ;;  %6590 = vmatprep.mubr.msk.bf16.mxu1 %vm891_vm3, %v9817_v22  ;;  %v2699_v27 = vshll.u32 %v8440_v11, 16  ;;  %v9819_v11 = vld [vmem:[#allocation33_spill] sm:$0xff]  ;;  %v9831_v46 = vld [vmem:[#allocation23_spill] sm:$0xff]  ;;  %v3576_v51 = vunpack.c.l.s4 %v7188_v19 }
  0xd9   : > { %6620 = vmatprep.subr.bf16.mxu1 %v7162_v43 }
  0xda   : > { %v2701_v31 = vrot.slane %v2699_v27, 5  ;;  %v3191_v29 = vrot.slane %v2699_v27, 6 }
  0xdc   : > { %6621 = vmatpush3.bf16.msra.mxu1 %v7162_v43  ;;  %6767 = vmatmul.mubr.msk.bf16.gmra.mrb[20].mxu0 %vm891_vm3, %v8401_v54  ;;  %v2706_v6 = vor.u32 %v2705_v41, %v2701_v31  ;;  %v2711_v43 = vrot.slane %v2709_v0, 5  ;;  %v2702_v1 = vsel %vm7324_vm6, %v2697_v56, %v2701_v31  ;;  %v9822_v31 = vld [vmem:[#allocation7_spill] sm:$0xff]  ;;  %v9829_v0 = vld [vmem:[#allocation9_spill] sm:$0xff]  ;;  %v9832_v56 = vld [vmem:[#allocation24_spill] sm:$0xff] }
  0xdd   : > { %6622 = vmatprep.subr.bf16.mxu1 %v7164_v24  ;;  %6770 = vmatprep.mubr.msk.bf16.mxu0 %vm891_vm3, %v8407_v15  ;;  %v9824_v41 = vld [vmem:[#allocation19_spill] sm:$0xff] }
  0xde   : > { %v2707_v45 = vrot.slane %v2706_v6, 4  ;;  %v9828_v6 = vld [vmem:[#allocation22_spill] sm:$0xff] }
  0xdf   : > { %6591 = vmatmul.mubr.msk.bf16.gmra.mrb[4].mxu1 %vm891_vm3, %v9818_v9 }
  0xe0   : > { %6594 = vmatprep.mubr.msk.bf16.mxu1 %vm891_vm3, %v9819_v11  ;;  %6623 = vmatpush3.bf16.msra.mxu1 %v7164_v24  ;;  %v2712_v20 = vsel %vm7324_vm6, %v2707_v45, %v2711_v43  ;;  %v3192_v24 = vor.u32 %v3191_v29, %v3190_v14  ;;  %v9833_v45 = vld [vmem:[#allocation11_spill] sm:$0xff]  ;;  %v9834_v43 = vld [vmem:[#allocation38_spill] sm:$0xff]  ;;  %vm5792_vm6 = vcmask 516096  }
  0xe1   : > { %6624 = vmatprep.subr.bf16.mxu1 %v7166_v34  ;;  %v6090_v58 = vcombine.low %v2702_v1, %v2712_v20  ;;  %v9837_v14 = vld [vmem:[#allocation30_spill] sm:$0xff]  ;;  %v7171_v29 = vld [vmem:[%s9527_s1 + $0x88] sm:$0xff]   ;;  %v9838_v1 = vld [vmem:[#allocation32_spill] sm:$0xff] }
  0xe2   : > { %v3194_v27 = vrot.slane %v3192_v24, 4  ;;  %v3193_v49 = vsel %vm7542_vm9, %v3189_v52, %v3192_v24  ;;  %v3578_v52 = vlaneseq }
  0xe4   : > { %6625 = vmatpush3.bf16.msra.mxu1 %v7166_v34  ;;  %6771 = vmatmul.mubr.msk.bf16.gmra.mrb[24].mxu0 %vm891_vm3, %v8432_v2  ;;  %v3200_v33 = vsel %vm7542_vm9, %v3194_v27, %v3199_v63  ;;  %v7167_v34 = vld [vmem:[%s9527_s1 + $0x108] sm:$0xff]  }
  0xe5   : > { %6858 = vmatprep.subr.bf16.mxu1 %v7170_v59  ;;  %6774 = vmatprep.mubr.msk.bf16.mxu0 %vm891_vm3, %v8519_v38  ;;  %v8542_v55 = vcombine.low %v3193_v49, %v3200_v33  ;;  %v3577_v49 = vunpack.c.0.s8 %v3576_v51  ;;  %v3579_v33 = vshrl.u32 %v3578_v52, 7 }
  0xe7   : > { %6595 = vmatmul.mubr.msk.bf16.gmra.mrb[8].mxu1 %vm891_vm3, %v9820_v23 }
  0xe8   : > { %6598 = vmatprep.mubr.msk.bf16.mxu1 %vm891_vm3, %v7845_v25 }
  0xec   : > { %6775 = vmatmul.mubr.msk.bf16.gmra.mrb[28].mxu0 %vm891_vm3, %v6090_v58  ;;  %v8768_v58 = vld [vmem:[%s9528_s2] ss:$0 sm:$0xff] }
  0xed   : > { %6786 = vmatprep.mubr.msk.bf16.mxu0 %vm891_vm3, %v9821_v37  ;;  %v8773_v37 = vld [vmem:[%s9529_s3] ss:$0 sm:$0xff] }
  0xef   : > { %6599 = vmatmul.mubr.msk.bf16.gmra.mrb[12].mxu1 %vm891_vm3, %v7882_v32 }
  0xf0   : > { %6602 = vmatprep.mubr.msk.bf16.mxu1 %vm891_vm3, %v7915_v57 }
  0xf4   : > { %6787 = vmatmul.mubr.msk.bf16.vlgmr.msra.gmra.mrb[0].mxu0 %vm891_vm3, %v9823_v13 }
  0xf5   : > { %6819 = vmatpush3.bf16.msra.mxu0 %v8412_v21  ;;  %6790 = vmatprep.mubr.msk.bf16.mxu0 %vm891_vm3, %v9824_v41  ;;  %v9827_v21 = vld [vmem:[#allocation21_spill] sm:$0xff] }
  0xf6   : > { %6820 = vmatprep.subr.bf16.mxu0 %v7167_v34 }
  0xf7   : > { %6603 = vmatmul.mubr.msk.bf16.gmra.mrb[16].mxu1 %vm891_vm3, %v7967_v12 }
  0xf8   : > { %6606 = vmatprep.mubr.msk.bf16.mxu1 %vm891_vm3, %v9822_v31 }
  0xf9   : > { %6821 = vmatpush3.bf16.msra.mxu0 %v7167_v34 }
  0xfa   : > { %6822 = vmatprep.subr.bf16.mxu0 %v7168_v35 }
  0xfc   : > { %6791 = vmatmul.mubr.msk.bf16.gmra.mrb[4].mxu0 %vm891_vm3, %v9827_v21  ;;  %v8778_v21 = vsub.s32 %v3577_v49, %v3579_v33 }
  0xfd   : > { %6794 = vmatprep.mubr.msk.bf16.mxu0 %vm891_vm3, %v9828_v6  ;;  %6823 = vmatpush3.bf16.msra.mxu0 %v7168_v35 }
  0xfe   : > { %6824 = vmatprep.subr.bf16.mxu0 %v7169_v7 }
  0xff   : > { %6607 = vmatmul.mubr.msk.bf16.gmra.mrb[20].mxu1 %vm891_vm3, %v9825_v61 }
 0x100   : > { %6610 = vmatprep.mubr.msk.bf16.mxu1 %vm891_vm3, %v9826_v17 }
 0x101   : > { %6825 = vmatpush3.bf16.msra.mxu0 %v7169_v7 }
 0x104   : > { %6795 = vmatmul.mubr.msk.bf16.gmra.mrb[8].mxu0 %vm891_vm3, %v9831_v46 }
 0x105   : > { %6798 = vmatprep.mubr.msk.bf16.mxu0 %vm891_vm3, %v9832_v56 }
 0x107   : > { %6611 = vmatmul.mubr.msk.bf16.gmra.mrb[24].mxu1 %vm891_vm3, %v9829_v0 }
 0x108   : > { %6614 = vmatprep.mubr.msk.bf16.mxu1 %vm891_vm3, %v9830_v18 }
 0x10c   : > { %6799 = vmatmul.mubr.msk.bf16.gmra.mrb[12].mxu0 %vm891_vm3, %v9835_v53 }
 0x10d   : > { %6802 = vmatprep.mubr.msk.bf16.mxu0 %vm891_vm3, %v9836_v60 }
 0x10f   : > { %6615 = vmatmul.mubr.msk.bf16.gmra.mrb[28].mxu1 %vm891_vm3, %v9833_v45 }
 0x110   : > { %6626 = vmatprep.mubr.msk.bf16.mxu1 %vm891_vm3, %v9834_v43 }
 0x114   : > { %6803 = vmatmul.mubr.msk.bf16.gmra.mrb[16].mxu0 %vm891_vm3, %v9837_v14 }
 0x115   : > { %6806 = vmatprep.mubr.msk.bf16.mxu0 %vm891_vm3, %v9838_v1 }
 0x117   : > { %6627 = vmatmul.mubr.msk.bf16.vlgmr.msra.gmra.mrb[0].mxu1 %vm891_vm3, %v8015_v16  ;;  %v7172_v16 = vld [vmem:[%s9527_s1 + $0x90] sm:$0xff]  }
 0x118   : > { %6862 = vmatpush3.bf16.msra.mxu1 %v7170_v59  ;;  %6630 = vmatprep.mubr.msk.bf16.mxu1 %vm891_vm3, %v8063_v28  ;;  %v9839_v28 = vld [vmem:[#allocation34_spill] sm:$0xff]  ;;  %v7173_v59 = vld [vmem:[%s9527_s1 + $0x98] sm:$0xff]  }
 0x119   : > { %6859 = vmatprep.subr.bf16.mxu1 %v7171_v29 }
 0x11c   : > { %6863 = vmatpush3.bf16.msra.mxu1 %v7171_v29  ;;  %6807 = vmatmul.mubr.msk.bf16.gmra.mrb[20].mxu0 %vm891_vm3, %v9839_v28 }
 0x11d   : > { %6860 = vmatprep.subr.bf16.mxu1 %v7172_v16  ;;  %6810 = vmatprep.mubr.msk.bf16.mxu0 %vm891_vm3, %v9840_v10 }
 0x11f   : > { %6631 = vmatmul.mubr.msk.bf16.gmra.mrb[4].mxu1 %vm891_vm3, %v8105_v8  ;;  %v9841_v8 = vld [vmem:[#allocation37_spill] sm:$0xff] }
 0x120   : > { %6634 = vmatprep.mubr.msk.bf16.mxu1 %vm891_vm3, %v8147_v50  ;;  %6864 = vmatpush3.bf16.msra.mxu1 %v7172_v16  ;;  %v5412_v50 = vld [vmem:[%s8696_s8 + $0x14] sm:$0x3] }
 0x121   : > { %6861 = vmatprep.subr.bf16.mxu1 %v7173_v59 }
 0x124   : > { %6865 = vmatpush3.bf16.msra.mxu1 %v7173_v59  ;;  %6811 = vmatmul.mubr.msk.bf16.gmra.mrb[24].mxu0 %vm891_vm3, %v9841_v8 }
 0x125   : > { %6814 = vmatprep.mubr.msk.bf16.mxu0 %vm891_vm3, %v8459_v30 }
 0x127   : > { %6635 = vmatmul.mubr.msk.bf16.gmra.mrb[8].mxu1 %vm891_vm3, %v8192_v26 }
 0x128   : > { %6638 = vmatprep.mubr.msk.bf16.mxu1 %vm891_vm3, %v8240_v3 }
 0x12c   : > { %6815 = vmatmul.mubr.msk.bf16.gmra.mrb[28].mxu0 %vm891_vm3, %v6120_v39  ;;  %v5417_v39 = vsel %vm8702_vm13, 0, %v5416_v5 }
 0x12d   : > { %6826 = vmatprep.mubr.msk.bf16.mxu0 %vm891_vm3, %v9817_v22  ;;  %5418 = vst [vmem:[%s8696_s8 + $0x1c] sm:$0x3] %v5417_v39 }
 0x12f   : > { %6639 = vmatmul.mubr.msk.bf16.gmra.mrb[12].mxu1 %vm891_vm3, %v8284_v4  ;;  %v5444_v4 = vld [vmem:[%s8696_s8 + $0x54] sm:$0x3] }
 0x130   : > { %6642 = vmatprep.mubr.msk.bf16.mxu1 %vm891_vm3, %v8304_v47  ;;  %v5445_v47 = vsel %vm8702_vm13, 0, %v5444_v4 }
 0x131   : > { %5446 = vst [vmem:[%s8696_s8 + $0x54] sm:$0x3] %v5445_v47 }
 0x134   : > { %6827 = vmatmul.mubr.msk.bf16.vlgmr.msra.gmra.mrb[0].mxu0 %vm891_vm3, %v9818_v9 }
 0x135   : > { %6830 = vmatprep.mubr.msk.bf16.mxu0 %vm891_vm3, %v9819_v11 }
 0x137   : > { %6643 = vmatmul.mubr.msk.bf16.gmra.mrb[16].mxu1 %vm891_vm3, %v8325_v62 }
 0x138   : > { %6646 = vmatprep.mubr.msk.bf16.mxu1 %vm891_vm3, %v8348_v44 }
 0x13c   : > { %6831 = vmatmul.mubr.msk.bf16.gmra.mrb[4].mxu0 %vm891_vm3, %v9820_v23 }
 0x13d   : > { %6834 = vmatprep.mubr.msk.bf16.mxu0 %vm891_vm3, %v7845_v25  ;;  %v5404_v25 = vld [vmem:[%s8696_s8 + $0x4] sm:$0x3] }
 0x13e   : > { %v5405_v26 = vsel %vm8702_vm13, 0, %v5404_v25 }
 0x13f   : > { %6647 = vmatmul.mubr.msk.bf16.gmra.mrb[20].mxu1 %vm891_vm3, %v8367_v40  ;;  %5406 = vst [vmem:[%s8696_s8 + $0x4] sm:$0x3] %v5405_v26 }
 0x140   : > { %6650 = vmatprep.mubr.msk.bf16.mxu1 %vm891_vm3, %v8401_v54 }
 0x144   : > { %6835 = vmatmul.mubr.msk.bf16.gmra.mrb[8].mxu0 %vm891_vm3, %v7882_v32  ;;  %v7187_v32 = vmov 0  }
 0x145   : > { %6838 = vmatprep.mubr.msk.bf16.mxu0 %vm891_vm3, %v7915_v57  ;;  %5400 = vst.msk [vmem:[%s8696_s8] sm:$0xf] %vm5399_vm11, %v7187_v32  ;;  %5407 = vst.msk [vmem:[%s8696_s8 + $0x8] sm:$0xf] %vm5399_vm11, %v7187_v32 }
 0x146   : > { %5411 = vst.msk [vmem:[%s8696_s8 + $0x10] sm:$0xf] %vm5399_vm11, %v7187_v32  ;;  %5443 = vst.msk [vmem:[%s8696_s8 + $0x50] sm:$0xf] %vm5399_vm11, %v7187_v32 }
 0x147   : > { %6651 = vmatmul.mubr.msk.bf16.gmra.mrb[24].mxu1 %vm891_vm3, %v8407_v15  ;;  %5415 = vst.msk [vmem:[%s8696_s8 + $0x18] sm:$0xf] %vm5399_vm11, %v7187_v32  ;;  %5419 = vst.msk [vmem:[%s8696_s8 + $0x20] sm:$0xf] %vm5399_vm11, %v7187_v32 }
 0x148   : > { %6654 = vmatprep.mubr.msk.bf16.mxu1 %vm891_vm3, %v8432_v2  ;;  %5423 = vst.msk [vmem:[%s8696_s8 + $0x28] sm:$0xf] %vm5399_vm11, %v7187_v32  ;;  %5427 = vst.msk [vmem:[%s8696_s8 + $0x30] sm:$0xf] %vm5399_vm11, %v7187_v32 }
 0x149   : > { %5431 = vst.msk [vmem:[%s8696_s8 + $0x38] sm:$0xf] %vm5399_vm11, %v7187_v32  ;;  %5435 = vst.msk [vmem:[%s8696_s8 + $0x40] sm:$0xf] %vm5399_vm11, %v7187_v32 }
 0x14a   : > { %5439 = vst.msk [vmem:[%s8696_s8 + $0x48] sm:$0xf] %vm5399_vm11, %v7187_v32 }
 0x14c   : > { %6839 = vmatmul.mubr.msk.bf16.gmra.mrb[12].mxu0 %vm891_vm3, %v7967_v12  ;;  %v5408_v12 = vld [vmem:[%s8696_s8 + $0xc] sm:$0x3] }
 0x14d   : > { %6842 = vmatprep.mubr.msk.bf16.mxu0 %vm891_vm3, %v9822_v31  ;;  %v5409_v3 = vsel %vm8702_vm13, 0, %v5408_v12 }
 0x14e   : > { %5410 = vst [vmem:[%s8696_s8 + $0xc] sm:$0x3] %v5409_v3 }
 0x14f   : > { %6655 = vmatmul.mubr.msk.bf16.gmra.mrb[28].mxu1 %vm891_vm3, %v8519_v38 }
 0x150   : > { %6682 = vmatprep.mubr.msk.bf16.mxu1 %vm891_vm3, %v9835_v53 }
 0x154   : > { %6843 = vmatmul.mubr.msk.bf16.gmra.mrb[16].mxu0 %vm891_vm3, %v9825_v61 }
 0x155   : > { %6846 = vmatprep.mubr.msk.bf16.mxu0 %vm891_vm3, %v9826_v17 }
 0x157   : > { %6683 = vmatmul.mubr.msk.bf16.vlgmr.msra.gmra.mrb[16].mxu1 %vm891_vm3, %v9836_v60 }
 0x158   : > { %6686 = vmatprep.mubr.msk.bf16.mxu1 %vm891_vm3, %v9837_v14 }
 0x15c   : > { %6847 = vmatmul.mubr.msk.bf16.gmra.mrb[20].mxu0 %vm891_vm3, %v9829_v0 }
 0x15d   : > { %6850 = vmatprep.mubr.msk.bf16.mxu0 %vm891_vm3, %v9830_v18 }
 0x15f   : > { %6687 = vmatmul.mubr.msk.bf16.gmra.mrb[20].mxu1 %vm891_vm3, %v9838_v1 }
 0x160   : > { %6690 = vmatprep.mubr.msk.bf16.mxu1 %vm891_vm3, %v9839_v28 }
 0x164   : > { %6851 = vmatmul.mubr.msk.bf16.gmra.mrb[24].mxu0 %vm891_vm3, %v9833_v45 }
 0x165   : > { %6854 = vmatprep.mubr.msk.bf16.mxu0 %vm891_vm3, %v8266_v42  ;;  %v5413_v42 = vsel %vm8702_vm13, 0, %v5412_v50 }
 0x166   : > { %5414 = vst [vmem:[%s8696_s8 + $0x14] sm:$0x3] %v5413_v42 }
 0x167   : > { %6691 = vmatmul.mubr.msk.bf16.gmra.mrb[24].mxu1 %vm891_vm3, %v9840_v10 }
 0x168   : > { %6694 = vmatprep.mubr.msk.bf16.mxu1 %vm891_vm3, %v9841_v8 }
 0x16c   : > { %6855 = vmatmul.mubr.msk.bf16.gmra.mrb[28].mxu0 %vm891_vm3, %v8542_v55 }
 0x16f   : > { %6695 = vmatmul.mubr.msk.bf16.gmra.mrb[28].mxu1 %vm891_vm3, %v8459_v30 }
 0x1ea   : > { %v6628_v62 = vpop.f32.mrb[0].mxu1 }
 0x1eb   : > { %v2043_v44 = vpop.f32.mrb[1].mxu1 }
 0x1ec   : > { %v6629_v40 = vpop.f32.mrb[2].mxu1 }
 0x1ed   : > { %v2046_v54 = vpop.f32.mrb[3].mxu1 }
 0x1f2   : > { %v6632_v15 = vpop.f32.mrb[4].mxu1 }
 0x1f3   : > { %v2059_v2 = vpop.f32.mrb[5].mxu1 }
 0x1f4   : > { %v8741_v36 = vpop.f32.mrb[6].mxu1 }
 0x1f5   : > { %v8743_v30 = vpop.f32.mrb[7].mxu1 }
 0x1fa   : > { %v8749_v22 = vpop.f32.mrb[8].mxu1 }
 0x1fb   : > { %v8751_v9 = vpop.f32.mrb[9].mxu1 }
 0x1fc   : > { %v8753_v11 = vpop.f32.mrb[10].mxu1 }
 0x1fd   : > { %v8755_v38 = vpop.f32.mrb[11].mxu1 }
 0x202   : > { %v8757_v23 = vpop.f32.mrb[12].mxu1 }
 0x203   : > { %v8759_v20 = vpop.f32.mrb[13].mxu1 }
 0x204   : > { %v8761_v48 = vpop.f32.mrb[14].mxu1 }
 0x205   : > { %v8763_v24 = vpop.f32.mrb[15].mxu1 }
 0x207   : > { %v6828_v27 = vpop.f32.mrb[0].mxu0 }
 0x208   : > { %v6866_v63 = vadd.f32 %v6828_v27, %v6628_v62  ;;  %v3273_v55 = vpop.f32.mrb[1].mxu0 }
 0x209   : > { %v6867_v34 = vadd.f32 %v3273_v55, %v2043_v44  ;;  %v6829_v31 = vpop.f32.mrb[2].mxu0 }
 0x20a   : > { %v3441_v13 = vmul.f32 %v6866_v63, %v8768_v58  ;;  %v6868_v41 = vadd.f32 %v6829_v31, %v6629_v40  ;;  %v3276_v35 = vpop.f32.mrb[3].mxu0 }
 0x20b   : > { %v3439_v61 = vmul.f32 %v6867_v34, %v8768_v58  ;;  %v6869_v7 = vadd.f32 %v3276_v35, %v2046_v54 }
 0x20c   : > { %v3480_v17 = vadd.f32 %v8773_v37, %v3441_v13  ;;  %v3442_v6 = vmul.f32 %v6868_v41, %v8768_v58 }
 0x20d   : > { %v3478_v0 = vadd.f32 %v8773_v37, %v3439_v61  ;;  %v3440_v18 = vmul.f32 %v6869_v7, %v8768_v58 }
 0x20e   : > { %v3512_v46 = vmax.f32 %v3480_v17, 0.0  ;;  %v3481_v56 = vadd.f32 %v8773_v37, %v3442_v6 }
 0x20f   : > { %v3510_v45 = vmax.f32 %v3478_v0, 0.0  ;;  %v3479_v43 = vadd.f32 %v8773_v37, %v3440_v18  ;;  %v6832_v53 = vpop.f32.mrb[4].mxu0 }
 0x210   : > { %v3608_v60 = vcombine.high %v3512_v46, %v3512_v46  ;;  %v3615_v14 = vrot.slane %v3512_v46, %v8778_v21  ;;  %v8786_v29 = vmax.f32 %v3481_v56, 0.0  ;;  %v8788_v1 = vadd.f32 %v6832_v53, %v6632_v15  ;;  %v3289_v16 = vpop.f32.mrb[5].mxu0 }
 0x211   : > { %v3574_v28 = vcombine.high %v3510_v45, %v3510_v45  ;;  %v3581_v59 = vrot.slane %v3510_v45, %v8778_v21  ;;  %v8791_v10 = vmax.f32 %v3479_v43, 0.0  ;;  %v8793_v8 = vadd.f32 %v3289_v16, %v2059_v2  ;;  %v8795_v25 = vpop.f32.mrb[6].mxu0 }
 0x212   : > { %v3622_v32 = vrot.slane %v3608_v60, %v8778_v21  ;;  %v3623_v12 = vcombine.high %v3615_v14, %v3615_v14  ;;  %v4303_v50 = vsel %vm4246_vm10, %v3615_v14, -inf  ;;  %v3625_v26 = vcombine.high %v8786_v29, %v8786_v29  ;;  %v8801_v3 = vpop.f32.mrb[7].mxu0 }
 0x213   : > { %v4304_v42 = vrot.slane %v4303_v50, 4  ;;  %v3588_v4 = vrot.slane %v3574_v28, %v8778_v21  ;;  %v3589_v47 = vcombine.high %v3581_v59, %v3581_v59  ;;  %v4247_v62 = vsel %vm4246_vm10, %v3581_v59, -inf }
 0x214   : > { %v3624_v44 = vcombine.high %v3622_v32, %v3622_v32  ;;  %v4310_v40 = vsel %vm4246_vm10, %v3623_v12, -inf  ;;  %v4317_v54 = vsel %vm4246_vm10, %v3622_v32, -inf  ;;  %v4248_v15 = vrot.slane %v4247_v62, 4 }
 0x215   : > { %v4305_v2 = vmax.f32 %v4303_v50, %v4304_v42  ;;  %v4311_v5 = vrot.slane %v4310_v40, 4  ;;  %v4318_v39 = vrot.slane %v4317_v54, 4  ;;  %v3590_v19 = vcombine.high %v3588_v4, %v3588_v4 }
 0x216   : > { %v4324_v51 = vsel %vm4246_vm10, %v3624_v44, -inf  ;;  %v4249_v52 = vmax.f32 %v4247_v62, %v4248_v15  ;;  %v4254_v27 = vsel %vm4246_vm10, %v3589_v47, -inf  ;;  %v4261_v63 = vsel %vm4246_vm10, %v3588_v4, -inf }
 0x217   : > { %v4306_v49 = vrot.slane %v4305_v2, 2  ;;  %v4312_v33 = vmax.f32 %v4310_v40, %v4311_v5  ;;  %v4319_v55 = vmax.f32 %v4317_v54, %v4318_v39  ;;  %v4325_v34 = vrot.slane %v4324_v51, 4  ;;  %v8810_v31 = vpop.f32.mrb[8].mxu0 }
 0x218   : > { %v4250_v13 = vrot.slane %v4249_v52, 2  ;;  %v4255_v41 = vrot.slane %v4254_v27, 4  ;;  %v4262_v35 = vrot.slane %v4261_v63, 4  ;;  %v4268_v61 = vsel %vm4246_vm10, %v3590_v19, -inf  ;;  %v8813_v7 = vpop.f32.mrb[9].mxu0 }
 0x219   : > { %v4307_v17 = vmax.f32 %v4305_v2, %v4306_v49  ;;  %v4313_v6 = vrot.slane %v4312_v33, 2  ;;  %v4320_v0 = vrot.slane %v4319_v55, 2  ;;  %v4326_v18 = vmax.f32 %v4324_v51, %v4325_v34  ;;  %v8815_v46 = vpop.f32.mrb[10].mxu0 }
 0x21a   : > { %v4251_v56 = vmax.f32 %v4249_v52, %v4250_v13  ;;  %v4256_v45 = vmax.f32 %v4254_v27, %v4255_v41  ;;  %v4263_v43 = vmax.f32 %v4261_v63, %v4262_v35  ;;  %v4269_v53 = vrot.slane %v4268_v61, 4  ;;  %v8817_v60 = vpop.f32.mrb[11].mxu0 }
 0x21b   : > { %v4308_v14 = vrot.slane %v4307_v17, 1  ;;  %v4314_v16 = vmax.f32 %v4312_v33, %v4313_v6  ;;  %v4321_v28 = vmax.f32 %v4319_v55, %v4320_v0  ;;  %v4327_v59 = vrot.slane %v4326_v18, 2 }
 0x21c   : > { %v4252_v32 = vrot.slane %v4251_v56, 1  ;;  %v4257_v12 = vrot.slane %v4256_v45, 2  ;;  %v4264_v50 = vrot.slane %v4263_v43, 2  ;;  %v4270_v42 = vmax.f32 %v4268_v61, %v4269_v53 }
 0x21d   : > { %v4309_v4 = vmax.f32 %v4307_v17, %v4308_v14  ;;  %v4315_v47 = vrot.slane %v4314_v16, 1  ;;  %v4322_v62 = vrot.slane %v4321_v28, 1  ;;  %v4328_v44 = vmax.f32 %v4326_v18, %v4327_v59 }
 0x21e   : > { %v4253_v40 = vmax.f32 %v4251_v56, %v4252_v32  ;;  %v4258_v54 = vmax.f32 %v4256_v45, %v4257_v12  ;;  %v4265_v15 = vmax.f32 %v4263_v43, %v4264_v50  ;;  %v4271_v2 = vrot.slane %v4270_v42, 2 }
 0x21f   : > { %v4316_v5 = vmax.f32 %v4314_v16, %v4315_v47  ;;  %v4323_v39 = vmax.f32 %v4321_v28, %v4322_v62  ;;  %v4329_v19 = vrot.slane %v4328_v44, 1  ;;  %v5144_v51 = vsel %vm891_vm3, %v4309_v4, -inf  ;;  %v8820_v52 = vpop.f32.mrb[12].mxu0 }
 0x220   : > { %v4259_v27 = vrot.slane %v4258_v54, 1  ;;  %v4266_v63 = vrot.slane %v4265_v15, 1  ;;  %v4272_v49 = vmax.f32 %v4270_v42, %v4271_v2  ;;  %v5143_v33 = vsel %vm891_vm3, %v4253_v40, -inf  ;;  %v8823_v55 = vpop.f32.mrb[13].mxu0 }
 0x221   : > { %v4330_v34 = vmax.f32 %v4328_v44, %v4329_v19  ;;  %v5147_v13 = vsel %vm891_vm3, %v4316_v5, -inf  ;;  %v5150_v41 = vsel %vm891_vm3, %v4323_v39, -inf  ;;  %v5145_v35 = vmax.f32 %v5143_v33, %v5144_v51  ;;  %v8827_v61 = vpop.f32.mrb[14].mxu0 }
 0x222   : > { %v4260_v17 = vmax.f32 %v4258_v54, %v4259_v27  ;;  %v4267_v6 = vmax.f32 %v4265_v15, %v4266_v63  ;;  %v4273_v0 = vrot.slane %v4272_v49, 1  ;;  %v3632_v18 = vrot.slane %v8786_v29, %v8778_v21 }
 0x223   : > { %v5153_v56 = vsel %vm891_vm3, %v4330_v34, -inf  ;;  %v6254_v45 = vpack.c.bf16 %v5145_v35, %v5145_v35  ;;  %v3639_v43 = vrot.slane %v3625_v26, %v8778_v21  ;;  %v3591_v53 = vcombine.high %v8791_v10, %v8791_v10 }
 0x224   : > { %v4274_v14 = vmax.f32 %v4272_v49, %v4273_v0  ;;  %v5146_v16 = vsel %vm891_vm3, %v4260_v17, -inf  ;;  %v5149_v28 = vsel %vm891_vm3, %v4267_v6, -inf  ;;  %v3640_v59 = vcombine.high %v3632_v18, %v3632_v18 }
 0x225   : > { %v5148_v32 = vmax.f32 %v5146_v16, %v5147_v13  ;;  %v5151_v12 = vmax.f32 %v5149_v28, %v5150_v41  ;;  %v5639_v50 = vunpack.c.l.b16 %v6254_v45  ;;  %v3641_v42 = vcombine.high %v3639_v43, %v3639_v43  ;;  %v8852_v28 = vpop.f32.mrb[15].mxu0 }
 0x226   : > { %v5152_v4 = vsel %vm891_vm3, %v4274_v14, -inf  ;;  %v4331_v47 = vsel %vm4246_vm10, %v3632_v18, -inf  ;;  %v4338_v29 = vsel %vm4246_vm10, %v3640_v59, -inf  ;;  %v4345_v26 = vsel %vm4246_vm10, %v3639_v43, -inf }
 0x227   : > { %v5154_v62 = vmax.f32 %v5152_v4, %v5153_v56  ;;  %v6255_v44 = vpack.c.bf16 %v5148_v32, %v5148_v32  ;;  %v6256_v40 = vpack.c.bf16 %v5151_v12, %v5151_v12  ;;  %v4332_v54 = vrot.slane %v4331_v47, 4 }
 0x228   : > { %v4339_v15 = vrot.slane %v4338_v29, 4  ;;  %v4346_v2 = vrot.slane %v4345_v26, 4  ;;  %v4352_v5 = vsel %vm4246_vm10, %v3641_v42, -inf  ;;  %v3598_v39 = vrot.slane %v8791_v10, %v8778_v21 }
 0x229   : > { %v6257_v19 = vpack.c.bf16 %v5154_v62, %v5154_v62  ;;  %v5640_v51 = vunpack.c.l.b16 %v6255_v44  ;;  %v5641_v27 = vunpack.c.l.b16 %v6256_v40  ;;  %v4333_v63 = vmax.f32 %v4331_v47, %v4332_v54 }
 0x22a   : > { %v4340_v49 = vmax.f32 %v4338_v29, %v4339_v15  ;;  %v4347_v33 = vmax.f32 %v4345_v26, %v4346_v2  ;;  %v4353_v34 = vrot.slane %v4352_v5, 4  ;;  %v3605_v13 = vrot.slane %v3591_v53, %v8778_v21 }
 0x22b   : > { %v5642_v41 = vunpack.c.l.b16 %v6257_v19  ;;  %v5704_v35 = vsel %vm5703_vm14, %v5640_v51, %v5639_v50  ;;  %v4334_v17 = vrot.slane %v4333_v63, 2  ;;  %v3606_v6 = vcombine.high %v3598_v39, %v3598_v39 }
 0x22c   : > { %v5706_v0 = vsel %vm5705_vm15, %v5641_v27, %v5704_v35  ;;  %v4341_v18 = vrot.slane %v4340_v49, 2  ;;  %v4348_v56 = vrot.slane %v4347_v33, 2  ;;  %v4354_v10 = vmax.f32 %v4352_v5, %v4353_v34 }
 0x22d   : > { %v4335_v45 = vmax.f32 %v4333_v63, %v4334_v17  ;;  %v3607_v43 = vcombine.high %v3605_v13, %v3605_v13  ;;  %v4275_v14 = vsel %vm4246_vm10, %v3598_v39, -inf  ;;  %v4282_v16 = vsel %vm4246_vm10, %v3606_v6, -inf }
 0x22e   : > { %v4342_v53 = vmax.f32 %v4340_v49, %v4341_v18  ;;  %v4349_v59 = vmax.f32 %v4347_v33, %v4348_v56  ;;  %v4355_v32 = vrot.slane %v4354_v10, 2  ;;  %v4276_v12 = vrot.slane %v4275_v14, 4 }
 0x22f   : > { %v4336_v50 = vrot.slane %v4335_v45, 1  ;;  %v4283_v42 = vrot.slane %v4282_v16, 4  ;;  %v4289_v4 = vsel %vm4246_vm10, %v3605_v13, -inf  ;;  %v4296_v47 = vsel %vm4246_vm10, %v3607_v43, -inf }
 0x230   : > { %v4343_v29 = vrot.slane %v4342_v53, 1  ;;  %v4350_v26 = vrot.slane %v4349_v59, 1  ;;  %v4356_v62 = vmax.f32 %v4354_v10, %v4355_v32  ;;  %v4277_v44 = vmax.f32 %v4275_v14, %v4276_v12 }
 0x231   : > { %v4337_v40 = vmax.f32 %v4335_v45, %v4336_v50  ;;  %v4284_v54 = vmax.f32 %v4282_v16, %v4283_v42  ;;  %v4290_v15 = vrot.slane %v4289_v4, 4  ;;  %v4297_v2 = vrot.slane %v4296_v47, 4 }
 0x232   : > { %v4344_v5 = vmax.f32 %v4342_v53, %v4343_v29  ;;  %v4351_v39 = vmax.f32 %v4349_v59, %v4350_v26  ;;  %v4357_v19 = vrot.slane %v4356_v62, 1  ;;  %v4278_v51 = vrot.slane %v4277_v44, 2 }
 0x233   : > { %v5156_v27 = vsel %vm891_vm3, %v4337_v40, -inf  ;;  %v4285_v63 = vrot.slane %v4284_v54, 2  ;;  %v4291_v49 = vmax.f32 %v4289_v4, %v4290_v15  ;;  %v4298_v33 = vmax.f32 %v4296_v47, %v4297_v2 }
 0x234   : > { %v4358_v34 = vmax.f32 %v4356_v62, %v4357_v19  ;;  %v5159_v13 = vsel %vm891_vm3, %v4344_v5, -inf  ;;  %v5162_v35 = vsel %vm891_vm3, %v4351_v39, -inf  ;;  %v4279_v17 = vmax.f32 %v4277_v44, %v4278_v51 }
 0x235   : > { %v4286_v6 = vmax.f32 %v4284_v54, %v4285_v63  ;;  %v4292_v18 = vrot.slane %v4291_v49, 2  ;;  %v4299_v56 = vrot.slane %v4298_v33, 2  ;;  %v5708_v10 = vsel %vm5707_vm0, %v5642_v41, %v5706_v0  ;;  %v8883_v63 = vpop.f32.mrb[16].mxu1 }
 0x236   : > { %v5165_v45 = vsel %vm891_vm3, %v4358_v34, -inf  ;;  %v4280_v43 = vrot.slane %v4279_v17, 1  ;;  %v3445_v14 = vmul.f32 %v8788_v1, %v8768_v58  ;;  %v3443_v16 = vmul.f32 %v8793_v8, %v8768_v58 }
 0x237   : > { %v4287_v53 = vrot.slane %v4286_v6, 1  ;;  %v4293_v59 = vmax.f32 %v4291_v49, %v4292_v18  ;;  %v4300_v32 = vmax.f32 %v4298_v33, %v4299_v56  ;;  %v6872_v12 = vadd.f32 %v8795_v25, %v8741_v36  ;;  %v8885_v49 = vpop.f32.mrb[16].mxu0 }
 0x238   : > { %v4281_v50 = vmax.f32 %v4279_v17, %v4280_v43  ;;  %v3484_v41 = vadd.f32 %v8773_v37, %v3445_v14  ;;  %v3482_v0 = vadd.f32 %v8773_v37, %v3443_v16  ;;  %v6873_v42 = vadd.f32 %v8801_v3, %v8743_v30 }
 0x239   : > { %v4288_v4 = vmax.f32 %v4286_v6, %v4287_v53  ;;  %v4294_v1 = vrot.slane %v4293_v59, 1  ;;  %v4301_v47 = vrot.slane %v4300_v32, 1  ;;  %v8872_v8 = vmul.f32 %v6872_v12, %v8768_v58 }
 0x23a   : > { %v5155_v29 = vsel %vm891_vm3, %v4281_v50, -inf  ;;  %v3516_v26 = vmax.f32 %v3484_v41, 0.0  ;;  %v3514_v36 = vmax.f32 %v3482_v0, 0.0  ;;  %v8876_v25 = vmul.f32 %v6873_v42, %v8768_v58 }
 0x23b   : > { %v4295_v62 = vmax.f32 %v4293_v59, %v4294_v1  ;;  %v4302_v44 = vmax.f32 %v4300_v32, %v4301_v47  ;;  %v5157_v40 = vmax.f32 %v5155_v29, %v5156_v27  ;;  %v5158_v30 = vsel %vm891_vm3, %v4288_v4, -inf }
 0x23c   : > { %v5160_v3 = vmax.f32 %v5158_v30, %v5159_v13  ;;  %v3676_v54 = vcombine.high %v3516_v26, %v3516_v26  ;;  %v3683_v15 = vrot.slane %v3516_v26, %v8778_v21  ;;  %v3642_v2 = vcombine.high %v3514_v36, %v3514_v36 }
 0x23d   : > { %v5161_v5 = vsel %vm891_vm3, %v4295_v62, -inf  ;;  %v5164_v39 = vsel %vm891_vm3, %v4302_v44, -inf  ;;  %v6258_v19 = vpack.c.bf16 %v5157_v40, %v5157_v40  ;;  %v3649_v51 = vrot.slane %v3514_v36, %v8778_v21 }
 0x23e   : > { %v5163_v27 = vmax.f32 %v5161_v5, %v5162_v35  ;;  %v5166_v33 = vmax.f32 %v5164_v39, %v5165_v45  ;;  %v6259_v34 = vpack.c.bf16 %v5160_v3, %v5160_v3  ;;  %v3690_v13 = vrot.slane %v3676_v54, %v8778_v21 }
 0x23f   : > { %v5643_v17 = vunpack.c.l.b16 %v6258_v19  ;;  %v3691_v6 = vcombine.high %v3683_v15, %v3683_v15  ;;  %v4415_v18 = vsel %vm4246_vm10, %v3683_v15, -inf  ;;  %v3656_v56 = vrot.slane %v3642_v2, %v8778_v21 }
 0x240   : > { %v6260_v43 = vpack.c.bf16 %v5163_v27, %v5163_v27  ;;  %v6261_v14 = vpack.c.bf16 %v5166_v33, %v5166_v33  ;;  %v5644_v16 = vunpack.c.l.b16 %v6259_v34  ;;  %v3692_v53 = vcombine.high %v3690_v13, %v3690_v13 }
 0x241   : > { %v5710_v59 = vsel %vm5709_vm1, %v5643_v17, %v5708_v10  ;;  %v4416_v32 = vrot.slane %v4415_v18, 4  ;;  %v4422_v35 = vsel %vm4246_vm10, %v3691_v6, -inf  ;;  %v4429_v45 = vsel %vm4246_vm10, %v3690_v13, -inf }
 0x242   : > { %v5645_v12 = vunpack.c.l.b16 %v6260_v43  ;;  %v5646_v50 = vunpack.c.l.b16 %v6261_v14  ;;  %v5712_v41 = vsel %vm5711_vm2, %v5644_v16, %v5710_v59  ;;  %v4423_v0 = vrot.slane %v4422_v35, 4  ;;  %v8904_v16 = vpop.f32.mrb[17].mxu1 }
 0x243   : > { %v5757_v42 = vpack.c.b16 %v5712_v41, %v5712_v41  ;;  %v4417_v4 = vmax.f32 %v4415_v18, %v4416_v32  ;;  %v4430_v1 = vrot.slane %v4429_v45, 4  ;;  %v4436_v47 = vsel %vm4246_vm10, %v3692_v53, -inf }
 0x244   : > { %v5714_v29 = vsel %vm5713_vm4, %v5646_v50, %v5645_v12  ;;  %v4424_v10 = vmax.f32 %v4422_v35, %v4423_v0  ;;  %v4437_v26 = vrot.slane %v4436_v47, 4  ;;  %v3657_v36 = vcombine.high %v3649_v51, %v3649_v51 }
 0x245   : > { %v5758_v62 = vpack.c.b16 %v5714_v29, %v5714_v29  ;;  %6236 = vst.msk [vmem:[%s8696_s8 + $0x10] sm:$0xe] %vm5790_vm5, %v5757_v42  ;;  %v4418_v44 = vrot.slane %v4417_v4, 2  ;;  %v4431_v40 = vmax.f32 %v4429_v45, %v4430_v1  ;;  %v3658_v30 = vcombine.high %v3656_v56, %v3656_v56 }
 0x246   : > { %v4425_v3 = vrot.slane %v4424_v10, 2  ;;  %v4438_v54 = vmax.f32 %v4436_v47, %v4437_v26  ;;  %v4359_v15 = vsel %vm4246_vm10, %v3649_v51, -inf  ;;  %v4366_v2 = vsel %vm4246_vm10, %v3657_v36, -inf  ;;  %v8906_v51 = vpop.f32.mrb[17].mxu0 }
 0x247   : > { %6237 = vst.msk [vmem:[%s8696_s8 + $0x14] sm:$0x1] %vm5792_vm6, %v5758_v62  ;;  %v4419_v5 = vmax.f32 %v4417_v4, %v4418_v44  ;;  %v4432_v39 = vrot.slane %v4431_v40, 2  ;;  %v4360_v19 = vrot.slane %v4359_v15, 4  ;;  %v4367_v27 = vrot.slane %v4366_v2, 4 }
 0x248   : > { %v4426_v33 = vmax.f32 %v4424_v10, %v4425_v3  ;;  %v4439_v34 = vrot.slane %v4438_v54, 2  ;;  %v4373_v13 = vsel %vm4246_vm10, %v3656_v56, -inf  ;;  %v4380_v17 = vsel %vm4246_vm10, %v3658_v30, -inf }
 0x249   : > { %v4420_v6 = vrot.slane %v4419_v5, 1  ;;  %v4433_v18 = vmax.f32 %v4431_v40, %v4432_v39  ;;  %v4361_v43 = vmax.f32 %v4359_v15, %v4360_v19  ;;  %v4368_v14 = vmax.f32 %v4366_v2, %v4367_v27 }
 0x24a   : > { %v4427_v53 = vrot.slane %v4426_v33, 1  ;;  %v4440_v59 = vmax.f32 %v4438_v54, %v4439_v34  ;;  %v4374_v32 = vrot.slane %v4373_v13, 4  ;;  %v4381_v35 = vrot.slane %v4380_v17, 4 }
 0x24b   : > { %v4421_v45 = vmax.f32 %v4419_v5, %v4420_v6  ;;  %v4434_v12 = vrot.slane %v4433_v18, 1  ;;  %v4362_v50 = vrot.slane %v4361_v43, 2  ;;  %v4369_v41 = vrot.slane %v4368_v14, 2 }
 0x24c   : > { %v4428_v0 = vmax.f32 %v4426_v33, %v4427_v53  ;;  %v4441_v56 = vrot.slane %v4440_v59, 1  ;;  %v4375_v42 = vmax.f32 %v4373_v13, %v4374_v32  ;;  %v4382_v4 = vmax.f32 %v4380_v17, %v4381_v35 }
 0x24d   : > { %v4435_v1 = vmax.f32 %v4433_v18, %v4434_v12  ;;  %v5168_v47 = vsel %vm891_vm3, %v4421_v45, -inf  ;;  %v4363_v29 = vmax.f32 %v4361_v43, %v4362_v50  ;;  %v4370_v10 = vmax.f32 %v4368_v14, %v4369_v41  ;;  %v8924_v18 = vpop.f32.mrb[18].mxu1  ;;  %v8926_v43 = vpop.f32.mrb[18].mxu0 }
 0x24e   : > { %v4442_v26 = vmax.f32 %v4440_v59, %v4441_v56  ;;  %v5171_v36 = vsel %vm891_vm3, %v4428_v0, -inf  ;;  %v4376_v62 = vrot.slane %v4375_v42, 2  ;;  %v4383_v44 = vrot.slane %v4382_v4, 2 }
 0x24f   : > { %v5174_v40 = vsel %vm891_vm3, %v4435_v1, -inf  ;;  %v4364_v30 = vrot.slane %v4363_v29, 1  ;;  %v4371_v3 = vrot.slane %v4370_v10, 1  ;;  %v3485_v54 = vadd.f32 %v8773_v37, %v8872_v8 }
 0x250   : > { %v5177_v15 = vsel %vm891_vm3, %v4442_v26, -inf  ;;  %v4377_v2 = vmax.f32 %v4375_v42, %v4376_v62  ;;  %v4384_v5 = vmax.f32 %v4382_v4, %v4383_v44  ;;  %v3483_v39 = vadd.f32 %v8773_v37, %v8876_v25 }
 0x251   : > { %v4365_v19 = vmax.f32 %v4363_v29, %v4364_v30  ;;  %v4372_v27 = vmax.f32 %v4370_v10, %v4371_v3  ;;  %v3517_v33 = vmax.f32 %v3485_v54, 0.0  ;;  %v8918_v34 = vadd.f32 %v8810_v31, %v8749_v22 }
 0x252   : > { %v4378_v13 = vrot.slane %v4377_v2, 1  ;;  %v4385_v17 = vrot.slane %v4384_v5, 1  ;;  %v3515_v6 = vmax.f32 %v3483_v39, 0.0  ;;  %v8922_v8 = vadd.f32 %v8813_v7, %v8751_v9 }
 0x253   : > { %v5167_v25 = vsel %vm891_vm3, %v4365_v19, -inf  ;;  %v5170_v14 = vsel %vm891_vm3, %v4372_v27, -inf  ;;  %v3693_v53 = vcombine.high %v3517_v33, %v3517_v33  ;;  %v3700_v59 = vrot.slane %v3517_v33, %v8778_v21 }
 0x254   : > { %v4379_v22 = vmax.f32 %v4377_v2, %v4378_v13  ;;  %v4386_v31 = vmax.f32 %v4384_v5, %v4385_v17  ;;  %v5169_v32 = vmax.f32 %v5167_v25, %v5168_v47  ;;  %v5172_v35 = vmax.f32 %v5170_v14, %v5171_v36 }
 0x255   : > { %v3707_v45 = vrot.slane %v3693_v53, %v8778_v21  ;;  %v3708_v12 = vcombine.high %v3700_v59, %v3700_v59  ;;  %v4443_v9 = vsel %vm4246_vm10, %v3700_v59, -inf  ;;  %v3659_v7 = vcombine.high %v3515_v6, %v3515_v6 }
 0x256   : > { %v5173_v50 = vsel %vm891_vm3, %v4379_v22, -inf  ;;  %v5176_v41 = vsel %vm891_vm3, %v4386_v31, -inf  ;;  %v6262_v0 = vpack.c.bf16 %v5169_v32, %v5169_v32  ;;  %v6263_v56 = vpack.c.bf16 %v5172_v35, %v5172_v35 }
 0x257   : > { %v5175_v42 = vmax.f32 %v5173_v50, %v5174_v40  ;;  %v5178_v4 = vmax.f32 %v5176_v41, %v5177_v15  ;;  %v3709_v1 = vcombine.high %v3707_v45, %v3707_v45  ;;  %v4444_v29 = vrot.slane %v4443_v9, 4 }
 0x258   : > { %v5647_v10 = vunpack.c.l.b16 %v6262_v0  ;;  %v5648_v26 = vunpack.c.l.b16 %v6263_v56  ;;  %v4450_v47 = vsel %vm4246_vm10, %v3708_v12, -inf  ;;  %v4457_v36 = vsel %vm4246_vm10, %v3707_v45, -inf  ;;  %v8945_v12 = vpop.f32.mrb[19].mxu0 }
 0x259   : > { %v6264_v62 = vpack.c.bf16 %v5175_v42, %v5175_v42  ;;  %v6265_v44 = vpack.c.bf16 %v5178_v4, %v5178_v4  ;;  %v4445_v30 = vmax.f32 %v4443_v9, %v4444_v29  ;;  %v4451_v3 = vrot.slane %v4450_v47, 4 }
 0x25a   : > { %v5715_v54 = vsel %vm5703_vm14, %v5648_v26, %v5647_v10  ;;  %v4458_v2 = vrot.slane %v4457_v36, 4  ;;  %v4464_v5 = vsel %vm4246_vm10, %v3709_v1, -inf  ;;  %v3666_v40 = vrot.slane %v3515_v6, %v8778_v21  ;;  %v8943_v6 = vpop.f32.mrb[19].mxu1 }
 0x25b   : > { %v5649_v15 = vunpack.c.l.b16 %v6264_v62  ;;  %v5650_v39 = vunpack.c.l.b16 %v6265_v44  ;;  %v4446_v19 = vrot.slane %v4445_v30, 2  ;;  %v4452_v27 = vmax.f32 %v4450_v47, %v4451_v3 }
 0x25c   : > { %v4459_v33 = vmax.f32 %v4457_v36, %v4458_v2  ;;  %v4465_v13 = vrot.slane %v4464_v5, 4  ;;  %v3673_v17 = vrot.slane %v3659_v7, %v8778_v21  ;;  %v3674_v25 = vcombine.high %v3666_v40, %v3666_v40 }
 0x25d   : > { %v5716_v14 = vsel %vm5705_vm15, %v5649_v15, %v5715_v54  ;;  %v4447_v53 = vmax.f32 %v4445_v30, %v4446_v19  ;;  %v4453_v59 = vrot.slane %v4452_v27, 2  ;;  %v4387_v22 = vsel %vm4246_vm10, %v3666_v40, -inf }
 0x25e   : > { %v4460_v31 = vrot.slane %v4459_v33, 2  ;;  %v4466_v32 = vmax.f32 %v4464_v5, %v4465_v13  ;;  %v3675_v35 = vcombine.high %v3673_v17, %v3673_v17  ;;  %v4388_v45 = vrot.slane %v4387_v22, 4 }
 0x25f   : > { %v4448_v9 = vrot.slane %v4447_v53, 1  ;;  %v4454_v50 = vmax.f32 %v4452_v27, %v4453_v59  ;;  %v4394_v41 = vsel %vm4246_vm10, %v3674_v25, -inf  ;;  %v4401_v7 = vsel %vm4246_vm10, %v3673_v17, -inf }
 0x260   : > { %v4461_v0 = vmax.f32 %v4459_v33, %v4460_v31  ;;  %v4467_v56 = vrot.slane %v4466_v32, 2  ;;  %v4389_v42 = vmax.f32 %v4387_v22, %v4388_v45  ;;  %v4395_v4 = vrot.slane %v4394_v41, 4 }
 0x261   : > { %v4449_v1 = vmax.f32 %v4447_v53, %v4448_v9  ;;  %v4455_v29 = vrot.slane %v4454_v50, 1  ;;  %v4402_v10 = vrot.slane %v4401_v7, 4  ;;  %v4408_v26 = vsel %vm4246_vm10, %v3675_v35, -inf }
 0x262   : > { %v4462_v47 = vrot.slane %v4461_v0, 1  ;;  %v4468_v36 = vmax.f32 %v4466_v32, %v4467_v56  ;;  %v4390_v62 = vrot.slane %v4389_v42, 2  ;;  %v4396_v44 = vmax.f32 %v4394_v41, %v4395_v4 }
 0x263   : > { %v4456_v30 = vmax.f32 %v4454_v50, %v4455_v29  ;;  %v5180_v3 = vsel %vm891_vm3, %v4449_v1, -inf  ;;  %v4403_v54 = vmax.f32 %v4401_v7, %v4402_v10  ;;  %v4409_v2 = vrot.slane %v4408_v26, 4 }
 0x264   : > { %v4463_v5 = vmax.f32 %v4461_v0, %v4462_v47  ;;  %v4469_v40 = vrot.slane %v4468_v36, 1  ;;  %v4391_v15 = vmax.f32 %v4389_v42, %v4390_v62  ;;  %v4397_v19 = vrot.slane %v4396_v44, 2 }
 0x265   : > { %v5183_v27 = vsel %vm891_vm3, %v4456_v30, -inf  ;;  %v4404_v33 = vrot.slane %v4403_v54, 2  ;;  %v4410_v13 = vmax.f32 %v4408_v26, %v4409_v2  ;;  %v5717_v17 = vsel %vm5707_vm0, %v5650_v39, %v5716_v14 }
 0x266   : > { %v4470_v25 = vmax.f32 %v4468_v36, %v4469_v40  ;;  %v5186_v53 = vsel %vm891_vm3, %v4463_v5, -inf  ;;  %v4392_v59 = vrot.slane %v4391_v15, 1  ;;  %v4398_v22 = vmax.f32 %v4396_v44, %v4397_v19  ;;  %v8978_v19 = vpop.f32.mrb[20].mxu1 }
 0x267   : > { %v4405_v31 = vmax.f32 %v4403_v54, %v4404_v33  ;;  %v4411_v32 = vrot.slane %v4410_v13, 2  ;;  %v3449_v35 = vmul.f32 %v8918_v34, %v8768_v58  ;;  %v3447_v45 = vmul.f32 %v8922_v8, %v8768_v58 }
 0x268   : > { %v5189_v9 = vsel %vm891_vm3, %v4470_v25, -inf  ;;  %v4393_v50 = vmax.f32 %v4391_v15, %v4392_v59  ;;  %v4399_v41 = vrot.slane %v4398_v22, 1  ;;  %v6876_v39 = vadd.f32 %v8815_v46, %v8753_v11 }
 0x269   : > { %v4406_v14 = vrot.slane %v4405_v31, 1  ;;  %v4412_v7 = vmax.f32 %v4410_v13, %v4411_v32  ;;  %v3488_v0 = vadd.f32 %v8773_v37, %v3449_v35  ;;  %v3486_v56 = vadd.f32 %v8773_v37, %v3447_v45 }
 0x26a   : > { %v4400_v42 = vmax.f32 %v4398_v22, %v4399_v41  ;;  %v5179_v4 = vsel %vm891_vm3, %v4393_v50, -inf  ;;  %v3450_v34 = vmul.f32 %v6876_v39, %v8768_v58  ;;  %v6877_v8 = vadd.f32 %v8817_v60, %v8755_v38 }
 0x26b   : > { %v4407_v1 = vmax.f32 %v4405_v31, %v4406_v14  ;;  %v4413_v29 = vrot.slane %v4412_v7, 1  ;;  %v5181_v10 = vmax.f32 %v5179_v4, %v5180_v3  ;;  %v3520_v26 = vmax.f32 %v3488_v0, 0.0 }
 0x26c   : > { %v5182_v11 = vsel %vm891_vm3, %v4400_v42, -inf  ;;  %v3518_v46 = vmax.f32 %v3486_v56, 0.0  ;;  %v8969_v47 = vadd.f32 %v8773_v37, %v3450_v34  ;;  %v8972_v36 = vmul.f32 %v6877_v8, %v8768_v58  ;;  %v8980_v58 = vpop.f32.mrb[20].mxu0 }
 0x26d   : > { %v4414_v62 = vmax.f32 %v4412_v7, %v4413_v29  ;;  %v5184_v44 = vmax.f32 %v5182_v11, %v5183_v27  ;;  %v5185_v30 = vsel %vm891_vm3, %v4407_v1, -inf  ;;  %v6266_v54 = vpack.c.bf16 %v5181_v10, %v5181_v10 }
 0x26e   : > { %v5187_v2 = vmax.f32 %v5185_v30, %v5186_v53  ;;  %v3744_v38 = vcombine.high %v3520_v26, %v3520_v26  ;;  %v3751_v60 = vrot.slane %v3520_v26, %v8778_v21  ;;  %v3710_v3 = vcombine.high %v3518_v46, %v3518_v46 }
 0x26f   : > { %v5188_v5 = vsel %vm891_vm3, %v4414_v62, -inf  ;;  %v6267_v40 = vpack.c.bf16 %v5184_v44, %v5184_v44  ;;  %v5651_v15 = vunpack.c.l.b16 %v6266_v54  ;;  %v3717_v37 = vrot.slane %v3518_v46, %v8778_v21 }
 0x270   : > { %v5190_v33 = vmax.f32 %v5188_v5, %v5189_v9  ;;  %v6268_v27 = vpack.c.bf16 %v5187_v2, %v5187_v2  ;;  %v3758_v13 = vrot.slane %v3744_v38, %v8778_v21  ;;  %v3759_v25 = vcombine.high %v3751_v60, %v3751_v60 }
 0x271   : > { %v5652_v53 = vunpack.c.l.b16 %v6267_v40  ;;  %v5718_v59 = vsel %vm5709_vm1, %v5651_v15, %v5717_v17  ;;  %v4527_v22 = vsel %vm4246_vm10, %v3751_v60, -inf  ;;  %v3724_v31 = vrot.slane %v3710_v3, %v8778_v21 }
 0x272   : > { %v6269_v32 = vpack.c.bf16 %v5190_v33, %v5190_v33  ;;  %v5653_v35 = vunpack.c.l.b16 %v6268_v27  ;;  %v3760_v45 = vcombine.high %v3758_v13, %v3758_v13  ;;  %v4528_v50 = vrot.slane %v4527_v22, 4 }
 0x273   : > { %v5719_v41 = vsel %vm5711_vm2, %v5652_v53, %v5718_v59  ;;  %v4534_v9 = vsel %vm4246_vm10, %v3759_v25, -inf  ;;  %v4541_v39 = vsel %vm4246_vm10, %v3758_v13, -inf  ;;  %v3725_v14 = vcombine.high %v3717_v37, %v3717_v37 }
 0x274   : > { %v5654_v7 = vunpack.c.l.b16 %v6269_v32  ;;  %v5759_v0 = vpack.c.b16 %v5719_v41, %v5719_v41  ;;  %v4529_v56 = vmax.f32 %v4527_v22, %v4528_v50  ;;  %v4535_v17 = vrot.slane %v4534_v9, 4  ;;  %v8999_v22 = vpop.f32.mrb[21].mxu1  ;;  %v9001_v32 = vpop.f32.mrb[21].mxu0 }
 0x275   : > { %v4542_v42 = vrot.slane %v4541_v39, 4  ;;  %v4548_v4 = vsel %vm4246_vm10, %v3760_v45, -inf  ;;  %v3726_v34 = vcombine.high %v3724_v31, %v3724_v31  ;;  %v4471_v8 = vsel %vm4246_vm10, %v3717_v37, -inf }
 0x276   : > { %v5720_v1 = vsel %vm5713_vm4, %v5654_v7, %v5653_v35  ;;  %6238 = vst.msk [vmem:[%s8696_s8 + $0x18] sm:$0xe] %vm5790_vm5, %v5759_v0  ;;  %v4530_v29 = vrot.slane %v4529_v56, 2  ;;  %v4536_v10 = vmax.f32 %v4534_v9, %v4535_v17  ;;  %v4549_v26 = vrot.slane %v4548_v4, 4 }
 0x277   : > { %v5760_v11 = vpack.c.b16 %v5720_v1, %v5720_v1  ;;  %v4543_v46 = vmax.f32 %v4541_v39, %v4542_v42  ;;  %v4472_v62 = vrot.slane %v4471_v8, 4  ;;  %v4478_v44 = vsel %vm4246_vm10, %v3725_v14, -inf }
 0x278   : > { %v4531_v30 = vmax.f32 %v4529_v56, %v4530_v29  ;;  %v4537_v54 = vrot.slane %v4536_v10, 2  ;;  %v4550_v2 = vmax.f32 %v4548_v4, %v4549_v26  ;;  %v4479_v38 = vrot.slane %v4478_v44, 4 }
 0x279   : > { %6239 = vst.msk [vmem:[%s8696_s8 + $0x1c] sm:$0x1] %vm5792_vm6, %v5760_v11  ;;  %v4544_v60 = vrot.slane %v4543_v46, 2  ;;  %v4473_v3 = vmax.f32 %v4471_v8, %v4472_v62  ;;  %v4485_v5 = vsel %vm4246_vm10, %v3724_v31, -inf  ;;  %v4492_v40 = vsel %vm4246_vm10, %v3726_v34, -inf }
 0x27a   : > { %v4532_v15 = vrot.slane %v4531_v30, 1  ;;  %v4538_v37 = vmax.f32 %v4536_v10, %v4537_v54  ;;  %v4551_v33 = vrot.slane %v4550_v2, 2  ;;  %v4480_v27 = vmax.f32 %v4478_v44, %v4479_v38 }
 0x27b   : > { %v4545_v13 = vmax.f32 %v4543_v46, %v4544_v60  ;;  %v4474_v25 = vrot.slane %v4473_v3, 2  ;;  %v4486_v53 = vrot.slane %v4485_v5, 4  ;;  %v4493_v59 = vrot.slane %v4492_v40, 4 }
 0x27c   : > { %v4533_v35 = vmax.f32 %v4531_v30, %v4532_v15  ;;  %v4539_v45 = vrot.slane %v4538_v37, 1  ;;  %v4552_v50 = vmax.f32 %v4550_v2, %v4551_v33  ;;  %v4481_v41 = vrot.slane %v4480_v27, 2  ;;  %v9017_v15 = vpop.f32.mrb[22].mxu1 }
 0x27d   : > { %v4546_v9 = vrot.slane %v4545_v13, 1  ;;  %v4475_v31 = vmax.f32 %v4473_v3, %v4474_v25  ;;  %v4487_v39 = vmax.f32 %v4485_v5, %v4486_v53  ;;  %v4494_v14 = vmax.f32 %v4492_v40, %v4493_v59  ;;  %v9013_v40 = vld [vmem:[%s9529_s3] ss:$0 sm:$0xff] }
 0x27e   : > { %v4540_v7 = vmax.f32 %v4538_v37, %v4539_v45  ;;  %v4553_v0 = vrot.slane %v4552_v50, 1  ;;  %v5192_v56 = vsel %vm891_vm3, %v4533_v35, -inf  ;;  %v4482_v17 = vmax.f32 %v4480_v27, %v4481_v41  ;;  %v9019_v37 = vpop.f32.mrb[22].mxu0 }
 0x27f   : > { %v4547_v42 = vmax.f32 %v4545_v13, %v4546_v9  ;;  %v4476_v4 = vrot.slane %v4475_v31, 1  ;;  %v4488_v34 = vrot.slane %v4487_v39, 2  ;;  %v4495_v8 = vrot.slane %v4494_v14, 2 }
 0x280   : > { %v4554_v1 = vmax.f32 %v4552_v50, %v4553_v0  ;;  %v5195_v29 = vsel %vm891_vm3, %v4540_v7, -inf  ;;  %v4483_v10 = vrot.slane %v4482_v17, 1  ;;  %v3521_v26 = vmax.f32 %v8969_v47, 0.0 }
 0x281   : > { %v5198_v11 = vsel %vm891_vm3, %v4547_v42, -inf  ;;  %v4477_v46 = vmax.f32 %v4475_v31, %v4476_v4  ;;  %v4489_v62 = vmax.f32 %v4487_v39, %v4488_v34  ;;  %v4496_v44 = vmax.f32 %v4494_v14, %v4495_v8 }
 0x282   : > { %v5201_v30 = vsel %vm891_vm3, %v4554_v1, -inf  ;;  %v4484_v54 = vmax.f32 %v4482_v17, %v4483_v10  ;;  %v3761_v2 = vcombine.high %v3521_v26, %v3521_v26  ;;  %v3768_v38 = vrot.slane %v3521_v26, %v8778_v21 }
 0x283   : > { %v4490_v60 = vrot.slane %v4489_v62, 1  ;;  %v4497_v3 = vrot.slane %v4496_v44, 1  ;;  %v5191_v5 = vsel %vm891_vm3, %v4477_v46, -inf  ;;  %v3487_v47 = vadd.f32 %v9013_v40, %v8972_v36 }
 0x284   : > { %v5193_v33 = vmax.f32 %v5191_v5, %v5192_v56  ;;  %v5194_v27 = vsel %vm891_vm3, %v4484_v54, -inf  ;;  %v3775_v13 = vrot.slane %v3761_v2, %v8778_v21  ;;  %v3776_v25 = vcombine.high %v3768_v38, %v3768_v38 }
 0x285   : > { %v4491_v53 = vmax.f32 %v4489_v62, %v4490_v60  ;;  %v4498_v59 = vmax.f32 %v4496_v44, %v4497_v3  ;;  %v5196_v35 = vmax.f32 %v5194_v27, %v5195_v29  ;;  %v4555_v45 = vsel %vm4246_vm10, %v3768_v38, -inf }
 0x286   : > { %v6270_v50 = vpack.c.bf16 %v5193_v33, %v5193_v33  ;;  %v3777_v41 = vcombine.high %v3775_v13, %v3775_v13  ;;  %v4556_v9 = vrot.slane %v4555_v45, 4  ;;  %v4562_v36 = vsel %vm4246_vm10, %v3776_v25, -inf }
 0x287   : > { %v5197_v31 = vsel %vm891_vm3, %v4491_v53, -inf  ;;  %v5200_v39 = vsel %vm891_vm3, %v4498_v59, -inf  ;;  %v6271_v14 = vpack.c.bf16 %v5196_v35, %v5196_v35  ;;  %v4563_v7 = vrot.slane %v4562_v36, 4 }
 0x288   : > { %v5199_v0 = vmax.f32 %v5197_v31, %v5198_v11  ;;  %v5202_v56 = vmax.f32 %v5200_v39, %v5201_v30  ;;  %v5655_v17 = vunpack.c.l.b16 %v6270_v50  ;;  %v4557_v42 = vmax.f32 %v4555_v45, %v4556_v9  ;;  %v5420_v11 = vld [vmem:[%s8696_s8 + $0x24] sm:$0x3] }
 0x289   : > { %v5656_v4 = vunpack.c.l.b16 %v6271_v14  ;;  %v4564_v34 = vmax.f32 %v4562_v36, %v4563_v7  ;;  %v4569_v8 = vsel %vm4246_vm10, %v3775_v13, -inf  ;;  %v4576_v1 = vsel %vm4246_vm10, %v3777_v41, -inf  ;;  %v9041_v14 = vpop.f32.mrb[23].mxu1  ;;  %v9043_v7 = vpop.f32.mrb[23].mxu0 }
 0x28a   : > { %v6272_v29 = vpack.c.bf16 %v5199_v0, %v5199_v0  ;;  %v6273_v10 = vpack.c.bf16 %v5202_v56, %v5202_v56  ;;  %v4558_v26 = vrot.slane %v4557_v42, 2  ;;  %v4570_v46 = vrot.slane %v4569_v8, 4 }
 0x28b   : > { %v5721_v62 = vsel %vm5703_vm14, %v5656_v4, %v5655_v17  ;;  %v4565_v44 = vrot.slane %v4564_v34, 2  ;;  %v4577_v54 = vrot.slane %v4576_v1, 4  ;;  %v3519_v2 = vmax.f32 %v3487_v47, 0.0 }
 0x28c   : > { %v5657_v38 = vunpack.c.l.b16 %v6272_v29  ;;  %v5658_v30 = vunpack.c.l.b16 %v6273_v10  ;;  %v4559_v60 = vmax.f32 %v4557_v42, %v4558_v26  ;;  %v4571_v3 = vmax.f32 %v4569_v8, %v4570_v46 }
 0x28d   : > { %v4566_v5 = vmax.f32 %v4564_v34, %v4565_v44  ;;  %v4578_v33 = vmax.f32 %v4576_v1, %v4577_v54  ;;  %v3727_v27 = vcombine.high %v3519_v2, %v3519_v2  ;;  %v3734_v13 = vrot.slane %v3519_v2, %v8778_v21 }
 0x28e   : > { %v5722_v25 = vsel %vm5705_vm15, %v5657_v38, %v5721_v62  ;;  %v4560_v53 = vrot.slane %v4559_v60, 1  ;;  %v4572_v59 = vrot.slane %v4571_v3, 2  ;;  %v5421_v35 = vsel %vm8702_vm13, 0, %v5420_v11 }
 0x28f   : > { %v4567_v45 = vrot.slane %v4566_v5, 1  ;;  %v4579_v47 = vrot.slane %v4578_v33, 2  ;;  %v3741_v50 = vrot.slane %v3727_v27, %v8778_v21  ;;  %v3742_v41 = vcombine.high %v3734_v13, %v3734_v13  ;;  %5422 = vst [vmem:[%s8696_s8 + $0x24] sm:$0x3] %v5421_v35 }
 0x290   : > { %v4561_v9 = vmax.f32 %v4559_v60, %v4560_v53  ;;  %v4573_v36 = vmax.f32 %v4571_v3, %v4572_v59  ;;  %v4499_v31 = vsel %vm4246_vm10, %v3734_v13, -inf  ;;  %v9039_v39 = vsel %vm5707_vm0, %v5658_v30, %v5722_v25 }
 0x291   : > { %v4568_v0 = vmax.f32 %v4566_v5, %v4567_v45  ;;  %v4580_v56 = vmax.f32 %v4578_v33, %v4579_v47  ;;  %v3743_v17 = vcombine.high %v3741_v50, %v3741_v50  ;;  %v4500_v42 = vrot.slane %v4499_v31, 4  ;;  %v9056_v33 = vld [vmem:[%s9528_s2] ss:$0 sm:$0xff] }
 0x292   : > { %v4574_v4 = vrot.slane %v4573_v36, 1  ;;  %v5204_v34 = vsel %vm891_vm3, %v4561_v9, -inf  ;;  %v4506_v8 = vsel %vm4246_vm10, %v3742_v41, -inf  ;;  %v4513_v1 = vsel %vm4246_vm10, %v3741_v50, -inf }
 0x293   : > { %v4581_v29 = vrot.slane %v4580_v56, 1  ;;  %v5207_v10 = vsel %vm891_vm3, %v4568_v0, -inf  ;;  %v4501_v26 = vmax.f32 %v4499_v31, %v4500_v42  ;;  %v4507_v46 = vrot.slane %v4506_v8, 4 }
 0x294   : > { %v4575_v62 = vmax.f32 %v4573_v36, %v4574_v4  ;;  %v4514_v44 = vrot.slane %v4513_v1, 4  ;;  %v4520_v54 = vsel %vm4246_vm10, %v3743_v17, -inf  ;;  %v6878_v2 = vadd.f32 %v8820_v52, %v8757_v23 }
 0x295   : > { %v4582_v11 = vmax.f32 %v4580_v56, %v4581_v29  ;;  %v4502_v38 = vrot.slane %v4501_v26, 2  ;;  %v4508_v30 = vmax.f32 %v4506_v8, %v4507_v46  ;;  %v4521_v60 = vrot.slane %v4520_v54, 4 }
 0x296   : > { %v5210_v3 = vsel %vm891_vm3, %v4575_v62, -inf  ;;  %v4515_v5 = vmax.f32 %v4513_v1, %v4514_v44  ;;  %v3453_v27 = vmul.f32 %v9056_v33, %v6878_v2  ;;  %v6879_v13 = vadd.f32 %v8823_v55, %v8759_v20 }
 0x297   : > { %v5213_v25 = vsel %vm891_vm3, %v4582_v11, -inf  ;;  %v4503_v23 = vmax.f32 %v4501_v26, %v4502_v38  ;;  %v4509_v52 = vrot.slane %v4508_v30, 2  ;;  %v4522_v53 = vmax.f32 %v4520_v54, %v4521_v60  ;;  %v9081_v60 = vpop.f32.mrb[24].mxu1 }
 0x298   : > { %v4516_v59 = vrot.slane %v4515_v5, 2  ;;  %v3492_v35 = vadd.f32 %v9013_v40, %v3453_v27  ;;  %v3451_v45 = vmul.f32 %v9056_v33, %v6879_v13  ;;  %v6880_v47 = vadd.f32 %v8827_v61, %v8761_v48 }
 0x299   : > { %v4504_v50 = vrot.slane %v4503_v23, 1  ;;  %v4510_v41 = vmax.f32 %v4508_v30, %v4509_v52  ;;  %v4523_v9 = vrot.slane %v4522_v53, 2  ;;  %v6881_v36 = vadd.f32 %v8852_v28, %v8763_v24 }
 0x29a   : > { %v4517_v20 = vmax.f32 %v4515_v5, %v4516_v59  ;;  %v3524_v55 = vmax.f32 %v3492_v35, 0.0  ;;  %v3490_v31 = vadd.f32 %v9013_v40, %v3451_v45  ;;  %v3454_v0 = vmul.f32 %v9056_v33, %v6880_v47  ;;  %v9083_v5 = vpop.f32.mrb[24].mxu0 }
 0x29b   : > { %v4505_v56 = vmax.f32 %v4503_v23, %v4504_v50  ;;  %v4511_v17 = vrot.slane %v4510_v41, 1  ;;  %v4524_v42 = vmax.f32 %v4522_v53, %v4523_v9  ;;  %v9071_v4 = vmul.f32 %v9056_v33, %v6881_v36 }
 0x29c   : > { %v4518_v8 = vrot.slane %v4517_v20, 1  ;;  %v3812_v48 = vcombine.high %v3524_v55, %v3524_v55  ;;  %v3819_v61 = vrot.slane %v3524_v55, %v8778_v21  ;;  %v3522_v1 = vmax.f32 %v3490_v31, 0.0 }
 0x29d   : > { %v4512_v29 = vmax.f32 %v4510_v41, %v4511_v17  ;;  %v4525_v26 = vrot.slane %v4524_v42, 1  ;;  %v5203_v24 = vsel %vm891_vm3, %v4505_v56, -inf  ;;  %v9076_v28 = vadd.f32 %v9013_v40, %v3454_v0 }
 0x29e   : > { %v4519_v46 = vmax.f32 %v4517_v20, %v4518_v8  ;;  %v5205_v62 = vmax.f32 %v5203_v24, %v5204_v34  ;;  %v3826_v44 = vrot.slane %v3812_v48, %v8778_v21  ;;  %v3827_v54 = vcombine.high %v3819_v61, %v3819_v61 }
 0x29f   : > { %v4526_v2 = vmax.f32 %v4524_v42, %v4525_v26  ;;  %v5206_v11 = vsel %vm891_vm3, %v4512_v29, -inf  ;;  %v4639_v38 = vsel %vm4246_vm10, %v3819_v61, -inf  ;;  %v3778_v30 = vcombine.high %v3522_v1, %v3522_v1 }
 0x2a0   : > { %v5208_v27 = vmax.f32 %v5206_v11, %v5207_v10  ;;  %v5209_v13 = vsel %vm891_vm3, %v4519_v46, -inf  ;;  %v6274_v23 = vpack.c.bf16 %v5205_v62, %v5205_v62  ;;  %v3828_v52 = vcombine.high %v3826_v44, %v3826_v44 }
 0x2a1   : > { %v5211_v53 = vmax.f32 %v5209_v13, %v5210_v3  ;;  %v5212_v34 = vsel %vm891_vm3, %v4526_v2, -inf  ;;  %v4640_v59 = vrot.slane %v4639_v38, 4  ;;  %v4646_v35 = vsel %vm4246_vm10, %v3827_v54, -inf }
 0x2a2   : > { %v5214_v45 = vmax.f32 %v5212_v34, %v5213_v25  ;;  %v6275_v47 = vpack.c.bf16 %v5208_v27, %v5208_v27  ;;  %v5659_v50 = vunpack.c.l.b16 %v6274_v23  ;;  %v4647_v41 = vrot.slane %v4646_v35, 4 }
 0x2a3   : > { %v6276_v9 = vpack.c.bf16 %v5211_v53, %v5211_v53  ;;  %v4641_v36 = vmax.f32 %v4639_v38, %v4640_v59  ;;  %v4653_v20 = vsel %vm4246_vm10, %v3826_v44, -inf  ;;  %v4660_v10 = vsel %vm4246_vm10, %v3828_v52, -inf }
 0x2a4   : > { %v6277_v55 = vpack.c.bf16 %v5214_v45, %v5214_v45  ;;  %v5660_v31 = vunpack.c.l.b16 %v6275_v47  ;;  %v5724_v3 = vsel %vm5709_vm1, %v5659_v50, %v9039_v39  ;;  %v4648_v0 = vmax.f32 %v4646_v35, %v4647_v41 }
 0x2a5   : > { %v5661_v56 = vunpack.c.l.b16 %v6276_v9  ;;  %v4642_v17 = vrot.slane %v4641_v36, 2  ;;  %v4654_v42 = vrot.slane %v4653_v20, 4  ;;  %v4661_v25 = vrot.slane %v4660_v10, 4  ;;  %v9104_v9 = vpop.f32.mrb[25].mxu1 }
 0x2a6   : > { %v5662_v8 = vunpack.c.l.b16 %v6277_v55  ;;  %v5725_v48 = vsel %vm5711_vm2, %v5660_v31, %v5724_v3  ;;  %v4649_v61 = vrot.slane %v4648_v0, 2  ;;  %v3785_v29 = vrot.slane %v3522_v1, %v8778_v21 }
 0x2a7   : > { %v5761_v26 = vpack.c.b16 %v5725_v48, %v5725_v48  ;;  %v4643_v24 = vmax.f32 %v4641_v36, %v4642_v17  ;;  %v4655_v46 = vmax.f32 %v4653_v20, %v4654_v42  ;;  %v4662_v62 = vmax.f32 %v4660_v10, %v4661_v25  ;;  %v9106_v36 = vpop.f32.mrb[25].mxu0 }
 0x2a8   : > { %v5726_v44 = vsel %vm5713_vm4, %v5662_v8, %v5661_v56  ;;  %v4650_v39 = vmax.f32 %v4648_v0, %v4649_v61  ;;  %v3792_v54 = vrot.slane %v3778_v30, %v8778_v21  ;;  %v3793_v2 = vcombine.high %v3785_v29, %v3785_v29 }
 0x2a9   : > { %v5762_v11 = vpack.c.b16 %v5726_v44, %v5726_v44  ;;  %6240 = vst.msk [vmem:[%s8696_s8 + $0x20] sm:$0xe] %vm5790_vm5, %v5761_v26  ;;  %v4644_v38 = vrot.slane %v4643_v24, 1  ;;  %v4656_v27 = vrot.slane %v4655_v46, 2  ;;  %v4663_v13 = vrot.slane %v4662_v62, 2 }
 0x2aa   : > { %v4651_v23 = vrot.slane %v4650_v39, 1  ;;  %v3794_v52 = vcombine.high %v3792_v54, %v3792_v54  ;;  %v4583_v1 = vsel %vm4246_vm10, %v3785_v29, -inf  ;;  %v4590_v53 = vsel %vm4246_vm10, %v3793_v2, -inf }
 0x2ab   : > { %6241 = vst.msk [vmem:[%s8696_s8 + $0x24] sm:$0x1] %vm5792_vm6, %v5762_v11  ;;  %v4645_v34 = vmax.f32 %v4643_v24, %v4644_v38  ;;  %v4657_v59 = vmax.f32 %v4655_v46, %v4656_v27  ;;  %v4664_v35 = vmax.f32 %v4662_v62, %v4663_v13  ;;  %v4584_v45 = vrot.slane %v4583_v1, 4  ;;  %v5424_v46 = vld [vmem:[%s8696_s8 + $0x2c] sm:$0x3] }
 0x2ac   : > { %v4652_v30 = vmax.f32 %v4650_v39, %v4651_v23  ;;  %v4591_v47 = vrot.slane %v4590_v53, 4  ;;  %v4597_v50 = vsel %vm4246_vm10, %v3792_v54, -inf  ;;  %v4604_v41 = vsel %vm4246_vm10, %v3794_v52, -inf }
 0x2ad   : > { %v4658_v20 = vrot.slane %v4657_v59, 1  ;;  %v4665_v10 = vrot.slane %v4664_v35, 1  ;;  %v5216_v55 = vsel %vm891_vm3, %v4645_v34, -inf  ;;  %v4585_v31 = vmax.f32 %v4583_v1, %v4584_v45 }
 0x2ae   : > { %v5219_v3 = vsel %vm891_vm3, %v4652_v30, -inf  ;;  %v4592_v0 = vmax.f32 %v4590_v53, %v4591_v47  ;;  %v4598_v56 = vrot.slane %v4597_v50, 4  ;;  %v4605_v17 = vrot.slane %v4604_v41, 4  ;;  %v9123_v47 = vpop.f32.mrb[26].mxu1 }
 0x2af   : > { %v4659_v42 = vmax.f32 %v4657_v59, %v4658_v20  ;;  %v4666_v25 = vmax.f32 %v4664_v35, %v4665_v10  ;;  %v4586_v8 = vrot.slane %v4585_v31, 2  ;;  %v3525_v48 = vmax.f32 %v9076_v28, 0.0 }
 0x2b0   : > { %v4593_v61 = vrot.slane %v4592_v0, 2  ;;  %v4599_v29 = vmax.f32 %v4597_v50, %v4598_v56  ;;  %v4606_v26 = vmax.f32 %v4604_v41, %v4605_v17  ;;  %v3491_v24 = vadd.f32 %v9013_v40, %v9071_v4  ;;  %v9125_v50 = vpop.f32.mrb[26].mxu0 }
 0x2b1   : > { %v5222_v62 = vsel %vm891_vm3, %v4659_v42, -inf  ;;  %v5225_v44 = vsel %vm891_vm3, %v4666_v25, -inf  ;;  %v4587_v39 = vmax.f32 %v4585_v31, %v4586_v8  ;;  %v3829_v54 = vcombine.high %v3525_v48, %v3525_v48 }
 0x2b2   : > { %v4594_v2 = vmax.f32 %v4592_v0, %v4593_v61  ;;  %v4600_v11 = vrot.slane %v4599_v29, 2  ;;  %v4607_v38 = vrot.slane %v4606_v26, 2  ;;  %v3836_v27 = vrot.slane %v3525_v48, %v8778_v21 }
 0x2b3   : > { %v4588_v28 = vrot.slane %v4587_v39, 1  ;;  %v3843_v13 = vrot.slane %v3829_v54, %v8778_v21  ;;  %v3523_v23 = vmax.f32 %v3491_v24, 0.0  ;;  %v5425_v4 = vsel %vm8702_vm13, 0, %v5424_v46 }
 0x2b4   : > { %v4595_v52 = vrot.slane %v4594_v2, 1  ;;  %v4601_v1 = vmax.f32 %v4599_v29, %v4600_v11  ;;  %v4608_v53 = vmax.f32 %v4606_v26, %v4607_v38  ;;  %v3844_v34 = vcombine.high %v3836_v27, %v3836_v27  ;;  %5426 = vst [vmem:[%s8696_s8 + $0x2c] sm:$0x3] %v5425_v4 }
 0x2b5   : > { %v4589_v59 = vmax.f32 %v4587_v39, %v4588_v28  ;;  %v3845_v35 = vcombine.high %v3843_v13, %v3843_v13  ;;  %v4667_v45 = vsel %vm4246_vm10, %v3836_v27, -inf  ;;  %v4681_v30 = vsel %vm4246_vm10, %v3843_v13, -inf }
 0x2b6   : > { %v4596_v41 = vmax.f32 %v4594_v2, %v4595_v52  ;;  %v4602_v20 = vrot.slane %v4601_v1, 1  ;;  %v4609_v10 = vrot.slane %v4608_v53, 1  ;;  %v4668_v31 = vrot.slane %v4667_v45, 4 }
 0x2b7   : > { %v5215_v0 = vsel %vm891_vm3, %v4589_v59, -inf  ;;  %v4674_v56 = vsel %vm4246_vm10, %v3844_v34, -inf  ;;  %v4682_v17 = vrot.slane %v4681_v30, 4  ;;  %v4688_v42 = vsel %vm4246_vm10, %v3845_v35, -inf }
 0x2b8   : > { %v4603_v25 = vmax.f32 %v4601_v1, %v4602_v20  ;;  %v4610_v8 = vmax.f32 %v4608_v53, %v4609_v10  ;;  %v5217_v48 = vmax.f32 %v5215_v0, %v5216_v55  ;;  %v5218_v61 = vsel %vm891_vm3, %v4596_v41, -inf  ;;  %v9136_v0 = vpop.f32.mrb[27].mxu0 }
 0x2b9   : > { %v5220_v29 = vmax.f32 %v5218_v61, %v5219_v3  ;;  %v4669_v26 = vmax.f32 %v4667_v45, %v4668_v31  ;;  %v4675_v24 = vrot.slane %v4674_v56, 4  ;;  %v4683_v46 = vmax.f32 %v4681_v30, %v4682_v17 }
 0x2ba   : > { %v5221_v39 = vsel %vm891_vm3, %v4603_v25, -inf  ;;  %v5224_v54 = vsel %vm891_vm3, %v4610_v8, -inf  ;;  %v6278_v2 = vpack.c.bf16 %v5217_v48, %v5217_v48  ;;  %v4689_v11 = vrot.slane %v4688_v42, 4 }
 0x2bb   : > { %v5223_v38 = vmax.f32 %v5221_v39, %v5222_v62  ;;  %v5226_v27 = vmax.f32 %v5224_v54, %v5225_v44  ;;  %v6279_v28 = vpack.c.bf16 %v5220_v29, %v5220_v29  ;;  %v4670_v13 = vrot.slane %v4669_v26, 2  ;;  %v9134_v44 = vpop.f32.mrb[27].mxu1 }
 0x2bc   : > { %v5663_v4 = vunpack.c.l.b16 %v6278_v2  ;;  %v4676_v52 = vmax.f32 %v4674_v56, %v4675_v24  ;;  %v4684_v1 = vrot.slane %v4683_v46, 2  ;;  %v4690_v55 = vmax.f32 %v4688_v42, %v4689_v11 }
 0x2bd   : > { %v6280_v53 = vpack.c.bf16 %v5223_v38, %v5223_v38  ;;  %v6281_v34 = vpack.c.bf16 %v5226_v27, %v5226_v27  ;;  %v5664_v3 = vunpack.c.l.b16 %v6279_v28  ;;  %v4671_v59 = vmax.f32 %v4669_v26, %v4670_v13 }
 0x2be   : > { %v4677_v35 = vrot.slane %v4676_v52, 2  ;;  %v4685_v45 = vmax.f32 %v4683_v46, %v4684_v1  ;;  %v4691_v30 = vrot.slane %v4690_v55, 2  ;;  %v3795_v41 = vcombine.high %v3523_v23, %v3523_v23 }
 0x2bf   : > { %v5665_v20 = vunpack.c.l.b16 %v6280_v53  ;;  %v5666_v10 = vunpack.c.l.b16 %v6281_v34  ;;  %v5727_v31 = vsel %vm5703_vm14, %v5664_v3, %v5663_v4  ;;  %v4672_v62 = vrot.slane %v4671_v59, 1 }
 0x2c0   : > { %v4678_v56 = vmax.f32 %v4676_v52, %v4677_v35  ;;  %v4686_v17 = vrot.slane %v4685_v45, 1  ;;  %v4692_v42 = vmax.f32 %v4690_v55, %v4691_v30  ;;  %v3802_v25 = vrot.slane %v3523_v23, %v8778_v21 }
 0x2c1   : > { %v5728_v8 = vsel %vm5705_vm15, %v5665_v20, %v5727_v31  ;;  %v4673_v48 = vmax.f32 %v4671_v59, %v4672_v62  ;;  %v3809_v61 = vrot.slane %v3795_v41, %v8778_v21  ;;  %v6882_v29 = vadd.f32 %v8885_v49, %v8883_v63 }
 0x2c2   : > { %v4679_v26 = vrot.slane %v4678_v56, 1  ;;  %v4687_v24 = vmax.f32 %v4685_v45, %v4686_v17  ;;  %v4693_v46 = vrot.slane %v4692_v42, 1  ;;  %v3810_v39 = vcombine.high %v3802_v25, %v3802_v25 }
 0x2c3   : > { %v5228_v54 = vsel %vm891_vm3, %v4673_v48, -inf  ;;  %v3811_v2 = vcombine.high %v3809_v61, %v3809_v61  ;;  %v4611_v11 = vsel %vm4246_vm10, %v3802_v25, -inf  ;;  %v4625_v38 = vsel %vm4246_vm10, %v3809_v61, -inf }
 0x2c4   : > { %v4680_v23 = vmax.f32 %v4678_v56, %v4679_v26  ;;  %v4694_v27 = vmax.f32 %v4692_v42, %v4693_v46  ;;  %v5234_v28 = vsel %vm891_vm3, %v4687_v24, -inf  ;;  %v4612_v13 = vrot.slane %v4611_v11, 4 }
 0x2c5   : > { %v4618_v4 = vsel %vm4246_vm10, %v3810_v39, -inf  ;;  %v4626_v52 = vrot.slane %v4625_v38, 4  ;;  %v4632_v63 = vsel %vm4246_vm10, %v3811_v2, -inf  ;;  %v9150_v49 = vsel %vm5707_vm0, %v5666_v10, %v5728_v8 }
 0x2c6   : > { %v5231_v1 = vsel %vm891_vm3, %v4680_v23, -inf  ;;  %v5237_v55 = vsel %vm891_vm3, %v4694_v27, -inf  ;;  %v4613_v53 = vmax.f32 %v4611_v11, %v4612_v13  ;;  %v4619_v34 = vrot.slane %v4618_v4, 4 }
 0x2c7   : > { %v4627_v3 = vmax.f32 %v4625_v38, %v4626_v52  ;;  %v4633_v59 = vrot.slane %v4632_v63, 4  ;;  %v3457_v35 = vmul.f32 %v9056_v33, %v6882_v29  ;;  %v6883_v45 = vadd.f32 %v8906_v51, %v8904_v16 }
 0x2c8   : > { %v4614_v30 = vrot.slane %v4613_v53, 2  ;;  %v4620_v41 = vmax.f32 %v4618_v4, %v4619_v34  ;;  %v6884_v20 = vadd.f32 %v8926_v43, %v8924_v18  ;;  %v6885_v10 = vadd.f32 %v8945_v12, %v8943_v6 }
 0x2c9   : > { %v4628_v31 = vrot.slane %v4627_v3, 2  ;;  %v4634_v62 = vmax.f32 %v4632_v63, %v4633_v59  ;;  %v3496_v56 = vadd.f32 %v9013_v40, %v3457_v35  ;;  %v3455_v17 = vmul.f32 %v9056_v33, %v6883_v45 }
 0x2ca   : > { %v4615_v42 = vmax.f32 %v4613_v53, %v4614_v30  ;;  %v4621_v25 = vrot.slane %v4620_v41, 2  ;;  %v3458_v8 = vmul.f32 %v9056_v33, %v6884_v20  ;;  %v3456_v16 = vmul.f32 %v9056_v33, %v6885_v10 }
 0x2cb   : > { %v4629_v51 = vmax.f32 %v4627_v3, %v4628_v31  ;;  %v4635_v48 = vrot.slane %v4634_v62, 2  ;;  %v3528_v61 = vmax.f32 %v3496_v56, 0.0  ;;  %v3494_v18 = vadd.f32 %v9013_v40, %v3455_v17 }
 0x2cc   : > { %v4616_v43 = vrot.slane %v4615_v42, 1  ;;  %v4622_v29 = vmax.f32 %v4620_v41, %v4621_v25  ;;  %v3497_v6 = vadd.f32 %v9013_v40, %v3458_v8  ;;  %v9168_v12 = vadd.f32 %v9013_v40, %v3456_v16  ;;  %v9180_v25 = vpop.f32.mrb[28].mxu1  ;;  %v9182_v8 = vpop.f32.mrb[28].mxu0 }
 0x2cd   : > { %v4630_v26 = vrot.slane %v4629_v51, 1  ;;  %v4636_v24 = vmax.f32 %v4634_v62, %v4635_v48  ;;  %v3880_v46 = vcombine.high %v3528_v61, %v3528_v61  ;;  %v3887_v39 = vrot.slane %v3528_v61, %v8778_v21 }
 0x2ce   : > { %v4617_v2 = vmax.f32 %v4615_v42, %v4616_v43  ;;  %v4623_v11 = vrot.slane %v4622_v29, 1  ;;  %v3526_v38 = vmax.f32 %v3494_v18, 0.0  ;;  %v9171_v23 = vmax.f32 %v3497_v6, 0.0 }
 0x2cf   : > { %v4631_v27 = vmax.f32 %v4629_v51, %v4630_v26  ;;  %v4637_v13 = vrot.slane %v4636_v24, 1  ;;  %v3894_v4 = vrot.slane %v3880_v46, %v8778_v21  ;;  %v3895_v52 = vcombine.high %v3887_v39, %v3887_v39 }
 0x2d0   : > { %v4624_v63 = vmax.f32 %v4622_v29, %v4623_v11  ;;  %v5227_v53 = vsel %vm891_vm3, %v4617_v2, -inf  ;;  %v4751_v34 = vsel %vm4246_vm10, %v3887_v39, -inf  ;;  %v3846_v3 = vcombine.high %v3526_v38, %v3526_v38 }
 0x2d1   : > { %v4638_v59 = vmax.f32 %v4636_v24, %v4637_v13  ;;  %v5229_v35 = vmax.f32 %v5227_v53, %v5228_v54  ;;  %v5233_v45 = vsel %vm891_vm3, %v4631_v27, -inf  ;;  %v3896_v30 = vcombine.high %v3894_v4, %v3894_v4 }
 0x2d2   : > { %v5230_v41 = vsel %vm891_vm3, %v4624_v63, -inf  ;;  %v5235_v20 = vmax.f32 %v5233_v45, %v5234_v28  ;;  %v4752_v10 = vrot.slane %v4751_v34, 4  ;;  %v4758_v31 = vsel %vm4246_vm10, %v3895_v52, -inf  ;;  %v9192_v45 = vpop.f32.mrb[29].mxu1 }
 0x2d3   : > { %v5232_v62 = vmax.f32 %v5230_v41, %v5231_v1  ;;  %v5236_v56 = vsel %vm891_vm3, %v4638_v59, -inf  ;;  %v6282_v17 = vpack.c.bf16 %v5229_v35, %v5229_v35  ;;  %v4759_v42 = vrot.slane %v4758_v31, 4 }
 0x2d4   : > { %v5238_v16 = vmax.f32 %v5236_v56, %v5237_v55  ;;  %v6284_v54 = vpack.c.bf16 %v5235_v20, %v5235_v20  ;;  %v4753_v51 = vmax.f32 %v4751_v34, %v4752_v10  ;;  %v4765_v48 = vsel %vm4246_vm10, %v3894_v4, -inf }
 0x2d5   : > { %v6283_v61 = vpack.c.bf16 %v5232_v62, %v5232_v62  ;;  %v5667_v18 = vunpack.c.l.b16 %v6282_v17  ;;  %v4760_v28 = vmax.f32 %v4758_v31, %v4759_v42  ;;  %v4766_v43 = vrot.slane %v4765_v48, 4 }
 0x2d6   : > { %v6285_v29 = vpack.c.bf16 %v5238_v16, %v5238_v16  ;;  %v5669_v6 = vunpack.c.l.b16 %v6284_v54  ;;  %v4754_v1 = vrot.slane %v4753_v51, 2  ;;  %v4772_v26 = vsel %vm4246_vm10, %v3896_v30, -inf  ;;  %v9194_v30 = vpop.f32.mrb[29].mxu0 }
 0x2d7   : > { %v5668_v24 = vunpack.c.l.b16 %v6283_v61  ;;  %v5730_v46 = vsel %vm5709_vm1, %v5667_v18, %v9150_v49  ;;  %v4761_v39 = vrot.slane %v4760_v28, 2  ;;  %v4767_v2 = vmax.f32 %v4765_v48, %v4766_v43 }
 0x2d8   : > { %v5670_v55 = vunpack.c.l.b16 %v6285_v29  ;;  %v4755_v11 = vmax.f32 %v4753_v51, %v4754_v1  ;;  %v4773_v27 = vrot.slane %v4772_v26, 4  ;;  %v3853_v13 = vrot.slane %v3526_v38, %v8778_v21 }
 0x2d9   : > { %v5731_v4 = vsel %vm5711_vm2, %v5668_v24, %v5730_v46  ;;  %v4762_v52 = vmax.f32 %v4760_v28, %v4761_v39  ;;  %v4768_v63 = vrot.slane %v4767_v2, 2  ;;  %v3860_v53 = vrot.slane %v3846_v3, %v8778_v21 }
 0x2da   : > { %v5732_v34 = vsel %vm5713_vm4, %v5670_v55, %v5669_v6  ;;  %v5763_v59 = vpack.c.b16 %v5731_v4, %v5731_v4  ;;  %v4756_v35 = vrot.slane %v4755_v11, 1  ;;  %v4774_v49 = vmax.f32 %v4772_v26, %v4773_v27 }
 0x2db   : > { %v5764_v41 = vpack.c.b16 %v5732_v34, %v5732_v34  ;;  %v4763_v20 = vrot.slane %v4762_v52, 1  ;;  %v4769_v10 = vmax.f32 %v4767_v2, %v4768_v63  ;;  %v3861_v38 = vcombine.high %v3853_v13, %v3853_v13 }
 0x2dc   : > { %6242 = vst.msk [vmem:[%s8696_s8 + $0x28] sm:$0xe] %vm5790_vm5, %v5763_v59  ;;  %v4757_v31 = vmax.f32 %v4755_v11, %v4756_v35  ;;  %v4775_v62 = vrot.slane %v4774_v49, 2  ;;  %v3862_v56 = vcombine.high %v3860_v53, %v3860_v53  ;;  %v4695_v3 = vsel %vm4246_vm10, %v3853_v13, -inf }
 0x2dd   : > { %6243 = vst.msk [vmem:[%s8696_s8 + $0x2c] sm:$0x1] %vm5792_vm6, %v5764_v41  ;;  %v4764_v17 = vmax.f32 %v4762_v52, %v4763_v20  ;;  %v4770_v42 = vrot.slane %v4769_v10, 1  ;;  %v4696_v16 = vrot.slane %v4695_v3, 4  ;;  %v4702_v54 = vsel %vm4246_vm10, %v3861_v38, -inf }
 0x2de   : > { %v4776_v51 = vmax.f32 %v4774_v49, %v4775_v62  ;;  %v5240_v48 = vsel %vm891_vm3, %v4757_v31, -inf  ;;  %v4703_v61 = vrot.slane %v4702_v54, 4  ;;  %v4709_v18 = vsel %vm4246_vm10, %v3860_v53, -inf }
 0x2df   : > { %v4771_v28 = vmax.f32 %v4769_v10, %v4770_v42  ;;  %v5243_v43 = vsel %vm891_vm3, %v4764_v17, -inf  ;;  %v4697_v29 = vmax.f32 %v4695_v3, %v4696_v16  ;;  %v4710_v6 = vrot.slane %v4709_v18, 4 }
 0x2e0   : > { %v4777_v1 = vrot.slane %v4776_v51, 1  ;;  %v4704_v26 = vmax.f32 %v4702_v54, %v4703_v61  ;;  %v4716_v24 = vsel %vm4246_vm10, %v3862_v56, -inf  ;;  %v3897_v46 = vcombine.high %v9171_v23, %v9171_v23 }
 0x2e1   : > { %v5246_v39 = vsel %vm891_vm3, %v4771_v28, -inf  ;;  %v4698_v2 = vrot.slane %v4697_v29, 2  ;;  %v4711_v55 = vmax.f32 %v4709_v18, %v4710_v6  ;;  %v4717_v11 = vrot.slane %v4716_v24, 4  ;;  %v9222_v6 = vpop.f32.mrb[30].mxu0 }
 0x2e2   : > { %v4778_v27 = vmax.f32 %v4776_v51, %v4777_v1  ;;  %v4705_v13 = vrot.slane %v4704_v26, 2  ;;  %v3904_v4 = vrot.slane %v9171_v23, %v8778_v21  ;;  %v3911_v52 = vrot.slane %v3897_v46, %v8778_v21 }
 0x2e3   : > { %v4699_v63 = vmax.f32 %v4697_v29, %v4698_v2  ;;  %v4712_v53 = vrot.slane %v4711_v55, 2  ;;  %v4718_v34 = vmax.f32 %v4716_v24, %v4717_v11  ;;  %v9213_v59 = vmax.f32 %v9168_v12, 0.0  ;;  %v9220_v29 = vpop.f32.mrb[30].mxu1 }
 0x2e4   : > { %v5249_v35 = vsel %vm891_vm3, %v4778_v27, -inf  ;;  %v4706_v49 = vmax.f32 %v4704_v26, %v4705_v13  ;;  %v3912_v41 = vcombine.high %v3904_v4, %v3904_v4  ;;  %v3913_v20 = vcombine.high %v3911_v52, %v3911_v52 }
 0x2e5   : > { %v4700_v10 = vrot.slane %v4699_v63, 1  ;;  %v4713_v38 = vmax.f32 %v4711_v55, %v4712_v53  ;;  %v4719_v31 = vrot.slane %v4718_v34, 2  ;;  %v4779_v62 = vsel %vm4246_vm10, %v3904_v4, -inf }
 0x2e6   : > { %v4707_v56 = vrot.slane %v4706_v49, 1  ;;  %v4780_v23 = vrot.slane %v4779_v62, 4  ;;  %v4786_v3 = vsel %vm4246_vm10, %v3912_v41, -inf  ;;  %v4793_v17 = vsel %vm4246_vm10, %v3911_v52, -inf }
 0x2e7   : > { %v4701_v42 = vmax.f32 %v4699_v63, %v4700_v10  ;;  %v4714_v16 = vrot.slane %v4713_v38, 1  ;;  %v4720_v12 = vmax.f32 %v4718_v34, %v4719_v31  ;;  %v4787_v54 = vrot.slane %v4786_v3, 4 }
 0x2e8   : > { %v4708_v51 = vmax.f32 %v4706_v49, %v4707_v56  ;;  %v4781_v61 = vmax.f32 %v4779_v62, %v4780_v23  ;;  %v4794_v18 = vrot.slane %v4793_v17, 4  ;;  %v4800_v28 = vsel %vm4246_vm10, %v3913_v20, -inf }
 0x2e9   : > { %v4715_v1 = vmax.f32 %v4713_v38, %v4714_v16  ;;  %v4721_v26 = vrot.slane %v4720_v12, 1  ;;  %v5239_v24 = vsel %vm891_vm3, %v4701_v42, -inf  ;;  %v4788_v46 = vmax.f32 %v4786_v3, %v4787_v54  ;;  %v9228_v3 = vpop.f32.mrb[31].mxu1 }
 0x2ea   : > { %v5241_v2 = vmax.f32 %v5239_v24, %v5240_v48  ;;  %v5242_v55 = vsel %vm891_vm3, %v4708_v51, -inf  ;;  %v4782_v11 = vrot.slane %v4781_v61, 2  ;;  %v4795_v27 = vmax.f32 %v4793_v17, %v4794_v18  ;;  %v5428_v24 = vld [vmem:[%s8696_s8 + $0x34] sm:$0x3] }
 0x2eb   : > { %v4722_v13 = vmax.f32 %v4720_v12, %v4721_v26  ;;  %v5244_v4 = vmax.f32 %v5242_v55, %v5243_v43  ;;  %v5245_v52 = vsel %vm891_vm3, %v4715_v1, -inf  ;;  %v4789_v63 = vrot.slane %v4788_v46, 2  ;;  %v9230_v43 = vpop.f32.mrb[31].mxu0 }
 0x2ec   : > { %v5247_v53 = vmax.f32 %v5245_v52, %v5246_v39  ;;  %v6286_v34 = vpack.c.bf16 %v5241_v2, %v5241_v2  ;;  %v4783_v49 = vmax.f32 %v4781_v61, %v4782_v11  ;;  %v4796_v41 = vrot.slane %v4795_v27, 2 }
 0x2ed   : > { %v5248_v20 = vsel %vm891_vm3, %v4722_v13, -inf  ;;  %v6287_v10 = vpack.c.bf16 %v5244_v4, %v5244_v4  ;;  %v4790_v38 = vmax.f32 %v4788_v46, %v4789_v63  ;;  %v4801_v31 = vrot.slane %v4800_v28, 4 }
 0x2ee   : > { %v5250_v62 = vmax.f32 %v5248_v20, %v5249_v35  ;;  %v6288_v48 = vpack.c.bf16 %v5247_v53, %v5247_v53  ;;  %v5671_v56 = vunpack.c.l.b16 %v6286_v34  ;;  %v4784_v23 = vrot.slane %v4783_v49, 1 }
 0x2ef   : > { %v5672_v17 = vunpack.c.l.b16 %v6287_v10  ;;  %v4791_v42 = vrot.slane %v4790_v38, 1  ;;  %v4797_v39 = vmax.f32 %v4795_v27, %v4796_v41  ;;  %v4802_v16 = vmax.f32 %v4800_v28, %v4801_v31 }
 0x2f0   : > { %v6289_v12 = vpack.c.bf16 %v5250_v62, %v5250_v62  ;;  %v5673_v54 = vunpack.c.l.b16 %v6288_v48  ;;  %v4785_v51 = vmax.f32 %v4783_v49, %v4784_v23  ;;  %v3863_v61 = vcombine.high %v9213_v59, %v9213_v59 }
 0x2f1   : > { %v5733_v35 = vsel %vm5703_vm14, %v5672_v17, %v5671_v56  ;;  %v4792_v18 = vmax.f32 %v4790_v38, %v4791_v42  ;;  %v4798_v1 = vrot.slane %v4797_v39, 1  ;;  %v4803_v26 = vrot.slane %v4802_v16, 2 }
 0x2f2   : > { %v5674_v46 = vunpack.c.l.b16 %v6289_v12  ;;  %v5734_v2 = vsel %vm5705_vm15, %v5673_v54, %v5733_v35  ;;  %v9238_v55 = vsel %vm891_vm3, %v4785_v51, -inf  ;;  %v3870_v28 = vrot.slane %v9213_v59, %v8778_v21 }
 0x2f3   : > { %v4799_v11 = vmax.f32 %v4797_v39, %v4798_v1  ;;  %v4804_v27 = vmax.f32 %v4802_v16, %v4803_v26  ;;  %v9243_v13 = vsel %vm891_vm3, %v4792_v18, -inf  ;;  %v3877_v4 = vrot.slane %v3863_v61, %v8778_v21 }
 0x2f4   : > { %v3878_v52 = vcombine.high %v3870_v28, %v3870_v28  ;;  %v4723_v63 = vsel %vm4246_vm10, %v3870_v28, -inf  ;;  %v5429_v53 = vsel %vm8702_vm13, 0, %v5428_v24  ;;  %v9250_v34 = vsel %vm5707_vm0, %v5674_v46, %v5734_v2  ;;  %v9276_v2 = vld [vmem:[%s9529_s3] ss:$0 sm:$0xff] }
 0x2f5   : > { %v4805_v49 = vrot.slane %v4804_v27, 1  ;;  %v9253_v41 = vsel %vm891_vm3, %v4799_v11, -inf  ;;  %v3879_v59 = vcombine.high %v3877_v4, %v3877_v4  ;;  %v4724_v20 = vrot.slane %v4723_v63, 4  ;;  %5430 = vst [vmem:[%s8696_s8 + $0x34] sm:$0x3] %v5429_v53 }
 0x2f6   : > { %v4730_v10 = vsel %vm4246_vm10, %v3878_v52, -inf  ;;  %v4737_v38 = vsel %vm4246_vm10, %v3877_v4, -inf  ;;  %v6886_v31 = vadd.f32 %v8980_v58, %v8978_v19  ;;  %v6887_v62 = vadd.f32 %v9001_v32, %v8999_v22 }
 0x2f7   : > { %v4806_v48 = vmax.f32 %v4804_v27, %v4805_v49  ;;  %v4725_v56 = vmax.f32 %v4723_v63, %v4724_v20  ;;  %v4731_v23 = vrot.slane %v4730_v10, 4  ;;  %v4738_v17 = vrot.slane %v4737_v38, 4 }
 0x2f8   : > { %v4744_v42 = vsel %vm4246_vm10, %v3879_v59, -inf  ;;  %v3461_v39 = vmul.f32 %v9056_v33, %v6886_v31  ;;  %v3459_v16 = vmul.f32 %v9056_v33, %v6887_v62  ;;  %v6888_v12 = vadd.f32 %v9019_v37, %v9017_v15 }
 0x2f9   : > { %v5261_v54 = vsel %vm891_vm3, %v4806_v48, -inf  ;;  %v4726_v51 = vrot.slane %v4725_v56, 2  ;;  %v4732_v19 = vmax.f32 %v4730_v10, %v4731_v23  ;;  %v4739_v58 = vmax.f32 %v4737_v38, %v4738_v17 }
 0x2fa   : > { %v4745_v61 = vrot.slane %v4744_v42, 4  ;;  %v3500_v22 = vadd.f32 %v9013_v40, %v3461_v39  ;;  %v3498_v32 = vadd.f32 %v9013_v40, %v3459_v16  ;;  %v3462_v35 = vmul.f32 %v9056_v33, %v6888_v12 }
 0x2fb   : > { %v4727_v18 = vmax.f32 %v4725_v56, %v4726_v51  ;;  %v4733_v1 = vrot.slane %v4732_v19, 2  ;;  %v4740_v26 = vrot.slane %v4739_v58, 2  ;;  %v6889_v24 = vadd.f32 %v9043_v7, %v9041_v14 }
 0x2fc   : > { %v4746_v46 = vmax.f32 %v4744_v42, %v4745_v61  ;;  %v3532_v15 = vmax.f32 %v3500_v22, 0.0  ;;  %v3530_v37 = vmax.f32 %v3498_v32, 0.0  ;;  %v9279_v28 = vadd.f32 %v9276_v2, %v3462_v35 }
 0x2fd   : > { %v4728_v40 = vrot.slane %v4727_v18, 1  ;;  %v4734_v11 = vmax.f32 %v4732_v19, %v4733_v1  ;;  %v4741_v27 = vmax.f32 %v4739_v58, %v4740_v26  ;;  %v9282_v4 = vmul.f32 %v9056_v33, %v6889_v24 }
 0x2fe   : > { %v4747_v52 = vrot.slane %v4746_v46, 2  ;;  %v3948_v63 = vcombine.high %v3532_v15, %v3532_v15  ;;  %v3955_v14 = vrot.slane %v3532_v15, %v8778_v21  ;;  %v3914_v7 = vcombine.high %v3530_v37, %v3530_v37 }
 0x2ff   : > { %v4729_v53 = vmax.f32 %v4727_v18, %v4728_v40  ;;  %v4735_v49 = vrot.slane %v4734_v11, 1  ;;  %v4742_v59 = vrot.slane %v4741_v27, 1  ;;  %v3921_v20 = vrot.slane %v3530_v37, %v8778_v21 }
 0x300   : > { %v4748_v10 = vmax.f32 %v4746_v46, %v4747_v52  ;;  %v3962_v38 = vrot.slane %v3948_v63, %v8778_v21  ;;  %v3963_v31 = vcombine.high %v3955_v14, %v3955_v14  ;;  %v4863_v62 = vsel %vm4246_vm10, %v3955_v14, -inf }
 0x301   : > { %v4736_v48 = vmax.f32 %v4734_v11, %v4735_v49  ;;  %v4743_v56 = vmax.f32 %v4741_v27, %v4742_v59  ;;  %v5251_v33 = vsel %vm891_vm3, %v4729_v53, -inf  ;;  %v4864_v23 = vrot.slane %v4863_v62, 4 }
 0x302   : > { %v4749_v17 = vrot.slane %v4748_v10, 1  ;;  %v5253_v42 = vmax.f32 %v5251_v33, %v9238_v55  ;;  %v3964_v39 = vcombine.high %v3962_v38, %v3962_v38  ;;  %v4870_v16 = vsel %vm4246_vm10, %v3963_v31, -inf }
 0x303   : > { %v5254_v12 = vsel %vm891_vm3, %v4736_v48, -inf  ;;  %v5257_v51 = vsel %vm891_vm3, %v4743_v56, -inf  ;;  %v4865_v19 = vmax.f32 %v4863_v62, %v4864_v23  ;;  %v4871_v58 = vrot.slane %v4870_v16, 4 }
 0x304   : > { %v4750_v61 = vmax.f32 %v4748_v10, %v4749_v17  ;;  %v5256_v22 = vmax.f32 %v5254_v12, %v9243_v13  ;;  %v5259_v32 = vmax.f32 %v5257_v51, %v9253_v41  ;;  %v6290_v35 = vpack.c.bf16 %v5253_v42, %v5253_v42 }
 0x305   : > { %v4866_v18 = vrot.slane %v4865_v19, 2  ;;  %v4872_v1 = vmax.f32 %v4870_v16, %v4871_v58  ;;  %v4877_v26 = vsel %vm4246_vm10, %v3962_v38, -inf  ;;  %v4884_v55 = vsel %vm4246_vm10, %v3964_v39, -inf }
 0x306   : > { %v5260_v24 = vsel %vm891_vm3, %v4750_v61, -inf  ;;  %v6291_v46 = vpack.c.bf16 %v5256_v22, %v5256_v22  ;;  %v6292_v15 = vpack.c.bf16 %v5259_v32, %v5259_v32  ;;  %v5675_v37 = vunpack.c.l.b16 %v6290_v35 }
 0x307   : > { %v5262_v40 = vmax.f32 %v5260_v24, %v5261_v54  ;;  %v4867_v11 = vmax.f32 %v4865_v19, %v4866_v18  ;;  %v4873_v27 = vrot.slane %v4872_v1, 2  ;;  %v4878_v52 = vrot.slane %v4877_v26, 4 }
 0x308   : > { %v5676_v63 = vunpack.c.l.b16 %v6291_v46  ;;  %v5677_v13 = vunpack.c.l.b16 %v6292_v15  ;;  %v5736_v41 = vsel %vm5709_vm1, %v5675_v37, %v9250_v34  ;;  %v4885_v14 = vrot.slane %v4884_v55, 4 }
 0x309   : > { %v6293_v53 = vpack.c.bf16 %v5262_v40, %v5262_v40  ;;  %v4868_v49 = vrot.slane %v4867_v11, 1  ;;  %v4874_v59 = vmax.f32 %v4872_v1, %v4873_v27  ;;  %v4879_v10 = vmax.f32 %v4877_v26, %v4878_v52 }
 0x30a   : > { %v5737_v38 = vsel %vm5711_vm2, %v5676_v63, %v5736_v41  ;;  %v4886_v31 = vmax.f32 %v4884_v55, %v4885_v14  ;;  %v3928_v62 = vrot.slane %v3914_v7, %v8778_v21  ;;  %v3929_v54 = vcombine.high %v3921_v20, %v3921_v20 }
 0x30b   : > { %v5678_v48 = vunpack.c.l.b16 %v6293_v53  ;;  %v5765_v56 = vpack.c.b16 %v5737_v38, %v5737_v38  ;;  %v4869_v33 = vmax.f32 %v4867_v11, %v4868_v49  ;;  %v4875_v23 = vrot.slane %v4874_v59, 1 }
 0x30c   : > { %v4880_v17 = vrot.slane %v4879_v10, 2  ;;  %v4887_v42 = vrot.slane %v4886_v31, 2  ;;  %v3930_v34 = vcombine.high %v3928_v62, %v3928_v62  ;;  %v4807_v39 = vsel %vm4246_vm10, %v3921_v20, -inf }
 0x30d   : > { %v5738_v16 = vsel %vm5713_vm4, %v5678_v48, %v5677_v13  ;;  %6244 = vst.msk [vmem:[%s8696_s8 + $0x30] sm:$0xe] %vm5790_vm5, %v5765_v56  ;;  %v4876_v12 = vmax.f32 %v4874_v59, %v4875_v23  ;;  %v5264_v51 = vsel %vm891_vm3, %v4869_v33, -inf  ;;  %v4808_v19 = vrot.slane %v4807_v39, 4 }
 0x30e   : > { %v5766_v7 = vpack.c.b16 %v5738_v16, %v5738_v16  ;;  %v4881_v58 = vmax.f32 %v4879_v10, %v4880_v17  ;;  %v4888_v61 = vmax.f32 %v4886_v31, %v4887_v42  ;;  %v4814_v22 = vsel %vm4246_vm10, %v3929_v54, -inf }
 0x30f   : > { %v5267_v32 = vsel %vm891_vm3, %v4876_v12, -inf  ;;  %v4809_v35 = vmax.f32 %v4807_v39, %v4808_v19  ;;  %v4815_v18 = vrot.slane %v4814_v22, 4  ;;  %v4821_v1 = vsel %vm4246_vm10, %v3928_v62, -inf }
 0x310   : > { %6245 = vst.msk [vmem:[%s8696_s8 + $0x34] sm:$0x1] %vm5792_vm6, %v5766_v7  ;;  %v4882_v20 = vrot.slane %v4881_v58, 1  ;;  %v4889_v26 = vrot.slane %v4888_v61, 1  ;;  %v4822_v55 = vrot.slane %v4821_v1, 4  ;;  %v4828_v24 = vsel %vm4246_vm10, %v3930_v34, -inf }
 0x311   : > { %v4810_v46 = vrot.slane %v4809_v35, 2  ;;  %v4816_v15 = vmax.f32 %v4814_v22, %v4815_v18  ;;  %v4829_v37 = vrot.slane %v4828_v24, 4  ;;  %v3533_v40 = vmax.f32 %v9279_v28, 0.0 }
 0x312   : > { %v4883_v11 = vmax.f32 %v4881_v58, %v4882_v20  ;;  %v4890_v27 = vmax.f32 %v4888_v61, %v4889_v26  ;;  %v4823_v52 = vmax.f32 %v4821_v1, %v4822_v55  ;;  %v3499_v63 = vadd.f32 %v9276_v2, %v9282_v4 }
 0x313   : > { %v4811_v13 = vmax.f32 %v4809_v35, %v4810_v46  ;;  %v4817_v41 = vrot.slane %v4816_v15, 2  ;;  %v4830_v14 = vmax.f32 %v4828_v24, %v4829_v37  ;;  %v3965_v53 = vcombine.high %v3533_v40, %v3533_v40 }
 0x314   : > { %v5270_v49 = vsel %vm891_vm3, %v4883_v11, -inf  ;;  %v5273_v59 = vsel %vm891_vm3, %v4890_v27, -inf  ;;  %v4824_v10 = vrot.slane %v4823_v52, 2  ;;  %v3972_v38 = vrot.slane %v3533_v40, %v8778_v21 }
 0x315   : > { %v4812_v31 = vrot.slane %v4811_v13, 1  ;;  %v4818_v62 = vmax.f32 %v4816_v15, %v4817_v41  ;;  %v4831_v28 = vrot.slane %v4830_v14, 2  ;;  %v3979_v54 = vrot.slane %v3965_v53, %v8778_v21 }
 0x316   : > { %v4825_v48 = vmax.f32 %v4823_v52, %v4824_v10  ;;  %v3980_v56 = vcombine.high %v3972_v38, %v3972_v38  ;;  %v4891_v4 = vsel %vm4246_vm10, %v3972_v38, -inf  ;;  %v3531_v33 = vmax.f32 %v3499_v63, 0.0 }
 0x317   : > { %v4813_v23 = vmax.f32 %v4811_v13, %v4812_v31  ;;  %v4819_v17 = vrot.slane %v4818_v62, 1  ;;  %v4832_v42 = vmax.f32 %v4830_v14, %v4831_v28  ;;  %v3981_v34 = vcombine.high %v3979_v54, %v3979_v54 }
 0x318   : > { %v4826_v39 = vrot.slane %v4825_v48, 1  ;;  %v4892_v16 = vrot.slane %v4891_v4, 4  ;;  %v4898_v12 = vsel %vm4246_vm10, %v3980_v56, -inf  ;;  %v4905_v19 = vsel %vm4246_vm10, %v3979_v54, -inf }
 0x319   : > { %v4820_v7 = vmax.f32 %v4818_v62, %v4819_v17  ;;  %v4833_v58 = vrot.slane %v4832_v42, 1  ;;  %v5263_v61 = vsel %vm891_vm3, %v4813_v23, -inf  ;;  %v4899_v22 = vrot.slane %v4898_v12, 4 }
 0x31a   : > { %v4827_v35 = vmax.f32 %v4825_v48, %v4826_v39  ;;  %v5265_v18 = vmax.f32 %v5263_v61, %v5264_v51  ;;  %v4893_v1 = vmax.f32 %v4891_v4, %v4892_v16  ;;  %v4906_v20 = vrot.slane %v4905_v19, 4 }
 0x31b   : > { %v4834_v26 = vmax.f32 %v4832_v42, %v4833_v58  ;;  %v5266_v55 = vsel %vm891_vm3, %v4820_v7, -inf  ;;  %v4900_v24 = vmax.f32 %v4898_v12, %v4899_v22  ;;  %v4912_v46 = vsel %vm4246_vm10, %v3981_v34, -inf  ;;  %v5432_v7 = vld [vmem:[%s8696_s8 + $0x3c] sm:$0x3] }
 0x31c   : > { %v5268_v15 = vmax.f32 %v5266_v55, %v5267_v32  ;;  %v5269_v37 = vsel %vm891_vm3, %v4827_v35, -inf  ;;  %v6294_v40 = vpack.c.bf16 %v5265_v18, %v5265_v18  ;;  %v4894_v11 = vrot.slane %v4893_v1, 2 }
 0x31d   : > { %v5271_v27 = vmax.f32 %v5269_v37, %v5270_v49  ;;  %v5272_v52 = vsel %vm891_vm3, %v4834_v26, -inf  ;;  %v4901_v63 = vrot.slane %v4900_v24, 2  ;;  %v4907_v13 = vmax.f32 %v4905_v19, %v4906_v20 }
 0x31e   : > { %v5274_v41 = vmax.f32 %v5272_v52, %v5273_v59  ;;  %v6295_v51 = vpack.c.bf16 %v5268_v15, %v5268_v15  ;;  %v5679_v14 = vunpack.c.l.b16 %v6294_v40  ;;  %v4895_v53 = vmax.f32 %v4893_v1, %v4894_v11 }
 0x31f   : > { %v6296_v10 = vpack.c.bf16 %v5271_v27, %v5271_v27  ;;  %v4902_v38 = vmax.f32 %v4900_v24, %v4901_v63  ;;  %v4908_v31 = vrot.slane %v4907_v13, 2  ;;  %v4913_v62 = vrot.slane %v4912_v46, 4 }
 0x320   : > { %v6297_v28 = vpack.c.bf16 %v5274_v41, %v5274_v41  ;;  %v5680_v32 = vunpack.c.l.b16 %v6295_v51  ;;  %v4896_v54 = vrot.slane %v4895_v53, 1  ;;  %v3931_v48 = vcombine.high %v3531_v33, %v3531_v33 }
 0x321   : > { %v5681_v56 = vunpack.c.l.b16 %v6296_v10  ;;  %v4903_v4 = vrot.slane %v4902_v38, 1  ;;  %v4909_v49 = vmax.f32 %v4907_v13, %v4908_v31  ;;  %v4914_v23 = vmax.f32 %v4912_v46, %v4913_v62 }
 0x322   : > { %v5682_v17 = vunpack.c.l.b16 %v6297_v28  ;;  %v5739_v42 = vsel %vm5703_vm14, %v5680_v32, %v5679_v14  ;;  %v4897_v59 = vmax.f32 %v4895_v53, %v4896_v54  ;;  %v3938_v34 = vrot.slane %v3531_v33, %v8778_v21 }
 0x323   : > { %v5740_v39 = vsel %vm5705_vm15, %v5681_v56, %v5739_v42  ;;  %v4904_v16 = vmax.f32 %v4902_v38, %v4903_v4  ;;  %v4910_v12 = vrot.slane %v4909_v49, 1  ;;  %v4915_v19 = vrot.slane %v4914_v23, 2  ;;  %v9351_v38 = vld [vmem:[%s9528_s2] ss:$0 sm:$0xff] }
 0x324   : > { %v5276_v58 = vsel %vm891_vm3, %v4897_v59, -inf  ;;  %v3945_v61 = vrot.slane %v3931_v48, %v8778_v21  ;;  %v3946_v22 = vcombine.high %v3938_v34, %v3938_v34  ;;  %v4835_v35 = vsel %vm4246_vm10, %v3938_v34, -inf }
 0x325   : > { %v4911_v18 = vmax.f32 %v4909_v49, %v4910_v12  ;;  %v4916_v1 = vmax.f32 %v4914_v23, %v4915_v19  ;;  %v5279_v20 = vsel %vm891_vm3, %v4904_v16, -inf  ;;  %v4836_v26 = vrot.slane %v4835_v35, 4 }
 0x326   : > { %v3947_v33 = vcombine.high %v3945_v61, %v3945_v61  ;;  %v4842_v55 = vsel %vm4246_vm10, %v3946_v22, -inf  ;;  %v4849_v24 = vsel %vm4246_vm10, %v3945_v61, -inf  ;;  %v5433_v46 = vsel %vm8702_vm13, 0, %v5432_v7 }
 0x327   : > { %v4917_v15 = vrot.slane %v4916_v1, 1  ;;  %v5282_v37 = vsel %vm891_vm3, %v4911_v18, -inf  ;;  %v4837_v40 = vmax.f32 %v4835_v35, %v4836_v26  ;;  %v4843_v11 = vrot.slane %v4842_v55, 4  ;;  %5434 = vst [vmem:[%s8696_s8 + $0x3c] sm:$0x3] %v5433_v46 }
 0x328   : > { %v4850_v27 = vrot.slane %v4849_v24, 4  ;;  %v4856_v52 = vsel %vm4246_vm10, %v3947_v33, -inf  ;;  %v9344_v63 = vsel %vm5707_vm0, %v5682_v17, %v5740_v39  ;;  %v6890_v13 = vadd.f32 %v9083_v5, %v9081_v60 }
 0x329   : > { %v4918_v41 = vmax.f32 %v4916_v1, %v4917_v15  ;;  %v4838_v51 = vrot.slane %v4837_v40, 2  ;;  %v4844_v14 = vmax.f32 %v4842_v55, %v4843_v11  ;;  %v4857_v53 = vrot.slane %v4856_v52, 4 }
 0x32a   : > { %v4851_v10 = vmax.f32 %v4849_v24, %v4850_v27  ;;  %v3465_v31 = vmul.f32 %v9351_v38, %v6890_v13  ;;  %v6891_v62 = vadd.f32 %v9106_v36, %v9104_v9  ;;  %v6892_v28 = vadd.f32 %v9125_v50, %v9123_v47 }
 0x32b   : > { %v5285_v60 = vsel %vm891_vm3, %v4918_v41, -inf  ;;  %v4839_v5 = vmax.f32 %v4837_v40, %v4838_v51  ;;  %v4845_v32 = vrot.slane %v4844_v14, 2  ;;  %v4858_v54 = vmax.f32 %v4856_v52, %v4857_v53 }
 0x32c   : > { %v4852_v48 = vrot.slane %v4851_v10, 2  ;;  %v3504_v56 = vadd.f32 %v9276_v2, %v3465_v31  ;;  %v3463_v4 = vmul.f32 %v9351_v38, %v6891_v62  ;;  %v3466_v49 = vmul.f32 %v9351_v38, %v6892_v28 }
 0x32d   : > { %v4840_v23 = vrot.slane %v4839_v5, 1  ;;  %v4846_v17 = vmax.f32 %v4844_v14, %v4845_v32  ;;  %v4859_v42 = vrot.slane %v4858_v54, 2  ;;  %v6893_v9 = vadd.f32 %v9136_v0, %v9134_v44 }
 0x32e   : > { %v4853_v36 = vmax.f32 %v4851_v10, %v4852_v48  ;;  %v3536_v47 = vmax.f32 %v3504_v56, 0.0  ;;  %v3502_v50 = vadd.f32 %v9276_v2, %v3463_v4  ;;  %v3505_v59 = vadd.f32 %v9276_v2, %v3466_v49 }
 0x32f   : > { %v4841_v34 = vmax.f32 %v4839_v5, %v4840_v23  ;;  %v4847_v39 = vrot.slane %v4846_v17, 1  ;;  %v4860_v16 = vmax.f32 %v4858_v54, %v4859_v42  ;;  %v9367_v12 = vmul.f32 %v9351_v38, %v6893_v9 }
 0x330   : > { %v4854_v19 = vrot.slane %v4853_v36, 1  ;;  %v4016_v7 = vcombine.high %v3536_v47, %v3536_v47  ;;  %v4023_v61 = vrot.slane %v3536_v47, %v8778_v21  ;;  %v3534_v22 = vmax.f32 %v3502_v50, 0.0 }
 0x331   : > { %v4848_v35 = vmax.f32 %v4846_v17, %v4847_v39  ;;  %v4861_v18 = vrot.slane %v4860_v16, 1  ;;  %v5275_v44 = vsel %vm891_vm3, %v4841_v34, -inf  ;;  %v9371_v0 = vmax.f32 %v3505_v59, 0.0 }
 0x332   : > { %v4855_v1 = vmax.f32 %v4853_v36, %v4854_v19  ;;  %v5277_v26 = vmax.f32 %v5275_v44, %v5276_v58  ;;  %v4030_v33 = vrot.slane %v4016_v7, %v8778_v21  ;;  %v4031_v55 = vcombine.high %v4023_v61, %v4023_v61 }
 0x333   : > { %v4862_v24 = vmax.f32 %v4860_v16, %v4861_v18  ;;  %v5278_v46 = vsel %vm891_vm3, %v4848_v35, -inf  ;;  %v4975_v15 = vsel %vm4246_vm10, %v4023_v61, -inf  ;;  %v3982_v40 = vcombine.high %v3534_v22, %v3534_v22 }
 0x334   : > { %v5280_v11 = vmax.f32 %v5278_v46, %v5279_v20  ;;  %v5281_v27 = vsel %vm891_vm3, %v4855_v1, -inf  ;;  %v6298_v52 = vpack.c.bf16 %v5277_v26, %v5277_v26  ;;  %v4032_v13 = vcombine.high %v4030_v33, %v4030_v33 }
 0x335   : > { %v5283_v41 = vmax.f32 %v5281_v27, %v5282_v37  ;;  %v5284_v51 = vsel %vm891_vm3, %v4862_v24, -inf  ;;  %v4976_v14 = vrot.slane %v4975_v15, 4  ;;  %v4982_v58 = vsel %vm4246_vm10, %v4031_v55, -inf }
 0x336   : > { %v5286_v53 = vmax.f32 %v5284_v51, %v5285_v60  ;;  %v6299_v10 = vpack.c.bf16 %v5280_v11, %v5280_v11  ;;  %v5683_v31 = vunpack.c.l.b16 %v6298_v52  ;;  %v4983_v62 = vrot.slane %v4982_v58, 4 }
 0x337   : > { %v6300_v28 = vpack.c.bf16 %v5283_v41, %v5283_v41  ;;  %v4977_v5 = vmax.f32 %v4975_v15, %v4976_v14  ;;  %v4989_v32 = vsel %vm4246_vm10, %v4030_v33, -inf  ;;  %v4996_v20 = vsel %vm4246_vm10, %v4032_v13, -inf }
 0x338   : > { %v6301_v54 = vpack.c.bf16 %v5286_v53, %v5286_v53  ;;  %v5684_v48 = vunpack.c.l.b16 %v6299_v10  ;;  %v5742_v37 = vsel %vm5709_vm1, %v5683_v31, %v9344_v63  ;;  %v4984_v56 = vmax.f32 %v4982_v58, %v4983_v62 }
 0x339   : > { %v5685_v4 = vunpack.c.l.b16 %v6300_v28  ;;  %v4978_v49 = vrot.slane %v4977_v5, 2  ;;  %v4990_v23 = vrot.slane %v4989_v32, 4  ;;  %v4997_v60 = vrot.slane %v4996_v20, 4 }
 0x33a   : > { %v5686_v17 = vunpack.c.l.b16 %v6301_v54  ;;  %v5743_v42 = vsel %vm5711_vm2, %v5684_v48, %v5742_v37  ;;  %v4985_v9 = vrot.slane %v4984_v56, 2  ;;  %v3989_v36 = vrot.slane %v3534_v22, %v8778_v21 }
 0x33b   : > { %v5767_v47 = vpack.c.b16 %v5743_v42, %v5743_v42  ;;  %v4979_v50 = vmax.f32 %v4977_v5, %v4978_v49  ;;  %v4991_v59 = vmax.f32 %v4989_v32, %v4990_v23  ;;  %v4998_v34 = vmax.f32 %v4996_v20, %v4997_v60 }
 0x33c   : > { %v5744_v39 = vsel %vm5713_vm4, %v5686_v17, %v5685_v4  ;;  %v4986_v63 = vmax.f32 %v4984_v56, %v4985_v9  ;;  %v3996_v16 = vrot.slane %v3982_v40, %v8778_v21  ;;  %v3997_v19 = vcombine.high %v3989_v36, %v3989_v36 }
 0x33d   : > { %v5768_v7 = vpack.c.b16 %v5744_v39, %v5744_v39  ;;  %6246 = vst.msk [vmem:[%s8696_s8 + $0x38] sm:$0xe] %vm5790_vm5, %v5767_v47  ;;  %v4980_v61 = vrot.slane %v4979_v50, 1  ;;  %v4992_v35 = vrot.slane %v4991_v59, 2  ;;  %v4999_v18 = vrot.slane %v4998_v34, 2 }
 0x33e   : > { %v4987_v44 = vrot.slane %v4986_v63, 1  ;;  %v3998_v1 = vcombine.high %v3996_v16, %v3996_v16  ;;  %v4919_v22 = vsel %vm4246_vm10, %v3989_v36, -inf  ;;  %v4926_v26 = vsel %vm4246_vm10, %v3997_v19, -inf }
 0x33f   : > { %6247 = vst.msk [vmem:[%s8696_s8 + $0x3c] sm:$0x1] %vm5792_vm6, %v5768_v7  ;;  %v4981_v33 = vmax.f32 %v4979_v50, %v4980_v61  ;;  %v4993_v55 = vmax.f32 %v4991_v59, %v4992_v35  ;;  %v5000_v24 = vmax.f32 %v4998_v34, %v4999_v18  ;;  %v4920_v46 = vrot.slane %v4919_v22, 4 }
 0x340   : > { %v4988_v15 = vmax.f32 %v4986_v63, %v4987_v44  ;;  %v4927_v40 = vrot.slane %v4926_v26, 4  ;;  %v4933_v11 = vsel %vm4246_vm10, %v3996_v16, -inf  ;;  %v4940_v27 = vsel %vm4246_vm10, %v3998_v1, -inf }
 0x341   : > { %v4994_v52 = vrot.slane %v4993_v55, 1  ;;  %v5001_v13 = vrot.slane %v5000_v24, 1  ;;  %v5288_v41 = vsel %vm891_vm3, %v4981_v33, -inf  ;;  %v4921_v51 = vmax.f32 %v4919_v22, %v4920_v46 }
 0x342   : > { %v5291_v14 = vsel %vm891_vm3, %v4988_v15, -inf  ;;  %v4928_v58 = vmax.f32 %v4926_v26, %v4927_v40  ;;  %v4934_v53 = vrot.slane %v4933_v11, 4  ;;  %v4941_v10 = vrot.slane %v4940_v27, 4 }
 0x343   : > { %v4995_v31 = vmax.f32 %v4993_v55, %v4994_v52  ;;  %v5002_v62 = vmax.f32 %v5000_v24, %v5001_v13  ;;  %v4922_v28 = vrot.slane %v4921_v51, 2  ;;  %v4033_v5 = vcombine.high %v9371_v0, %v9371_v0 }
 0x344   : > { %v4929_v32 = vrot.slane %v4928_v58, 2  ;;  %v4935_v20 = vmax.f32 %v4933_v11, %v4934_v53  ;;  %v4942_v54 = vmax.f32 %v4940_v27, %v4941_v10  ;;  %v4040_v48 = vrot.slane %v9371_v0, %v8778_v21 }
 0x345   : > { %v5294_v37 = vsel %vm891_vm3, %v4995_v31, -inf  ;;  %v5297_v56 = vsel %vm891_vm3, %v5002_v62, -inf  ;;  %v4923_v4 = vmax.f32 %v4921_v51, %v4922_v28  ;;  %v4047_v49 = vrot.slane %v4033_v5, %v8778_v21 }
 0x346   : > { %v4930_v23 = vmax.f32 %v4928_v58, %v4929_v32  ;;  %v4936_v60 = vrot.slane %v4935_v20, 2  ;;  %v4943_v17 = vrot.slane %v4942_v54, 2  ;;  %v4048_v42 = vcombine.high %v4040_v48, %v4040_v48 }
 0x347   : > { %v4924_v9 = vrot.slane %v4923_v4, 1  ;;  %v4049_v36 = vcombine.high %v4047_v49, %v4047_v49  ;;  %v5003_v47 = vsel %vm4246_vm10, %v4040_v48, -inf  ;;  %v5017_v50 = vsel %vm4246_vm10, %v4047_v49, -inf }
 0x348   : > { %v4931_v59 = vrot.slane %v4930_v23, 1  ;;  %v4937_v34 = vmax.f32 %v4935_v20, %v4936_v60  ;;  %v4944_v0 = vmax.f32 %v4942_v54, %v4943_v17  ;;  %v5004_v39 = vrot.slane %v5003_v47, 4 }
 0x349   : > { %v4925_v63 = vmax.f32 %v4923_v4, %v4924_v9  ;;  %v5010_v16 = vsel %vm4246_vm10, %v4048_v42, -inf  ;;  %v5018_v19 = vrot.slane %v5017_v50, 4  ;;  %v5024_v7 = vsel %vm4246_vm10, %v4049_v36, -inf }
 0x34a   : > { %v4932_v61 = vmax.f32 %v4930_v23, %v4931_v59  ;;  %v4938_v35 = vrot.slane %v4937_v34, 1  ;;  %v4945_v18 = vrot.slane %v4944_v0, 1  ;;  %v5005_v44 = vmax.f32 %v5003_v47, %v5004_v39  ;;  %v5436_v23 = vld [vmem:[%s8696_s8 + $0x44] sm:$0x3] }
 0x34b   : > { %v5287_v1 = vsel %vm891_vm3, %v4925_v63, -inf  ;;  %v5011_v22 = vrot.slane %v5010_v16, 4  ;;  %v5019_v26 = vmax.f32 %v5017_v50, %v5018_v19  ;;  %v5025_v33 = vrot.slane %v5024_v7, 4 }
 0x34c   : > { %v4939_v55 = vmax.f32 %v4937_v34, %v4938_v35  ;;  %v4946_v24 = vmax.f32 %v4944_v0, %v4945_v18  ;;  %v5289_v46 = vmax.f32 %v5287_v1, %v5288_v41  ;;  %v5290_v15 = vsel %vm891_vm3, %v4932_v61, -inf }
 0x34d   : > { %v5292_v40 = vmax.f32 %v5290_v15, %v5291_v14  ;;  %v5006_v11 = vrot.slane %v5005_v44, 2  ;;  %v5012_v27 = vmax.f32 %v5010_v16, %v5011_v22  ;;  %v5020_v52 = vrot.slane %v5019_v26, 2 }
 0x34e   : > { %v5293_v13 = vsel %vm891_vm3, %v4939_v55, -inf  ;;  %v5296_v51 = vsel %vm891_vm3, %v4946_v24, -inf  ;;  %v6302_v58 = vpack.c.bf16 %v5289_v46, %v5289_v46  ;;  %v5026_v53 = vmax.f32 %v5024_v7, %v5025_v33 }
 0x34f   : > { %v5295_v10 = vmax.f32 %v5293_v13, %v5294_v37  ;;  %v5298_v31 = vmax.f32 %v5296_v51, %v5297_v56  ;;  %v6303_v62 = vpack.c.bf16 %v5292_v40, %v5292_v40  ;;  %v5007_v28 = vmax.f32 %v5005_v44, %v5006_v11 }
 0x350   : > { %v5687_v5 = vunpack.c.l.b16 %v6302_v58  ;;  %v5013_v32 = vrot.slane %v5012_v27, 2  ;;  %v5021_v14 = vmax.f32 %v5019_v26, %v5020_v52  ;;  %v5027_v4 = vrot.slane %v5026_v53, 2 }
 0x351   : > { %v6304_v41 = vpack.c.bf16 %v5295_v10, %v5295_v10  ;;  %v6305_v20 = vpack.c.bf16 %v5298_v31, %v5298_v31  ;;  %v5688_v54 = vunpack.c.l.b16 %v6303_v62  ;;  %v5008_v48 = vrot.slane %v5007_v28, 1 }
 0x352   : > { %v3503_v49 = vadd.f32 %v9276_v2, %v9367_v12  ;;  %v5014_v56 = vmax.f32 %v5012_v27, %v5013_v32  ;;  %v5022_v36 = vrot.slane %v5021_v14, 1  ;;  %v5437_v47 = vsel %vm8702_vm13, 0, %v5436_v23 }
 0x353   : > { %v5689_v60 = vunpack.c.l.b16 %v6304_v41  ;;  %v5690_v17 = vunpack.c.l.b16 %v6305_v20  ;;  %v5745_v37 = vsel %vm5703_vm14, %v5688_v54, %v5687_v5  ;;  %v6894_v50 = vadd.f32 %v9182_v8, %v9180_v25  ;;  %5438 = vst [vmem:[%s8696_s8 + $0x44] sm:$0x3] %v5437_v47 }
 0x354   : > { %v3535_v42 = vmax.f32 %v3503_v49, 0.0  ;;  %v5009_v59 = vmax.f32 %v5007_v28, %v5008_v48  ;;  %v5028_v34 = vmax.f32 %v5026_v53, %v5027_v4  ;;  %v6895_v16 = vadd.f32 %v9194_v30, %v9192_v45 }
 0x355   : > { %v5746_v9 = vsel %vm5705_vm15, %v5689_v60, %v5745_v37  ;;  %v3469_v63 = vmul.f32 %v9351_v38, %v6894_v50  ;;  %v5015_v19 = vrot.slane %v5014_v56, 1  ;;  %v9432_v25 = vadd.f32 %v9222_v6, %v9220_v29 }
 0x356   : > { %v3999_v0 = vcombine.high %v3535_v42, %v3535_v42  ;;  %v4006_v12 = vrot.slane %v3535_v42, %v8778_v21  ;;  %v9424_v39 = vsel %vm5707_vm0, %v5690_v17, %v5746_v9  ;;  %v5023_v8 = vmax.f32 %v5021_v14, %v5022_v36 }
 0x357   : > { %v3508_v18 = vadd.f32 %v9276_v2, %v3469_v63  ;;  %v5029_v44 = vrot.slane %v5028_v34, 1  ;;  %v5300_v45 = vsel %vm891_vm3, %v5009_v59, -inf  ;;  %v3467_v46 = vmul.f32 %v9351_v38, %v6895_v16 }
 0x358   : > { %v4013_v7 = vrot.slane %v3999_v0, %v8778_v21  ;;  %v4014_v61 = vcombine.high %v4006_v12, %v4006_v12  ;;  %v4947_v35 = vsel %vm4246_vm10, %v4006_v12, -inf  ;;  %v5016_v52 = vmax.f32 %v5014_v56, %v5015_v19 }
 0x359   : > { %v4948_v22 = vrot.slane %v4947_v35, 4  ;;  %v3540_v55 = vmax.f32 %v3508_v18, 0.0  ;;  %v5030_v13 = vmax.f32 %v5028_v34, %v5029_v44  ;;  %v3506_v41 = vadd.f32 %v9276_v2, %v3467_v46 }
 0x35a   : > { %v4015_v1 = vcombine.high %v4013_v7, %v4013_v7  ;;  %v4961_v26 = vsel %vm4246_vm10, %v4013_v7, -inf  ;;  %v4954_v30 = vsel %vm4246_vm10, %v4014_v61, -inf  ;;  %v5306_v17 = vsel %vm891_vm3, %v5023_v8, -inf }
 0x35b   : > { %v4962_v33 = vrot.slane %v4961_v26, 4  ;;  %v4949_v24 = vmax.f32 %v4947_v35, %v4948_v22  ;;  %v4955_v29 = vrot.slane %v4954_v30, 4  ;;  %v4084_v11 = vcombine.high %v3540_v55, %v3540_v55 }
 0x35c   : > { %v4968_v6 = vsel %vm4246_vm10, %v4015_v1, -inf  ;;  %v4091_v27 = vrot.slane %v3540_v55, %v8778_v21  ;;  %v5303_v59 = vsel %vm891_vm3, %v5016_v52, -inf  ;;  %v5309_v34 = vsel %vm891_vm3, %v5030_v13, -inf }
 0x35d   : > { %v4963_v15 = vmax.f32 %v4961_v26, %v4962_v33  ;;  %v4969_v40 = vrot.slane %v4968_v6, 4  ;;  %v4950_v51 = vrot.slane %v4949_v24, 2  ;;  %v4956_v58 = vmax.f32 %v4954_v30, %v4955_v29 }
 0x35e   : > { %v4098_v31 = vrot.slane %v4084_v11, %v8778_v21  ;;  %v4099_v62 = vcombine.high %v4091_v27, %v4091_v27  ;;  %v5087_v32 = vsel %vm4246_vm10, %v4091_v27, -inf  ;;  %v3538_v7 = vmax.f32 %v3506_v41, 0.0 }
 0x35f   : > { %v4964_v53 = vrot.slane %v4963_v15, 2  ;;  %v4970_v10 = vmax.f32 %v4968_v6, %v4969_v40  ;;  %v4951_v28 = vmax.f32 %v4949_v24, %v4950_v51  ;;  %v4957_v5 = vrot.slane %v4956_v58, 2 }
 0x360   : > { %v4100_v14 = vcombine.high %v4098_v31, %v4098_v31  ;;  %v5088_v48 = vrot.slane %v5087_v32, 4  ;;  %v5094_v23 = vsel %vm4246_vm10, %v4099_v62, -inf  ;;  %v5101_v60 = vsel %vm4246_vm10, %v4098_v31, -inf }
 0x361   : > { %v4965_v20 = vmax.f32 %v4963_v15, %v4964_v53  ;;  %v4971_v54 = vrot.slane %v4970_v10, 2  ;;  %v4952_v4 = vrot.slane %v4951_v28, 1  ;;  %v4958_v49 = vmax.f32 %v4956_v58, %v4957_v5 }
 0x362   : > { %v5095_v42 = vrot.slane %v5094_v23, 4  ;;  %v5102_v47 = vrot.slane %v5101_v60, 4  ;;  %v5108_v50 = vsel %vm4246_vm10, %v4100_v14, -inf  ;;  %v5089_v19 = vmax.f32 %v5087_v32, %v5088_v48 }
 0x363   : > { %v4966_v37 = vrot.slane %v4965_v20, 1  ;;  %v4972_v56 = vmax.f32 %v4970_v10, %v4971_v54  ;;  %v4953_v9 = vmax.f32 %v4951_v28, %v4952_v4  ;;  %v4959_v36 = vrot.slane %v4958_v49, 1 }
 0x364   : > { %v5109_v18 = vrot.slane %v5108_v50, 4  ;;  %v5096_v22 = vmax.f32 %v5094_v23, %v5095_v42  ;;  %v5103_v26 = vmax.f32 %v5101_v60, %v5102_v47  ;;  %v3470_v24 = vmul.f32 %v9351_v38, %v9432_v25 }
 0x365   : > { %v4967_v0 = vmax.f32 %v4965_v20, %v4966_v37  ;;  %v4973_v12 = vrot.slane %v4972_v56, 1  ;;  %v4960_v63 = vmax.f32 %v4958_v49, %v4959_v36  ;;  %v5299_v16 = vsel %vm891_vm3, %v4953_v9, -inf }
 0x366   : > { %v5301_v61 = vmax.f32 %v5299_v16, %v5300_v45  ;;  %v4050_v46 = vcombine.high %v3538_v7, %v3538_v7  ;;  %v5090_v40 = vrot.slane %v5089_v19, 2  ;;  %v5110_v11 = vmax.f32 %v5108_v50, %v5109_v18 }
 0x367   : > { %v4974_v8 = vmax.f32 %v4972_v56, %v4973_v12  ;;  %v5305_v35 = vsel %vm891_vm3, %v4967_v0, -inf  ;;  %v5302_v44 = vsel %vm891_vm3, %v4960_v63, -inf  ;;  %v5097_v52 = vrot.slane %v5096_v22, 2 }
 0x368   : > { %v5307_v1 = vmax.f32 %v5305_v35, %v5306_v17  ;;  %v5304_v30 = vmax.f32 %v5302_v44, %v5303_v59  ;;  %v6306_v55 = vpack.c.bf16 %v5301_v61, %v5301_v61  ;;  %v5104_v13 = vrot.slane %v5103_v26, 2 }
 0x369   : > { %v5308_v33 = vsel %vm891_vm3, %v4974_v8, -inf  ;;  %v3509_v53 = vadd.f32 %v9276_v2, %v3470_v24  ;;  %v5111_v25 = vrot.slane %v5110_v11, 2  ;;  %v4057_v62 = vrot.slane %v3538_v7, %v8778_v21 }
 0x36a   : > { %v5310_v29 = vmax.f32 %v5308_v33, %v5309_v34  ;;  %v6308_v6 = vpack.c.bf16 %v5307_v1, %v5307_v1  ;;  %v6307_v15 = vpack.c.bf16 %v5304_v30, %v5304_v30  ;;  %v5691_v45 = vunpack.c.l.b16 %v6306_v55 }
 0x36b   : > { %v5091_v5 = vmax.f32 %v5089_v19, %v5090_v40  ;;  %v4064_v32 = vrot.slane %v4050_v46, %v8778_v21  ;;  %v5098_v54 = vmax.f32 %v5096_v22, %v5097_v52  ;;  %v5105_v14 = vmax.f32 %v5103_v26, %v5104_v13 }
 0x36c   : > { %v6309_v27 = vpack.c.bf16 %v5310_v29, %v5310_v29  ;;  %v5692_v51 = vunpack.c.l.b16 %v6307_v15  ;;  %v5748_v58 = vsel %vm5709_vm1, %v5691_v45, %v9424_v39  ;;  %v5693_v10 = vunpack.c.l.b16 %v6308_v6 }
 0x36d   : > { %v4065_v48 = vcombine.high %v4057_v62, %v4057_v62  ;;  %v4066_v4 = vcombine.high %v4064_v32, %v4064_v32  ;;  %v5112_v2 = vmax.f32 %v5110_v11, %v5111_v25  ;;  %v5031_v49 = vsel %vm4246_vm10, %v4057_v62, -inf }
 0x36e   : > { %v5694_v31 = vunpack.c.l.b16 %v6309_v27  ;;  %v5749_v28 = vsel %vm5711_vm2, %v5692_v51, %v5748_v58  ;;  %v5045_v23 = vsel %vm4246_vm10, %v4064_v32, -inf  ;;  %v3541_v60 = vmax.f32 %v3509_v53, 0.0 }
 0x36f   : > { %v5769_v20 = vpack.c.b16 %v5749_v28, %v5749_v28  ;;  %v5092_v17 = vrot.slane %v5091_v5, 1  ;;  %v5032_v37 = vrot.slane %v5031_v49, 4  ;;  %v5038_v56 = vsel %vm4246_vm10, %v4065_v48, -inf }
 0x370   : > { %v5750_v41 = vsel %vm5713_vm4, %v5694_v31, %v5693_v10  ;;  %v5046_v42 = vrot.slane %v5045_v23, 4  ;;  %v5099_v9 = vrot.slane %v5098_v54, 1  ;;  %v5106_v36 = vrot.slane %v5105_v14, 1 }
 0x371   : > { %v5770_v39 = vpack.c.b16 %v5750_v41, %v5750_v41  ;;  %6248 = vst.msk [vmem:[%s8696_s8 + $0x40] sm:$0xe] %vm5790_vm5, %v5769_v20  ;;  %v5039_v47 = vrot.slane %v5038_v56, 4  ;;  %v5052_v50 = vsel %vm4246_vm10, %v4066_v4, -inf  ;;  %v5033_v59 = vmax.f32 %v5031_v49, %v5032_v37 }
 0x372   : > { %v5047_v34 = vmax.f32 %v5045_v23, %v5046_v42  ;;  %v5053_v0 = vrot.slane %v5052_v50, 4  ;;  %v5113_v12 = vrot.slane %v5112_v2, 1  ;;  %v4101_v16 = vcombine.high %v3541_v60, %v3541_v60 }
 0x373   : > { %6249 = vst.msk [vmem:[%s8696_s8 + $0x44] sm:$0x1] %vm5792_vm6, %v5770_v39  ;;  %v5040_v63 = vmax.f32 %v5038_v56, %v5039_v47  ;;  %v4108_v19 = vrot.slane %v3541_v60, %v8778_v21  ;;  %v5034_v7 = vrot.slane %v5033_v59, 2  ;;  %v5093_v35 = vmax.f32 %v5091_v5, %v5092_v17  ;;  %v5440_v56 = vld [vmem:[%s8696_s8 + $0x4c] sm:$0x3] }
 0x374   : > { %v5048_v8 = vrot.slane %v5047_v34, 2  ;;  %v5054_v61 = vmax.f32 %v5052_v50, %v5053_v0  ;;  %v5100_v18 = vmax.f32 %v5098_v54, %v5099_v9  ;;  %v5107_v44 = vmax.f32 %v5105_v14, %v5106_v36 }
 0x375   : > { %v5041_v1 = vrot.slane %v5040_v63, 2  ;;  %v5035_v22 = vmax.f32 %v5033_v59, %v5034_v7  ;;  %v5114_v33 = vmax.f32 %v5112_v2, %v5113_v12  ;;  %v4115_v24 = vrot.slane %v4101_v16, %v8778_v21 }
 0x376   : > { %v5049_v26 = vmax.f32 %v5047_v34, %v5048_v8  ;;  %v5055_v30 = vrot.slane %v5054_v61, 2  ;;  %v4116_v29 = vcombine.high %v4108_v19, %v4108_v19  ;;  %v5312_v45 = vsel %vm891_vm3, %v5093_v35, -inf }
 0x377   : > { %v5042_v55 = vmax.f32 %v5040_v63, %v5041_v1  ;;  %v5036_v6 = vrot.slane %v5035_v22, 1  ;;  %v5315_v40 = vsel %vm891_vm3, %v5100_v18, -inf  ;;  %v5318_v11 = vsel %vm891_vm3, %v5107_v44, -inf  ;;  %v7178_v18 = vld [vmem:[%s9529_s3] ss:$0 sm:$0xff] }
 0x378   : > { %v5050_v46 = vrot.slane %v5049_v26, 1  ;;  %v5056_v15 = vmax.f32 %v5054_v61, %v5055_v30  ;;  %v5115_v58 = vsel %vm4246_vm10, %v4108_v19, -inf  ;;  %v5321_v53 = vsel %vm891_vm3, %v5114_v33, -inf }
 0x379   : > { %v5043_v27 = vrot.slane %v5042_v55, 1  ;;  %v5037_v52 = vmax.f32 %v5035_v22, %v5036_v6  ;;  %v4117_v31 = vcombine.high %v4115_v24, %v4115_v24  ;;  %v5122_v25 = vsel %vm4246_vm10, %v4116_v29, -inf }
 0x37a   : > { %v5051_v13 = vmax.f32 %v5049_v26, %v5050_v46  ;;  %v5057_v51 = vrot.slane %v5056_v15, 1  ;;  %v5129_v32 = vsel %vm4246_vm10, %v4115_v24, -inf  ;;  %v5116_v14 = vrot.slane %v5115_v58, 4 }
 0x37b   : > { %v5044_v10 = vmax.f32 %v5042_v55, %v5043_v27  ;;  %v5311_v28 = vsel %vm891_vm3, %v5037_v52, -inf  ;;  %v5123_v4 = vrot.slane %v5122_v25, 4  ;;  %v5136_v60 = vsel %vm4246_vm10, %v4117_v31, -inf }
 0x37c   : > { %v5058_v62 = vmax.f32 %v5056_v15, %v5057_v51  ;;  %v5317_v5 = vsel %vm891_vm3, %v5051_v13, -inf  ;;  %v5313_v41 = vmax.f32 %v5311_v28, %v5312_v45  ;;  %v5130_v37 = vrot.slane %v5129_v32, 4 }
 0x37d   : > { %v5314_v20 = vsel %vm891_vm3, %v5044_v10, -inf  ;;  %v5319_v54 = vmax.f32 %v5317_v5, %v5318_v11  ;;  %v5117_v36 = vmax.f32 %v5115_v58, %v5116_v14  ;;  %v5137_v59 = vrot.slane %v5136_v60, 4 }
 0x37e   : > { %v5316_v39 = vmax.f32 %v5314_v20, %v5315_v40  ;;  %v5320_v48 = vsel %vm891_vm3, %v5058_v62, -inf  ;;  %v6310_v49 = vpack.c.bf16 %v5313_v41, %v5313_v41  ;;  %v6897_v34 = vadd.f32 %v9230_v43, %v9228_v3 }
 0x37f   : > { %v5322_v2 = vmax.f32 %v5320_v48, %v5321_v53  ;;  %v6312_v23 = vpack.c.bf16 %v5319_v54, %v5319_v54  ;;  %v5124_v12 = vmax.f32 %v5122_v25, %v5123_v4  ;;  %v5441_v63 = vsel %vm8702_vm13, 0, %v5440_v56 }
 0x380   : > { %v6311_v17 = vpack.c.bf16 %v5316_v39, %v5316_v39  ;;  %v5695_v47 = vunpack.c.l.b16 %v6310_v49  ;;  %v5131_v19 = vmax.f32 %v5129_v32, %v5130_v37  ;;  %v3468_v7 = vmul.f32 %v9351_v38, %v6897_v34  ;;  %5442 = vst [vmem:[%s8696_s8 + $0x4c] sm:$0x3] %v5441_v63 }
 0x381   : > { %v6313_v42 = vpack.c.bf16 %v5322_v2, %v5322_v2  ;;  %v5697_v9 = vunpack.c.l.b16 %v6312_v23  ;;  %v5118_v61 = vrot.slane %v5117_v36, 2  ;;  %v5138_v35 = vmax.f32 %v5136_v60, %v5137_v59 }
 0x382   : > { %v5696_v50 = vunpack.c.l.b16 %v6311_v17  ;;  %v3507_v3 = vadd.f32 %v7178_v18, %v3468_v7  ;;  %v5125_v57 = vrot.slane %v5124_v12, 2  ;;  %v5132_v44 = vrot.slane %v5131_v19, 2 }
 0x383   : > { %v5698_v0 = vunpack.c.l.b16 %v6313_v42  ;;  %v5119_v22 = vmax.f32 %v5117_v36, %v5118_v61  ;;  %v5139_v26 = vrot.slane %v5138_v35, 2 }
 0x384   : > { %v5751_v16 = vsel %vm5703_vm14, %v5696_v50, %v5695_v47  ;;  %v3539_v1 = vmax.f32 %v3507_v3, 0.0  ;;  %v5126_v33 = vmax.f32 %v5124_v12, %v5125_v57  ;;  %v5133_v55 = vmax.f32 %v5131_v19, %v5132_v44 }
 0x385   : > { %v5752_v8 = vsel %vm5705_vm15, %v5697_v9, %v5751_v16  ;;  %v5120_v46 = vrot.slane %v5119_v22, 1  ;;  %v5140_v45 = vmax.f32 %v5138_v35, %v5139_v26 }
 0x386   : > { %v9499_v43 = vsel %vm5707_vm0, %v5698_v0, %v5752_v8  ;;  %v4067_v30 = vcombine.high %v3539_v1, %v3539_v1  ;;  %v4074_v38 = vrot.slane %v3539_v1, %v8778_v21  ;;  %v5127_v58 = vrot.slane %v5126_v33, 1 }
 0x387   : > { %v5134_v53 = vrot.slane %v5133_v55, 1  ;;  %v5121_v28 = vmax.f32 %v5119_v22, %v5120_v46  ;;  %v5141_v5 = vrot.slane %v5140_v45, 1 }
 0x388   : > { %v4081_v24 = vrot.slane %v4067_v30, %v8778_v21  ;;  %v4082_v29 = vcombine.high %v4074_v38, %v4074_v38  ;;  %v5059_v6 = vsel %vm4246_vm10, %v4074_v38, -inf  ;;  %v5128_v14 = vmax.f32 %v5126_v33, %v5127_v58 }
 0x389   : > { %v5060_v15 = vrot.slane %v5059_v6, 4  ;;  %v5135_v39 = vmax.f32 %v5133_v55, %v5134_v53  ;;  %v5142_v23 = vmax.f32 %v5140_v45, %v5141_v5  ;;  %v5324_v60 = vsel %vm891_vm3, %v5121_v28, -inf }
 0x38a   : > { %v4083_v40 = vcombine.high %v4081_v24, %v4081_v24  ;;  %v5066_v11 = vsel %vm4246_vm10, %v4082_v29, -inf  ;;  %v5073_v27 = vsel %vm4246_vm10, %v4081_v24, -inf  ;;  %v5327_v9 = vsel %vm891_vm3, %v5128_v14, -inf }
 0x38b   : > { %v5061_v52 = vmax.f32 %v5059_v6, %v5060_v15  ;;  %v5067_v13 = vrot.slane %v5066_v11, 4  ;;  %v5074_v51 = vrot.slane %v5073_v27, 4  ;;  %v5330_v36 = vsel %vm891_vm3, %v5135_v39, -inf }
 0x38c   : > { %v5080_v10 = vsel %vm4246_vm10, %v4083_v40, -inf  ;;  %v5333_v12 = vsel %vm891_vm3, %v5142_v23, -inf }
 0x38d   : > { %v5062_v31 = vrot.slane %v5061_v52, 2  ;;  %v5068_v21 = vmax.f32 %v5066_v11, %v5067_v13  ;;  %v5075_v25 = vmax.f32 %v5073_v27, %v5074_v51  ;;  %v5081_v62 = vrot.slane %v5080_v10, 4 }
 0x38f   : > { %v5063_v32 = vmax.f32 %v5061_v52, %v5062_v31  ;;  %v5069_v41 = vrot.slane %v5068_v21, 2  ;;  %v5076_v20 = vrot.slane %v5075_v25, 2  ;;  %v5082_v54 = vmax.f32 %v5080_v10, %v5081_v62 }
 0x391   : > { %v5064_v48 = vrot.slane %v5063_v32, 1  ;;  %v5070_v4 = vmax.f32 %v5068_v21, %v5069_v41  ;;  %v5077_v2 = vmax.f32 %v5075_v25, %v5076_v20  ;;  %v5083_v49 = vrot.slane %v5082_v54, 2 }
 0x393   : > { %v5065_v17 = vmax.f32 %v5063_v32, %v5064_v48  ;;  %v5071_v37 = vrot.slane %v5070_v4, 1  ;;  %v5078_v56 = vrot.slane %v5077_v2, 1  ;;  %v5084_v42 = vmax.f32 %v5082_v54, %v5083_v49 }
 0x395   : > { %v5072_v47 = vmax.f32 %v5070_v4, %v5071_v37  ;;  %v5079_v50 = vmax.f32 %v5077_v2, %v5078_v56  ;;  %v5085_v59 = vrot.slane %v5084_v42, 1  ;;  %v5323_v34 = vsel %vm891_vm3, %v5065_v17, -inf }
 0x396   : > { %v5325_v0 = vmax.f32 %v5323_v34, %v5324_v60 }
 0x397   : > { %v5086_v63 = vmax.f32 %v5084_v42, %v5085_v59  ;;  %v5326_v16 = vsel %vm891_vm3, %v5072_v47, -inf  ;;  %v5329_v19 = vsel %vm891_vm3, %v5079_v50, -inf }
 0x398   : > { %v5328_v7 = vmax.f32 %v5326_v16, %v5327_v9  ;;  %v5331_v8 = vmax.f32 %v5329_v19, %v5330_v36  ;;  %v6314_v61 = vpack.c.bf16 %v5325_v0, %v5325_v0 }
 0x399   : > { %v5332_v35 = vsel %vm891_vm3, %v5086_v63, -inf }
 0x39a   : > { %v5334_v18 = vmax.f32 %v5332_v35, %v5333_v12  ;;  %v6315_v3 = vpack.c.bf16 %v5328_v7, %v5328_v7  ;;  %v6316_v57 = vpack.c.bf16 %v5331_v8, %v5331_v8  ;;  %v5699_v44 = vunpack.c.l.b16 %v6314_v61 }
 0x39c   : > { %v6317_v1 = vpack.c.bf16 %v5334_v18, %v5334_v18  ;;  %v5700_v22 = vunpack.c.l.b16 %v6315_v3  ;;  %v5754_v26 = vsel %vm5709_vm1, %v5699_v44, %v9499_v43  ;;  %v5701_v30 = vunpack.c.l.b16 %v6316_v57 }
 0x39e   : > { %v5702_v38 = vunpack.c.l.b16 %v6317_v1  ;;  %v5755_v33 = vsel %vm5711_vm2, %v5700_v22, %v5754_v26 }
 0x39f   : > { %v5771_v55 = vpack.c.b16 %v5755_v33, %v5755_v33 }
 0x3a0   : > { %v5756_v24 = vsel %vm5713_vm4, %v5702_v38, %v5701_v30 }
 0x3a1   : > { %v5772_v29 = vpack.c.b16 %v5756_v24, %v5756_v24  ;;  %6250 = vst.msk [vmem:[%s8696_s8 + $0x48] sm:$0xe] %vm5790_vm5, %v5771_v55 }
 0x3a3   : > { %6251 = vst.msk [vmem:[%s8696_s8 + $0x4c] sm:$0x1] %vm5792_vm6, %v5772_v29 }
 0x3a4 PF: > { %s14_s15 = sadd.s32 1, %s7185_s15  }
 0x3a5   : > { %p11_p4 = scmp.ge.s32.totalorder %s14_s15, 4  }
 0x3a7   :  { %13 = sbr.rel (!%p11_p4) target bundleno = 1 (0x1), region = 69 }

// kernel: szcvi_forward.10
= control target key start
LH: loop header
LB: loop body
LE: loop exit
PB: predicated region body
PF: predicated region fallthrough
CT: control target
= control target key end

     0   :  { %s2414_s15 = smov 0   ;;  %s2992_s0 = inlined_call_operand.vmem [shape: bf16[2,7,7,128], index: 0, kind: input, shape index: {}]   ;;  %s2993_s1 = inlined_call_operand.vmem [shape: bf16[3,384,256], index: 1, kind: input, shape index: {}]   ;;  %s2994_s2 = inlined_call_operand.vmem [shape: f32[1,256], index: 2, kind: input, shape index: {}]   ;;  %s2995_s3 = inlined_call_operand.vmem [shape: f32[1,256], index: 3, kind: input, shape index: {}]   ;;  %s2996_s4 = inlined_call_operand.vmem [shape: bf16[2,4,4,256], index: 4, kind: output, shape index: {}]  }
   0x1 LB: > { %s1857_s16 = sadd.s32 4294967295, %s2385_s15   ;;  %p1861_p0 = scmp.ge.s32.totalorder %s2385_s15, 1  ;;  %s2385_s15 = sphi %s2414_s15, %s14_s15  }
   0x2   : > { %p162_p1 = scmp.lt.s32.totalorder %s2385_s15, 3 }
   0x4   : > { %p163_p2 = pnand %p1861_p0, %p162_p1 }
   0x5   : > { %v2157_v0 = vld [vmem:[%s2993_s1 + $0x184] ss:$8 sps:$4 sm:$0xff] (!%p163_p2)   ;;  %v2159_v1 = vld [vmem:[%s2993_s1 + $0x180] ss:$8 sps:$4 sm:$0xff] (!%p163_p2)   ;;  %v2387_v2 = vmov (!%p163_p2), 0   ;;  %p188_p3 = scmp.lt.s32.totalorder (!%p163_p2), %s1857_s16, 1  ;;  %v253_v24 = vlaneseq (!%p163_p2) }
   0x6   : > { %166 = sbr.rel (%p163_p2) target bundleno = 410 (0x19a), region = 36  ;;  %872 = vmatprep.mubr.bf16.mxu0 (!%p163_p2), %v2387_v2  ;;  %797 = vmatprep.subr.bf16.mxu1 (!%p163_p2), %v2157_v0  ;;  %v2160_v3 = vld [vmem:[%s2993_s1 + $0x284] ss:$8 sps:$4 sm:$0xff] (!%p163_p2)   ;;  %v2162_v4 = vld [vmem:[%s2993_s1 + $0x280] ss:$8 sps:$4 sm:$0xff] (!%p163_p2)  }
   0x7   : > { %798 = vmatpush1.bf16.msra.mxu1 (!%p163_p2), %v2159_v1  ;;  %v2163_v5 = vld [vmem:[%s2993_s1 + $0x194] ss:$8 sps:$4 sm:$0xff] (!%p163_p2)   ;;  %v2165_v6 = vld [vmem:[%s2993_s1 + $0x190] ss:$8 sps:$4 sm:$0xff] (!%p163_p2)   ;;  %840 = vmatprep.subr.bf16.mxu0 (!%p163_p2), %v2160_v3  ;;  %v2169_v9 = vld [vmem:[%s2993_s1 + $0x1a4] ss:$8 sps:$4 sm:$0xff] (!%p163_p2)  }
   0x8   : > { %v2166_v7 = vld [vmem:[%s2993_s1 + $0x294] ss:$8 sps:$4 sm:$0xff] (!%p163_p2)   ;;  %841 = vmatpush1.bf16.msra.mxu0 (!%p163_p2), %v2162_v4  ;;  %799 = vmatprep.subr.bf16.mxu1 (!%p163_p2), %v2163_v5  ;;  %v2168_v8 = vld [vmem:[%s2993_s1 + $0x290] ss:$8 sps:$4 sm:$0xff] (!%p163_p2)   ;;  %v2171_v10 = vld [vmem:[%s2993_s1 + $0x1a0] ss:$8 sps:$4 sm:$0xff] (!%p163_p2)  }
   0x9   : > { %842 = vmatprep.subr.bf16.mxu0 (!%p163_p2), %v2166_v7  ;;  %v2172_v11 = vld [vmem:[%s2993_s1 + $0x2a4] ss:$8 sps:$4 sm:$0xff] (!%p163_p2)   ;;  %v2175_v12 = vld [vmem:[%s2993_s1 + $0x1b4] ss:$8 sps:$4 sm:$0xff] (!%p163_p2)   ;;  %v2174_v13 = vld [vmem:[%s2993_s1 + $0x2a0] ss:$8 sps:$4 sm:$0xff] (!%p163_p2)  }
   0xa   : > { %v2178_v14 = vld [vmem:[%s2993_s1 + $0x2b4] ss:$8 sps:$4 sm:$0xff] (!%p163_p2)   ;;  %v2177_v15 = vld [vmem:[%s2993_s1 + $0x1b0] ss:$8 sps:$4 sm:$0xff] (!%p163_p2)   ;;  %v2181_v16 = vld [vmem:[%s2993_s1 + $0x1c4] ss:$8 sps:$4 sm:$0xff] (!%p163_p2)  }
   0xb   : > { %800 = vmatpush1.bf16.msra.mxu1 (!%p163_p2), %v2165_v6  ;;  %v2180_v17 = vld [vmem:[%s2993_s1 + $0x2b0] ss:$8 sps:$4 sm:$0xff] (!%p163_p2)   ;;  %v2184_v18 = vld [vmem:[%s2993_s1 + $0x2c4] ss:$8 sps:$4 sm:$0xff] (!%p163_p2)   ;;  %v2183_v19 = vld [vmem:[%s2993_s1 + $0x1c0] ss:$8 sps:$4 sm:$0xff] (!%p163_p2)  }
   0xc   : > { %801 = vmatprep.subr.bf16.mxu1 (!%p163_p2), %v2169_v9  ;;  %843 = vmatpush1.bf16.msra.mxu0 (!%p163_p2), %v2168_v8  ;;  %v2187_v20 = vld [vmem:[%s2993_s1 + $0x1d4] ss:$8 sps:$4 sm:$0xff] (!%p163_p2)   ;;  %v2186_v21 = vld [vmem:[%s2993_s1 + $0x2c0] ss:$8 sps:$4 sm:$0xff] (!%p163_p2)   ;;  %v2189_v23 = vld [vmem:[%s2993_s1 + $0x1d0] ss:$8 sps:$4 sm:$0xff] (!%p163_p2)  }
   0xd   : > { %844 = vmatprep.subr.bf16.mxu0 %v2172_v11  ;;  %s3002_s16 = smov (!%p188_p3, %s1857_s16), 1  ;;  %v2190_v22 = vld [vmem:[%s2993_s1 + $0x2d4] ss:$8 sps:$4 sm:$0xff]   ;;  %v2193_v25 = vld [vmem:[%s2993_s1 + $0x1e4] ss:$8 sps:$4 sm:$0xff]   ;;  %v2519_v32 = vshrl.u32 %v253_v24, 7 }
   0xe   : > { %s2146_s9 = smul.u32 28, %s3002_s16  ;;  %v2388_v26 = vmov 1983009808   ;;  %v2192_v28 = vld [vmem:[%s2993_s1 + $0x2d0] ss:$8 sps:$4 sm:$0xff]   ;;  %s2125_s30 = sshll.u32 %s3002_s16, 4 }
   0xf   : > { %802 = vmatpush1.bf16.msra.mxu1 %v2171_v10  ;;  %v251_v27 = vunpack.c.l.s4 %v2388_v26  ;;  %v2196_v29 = vld [vmem:[%s2993_s1 + $0x2e4] ss:$8 sps:$4 sm:$0xff]   ;;  %v2195_v30 = vld [vmem:[%s2993_s1 + $0x1e0] ss:$8 sps:$4 sm:$0xff]   ;;  %v2199_v31 = vld [vmem:[%s2993_s1 + $0x1f4] ss:$8 sps:$4 sm:$0xff]   ;;  %s197_s7 = scalar_lea.vmem %s2996_s4, %s2125_s30 }
  0x10   : > { %803 = vmatprep.subr.bf16.mxu1 %v2175_v12  ;;  %845 = vmatpush1.bf16.msra.mxu0 %v2174_v13  ;;  %s2508_s22 = scalar_lea.vmem %s2992_s0, %s2146_s9  ;;  %v2198_v37 = vld [vmem:[%s2993_s1 + $0x2e0] ss:$8 sps:$4 sm:$0xff]   ;;  %v2201_v42 = vld [vmem:[%s2993_s1 + $0x1f0] ss:$8 sps:$4 sm:$0xff]   ;;  %v2202_v43 = vld [vmem:[%s2993_s1 + $0x2f4] ss:$8 sps:$4 sm:$0xff]  }
  0x11   : > { %846 = vmatprep.subr.bf16.mxu0 %v2178_v14  ;;  %v200_v33 = vld [vmem:[%s2508_s22 + $0x8] sm:$0xf]  ;;  %v201_v34 = vld [vmem:[%s2508_s22 + $0xc] sm:$0xf]  ;;  %v202_v35 = vld [vmem:[%s2508_s22 + $0x10] sm:$0xf]  ;;  %v252_v36 = vunpack.c.0.s8 %v251_v27 }
  0x12   : > { %v2528_v38 = vld [vmem:[%s2508_s22 + $0x14] sm:$0xf]  ;;  %v1866_v39 = vcombine.low %v200_v33, %v200_v33  ;;  %v1867_v40 = vcombine.low %v201_v34, %v201_v34  ;;  %v1868_v41 = vcombine.low %v202_v35, %v202_v35  ;;  %v2204_v45 = vld [vmem:[%s2993_s1 + $0x2f0] ss:$8 sps:$4 sm:$0xff]   ;;  %v2205_v50 = vld [vmem:[%s2993_s1 + $0x204] ss:$8 sps:$4 sm:$0xff]  }
  0x13   : > { %804 = vmatpush1.bf16.msra.mxu1 %v2177_v15  ;;  %v1869_v44 = vcombine.low %v2528_v38, %v2528_v38  ;;  %v2545_v53 = vsub.s32 %v252_v36, %v2519_v32  ;;  %v2210_v54 = vld [vmem:[%s2993_s1 + $0x104] ss:$8 sps:$4 sm:$0xff]   ;;  %v2207_v63 = vld [vmem:[%s2993_s1 + $0x200] ss:$8 sps:$4 sm:$0xff]   ;;  %vm317_vm0 = vsmask.f32 1280 }
  0x14   : > { %805 = vmatprep.subr.bf16.mxu1 %v2181_v16  ;;  %847 = vmatpush1.bf16.msra.mxu0 %v2180_v17  ;;  %v225_v46 = vshrl.u32 %v1866_v39, 16  ;;  %v227_v47 = vshll.u32 %v1866_v39, 16  ;;  %v232_v48 = vshrl.u32 %v1867_v40, 16  ;;  %v234_v49 = vshll.u32 %v1867_v40, 16  ;;  %v2215_v5 = vld [vmem:[%s2993_s1 + $0x214] ss:$8 sps:$4 sm:$0xff]  }
  0x15   : > { %848 = vmatprep.subr.bf16.mxu0 %v2184_v18  ;;  %v239_v51 = vshrl.u32 %v1868_v41, 16  ;;  %v241_v52 = vshll.u32 %v1868_v41, 16  ;;  %v246_v57 = vrot.slane %v1866_v39, 1  ;;  %v247_v58 = vrot.slane %v1867_v40, 1  ;;  %v2217_v16 = vld [vmem:[%s2993_s1 + $0x210] ss:$8 sps:$4 sm:$0xff]  }
  0x16   : > { %v229_v55 = vrot.slane %v227_v47, 1  ;;  %v236_v56 = vrot.slane %v234_v49, 1  ;;  %v248_v60 = vrot.slane %v1868_v41, 1  ;;  %v432_v61 = vshrl.u32 %v1869_v44, 16  ;;  %v2227_v39 = vld [vmem:[%s2993_s1 + $0x234] ss:$8 sps:$4 sm:$0xff]  }
  0x17   : > { %806 = vmatpush1.bf16.msra.mxu1 %v2183_v19  ;;  %v243_v59 = vrot.slane %v241_v52, 1  ;;  %v434_v62 = vshll.u32 %v1869_v44, 16  ;;  %vm318_vm1 = vsmask.f32 3336  ;;  %v280_v7 = vrot.slane %v246_v57, %v2545_v53  ;;  %v2221_v19 = vld [vmem:[%s2993_s1 + $0x224] ss:$8 sps:$4 sm:$0xff]  }
  0x18   : > { %807 = vmatprep.subr.bf16.mxu1 %v2187_v20  ;;  %849 = vmatpush1.bf16.msra.mxu0 %v2186_v21  ;;  %v230_v0 = vor.u32 %v229_v55, %v225_v46  ;;  %v237_v1 = vor.u32 %v236_v56, %v232_v48  ;;  %v297_v9 = vrot.slane %v247_v58, %v2545_v53  ;;  %v438_v13 = vrot.slane %v1869_v44, 1  ;;  %vm2571_vm4 = vmor %vm317_vm0, %vm318_vm1  ;;  %v2233_v57 = vld [vmem:[%s2993_s1 + $0x244] ss:$8 sps:$4 sm:$0xff]   ;;  %v2342_v52 = vld [vmem:[%s2993_s1 + $0xe0] ss:$8 sps:$4 sm:$0xff]  }
  0x19   : > { %850 = vmatprep.subr.bf16.mxu0 %v2190_v22  ;;  %v244_v3 = vor.u32 %v243_v59, %v239_v51  ;;  %v436_v4 = vrot.slane %v434_v62, 1  ;;  %v314_v11 = vrot.slane %v248_v60, %v2545_v53  ;;  %vm320_vm2 = vsmask.f32 5392  ;;  %v2229_v51 = vld [vmem:[%s2993_s1 + $0x230] ss:$8 sps:$4 sm:$0xff]  }
  0x1a   : > { %v266_v6 = vcombine.low %v200_v33, %v230_v0  ;;  %v283_v8 = vcombine.low %v201_v34, %v237_v1  ;;  %vm322_vm3 = vsmask.f32 7448  ;;  %v2223_v34 = vld [vmem:[%s2993_s1 + $0x220] ss:$8 sps:$4 sm:$0xff]   ;;  %vm321_vm5 = vmor %vm2571_vm4, %vm320_vm2 }
  0x1b   : > { %808 = vmatpush1.bf16.msra.mxu1 %v2189_v23  ;;  %v300_v10 = vcombine.low %v202_v35, %v244_v3  ;;  %v437_v12 = vor.u32 %v436_v4, %v432_v61  ;;  %vm2590_vm6 = vmor %vm321_vm5, %vm322_vm3 }
  0x1c   : > { %809 = vmatprep.subr.bf16.mxu1 %v2193_v25  ;;  %851 = vmatpush1.bf16.msra.mxu0 %v2192_v28  ;;  %v273_v14 = vrot.slane %v266_v6, %v2545_v53  ;;  %v290_v15 = vrot.slane %v283_v8, %v2545_v53  ;;  %v453_v28 = vrot.slane %v438_v13, %v2545_v53 }
  0x1d   : > { %852 = vmatprep.subr.bf16.mxu0 %v2196_v29  ;;  %v307_v17 = vrot.slane %v300_v10, %v2545_v53  ;;  %v439_v18 = vcombine.low %v2528_v38, %v437_v12 }
  0x1e   : > { %v281_v20 = vcombine.low %v273_v14, %v280_v7  ;;  %v282_v21 = vcombine.high %v273_v14, %v280_v7  ;;  %v298_v22 = vcombine.low %v290_v15, %v297_v9  ;;  %v299_v23 = vcombine.high %v290_v15, %v297_v9  ;;  %v2239_v7 = vld [vmem:[%s2993_s1 + $0x254] ss:$8 sps:$4 sm:$0xff]   ;;  %v2241_v14 = vld [vmem:[%s2993_s1 + $0x250] ss:$8 sps:$4 sm:$0xff]   ;;  %v2245_v15 = vld [vmem:[%s2993_s1 + $0x264] ss:$8 sps:$4 sm:$0xff]  }
  0x1f   : > { %810 = vmatpush1.bf16.msra.mxu1 %v2195_v30  ;;  %v315_v24 = vcombine.low %v307_v17, %v314_v11  ;;  %v316_v25 = vcombine.high %v307_v17, %v314_v11  ;;  %v446_v27 = vrot.slane %v439_v18, %v2545_v53 }
  0x20   : > { %811 = vmatprep.subr.bf16.mxu1 %v2199_v31  ;;  %853 = vmatpush1.bf16.msra.mxu0 %v2198_v37  ;;  %v339_v29 = vshrl.u32 %v281_v20, 16  ;;  %v342_v30 = vshll.u32 %v281_v20, 16  ;;  %v348_v31 = vshll.u32 %v282_v21, 16  ;;  %v353_v33 = vshrl.u32 %v298_v22, 16 }
  0x21   : > { %854 = vmatprep.subr.bf16.mxu0 %v2202_v43  ;;  %v356_v35 = vshll.u32 %v298_v22, 16  ;;  %v362_v36 = vshll.u32 %v299_v23, 16  ;;  %v367_v37 = vshrl.u32 %v315_v24, 16  ;;  %v370_v38 = vshll.u32 %v315_v24, 16  ;;  %v2247_v23 = vld [vmem:[%s2993_s1 + $0x260] ss:$8 sps:$4 sm:$0xff]  }
  0x22   : > { %v341_v40 = vrot.slane %v339_v29, 6  ;;  %v344_v41 = vrot.slane %v342_v30, 7  ;;  %v350_v43 = vrot.slane %v348_v31, 7  ;;  %v376_v48 = vshll.u32 %v316_v25, 16  ;;  %v2208_v29 = vld [vmem:[%s2993_s1 + $0x100] ss:$8 sps:$4 sm:$0xff]  }
  0x23   : > { %812 = vmatpush1.bf16.msra.mxu1 %v2201_v42  ;;  %v355_v42 = vrot.slane %v353_v33, 6  ;;  %v358_v44 = vrot.slane %v356_v35, 7  ;;  %v372_v46 = vrot.slane %v370_v38, 7  ;;  %v454_v49 = vcombine.low %v446_v27, %v453_v28  ;;  %v2259_v38 = vld [vmem:[%s2993_s1 + $0x4] ss:$8 sps:$4 sm:$0xff]  }
  0x24   : > { %813 = vmatprep.subr.bf16.mxu1 %v2205_v50  ;;  %855 = vmatpush1.bf16.msra.mxu0 %v2204_v45  ;;  %v369_v45 = vrot.slane %v367_v37, 6  ;;  %v345_v47 = vor.u32 %v344_v41, %v341_v40  ;;  %v455_v50 = vcombine.high %v446_v27, %v453_v28  ;;  %v364_v55 = vrot.slane %v362_v36, 7  ;;  %v2251_v27 = vld [vmem:[%s2993_s1 + $0x274] ss:$8 sps:$4 sm:$0xff]   ;;  %v2253_v36 = vld [vmem:[%s2993_s1 + $0x270] ss:$8 sps:$4 sm:$0xff]  }
  0x25   : > { %1204 = vmatprep.subr.bf16.mxu0 %v2210_v54  ;;  %v359_v54 = vor.u32 %v358_v44, %v355_v42  ;;  %v457_v59 = vshrl.u32 %v454_v49, 16  ;;  %v460_v60 = vshll.u32 %v454_v49, 16  ;;  %v378_v62 = vrot.slane %v376_v48, 7  ;;  %v2226_v42 = vld [vmem:[%s2993_s1 + $0x124] ss:$8 sps:$4 sm:$0xff]  }
  0x26   : > { %v373_v56 = vor.u32 %v372_v46, %v369_v45  ;;  %v346_v58 = vrot.slane %v345_v47, 2  ;;  %v2257_v44 = vld [vmem:[%s2993_s1] ss:$8 sps:$4 sm:$0xff]   ;;  %v2266_v46 = vld [vmem:[%s2993_s1 + $0x14] ss:$8 sps:$4 sm:$0xff]  }
  0x27   : > { %814 = vmatpush1.bf16.msra.mxu1 %v2207_v63  ;;  %v360_v61 = vrot.slane %v359_v54, 2  ;;  %v466_v63 = vshll.u32 %v455_v50, 16  ;;  %v459_v3 = vrot.slane %v457_v59, 6  ;;  %v462_v4 = vrot.slane %v460_v60, 7  ;;  %v2224_v47 = vld [vmem:[%s2993_s1 + $0x120] ss:$8 sps:$4 sm:$0xff]  }
  0x28   : > { %815 = vmatprep.subr.bf16.mxu1 %v2215_v5  ;;  %v2599_v0 = vsel %vm2590_vm6, %v346_v58, %v350_v43  ;;  %v374_v1 = vrot.slane %v373_v56, 2  ;;  %v2235_v5 = vld [vmem:[%s2993_s1 + $0x240] ss:$8 sps:$4 sm:$0xff]   ;;  %v2232_v50 = vld [vmem:[%s2993_s1 + $0x134] ss:$8 sps:$4 sm:$0xff]  }
  0x29   : > { %v2606_v6 = vsel %vm2590_vm6, %v360_v61, %v364_v55  ;;  %v463_v8 = vor.u32 %v462_v4, %v459_v3  ;;  %v468_v9 = vrot.slane %v466_v63, 7  ;;  %v2264_v56 = vld [vmem:[%s2993_s1 + $0x10] ss:$8 sps:$4 sm:$0xff]   ;;  %v2238_v61 = vld [vmem:[%s2993_s1 + $0x144] ss:$8 sps:$4 sm:$0xff]  }
  0x2a   : > { %v520_v10 = vcombine.high %v2599_v0, %v2606_v6  ;;  %v519_v11 = vcombine.low %v2599_v0, %v2606_v6  ;;  %v2617_v12 = vsel %vm2590_vm6, %v374_v1, %v378_v62  ;;  %v2230_v58 = vld [vmem:[%s2993_s1 + $0x130] ss:$8 sps:$4 sm:$0xff]   ;;  %v2270_v1 = vld [vmem:[%s2993_s1 + $0x20] ss:$8 sps:$4 sm:$0xff]   ;;  %v2278_v3 = vld [vmem:[%s2993_s1 + $0x34] ss:$8 sps:$4 sm:$0xff]  }
  0x2b   : > { %816 = vmatpush1.bf16.msra.mxu1 %v2217_v16  ;;  %v464_v13 = vrot.slane %v463_v8, 2  ;;  %v199_v16 = vld [vmem:[%s2508_s22 + $0x4] sm:$0xf]  ;;  %v885_v4 = vcombine.low %v2606_v6, %v2617_v12  ;;  %v2244_v8 = vld [vmem:[%s2993_s1 + $0x154] ss:$8 sps:$4 sm:$0xff]  }
  0x2c   : > { %817 = vmatprep.subr.bf16.mxu1 %v2221_v19  ;;  %v1865_v18 = vcombine.low %v199_v16, %v199_v16  ;;  %v536_v20 = vrot.slane %v520_v10, %v2545_v53  ;;  %v529_v22 = vrot.slane %v519_v11, %v2545_v53  ;;  %v2276_v10 = vld [vmem:[%s2993_s1 + $0x30] ss:$8 sps:$4 sm:$0xff]   ;;  %v2284_v11 = vld [vmem:[%s2993_s1 + $0x44] ss:$8 sps:$4 sm:$0xff]  }
  0x2d   : > { %v2628_v17 = vsel %vm2590_vm6, %v464_v13, %v468_v9 }
  0x2e   : > { %v522_v19 = vcombine.high %v2617_v12, %v2628_v17  ;;  %v521_v21 = vcombine.low %v2617_v12, %v2628_v17  ;;  %v218_v24 = vshrl.u32 %v1865_v18, 16  ;;  %v220_v25 = vshll.u32 %v1865_v18, 16 }
  0x2f   : > { %818 = vmatpush1.bf16.msra.mxu1 %v2223_v34  ;;  %v245_v31 = vrot.slane %v1865_v18, 1  ;;  %v2220_v34 = vld [vmem:[%s2993_s1 + $0x114] ss:$8 sps:$4 sm:$0xff]  }
  0x30   : > { %819 = vmatprep.subr.bf16.mxu1 %v2227_v39  ;;  %v550_v26 = vrot.slane %v522_v19, %v2545_v53  ;;  %v543_v28 = vrot.slane %v521_v21, %v2545_v53  ;;  %v222_v30 = vrot.slane %v220_v25, 1  ;;  %v2218_v39 = vld [vmem:[%s2993_s1 + $0x110] ss:$8 sps:$4 sm:$0xff]   ;;  %v2282_v19 = vld [vmem:[%s2993_s1 + $0x40] ss:$8 sps:$4 sm:$0xff]   ;;  %v886_v21 = vcombine.high %v2606_v6, %v2617_v12 }
  0x31   : > { %v263_v41 = vrot.slane %v245_v31, %v2545_v53  ;;  %v2288_v6 = vld [vmem:[%s2993_s1 + $0x50] ss:$8 sps:$4 sm:$0xff]   ;;  %v2302_v31 = vld [vmem:[%s2993_s1 + $0x74] ss:$8 sps:$4 sm:$0xff]  }
  0x32   : > { %v553_v33 = vcombine.low %v536_v20, %v550_v26  ;;  %v552_v35 = vcombine.high %v529_v22, %v543_v28  ;;  %v223_v37 = vor.u32 %v222_v30, %v218_v24  ;;  %v551_v43 = vcombine.low %v529_v22, %v543_v28  ;;  %v2290_v22 = vld [vmem:[%s2993_s1 + $0x54] ss:$8 sps:$4 sm:$0xff]   ;;  %v2248_v24 = vld [vmem:[%s2993_s1 + $0x160] ss:$8 sps:$4 sm:$0xff]   ;;  %v2296_v26 = vld [vmem:[%s2993_s1 + $0x64] ss:$8 sps:$4 sm:$0xff]  }
  0x33   : > { %820 = vmatpush1.bf16.msra.mxu1 %v2229_v51  ;;  %v2746_v25 = vrot.slane %v886_v21, %v2545_v53  ;;  %v2262_v28 = vld [vmem:[%s2993_s1 + $0x304] ss:$8 sps:$4 sm:$0xff]   ;;  %v2297_v21 = vld [vmem:[%s2993_s1 + $0x360] ss:$8 sps:$4 sm:$0xff]  }
  0x34   : > { %821 = vmatprep.subr.bf16.mxu1 %v2233_v57  ;;  %873 = vmatmul.mubr.bf16.vlgmr.msra.gmra.mrb[0].mxu0 %v553_v33  ;;  %v249_v40 = vcombine.low %v199_v16, %v223_v37  ;;  %v2272_v57 = vld [vmem:[%s2993_s1 + $0x24] ss:$8 sps:$4 sm:$0xff]   ;;  %v2260_v33 = vld [vmem:[%s2993_s1 + $0x300] ss:$8 sps:$4 sm:$0xff]   ;;  %v2267_v37 = vld [vmem:[%s2993_s1 + $0x310] ss:$8 sps:$4 sm:$0xff]  }
  0x35   : > { %1205 = vmatpush1.bf16.msra.mxu0 %v2208_v29  ;;  %829 = vmatprep.mubr.bf16.mxu1 %v552_v35  ;;  %v2250_v16 = vld [vmem:[%s2993_s1 + $0x164] ss:$8 sps:$4 sm:$0xff]   ;;  %v2294_v29 = vld [vmem:[%s2993_s1 + $0x60] ss:$8 sps:$4 sm:$0xff]   ;;  %v2300_v35 = vld [vmem:[%s2993_s1 + $0x70] ss:$8 sps:$4 sm:$0xff]  }
  0x36   : > { %1206 = vmatprep.subr.bf16.mxu0 %v2220_v34  ;;  %1236 = vmatprep.mubr.bf16.mxu0 %v2387_v2  ;;  %v256_v45 = vrot.slane %v249_v40, %v2545_v53  ;;  %v2269_v34 = vld [vmem:[%s2993_s1 + $0x314] ss:$8 sps:$4 sm:$0xff]  }
  0x37   : > { %822 = vmatpush1.bf16.msra.mxu1 %v2235_v5  ;;  %v2236_v5 = vld [vmem:[%s2993_s1 + $0x140] ss:$8 sps:$4 sm:$0xff]  }
  0x38   : > { %823 = vmatprep.subr.bf16.mxu1 %v2239_v7  ;;  %v264_v48 = vcombine.low %v256_v45, %v263_v41  ;;  %v265_v49 = vcombine.high %v256_v45, %v263_v41  ;;  %v2306_v41 = vld [vmem:[%s2993_s1 + $0x80] ss:$8 sps:$4 sm:$0xff]  }
  0x39   : > { %1207 = vmatpush1.bf16.msra.mxu0 %v2218_v39  ;;  %v2275_v39 = vld [vmem:[%s2993_s1 + $0x324] ss:$8 sps:$4 sm:$0xff]   ;;  %v2273_v45 = vld [vmem:[%s2993_s1 + $0x320] ss:$8 sps:$4 sm:$0xff]  }
  0x3a   : > { %1208 = vmatprep.subr.bf16.mxu0 %v2226_v42  ;;  %v325_v51 = vshrl.u32 %v264_v48, 16  ;;  %v328_v54 = vshll.u32 %v264_v48, 16  ;;  %v334_v55 = vshll.u32 %v265_v49, 16  ;;  %v2314_v42 = vld [vmem:[%s2993_s1 + $0x94] ss:$8 sps:$4 sm:$0xff]  }
  0x3b   : > { %824 = vmatpush1.bf16.msra.mxu1 %v2241_v14  ;;  %v2713_v14 = vrot.slane %v885_v4, %v2545_v53  ;;  %v2312_v49 = vld [vmem:[%s2993_s1 + $0x90] ss:$8 sps:$4 sm:$0xff]   ;;  %v2332_v4 = vld [vmem:[%s2993_s1 + $0xc4] ss:$8 sps:$4 sm:$0xff]  }
  0x3c   : > { %825 = vmatprep.subr.bf16.mxu1 %v2245_v15  ;;  %v327_v59 = vrot.slane %v325_v51, 6  ;;  %v330_v60 = vrot.slane %v328_v54, 7  ;;  %v336_v63 = vrot.slane %v334_v55, 7  ;;  %v2242_v15 = vld [vmem:[%s2993_s1 + $0x150] ss:$8 sps:$4 sm:$0xff]  }
  0x3d   : > { %1209 = vmatpush1.bf16.msra.mxu0 %v2224_v47  ;;  %v2279_v54 = vld [vmem:[%s2993_s1 + $0x330] ss:$8 sps:$4 sm:$0xff]   ;;  %v2287_v55 = vld [vmem:[%s2993_s1 + $0x344] ss:$8 sps:$4 sm:$0xff]  }
  0x3e   : > { %1210 = vmatprep.subr.bf16.mxu0 %v2232_v50  ;;  %v331_v62 = vor.u32 %v330_v60, %v327_v59  ;;  %v2320_v50 = vld [vmem:[%s2993_s1 + $0xa4] ss:$8 sps:$4 sm:$0xff]   ;;  %v2326_v59 = vld [vmem:[%s2993_s1 + $0xb4] ss:$8 sps:$4 sm:$0xff]  }
  0x3f   : > { %826 = vmatpush1.bf16.msra.mxu1 %v2247_v23 }
  0x40   : > { %827 = vmatprep.subr.bf16.mxu1 %v2251_v27  ;;  %v332_v7 = vrot.slane %v331_v62, 2  ;;  %v2254_v27 = vld [vmem:[%s2993_s1 + $0x170] ss:$8 sps:$4 sm:$0xff]   ;;  %v2293_v62 = vld [vmem:[%s2993_s1 + $0x354] ss:$8 sps:$4 sm:$0xff]  }
  0x41   : > { %1211 = vmatpush1.bf16.msra.mxu0 %v2230_v58  ;;  %v2318_v58 = vld [vmem:[%s2993_s1 + $0xa0] ss:$8 sps:$4 sm:$0xff]  }
  0x42   : > { %1212 = vmatprep.subr.bf16.mxu0 %v2238_v61  ;;  %v337_v9 = vsel %vm2590_vm6, %v332_v7, %v336_v63  ;;  %v2285_v61 = vld [vmem:[%s2993_s1 + $0x340] ss:$8 sps:$4 sm:$0xff]  }
  0x43   : > { %828 = vmatpush1.bf16.msra.mxu1 %v2253_v36  ;;  %v883_v13 = vcombine.low %v337_v9, %v2599_v0  ;;  %v884_v20 = vcombine.high %v337_v9, %v2599_v0  ;;  %v2256_v0 = vld [vmem:[%s2993_s1 + $0x174] ss:$8 sps:$4 sm:$0xff]   ;;  %v2308_v36 = vld [vmem:[%s2993_s1 + $0x84] ss:$8 sps:$4 sm:$0xff]   ;;  %v2291_v9 = vld [vmem:[%s2993_s1 + $0x350] ss:$8 sps:$4 sm:$0xff]  }
  0x44   : > { %1161 = vmatprep.subr.bf16.mxu1 %v2259_v38  ;;  %v204_v38 = vld [vmem:[%s2508_s22 + $0x18] sm:$0xf] }
  0x45   : > { %1213 = vmatpush1.bf16.msra.mxu0 %v2236_v5  ;;  %v2722_v18 = vrot.slane %v883_v13, %v2545_v53  ;;  %v900_v12 = vrot.slane %v884_v20, %v2545_v53  ;;  %v2014_v40 = vcombine.low %v204_v38, %v204_v38 }
  0x46   : > { %830 = vmatmul.mubr.bf16.vlgmr.msra.gmra.mrb[0].mxu1 %v551_v43  ;;  %1214 = vmatprep.subr.bf16.mxu0 %v2244_v8 }
  0x47   : > { %1162 = vmatpush1.bf16.msra.mxu1 %v2257_v44  ;;  %v916_v23 = vcombine.high %v2722_v18, %v2713_v14  ;;  %v917_v30 = vcombine.low %v900_v12, %v2746_v25  ;;  %v1251_v43 = vshrl.u32 %v2014_v40, 16  ;;  %v1253_v44 = vshll.u32 %v2014_v40, 16  ;;  %v2303_v12 = vld [vmem:[%s2993_s1 + $0x370] ss:$8 sps:$4 sm:$0xff]  }
  0x48   : > { %1163 = vmatprep.subr.bf16.mxu1 %v2266_v46  ;;  %v2281_v46 = vld [vmem:[%s2993_s1 + $0x334] ss:$8 sps:$4 sm:$0xff]   ;;  %v1257_v48 = vrot.slane %v2014_v40, 1 }
  0x49   : > { %1215 = vmatpush1.bf16.msra.mxu0 %v2242_v15  ;;  %1193 = vmatprep.mubr.bf16.mxu1 %v916_v23  ;;  %v1255_v47 = vrot.slane %v1253_v44, 1  ;;  %v2330_v15 = vld [vmem:[%s2993_s1 + $0xc0] ss:$8 sps:$4 sm:$0xff]   ;;  %v2329_v40 = vld [vmem:[%s2993_s1 + $0x3b4] ss:$8 sps:$4 sm:$0xff]  }
  0x4a   : > { %1216 = vmatprep.subr.bf16.mxu0 %v2250_v16  ;;  %v2338_v16 = vld [vmem:[%s2993_s1 + $0xd4] ss:$8 sps:$4 sm:$0xff]   ;;  %v2339_v44 = vld [vmem:[%s2993_s1 + $0x3d0] ss:$8 sps:$4 sm:$0xff]  }
  0x4b   : > { %1164 = vmatpush1.bf16.msra.mxu1 %v2264_v56  ;;  %v1256_v51 = vor.u32 %v1255_v47, %v1251_v43  ;;  %v2341_v43 = vld [vmem:[%s2993_s1 + $0x3d4] ss:$8 sps:$4 sm:$0xff]  }
  0x4c   : > { %1165 = vmatprep.subr.bf16.mxu1 %v2272_v57  ;;  %v1272_v57 = vrot.slane %v1257_v48, %v2545_v53  ;;  %v2353_v47 = vld [vmem:[%s2993_s1 + $0x3f4] ss:$8 sps:$4 sm:$0xff]   ;;  %v2351_v48 = vld [vmem:[%s2993_s1 + $0x3f0] ss:$8 sps:$4 sm:$0xff]  }
  0x4d   : > { %1217 = vmatpush1.bf16.msra.mxu0 %v2248_v24  ;;  %v1258_v56 = vcombine.low %v204_v38, %v1256_v51  ;;  %v2336_v24 = vld [vmem:[%s2993_s1 + $0xd0] ss:$8 sps:$4 sm:$0xff]   ;;  %v915_v38 = vcombine.low %v2722_v18, %v2713_v14  ;;  %v2335_v18 = vld [vmem:[%s2993_s1 + $0x3c4] ss:$8 sps:$4 sm:$0xff]   ;;  %v2355_v51 = vld [vmem:[%s2993_s1 + $0x400] ss:$8 sps:$4 sm:$0xff]  }
  0x4e   : > { %1218 = vmatprep.subr.bf16.mxu0 %v2256_v0  ;;  %v2344_v0 = vld [vmem:[%s2993_s1 + $0xe4] ss:$8 sps:$4 sm:$0xff]  }
  0x4f   : > { %1166 = vmatpush1.bf16.msra.mxu1 %v2270_v1  ;;  %v1265_v60 = vrot.slane %v1258_v56, %v2545_v53  ;;  %v2361_v56 = vld [vmem:[%s2993_s1 + $0x420] ss:$8 sps:$4 sm:$0xff]  }
  0x50   : > { %1167 = vmatprep.subr.bf16.mxu1 %v2278_v3  ;;  %v2324_v3 = vld [vmem:[%s2993_s1 + $0xb0] ss:$8 sps:$4 sm:$0xff]  }
  0x51   : > { %1219 = vmatpush1.bf16.msra.mxu0 %v2254_v27  ;;  %v1273_v63 = vcombine.low %v1265_v60, %v1272_v57  ;;  %v1274_v1 = vcombine.high %v1265_v60, %v1272_v57  ;;  %v2366_v57 = vld [vmem:[%s2993_s1 + $0x434] ss:$8 sps:$4 sm:$0xff]  }
  0x52   : > { %1600 = vmatprep.subr.bf16.mxu0 %v2262_v28  ;;  %v2311_v28 = vld [vmem:[%s2993_s1 + $0x384] ss:$8 sps:$4 sm:$0xff]   ;;  %v2372_v60 = vld [vmem:[%s2993_s1 + $0x454] ss:$8 sps:$4 sm:$0xff]  }
  0x53   : > { %1168 = vmatpush1.bf16.msra.mxu1 %v2276_v10  ;;  %v1276_v5 = vshrl.u32 %v1273_v63, 16  ;;  %v1279_v7 = vshll.u32 %v1273_v63, 16  ;;  %v1285_v8 = vshll.u32 %v1274_v1, 16  ;;  %v2299_v10 = vld [vmem:[%s2993_s1 + $0x364] ss:$8 sps:$4 sm:$0xff]  }
  0x54   : > { %1169 = vmatprep.subr.bf16.mxu1 %v2284_v11  ;;  %1237 = vmatmul.mubr.bf16.vlgmr.msra.gmra.mrb[4].mxu0 %v917_v30  ;;  %v2373_v63 = vld [vmem:[%s2993_s1 + $0x460] ss:$8 sps:$4 sm:$0xff]   ;;  %v2378_v1 = vld [vmem:[%s2993_s1 + $0x474] ss:$8 sps:$4 sm:$0xff]  }
  0x55   : > { %1601 = vmatpush1.bf16.msra.mxu0 %v2260_v33  ;;  %v1278_v11 = vrot.slane %v1276_v5, 6  ;;  %v1281_v13 = vrot.slane %v1279_v7, 7  ;;  %v1287_v20 = vrot.slane %v1285_v8, 7 }
  0x56   : > { %1602 = vmatprep.subr.bf16.mxu0 %v2269_v34 }
  0x57   : > { %1170 = vmatpush1.bf16.msra.mxu1 %v2282_v19  ;;  %v1282_v19 = vor.u32 %v1281_v13, %v1278_v11 }
  0x58   : > { %1171 = vmatprep.subr.bf16.mxu1 %v2290_v22  ;;  %v2305_v22 = vld [vmem:[%s2993_s1 + $0x374] ss:$8 sps:$4 sm:$0xff]  }
  0x59   : > { %1603 = vmatpush1.bf16.msra.mxu0 %v2267_v37  ;;  %v1283_v23 = vrot.slane %v1282_v19, 2  ;;  %v2323_v37 = vld [vmem:[%s2993_s1 + $0x3a4] ss:$8 sps:$4 sm:$0xff]  }
  0x5a   : > { %1604 = vmatprep.subr.bf16.mxu0 %v2275_v39  ;;  %v2321_v39 = vld [vmem:[%s2993_s1 + $0x3a0] ss:$8 sps:$4 sm:$0xff]  }
  0x5b   : > { %1172 = vmatpush1.bf16.msra.mxu1 %v2288_v6  ;;  %v1288_v6 = vsel %vm2590_vm6, %v1283_v23, %v1287_v20 }
  0x5c   : > { %1173 = vmatprep.subr.bf16.mxu1 %v2296_v26  ;;  %v1338_v26 = vcombine.low %v2628_v17, %v1288_v6  ;;  %v1339_v27 = vcombine.high %v2628_v17, %v1288_v6  ;;  %v2350_v17 = vld [vmem:[%s2993_s1 + $0xf4] ss:$8 sps:$4 sm:$0xff]  }
  0x5d   : > { %1605 = vmatpush1.bf16.msra.mxu0 %v2273_v45  ;;  %v2347_v45 = vld [vmem:[%s2993_s1 + $0x3e4] ss:$8 sps:$4 sm:$0xff]  }
  0x5e   : > { %1606 = vmatprep.subr.bf16.mxu0 %v2281_v46  ;;  %v2866_v30 = vrot.slane %v1339_v27, %v2545_v53  ;;  %v2345_v46 = vld [vmem:[%s2993_s1 + $0x3e0] ss:$8 sps:$4 sm:$0xff]  }
  0x5f   : > { %1174 = vmatpush1.bf16.msra.mxu1 %v2294_v29  ;;  %v1346_v29 = vrot.slane %v1338_v26, %v2545_v53  ;;  %v2317_v53 = vld [vmem:[%s2993_s1 + $0x394] ss:$8 sps:$4 sm:$0xff]   ;;  %v1694_v26 = vsub.s32 0, %v2519_v32  ;;  %v1690_v27 = vld [vmem:[%s2994_s2] sm:$0x3] }
  0x60   : > { %1175 = vmatprep.subr.bf16.mxu1 %v2302_v31  ;;  %v2309_v31 = vld [vmem:[%s2993_s1 + $0x380] ss:$8 sps:$4 sm:$0xff]   ;;  %v1356_v34 = vcombine.low %v2746_v25, %v2866_v30 }
  0x61   : > { %1607 = vmatpush1.bf16.msra.mxu0 %v2279_v54  ;;  %v1355_v33 = vcombine.high %v2713_v14, %v1346_v29  ;;  %v2360_v54 = vld [vmem:[%s2993_s1 + $0x414] ss:$8 sps:$4 sm:$0xff]  }
  0x62   : > { %1608 = vmatprep.subr.bf16.mxu0 %v2287_v55  ;;  %v2358_v55 = vld [vmem:[%s2993_s1 + $0x410] ss:$8 sps:$4 sm:$0xff]  }
  0x63   : > { %1176 = vmatpush1.bf16.msra.mxu1 %v2300_v35  ;;  %v2348_v35 = vld [vmem:[%s2993_s1 + $0xf0] ss:$8 sps:$4 sm:$0xff]   ;;  %1632 = vmatprep.mubr.bf16.mxu0 %v1355_v33 }
  0x64   : > { %1177 = vmatprep.subr.bf16.mxu1 %v2308_v36  ;;  %v2315_v36 = vld [vmem:[%s2993_s1 + $0x390] ss:$8 sps:$4 sm:$0xff]  }
  0x65   : > { %1609 = vmatpush1.bf16.msra.mxu0 %v2285_v61  ;;  %v2370_v61 = vld [vmem:[%s2993_s1 + $0x450] ss:$8 sps:$4 sm:$0xff]  }
  0x66   : > { %1610 = vmatprep.subr.bf16.mxu0 %v2293_v62  ;;  %v2375_v62 = vld [vmem:[%s2993_s1 + $0x464] ss:$8 sps:$4 sm:$0xff]  }
  0x67   : > { %1178 = vmatpush1.bf16.msra.mxu1 %v2306_v41  ;;  %v2327_v41 = vld [vmem:[%s2993_s1 + $0x3b0] ss:$8 sps:$4 sm:$0xff]  }
  0x68   : > { %1179 = vmatprep.subr.bf16.mxu1 %v2314_v42  ;;  %v2333_v42 = vld [vmem:[%s2993_s1 + $0x3c0] ss:$8 sps:$4 sm:$0xff]  }
  0x69   : > { %1611 = vmatpush1.bf16.msra.mxu0 %v2291_v9 }
  0x6a   : > { %1612 = vmatprep.subr.bf16.mxu0 %v2299_v10 }
  0x6b   : > { %1180 = vmatpush1.bf16.msra.mxu1 %v2312_v49  ;;  %v2357_v49 = vld [vmem:[%s2993_s1 + $0x404] ss:$8 sps:$4 sm:$0xff]  }
  0x6c   : > { %1181 = vmatprep.subr.bf16.mxu1 %v2320_v50  ;;  %v1354_v50 = vcombine.low %v2713_v14, %v1346_v29  ;;  %v2363_v14 = vld [vmem:[%s2993_s1 + $0x424] ss:$8 sps:$4 sm:$0xff]   ;;  %v1695_v29 = vrot.slane %v1690_v27, %v1694_v26 }
  0x6d   : > { %1613 = vmatpush1.bf16.msra.mxu0 %v2297_v21 }
  0x6e   : > { %1614 = vmatprep.subr.bf16.mxu0 %v2305_v22 }
  0x6f   : > { %1182 = vmatpush1.bf16.msra.mxu1 %v2318_v58  ;;  %v2369_v58 = vld [vmem:[%s2993_s1 + $0x444] ss:$8 sps:$4 sm:$0xff]  }
  0x70   : > { %1183 = vmatprep.subr.bf16.mxu1 %v2326_v59  ;;  %v2367_v59 = vld [vmem:[%s2993_s1 + $0x440] ss:$8 sps:$4 sm:$0xff]  }
  0x71   : > { %1615 = vmatpush1.bf16.msra.mxu0 %v2303_v12 }
  0x72   : > { %1616 = vmatprep.subr.bf16.mxu0 %v2311_v28  ;;  %v1698_v28 = vsub.s32 1, %v2519_v32 }
  0x73   : > { %1184 = vmatpush1.bf16.msra.mxu1 %v2324_v3  ;;  %v2376_v3 = vld [vmem:[%s2993_s1 + $0x470] ss:$8 sps:$4 sm:$0xff]  }
  0x74   : > { %1185 = vmatprep.subr.bf16.mxu1 %v2332_v4 }
  0x75   : > { %1617 = vmatpush1.bf16.msra.mxu0 %v2309_v31 }
  0x76   : > { %1618 = vmatprep.subr.bf16.mxu0 %v2317_v53 }
  0x77   : > { %1186 = vmatpush1.bf16.msra.mxu1 %v2330_v15 }
  0x78   : > { %1187 = vmatprep.subr.bf16.mxu1 %v2338_v16 }
  0x79   : > { %1619 = vmatpush1.bf16.msra.mxu0 %v2315_v36 }
  0x7a   : > { %1620 = vmatprep.subr.bf16.mxu0 %v2323_v37 }
  0x7b   : > { %1188 = vmatpush1.bf16.msra.mxu1 %v2336_v24 }
  0x7c   : > { %1189 = vmatprep.subr.bf16.mxu1 %v2344_v0 }
  0x7d   : > { %1621 = vmatpush1.bf16.msra.mxu0 %v2321_v39 }
  0x7e   : > { %1622 = vmatprep.subr.bf16.mxu0 %v2329_v40 }
  0x7f   : > { %1190 = vmatpush1.bf16.msra.mxu1 %v2342_v52  ;;  %v1706_v52 = vld [vmem:[%s2995_s3] sm:$0x3] }
  0x80   : > { %1191 = vmatprep.subr.bf16.mxu1 %v2350_v17  ;;  %v1699_v17 = vrot.slane %v1690_v27, %v1698_v28  ;;  %v1711_v33 = vrot.slane %v1706_v52, %v1694_v26 }
  0x81   : > { %1623 = vmatpush1.bf16.msra.mxu0 %v2327_v41 }
  0x82   : > { %1624 = vmatprep.subr.bf16.mxu0 %v2335_v18 }
  0x83   : > { %1192 = vmatpush1.bf16.msra.mxu1 %v2348_v35  ;;  %v1715_v35 = vrot.slane %v1706_v52, %v1698_v28 }
  0x85   : > { %1625 = vmatpush1.bf16.msra.mxu0 %v2333_v42 }
  0x86   : > { %1194 = vmatmul.mubr.bf16.vlgmr.msra.gmra.mrb[4].mxu1 %v915_v38  ;;  %1626 = vmatprep.subr.bf16.mxu0 %v2341_v43 }
  0x89   : > { %1627 = vmatpush1.bf16.msra.mxu0 %v2339_v44 }
  0x8a   : > { %1628 = vmatprep.subr.bf16.mxu0 %v2347_v45 }
  0x8d   : > { %1629 = vmatpush1.bf16.msra.mxu0 %v2345_v46 }
  0x8e   : > { %1630 = vmatprep.subr.bf16.mxu0 %v2353_v47 }
  0x91   : > { %1631 = vmatpush1.bf16.msra.mxu0 %v2351_v48 }
  0x92   : > { %1643 = vmatprep.subr.bf16.mxu0 %v2357_v49 }
  0x94   : > { %1633 = vmatmul.mubr.bf16.vlgmr.msra.gmra.mrb[4].mxu0 %v1354_v50 }
  0x95   : > { %1644 = vmatpush1.bf16.msra.mxu0 %v2355_v51  ;;  %1675 = vmatprep.mubr.bf16.mxu0 %v2387_v2  ;;  %v2364_v2 = vld [vmem:[%s2993_s1 + $0x430] ss:$8 sps:$4 sm:$0xff]  }
  0x96   : > { %1645 = vmatprep.subr.bf16.mxu0 %v2360_v54 }
  0x99   : > { %1646 = vmatpush1.bf16.msra.mxu0 %v2358_v55 }
  0x9a   : > { %1647 = vmatprep.subr.bf16.mxu0 %v2363_v14 }
  0x9d   : > { %1648 = vmatpush1.bf16.msra.mxu0 %v2361_v56 }
  0x9e   : > { %1649 = vmatprep.subr.bf16.mxu0 %v2366_v57 }
  0xa1   : > { %1650 = vmatpush1.bf16.msra.mxu0 %v2364_v2 }
  0xa2   : > { %1651 = vmatprep.subr.bf16.mxu0 %v2369_v58 }
  0xa5   : > { %1652 = vmatpush1.bf16.msra.mxu0 %v2367_v59 }
  0xa6   : > { %1653 = vmatprep.subr.bf16.mxu0 %v2372_v60 }
  0xa9   : > { %1654 = vmatpush1.bf16.msra.mxu0 %v2370_v61 }
  0xaa   : > { %1655 = vmatprep.subr.bf16.mxu0 %v2375_v62 }
  0xad   : > { %1656 = vmatpush1.bf16.msra.mxu0 %v2373_v63 }
  0xae   : > { %1657 = vmatprep.subr.bf16.mxu0 %v2378_v1 }
  0xb1   : > { %1658 = vmatpush1.bf16.msra.mxu0 %v2376_v3 }
  0xb4   : > { %1676 = vmatmul.mubr.bf16.vlgmr.msra.gmra.mrb[4].mxu0 %v1356_v34 }
 0x107   : > { %v874_v4 = vpop.f32.mrb[0].mxu0 }
 0x108   : > { %v876_v5 = vpop.f32.mrb[1].mxu0 }
 0x109   : > { %v878_v7 = vpop.f32.mrb[2].mxu0 }
 0x10a   : > { %v880_v8 = vpop.f32.mrb[3].mxu0 }
 0x119   : > { %v831_v9 = vpop.f32.mrb[0].mxu1 }
 0x11a   : > { %v875_v10 = vadd.f32 %v874_v4, %v831_v9  ;;  %v833_v11 = vpop.f32.mrb[1].mxu1 }
 0x11b   : > { %v877_v13 = vadd.f32 %v876_v5, %v833_v11  ;;  %v835_v15 = vpop.f32.mrb[2].mxu1 }
 0x11c   : > { %v879_v16 = vadd.f32 %v878_v7, %v835_v15  ;;  %v837_v19 = vpop.f32.mrb[3].mxu1 }
 0x11d   : > { %v881_v20 = vadd.f32 %v880_v8, %v837_v19 }
 0x159   : > { %v1195_v21 = vpop.f32.mrb[4].mxu1 }
 0x15a   : > { %v1196_v22 = vadd.f32 %v1195_v21, %v875_v10  ;;  %v1197_v23 = vpop.f32.mrb[5].mxu1 }
 0x15b   : > { %v1198_v24 = vadd.f32 %v1197_v23, %v877_v13  ;;  %v1199_v0 = vpop.f32.mrb[6].mxu1 }
 0x15c   : > { %v1200_v6 = vadd.f32 %v1199_v0, %v879_v16  ;;  %v1201_v25 = vpop.f32.mrb[7].mxu1 }
 0x15d   : > { %v1202_v12 = vadd.f32 %v1201_v25, %v881_v20 }
 0x187   : > { %v1677_v30 = vpop.f32.mrb[4].mxu0 }
 0x188   : > { %v2128_v31 = vadd.f32 %v1677_v30, %v1196_v22  ;;  %v1679_v34 = vpop.f32.mrb[5].mxu0 }
 0x189   : > { %v2131_v53 = vadd.f32 %v1679_v34, %v1198_v24  ;;  %v1681_v36 = vpop.f32.mrb[6].mxu0 }
 0x18a   : > { %v1702_v37 = vmul.f32 %v2128_v31, %v1695_v29  ;;  %v2134_v38 = vadd.f32 %v1681_v36, %v1200_v6  ;;  %v1683_v39 = vpop.f32.mrb[7].mxu0 }
 0x18b   : > { %v1703_v40 = vmul.f32 %v2131_v53, %v1699_v17  ;;  %v2137_v41 = vadd.f32 %v1683_v39, %v1202_v12 }
 0x18c   : > { %v1718_v32 = vadd.f32 %v1711_v33, %v1702_v37  ;;  %v1704_v18 = vmul.f32 %v2134_v38, %v1695_v29 }
 0x18d   : > { %v1719_v42 = vadd.f32 %v1715_v35, %v1703_v40  ;;  %v1705_v43 = vmul.f32 %v2137_v41, %v1699_v17 }
 0x18e   : > { %v1722_v44 = vmax.f32 %v1718_v32, 0.0  ;;  %v1720_v45 = vadd.f32 %v1711_v33, %v1704_v18 }
 0x18f   : > { %v1723_v46 = vmax.f32 %v1719_v42, 0.0  ;;  %v1721_v47 = vadd.f32 %v1715_v35, %v1705_v43 }
 0x190   : > { %v1724_v48 = vmax.f32 %v1720_v45, 0.0 }
 0x191   : > { %v1730_v49 = vcombine.low %v1722_v44, %v1723_v46  ;;  %v1731_v50 = vcombine.high %v1722_v44, %v1723_v46  ;;  %v2111_v51 = vcombine.low %v1723_v46, %v1723_v46  ;;  %v2112_v54 = vcombine.high %v1723_v46, %v1723_v46 }
 0x192   : > { %v1725_v55 = vmax.f32 %v1721_v47, 0.0 }
 0x193   : > { %v2115_v14 = vpack.c.bf16 %v2111_v51, %v1730_v49  ;;  %v2116_v56 = vpack.c.bf16 %v2112_v54, %v1731_v50 }
 0x194   : > { %v1732_v57 = vcombine.low %v1724_v48, %v1725_v55  ;;  %v1733_v2 = vcombine.high %v1724_v48, %v1725_v55  ;;  %v2113_v58 = vcombine.low %v1725_v55, %v1725_v55  ;;  %v2114_v59 = vcombine.high %v1725_v55, %v1725_v55 }
 0x195   : > { %2119 = vst.sshfl [vmem:[%s197_s7] sm:$0x33 pattern:$0x76325410] %v2115_v14 }
 0x196   : > { %2120 = vst.sshfl [vmem:[%s197_s7 + $0x4] sm:$0x33 pattern:$0x76325410] %v2116_v56  ;;  %v2117_v60 = vpack.c.bf16 %v2113_v58, %v1732_v57  ;;  %v2118_v61 = vpack.c.bf16 %v2114_v59, %v1733_v2 }
 0x198   : > { %2121 = vst.sshfl [vmem:[%s197_s7 + $0x8] sm:$0x33 pattern:$0x76325410] %v2117_v60 }
 0x199   : > { %2122 = vst.sshfl [vmem:[%s197_s7 + $0xc] sm:$0x33 pattern:$0x76325410] %v2118_v61 }
 0x19a PF: > { %s14_s15 = sadd.s32 1, %s2385_s15  }
 0x19b   : > { %p11_p4 = scmp.ge.s32.totalorder %s14_s15, 4  }
 0x19d   :  { %13 = sbr.rel (!%p11_p4) target bundleno = 1 (0x1), region = 68 }

// kernel: szcvi_forward.11
= control target key start
LH: loop header
LB: loop body
LE: loop exit
PB: predicated region body
PF: predicated region fallthrough
CT: control target
= control target key end

     0   :  { %v39_v0 = vlaneseq  ;;  %v1201_v1 = vmov 1966171168   ;;  %s1316_s0 = inlined_call_operand.vmem [shape: bf16[2,4096], index: 0, kind: input, shape index: {}]   ;;  %s1317_s1 = inlined_call_operand.vmem [shape: bf16[2,4096], index: 1, kind: input, shape index: {}]   ;;  %s1318_s2 = inlined_call_operand.vmem [shape: f32[1,2], index: 2, kind: input, shape index: {}]   ;;  %s1319_s3 = inlined_call_operand.hbm [shape: f32[2,2], index: 3, kind: output, shape index: {}]  }
   0x1   :  { %v37_v2 = vunpack.c.l.s4 %v1201_v1  ;;  %v27_v3 = vld [vmem:[%s1317_s1] sm:$0xff] }
   0x2   :  { %v40_v4 = vshrl.u32 %v39_v0, 7 }
   0x3   :  { %8 = vsyncpa [#allocation4], 0  ;;  %v38_v5 = vunpack.c.0.s8 %v37_v2  ;;  %v267_v6 = vcombine.high %v27_v3, %v27_v3  ;;  %v23_v7 = vld [vmem:[%s1316_s0] sm:$0xff]  ;;  %v28_v10 = vld [vmem:[%s1317_s1 + $0x8] sm:$0xff]  ;;  %vm20_vm0 = vcmask 9216   ;;  %s1203_s28 = smov [#allocation3]  }
   0x4   :  { %v35_v8 = vcombine.high %v23_v7, %v23_v7  ;;  %v316_v25 = vcombine.high %v28_v10, %v28_v10  ;;  %v24_v29 = vld [vmem:[%s1316_s0 + $0x8] sm:$0xff]  ;;  %v29_v44 = vld [vmem:[%s1317_s1 + $0x10] sm:$0xff]  ;;  %s1157_s29 = sshll.u32 %s1203_s28, 4  ;;  %s1158_s29 = int_to_ptr.vmem [resolvable:$true] %s1157_s29 }
   0x5   :  { %v1230_v9 = vsub.s32 %v38_v5, %v40_v4  ;;  %v84_v41 = vcombine.high %v24_v29, %v24_v29  ;;  %v25_v57 = vld [vmem:[%s1316_s0 + $0x10] sm:$0xff]  ;;  %v365_v58 = vcombine.high %v29_v44, %v29_v44  ;;  %s1177_s30 = scalar_lea.vmem %s1158_s29, 32  ;;  %p1182_p1 = scmp.lt.s32.totalorder %s1158_s29, %s1158_s29 }
   0x6   :  { %v133_v5 = vcombine.high %v25_v57, %v25_v57  ;;  %p1178_p0 = scmp.ne.s32.totalorder %s1158_s29, %s1177_s30  ;;  %p1183_p2 = scmp.lt.s32.totalorder %s1177_s30, %s1177_s30 }
   0x7   :  { %v274_v11 = vrot.slane %v27_v3, %v1230_v9  ;;  %v42_v12 = vrot.slane %v23_v7, %v1230_v9  ;;  %v281_v13 = vrot.slane %v267_v6, %v1230_v9  ;;  %v49_v14 = vrot.slane %v35_v8, %v1230_v9  ;;  %v30_v8 = vld [vmem:[%s1317_s1 + $0x18] sm:$0xff] }
   0x8   :  { %v323_v18 = vrot.slane %v28_v10, %v1230_v9  ;;  %v91_v34 = vrot.slane %v24_v29, %v1230_v9  ;;  %v330_v36 = vrot.slane %v316_v25, %v1230_v9  ;;  %v98_v48 = vrot.slane %v84_v41, %v1230_v9  ;;  %p1184_p3 = por %p1183_p2, %p1182_p1 }
   0x9   :  { %v282_v15 = vcombine.high %v274_v11, %v274_v11  ;;  %v290_v16 = vrot.slane %v274_v11, %v1230_v9  ;;  %v50_v17 = vcombine.high %v42_v12, %v42_v12  ;;  %v283_v19 = vcombine.high %v281_v13, %v281_v13 }
   0xa   :  { %v51_v24 = vcombine.high %v49_v14, %v49_v14  ;;  %v331_v28 = vcombine.high %v323_v18, %v323_v18  ;;  %v58_v31 = vrot.slane %v42_v12, %v1230_v9  ;;  %v297_v32 = vrot.slane %v281_v13, %v1230_v9  ;;  %p1185_p4 = pnand %p1184_p3, %p1178_p0 }
   0xb   :  { %v304_v20 = vrot.slane %v282_v15, %v1230_v9  ;;  %v72_v21 = vrot.slane %v50_v17, %v1230_v9  ;;  %v312_v22 = vcombine.high %v290_v16, %v290_v16  ;;  %v311_v23 = vrot.slane %v283_v19, %v1230_v9 }
   0xc   :  { %v79_v33 = vrot.slane %v51_v24, %v1230_v9  ;;  %v353_v35 = vrot.slane %v331_v28, %v1230_v9  ;;  %v80_v37 = vcombine.high %v58_v31, %v58_v31  ;;  %v313_v38 = vcombine.high %v297_v32, %v297_v32 }
   0xd   :  { %495 = vmatprep.subr.bf16.mxu0 %v304_v20  ;;  %v314_v26 = vcombine.high %v304_v20, %v304_v20  ;;  %527 = vmatprep.mubr.bf16.mxu0 %v72_v21  ;;  %v82_v27 = vcombine.high %v72_v21, %v72_v21  ;;  %v315_v30 = vcombine.high %v311_v23, %v311_v23 }
   0xe   :  { %496 = vmatpush1.bf16.xpose.msra.mxu0 %v290_v16  ;;  %v83_v39 = vcombine.high %v79_v33, %v79_v33  ;;  %v99_v40 = vcombine.high %v91_v34, %v91_v34  ;;  %v363_v42 = vcombine.high %v353_v35, %v353_v35  ;;  %v332_v43 = vcombine.high %v330_v36, %v330_v36 }
   0xf   :  { %535 = vmatprep.subr.bf16.mxu1 %v314_v26  ;;  %575 = vmatprep.subr.bf16.mxu0 %v311_v23  ;;  %v65_v45 = vrot.slane %v49_v14, %v1230_v9  ;;  %v339_v46 = vrot.slane %v323_v18, %v1230_v9  ;;  %v372_v50 = vrot.slane %v29_v44, %v1230_v9 }
  0x10   :  { %536 = vmatpush1.bf16.xpose.msra.mxu1 %v312_v22  ;;  %567 = vmatprep.mubr.bf16.mxu1 %v82_v27  ;;  %v121_v47 = vrot.slane %v99_v40, %v1230_v9  ;;  %v360_v49 = vrot.slane %v332_v43, %v1230_v9  ;;  %v100_v54 = vcombine.high %v98_v48, %v98_v48  ;;  %v26_v22 = vld [vmem:[%s1316_s0 + $0x18] sm:$0xff] }
  0x11   :  { %615 = vmatprep.subr.bf16.mxu1 %v315_v30  ;;  %v81_v51 = vcombine.high %v65_v45, %v65_v45  ;;  %v361_v52 = vcombine.high %v339_v46, %v339_v46  ;;  %v380_v56 = vcombine.high %v372_v50, %v372_v50  ;;  %v107_v59 = vrot.slane %v91_v34, %v1230_v9 }
  0x12   :  { %v131_v53 = vcombine.high %v121_v47, %v121_v47  ;;  %v364_v55 = vcombine.high %v360_v49, %v360_v49  ;;  %v346_v60 = vrot.slane %v330_v36, %v1230_v9  ;;  %v128_v61 = vrot.slane %v100_v54, %v1230_v9 }
  0x13   :  { %v140_v62 = vrot.slane %v25_v57, %v1230_v9  ;;  %v402_v63 = vrot.slane %v380_v56, %v1230_v9  ;;  %v379_v0 = vrot.slane %v365_v58, %v1230_v9  ;;  %v129_v1 = vcombine.high %v107_v59, %v107_v59 }
  0x14   :  { %v362_v2 = vcombine.high %v346_v60, %v346_v60  ;;  %v132_v3 = vcombine.high %v128_v61, %v128_v61  ;;  %v114_v10 = vrot.slane %v98_v48, %v1230_v9  ;;  %v388_v11 = vrot.slane %v372_v50, %v1230_v9 }
  0x15   :  { %528 = vmatmul.mubr.bf16.vlgmr.msra.gmra.mrb[0].mxu0 %v58_v31  ;;  %v148_v4 = vcombine.high %v140_v62, %v140_v62  ;;  %v412_v6 = vcombine.high %v402_v63, %v402_v63  ;;  %v381_v7 = vcombine.high %v379_v0, %v379_v0  ;;  %v147_v13 = vrot.slane %v133_v5, %v1230_v9 }
  0x16   :  { %576 = vmatpush1.bf16.xpose.msra.mxu0 %v297_v32  ;;  %607 = vmatprep.mubr.bf16.mxu0 %v79_v33  ;;  %v421_v15 = vrot.slane %v30_v8, %v1230_v9  ;;  %v130_v16 = vcombine.high %v114_v10, %v114_v10  ;;  %v410_v17 = vcombine.high %v388_v11, %v388_v11 }
  0x17   :  { %568 = vmatmul.mubr.bf16.vlgmr.msra.gmra.mrb[0].mxu1 %v80_v37  ;;  %655 = vmatprep.subr.bf16.mxu0 %v353_v35  ;;  %v170_v12 = vrot.slane %v148_v4, %v1230_v9  ;;  %v409_v14 = vrot.slane %v381_v7, %v1230_v9  ;;  %v149_v19 = vcombine.high %v147_v13, %v147_v13 }
  0x18   :  { %616 = vmatpush1.bf16.xpose.msra.mxu1 %v313_v38  ;;  %647 = vmatprep.mubr.bf16.mxu1 %v83_v39  ;;  %v429_v21 = vcombine.high %v421_v15, %v421_v15  ;;  %v414_v23 = vcombine.high %v30_v8, %v30_v8  ;;  %v156_v24 = vrot.slane %v140_v62, %v1230_v9 }
  0x19   :  { %695 = vmatprep.subr.bf16.mxu1 %v363_v42  ;;  %v180_v18 = vcombine.high %v170_v12, %v170_v12  ;;  %v413_v20 = vcombine.high %v409_v14, %v409_v14  ;;  %v395_v25 = vrot.slane %v379_v0, %v1230_v9  ;;  %v177_v26 = vrot.slane %v149_v19, %v1230_v9 }
  0x1a   :  { %v189_v27 = vrot.slane %v26_v22, %v1230_v9  ;;  %v451_v28 = vrot.slane %v429_v21, %v1230_v9  ;;  %v428_v29 = vrot.slane %v414_v23, %v1230_v9  ;;  %v178_v30 = vcombine.high %v156_v24, %v156_v24 }
  0x1b   :  { %v411_v31 = vcombine.high %v395_v25, %v395_v25  ;;  %v181_v32 = vcombine.high %v177_v26, %v177_v26  ;;  %v182_v34 = vcombine.high %v26_v22, %v26_v22  ;;  %v163_v37 = vrot.slane %v147_v13, %v1230_v9 }
  0x1c   :  { %v197_v33 = vcombine.high %v189_v27, %v189_v27  ;;  %v461_v35 = vcombine.high %v451_v28, %v451_v28  ;;  %v430_v36 = vcombine.high %v428_v29, %v428_v29  ;;  %v437_v38 = vrot.slane %v421_v15, %v1230_v9 }
  0x1d   :  { %608 = vmatmul.mubr.bf16.vlgmr.msra.gmra.mrb[4].mxu0 %v65_v45  ;;  %v196_v40 = vrot.slane %v182_v34, %v1230_v9  ;;  %v179_v42 = vcombine.high %v163_v37, %v163_v37  ;;  %v444_v48 = vrot.slane %v428_v29, %v1230_v9 }
  0x1e   :  { %656 = vmatpush1.bf16.xpose.msra.mxu0 %v339_v46  ;;  %687 = vmatprep.mubr.bf16.mxu0 %v121_v47  ;;  %v219_v39 = vrot.slane %v197_v33, %v1230_v9  ;;  %v458_v41 = vrot.slane %v430_v36, %v1230_v9  ;;  %v459_v43 = vcombine.high %v437_v38, %v437_v38 }
  0x1f   :  { %648 = vmatmul.mubr.bf16.vlgmr.msra.gmra.mrb[4].mxu1 %v81_v51  ;;  %735 = vmatprep.subr.bf16.mxu0 %v360_v49  ;;  %v198_v45 = vcombine.high %v196_v40, %v196_v40  ;;  %v205_v47 = vrot.slane %v189_v27, %v1230_v9  ;;  %v460_v51 = vcombine.high %v444_v48, %v444_v48 }
  0x20   :  { %696 = vmatpush1.bf16.xpose.msra.mxu1 %v361_v52  ;;  %727 = vmatprep.mubr.bf16.mxu1 %v131_v53  ;;  %v229_v44 = vcombine.high %v219_v39, %v219_v39  ;;  %v462_v46 = vcombine.high %v458_v41, %v458_v41  ;;  %v212_v53 = vrot.slane %v196_v40, %v1230_v9 }
  0x21   :  { %775 = vmatprep.subr.bf16.mxu1 %v364_v55  ;;  %v226_v49 = vrot.slane %v198_v45, %v1230_v9  ;;  %v227_v50 = vcombine.high %v205_v47, %v205_v47  ;;  %v1202_v55 = vmov 0.0  }
  0x22   :  { %v228_v54 = vcombine.high %v212_v53, %v212_v53  ;;  %21 = vst.msk [vmem:[#allocation2] sm:$0x3] %vm20_vm0, %v1202_v55 }
  0x23   :  { %v230_v52 = vcombine.high %v226_v49, %v226_v49 }
  0x25   :  { %688 = vmatmul.mubr.bf16.vlgmr.msra.gmra.mrb[8].mxu0 %v107_v59 }
  0x26   :  { %736 = vmatpush1.bf16.xpose.msra.mxu0 %v346_v60  ;;  %767 = vmatprep.mubr.bf16.mxu0 %v128_v61 }
  0x27   :  { %728 = vmatmul.mubr.bf16.vlgmr.msra.gmra.mrb[8].mxu1 %v129_v1  ;;  %815 = vmatprep.subr.bf16.mxu0 %v402_v63 }
  0x28   :  { %776 = vmatpush1.bf16.xpose.msra.mxu1 %v362_v2  ;;  %807 = vmatprep.mubr.bf16.mxu1 %v132_v3 }
  0x29   :  { %855 = vmatprep.subr.bf16.mxu1 %v412_v6 }
  0x2d   :  { %768 = vmatmul.mubr.bf16.vlgmr.msra.gmra.mrb[12].mxu0 %v114_v10 }
  0x2e   :  { %816 = vmatpush1.bf16.xpose.msra.mxu0 %v388_v11  ;;  %847 = vmatprep.mubr.bf16.mxu0 %v170_v12 }
  0x2f   :  { %808 = vmatmul.mubr.bf16.vlgmr.msra.gmra.mrb[12].mxu1 %v130_v16  ;;  %895 = vmatprep.subr.bf16.mxu0 %v409_v14 }
  0x30   :  { %856 = vmatpush1.bf16.xpose.msra.mxu1 %v410_v17  ;;  %887 = vmatprep.mubr.bf16.mxu1 %v180_v18 }
  0x31   :  { %935 = vmatprep.subr.bf16.mxu1 %v413_v20 }
  0x35   :  { %848 = vmatmul.mubr.bf16.vlgmr.msra.gmra.mrb[16].mxu0 %v156_v24 }
  0x36   :  { %896 = vmatpush1.bf16.xpose.msra.mxu0 %v395_v25  ;;  %927 = vmatprep.mubr.bf16.mxu0 %v177_v26 }
  0x37   :  { %888 = vmatmul.mubr.bf16.vlgmr.msra.gmra.mrb[16].mxu1 %v178_v30  ;;  %975 = vmatprep.subr.bf16.mxu0 %v451_v28 }
  0x38   :  { %936 = vmatpush1.bf16.xpose.msra.mxu1 %v411_v31  ;;  %967 = vmatprep.mubr.bf16.mxu1 %v181_v32 }
  0x39   :  { %1015 = vmatprep.subr.bf16.mxu1 %v461_v35 }
  0x3d   :  { %928 = vmatmul.mubr.bf16.vlgmr.msra.gmra.mrb[20].mxu0 %v163_v37 }
  0x3e   :  { %976 = vmatpush1.bf16.xpose.msra.mxu0 %v437_v38  ;;  %1007 = vmatprep.mubr.bf16.mxu0 %v219_v39 }
  0x3f   :  { %968 = vmatmul.mubr.bf16.vlgmr.msra.gmra.mrb[20].mxu1 %v179_v42  ;;  %1055 = vmatprep.subr.bf16.mxu0 %v458_v41 }
  0x40   :  { %1016 = vmatpush1.bf16.xpose.msra.mxu1 %v459_v43  ;;  %1047 = vmatprep.mubr.bf16.mxu1 %v229_v44 }
  0x41   :  { %1095 = vmatprep.subr.bf16.mxu1 %v462_v46 }
  0x45   :  { %1008 = vmatmul.mubr.bf16.vlgmr.msra.gmra.mrb[24].mxu0 %v205_v47 }
  0x46   :  { %1056 = vmatpush1.bf16.xpose.msra.mxu0 %v444_v48  ;;  %1087 = vmatprep.mubr.bf16.mxu0 %v226_v49 }
  0x47   :  { %1048 = vmatmul.mubr.bf16.vlgmr.msra.gmra.mrb[24].mxu1 %v227_v50 }
  0x48   :  { %1096 = vmatpush1.bf16.xpose.msra.mxu1 %v460_v51  ;;  %1127 = vmatprep.mubr.bf16.mxu1 %v230_v52 }
  0x4d   :  { %1088 = vmatmul.mubr.bf16.vlgmr.msra.gmra.mrb[28].mxu0 %v212_v53 }
  0x4f   :  { %1128 = vmatmul.mubr.bf16.vlgmr.msra.gmra.mrb[28].mxu1 %v228_v54 }
  0xe8   :  { %v529_v56 = vpop.f32.mrb[0].mxu0 }
  0xe9   :  { %v531_v57 = vpop.f32.mrb[1].mxu0 }
  0xea   :  { %v532_v58 = vpop.f32.mrb[2].mxu0  ;;  %v569_v59 = vpop.f32.mrb[0].mxu1 }
  0xeb   :  { %v570_v60 = vadd.f32 %v569_v59, %v529_v56  ;;  %v533_v61 = vpop.f32.mrb[3].mxu0  ;;  %v571_v62 = vpop.f32.mrb[1].mxu1 }
  0xec   :  { %v572_v63 = vpop.f32.mrb[2].mxu1 }
  0xed   :  { %v573_v0 = vpop.f32.mrb[3].mxu1 }
  0xf0   :  { %v609_v1 = vpop.f32.mrb[4].mxu0 }
  0xf1   :  { %v610_v9 = vadd.f32 %v609_v1, %v570_v60  ;;  %v611_v2 = vpop.f32.mrb[5].mxu0  ;;  %v22_v1 = vld [vmem:[#allocation2] sm:$0x3] }
  0xf2   :  { %v612_v3 = vpop.f32.mrb[6].mxu0  ;;  %v649_v4 = vpop.f32.mrb[4].mxu1 }
  0xf3   :  { %v650_v5 = vadd.f32 %v649_v4, %v610_v9  ;;  %v613_v6 = vpop.f32.mrb[7].mxu0  ;;  %v651_v7 = vpop.f32.mrb[5].mxu1 }
  0xf4   :  { %v652_v8 = vpop.f32.mrb[6].mxu1 }
  0xf5   :  { %v653_v10 = vpop.f32.mrb[7].mxu1  ;;  %v1165_v8 = vld [vmem:[%s1318_s2] ss:$0 sm:$0xff] }
  0xf8   :  { %v689_v11 = vpop.f32.mrb[8].mxu0 }
  0xf9   :  { %v690_v12 = vadd.f32 %v689_v11, %v650_v5  ;;  %v691_v13 = vpop.f32.mrb[9].mxu0 }
  0xfa   :  { %v692_v14 = vpop.f32.mrb[10].mxu0  ;;  %v729_v15 = vpop.f32.mrb[8].mxu1 }
  0xfb   :  { %v730_v16 = vadd.f32 %v729_v15, %v690_v12  ;;  %v693_v17 = vpop.f32.mrb[11].mxu0  ;;  %v731_v18 = vpop.f32.mrb[9].mxu1 }
  0xfc   :  { %v732_v19 = vpop.f32.mrb[10].mxu1 }
  0xfd   :  { %v733_v20 = vpop.f32.mrb[11].mxu1 }
 0x100   :  { %v769_v21 = vpop.f32.mrb[12].mxu0 }
 0x101   :  { %v770_v22 = vadd.f32 %v769_v21, %v730_v16  ;;  %v771_v23 = vpop.f32.mrb[13].mxu0 }
 0x102   :  { %v772_v24 = vpop.f32.mrb[14].mxu0  ;;  %v809_v25 = vpop.f32.mrb[12].mxu1 }
 0x103   :  { %v810_v26 = vadd.f32 %v809_v25, %v770_v22  ;;  %v773_v27 = vpop.f32.mrb[15].mxu0  ;;  %v811_v28 = vpop.f32.mrb[13].mxu1 }
 0x104   :  { %v812_v29 = vpop.f32.mrb[14].mxu1 }
 0x105   :  { %v813_v30 = vpop.f32.mrb[15].mxu1 }
 0x108   :  { %v849_v31 = vpop.f32.mrb[16].mxu0 }
 0x109   :  { %v850_v32 = vadd.f32 %v849_v31, %v810_v26  ;;  %v851_v33 = vpop.f32.mrb[17].mxu0 }
 0x10a   :  { %v852_v34 = vpop.f32.mrb[18].mxu0  ;;  %v889_v35 = vpop.f32.mrb[16].mxu1 }
 0x10b   :  { %v890_v36 = vadd.f32 %v889_v35, %v850_v32  ;;  %v853_v37 = vpop.f32.mrb[19].mxu0  ;;  %v891_v38 = vpop.f32.mrb[17].mxu1 }
 0x10c   :  { %v892_v39 = vpop.f32.mrb[18].mxu1 }
 0x10d   :  { %v893_v40 = vpop.f32.mrb[19].mxu1 }
 0x110   :  { %v929_v41 = vpop.f32.mrb[20].mxu0 }
 0x111   :  { %v930_v42 = vadd.f32 %v929_v41, %v890_v36  ;;  %v931_v43 = vpop.f32.mrb[21].mxu0 }
 0x112   :  { %v932_v44 = vpop.f32.mrb[22].mxu0  ;;  %v969_v45 = vpop.f32.mrb[20].mxu1 }
 0x113   :  { %v970_v46 = vadd.f32 %v969_v45, %v930_v42  ;;  %v933_v47 = vpop.f32.mrb[23].mxu0  ;;  %v971_v48 = vpop.f32.mrb[21].mxu1 }
 0x114   :  { %v972_v49 = vpop.f32.mrb[22].mxu1 }
 0x115   :  { %v973_v50 = vpop.f32.mrb[23].mxu1 }
 0x118   :  { %v1009_v51 = vpop.f32.mrb[24].mxu0 }
 0x119   :  { %v1010_v52 = vadd.f32 %v1009_v51, %v970_v46  ;;  %v1011_v53 = vpop.f32.mrb[25].mxu0 }
 0x11a   :  { %v1012_v54 = vpop.f32.mrb[26].mxu0  ;;  %v1049_v55 = vpop.f32.mrb[24].mxu1 }
 0x11b   :  { %v1050_v56 = vadd.f32 %v1049_v55, %v1010_v52  ;;  %v1013_v57 = vpop.f32.mrb[27].mxu0  ;;  %v1051_v58 = vpop.f32.mrb[25].mxu1 }
 0x11c   :  { %v1052_v59 = vpop.f32.mrb[26].mxu1 }
 0x11d   :  { %v1053_v60 = vpop.f32.mrb[27].mxu1 }
 0x120   :  { %v1089_v61 = vpop.f32.mrb[28].mxu0 }
 0x121   :  { %v1090_v62 = vadd.f32 %v1089_v61, %v1050_v56  ;;  %v1091_v63 = vpop.f32.mrb[29].mxu0 }
 0x122   :  { %v1092_v0 = vpop.f32.mrb[30].mxu0  ;;  %v1129_v9 = vpop.f32.mrb[28].mxu1 }
 0x123   :  { %v1130_v2 = vadd.f32 %v1129_v9, %v1090_v62  ;;  %v1093_v3 = vpop.f32.mrb[31].mxu0  ;;  %v1131_v4 = vpop.f32.mrb[29].mxu1 }
 0x124   :  { %v1132_v5 = vpop.f32.mrb[30].mxu1 }
 0x125   :  { %v1135_v6 = vadd.f32 %v1130_v2, %v22_v1  ;;  %v1133_v7 = vpop.f32.mrb[31].mxu1 }
 0x127   :  { %1137 = vst.msk [vmem:[#allocation2] sm:$0x3] %vm20_vm0, %v1135_v6 }
 0x12e   :  { %v1141_v10 = vld [vmem:[#allocation2] sm:$0x3] }
 0x12f   :  { %v1149_v11 = vadd.f32 %v1165_v8, %v1141_v10 }
 0x131   :  { %1150 = vst.msk [vmem:[#allocation3] sm:$0x3] %vm20_vm0, %v1149_v11 }
 0x132   :  { %1188 = shalt.err (!%p1185_p4)
}
 0x133   :  { %s1189_s6 = scalar_lea.hbm %s1319_s3, 32 }
 0x134   :  { %p1190_p5 = scmp.ne.s32.totalorder %s1319_s3, %s1189_s6  ;;  %p1193_p6 = scmp.lt.u32.totalorder %s1189_s6, %s1319_s3 }
 0x136   :  { %p1195_p7 = pnand %p1193_p6, %p1190_p5 }
 0x138   :  { %1198 = shalt.err (!%p1195_p7)
}
 0x139   :  { %1160 = dma.vmem_to_hbm [thread:$0]  %s1158_s29, 32, %s1319_s3, [#allocation4]  }
 0x13a   :  { %1199 = dma.done.wait [#allocation4], 32  }
 0x13b   :  { %1200 = vsyncadd [#allocation4], 4294967264 }
 0x13c   :  { %1164 = vsyncpa [#allocation4], 1 }

</bundles_post_ra>
